<compile_context>
chip_gen: v6e
topology: v6e:2x2x1
jax: 0.10.0
libtpu: 0.0.40
codegen_flags: <defaults>
</compile_context>

<pallas_src>
import functools

import jax
import jax.numpy as jnp
from jax.experimental import pallas as pl
from jax.experimental.pallas import tpu as pltpu

BN_EPS = 1e-5
TILE_M = 256


def _round_up(x, m):
    return (x + m - 1) // m * m


# ---------------------------------------------------------------------------
# Pallas kernels
# ---------------------------------------------------------------------------
def _matmul_bn_relu_kernel(x_ref, w_ref, scale_ref, shift_ref, o_ref):
    # x: (TILE_M, K) bf16 im2col patches, w: (K, Cout) bf16,
    # scale/shift: (1, Cout) f32 (BatchNorm folded for eval mode).
    acc = jnp.dot(x_ref[...], w_ref[...], preferred_element_type=jnp.float32)
    o_ref[...] = jnp.maximum(acc * scale_ref[...] + shift_ref[...], 0.0).astype(o_ref.dtype)


def matmul_bn_relu(patches, w, scale, shift):
    M_pad, K = patches.shape
    _, Cout = w.shape
    return pl.pallas_call(
        _matmul_bn_relu_kernel,
        out_shape=jax.ShapeDtypeStruct((M_pad, Cout), jnp.bfloat16),
        grid=(M_pad // TILE_M,),
        in_specs=[
            pl.BlockSpec((TILE_M, K), lambda i: (i, 0)),
            pl.BlockSpec((K, Cout), lambda i: (0, 0)),   # constant block -> stays resident
            pl.BlockSpec((1, Cout), lambda i: (0, 0)),
            pl.BlockSpec((1, Cout), lambda i: (0, 0)),
        ],
        out_specs=pl.BlockSpec((TILE_M, Cout), lambda i: (i, 0)),
        compiler_params=pltpu.CompilerParams(dimension_semantics=("parallel",)),
    )(patches, w, scale, shift)


def _conv4_head_kernel(x_ref, w_ref, scale_ref, shift_ref, pool_ref,
                       fc1w_ref, fc1b_ref, fcw_ref, fcb_ref, o_ref):
    # conv4 matmul + folded BN + ReLU, entirely in VMEM.
    acc = jnp.dot(x_ref[...], w_ref[...], preferred_element_type=jnp.float32)
    y = jnp.maximum(acc * scale_ref[...] + shift_ref[...], 0.0)            # (M4, 512) f32
    # AdaptiveAvgPool2d((1,1)) + flatten as a tiny (N, M4) @ (M4, 512) matmul.
    pooled = jnp.dot(pool_ref[...], y, preferred_element_type=jnp.float32)  # (N, 512)
    h = jnp.dot(pooled, fc1w_ref[...], preferred_element_type=jnp.float32) + fc1b_ref[...]
    o_ref[...] = jnp.dot(h, fcw_ref[...], preferred_element_type=jnp.float32) + fcb_ref[...]


def conv4_head(patches, w_mat, scale, shift, pool, fc1_w, fc1_b, fc_w, fc_b):
    M4, K4 = patches.shape
    Cout = w_mat.shape[1]
    N = pool.shape[0]
    H1 = fc1_w.shape[1]   # 32
    H2 = fc_w.shape[1]    # 10
    return pl.pallas_call(
        _conv4_head_kernel,
        out_shape=jax.ShapeDtypeStruct((N, H2), jnp.float32),
        in_specs=[
            pl.BlockSpec((M4, K4), lambda: (0, 0)),
            pl.BlockSpec((K4, Cout), lambda: (0, 0)),
            pl.BlockSpec((1, Cout), lambda: (0, 0)),
            pl.BlockSpec((1, Cout), lambda: (0, 0)),
            pl.BlockSpec((N, M4), lambda: (0, 0)),
            pl.BlockSpec((Cout, H1), lambda: (0, 0)),
            pl.BlockSpec((1, H1), lambda: (0, 0)),
            pl.BlockSpec((H1, H2), lambda: (0, 0)),
            pl.BlockSpec((1, H2), lambda: (0, 0)),
        ],
        out_specs=pl.BlockSpec((N, H2), lambda: (0, 0)),
    )(patches, w_mat, scale, shift, pool, fc1_w, fc1_b, fc_w, fc_b)


# ---------------------------------------------------------------------------
# Glue: im2col, BN folding, parameter prep
# ---------------------------------------------------------------------------
def _im2col(x, kh, kw, stride):
    N, H, W, Cin = x.shape
    Ho = (H - kh) // stride + 1
    Wo = (W - kw) // stride + 1
    cols = []
    for i in range(kh):
        for j in range(kw):
            cols.append(x[:, i:i + stride * (Ho - 1) + 1:stride,
                             j:j + stride * (Wo - 1) + 1:stride, :])
    # (N, Ho, Wo, kh*kw, Cin) -> (N*Ho*Wo, kh*kw*Cin)
    patches = jnp.stack(cols, axis=3).reshape(N * Ho * Wo, kh * kw * Cin)
    return patches, Ho, Wo


def _conv_weight_matrix(w, cout_pad):
    # (Cout, Cin, kh, kw) -> (kh*kw*Cin, Cout) matching the im2col K ordering.
    Cout, Cin, kh, kw = w.shape
    w_mat = jnp.transpose(w, (2, 3, 1, 0)).reshape(kh * kw * Cin, Cout)
    w_mat = jnp.pad(w_mat, ((0, 0), (0, cout_pad - Cout)))
    return w_mat.astype(jnp.bfloat16)


def _fold_bn(bn, bias, cout_pad):
    gamma, beta, mean, var = bn
    scale = gamma / jnp.sqrt(var + BN_EPS)
    shift = beta + scale * (bias - mean)
    cout = scale.shape[0]
    scale = jnp.pad(scale, (0, cout_pad - cout)).reshape(1, cout_pad).astype(jnp.float32)
    shift = jnp.pad(shift, (0, cout_pad - cout)).reshape(1, cout_pad).astype(jnp.float32)
    return scale, shift


def conv_bn_relu(x, w, b, bn, stride):
    """x: (N,H,W,Cin) NHWC bf16. w: (Cout,Cin,kh,kw) PyTorch layout. bn=(gamma,beta,mean,var)."""
    Cout = w.shape[0]
    N = x.shape[0]
    patches, Ho, Wo = _im2col(x, 3, 3, stride)
    M, K = patches.shape
    Cout_pad = _round_up(Cout, 128)        # lane-dense output stores (conv1: 32 -> 128)
    M_pad = _round_up(M, TILE_M)
    patches = jnp.pad(patches.astype(jnp.bfloat16), ((0, M_pad - M), (0, 0)))
    w_mat = _conv_weight_matrix(w, Cout_pad)
    scale, shift = _fold_bn(bn, b, Cout_pad)
    out = matmul_bn_relu(patches, w_mat, scale, shift)
    return out[:M, :Cout].reshape(N, Ho, Wo, Cout)


def init_params(key):
    ks = jax.random.split(key, 12)

    def conv_p(k, cout, cin):
        k1, k2 = jax.random.split(k)
        w = 0.05 * jax.random.normal(k1, (cout, cin, 3, 3), jnp.float32)
        b = 0.05 * jax.random.normal(k2, (cout,), jnp.float32)
        return w, b

    def bn_p(k, c):
        k1, k2, k3, k4 = jax.random.split(k, 4)
        gamma = 1.0 + 0.1 * jax.random.normal(k1, (c,), jnp.float32)
        beta = 0.1 * jax.random.normal(k2, (c,), jnp.float32)
        mean = 0.1 * jax.random.normal(k3, (c,), jnp.float32)
        var = jax.random.uniform(k4, (c,), jnp.float32, minval=0.5, maxval=1.5)
        return gamma, beta, mean, var

    def lin_p(k, cout, cin):
        k1, k2 = jax.random.split(k)
        # stored already transposed to (cin, cout) for x @ W
        w = 0.05 * jax.random.normal(k1, (cin, cout), jnp.float32)
        b = 0.05 * jax.random.normal(k2, (cout,), jnp.float32)
        return w, b

    return {
        "conv1": conv_p(ks[0], 32, 3),    "bn1": bn_p(ks[1], 32),
        "conv2": conv_p(ks[2], 128, 32),  "bn2": bn_p(ks[3], 128),
        "conv3": conv_p(ks[4], 256, 128), "bn3": bn_p(ks[5], 256),
        "conv4": conv_p(ks[6], 512, 256), "bn4": bn_p(ks[7], 512),
        "fc1": lin_p(ks[8], 32, 512),
        "fc": lin_p(ks[9], 10, 32),
    }


@jax.jit
def mynet_forward(x_nchw, params):
    # NCHW (PyTorch) -> NHWC for the kernels; bf16 activations.
    x = jnp.transpose(x_nchw, (0, 2, 3, 1)).astype(jnp.bfloat16)

    x = conv_bn_relu(x, *params["conv1"], params["bn1"], stride=1)  # 32 -> 30
    x = conv_bn_relu(x, *params["conv2"], params["bn2"], stride=2)  # 30 -> 14
    x = conv_bn_relu(x, *params["conv3"], params["bn3"], stride=1)  # 14 -> 12

    # conv4 + bn4 + relu4 + avgpool + flatten + fc1 + fc, fused in one kernel.
    w4, b4 = params["conv4"]
    Cout4 = w4.shape[0]                                             # 512 (lane-dense)
    patches, Ho, Wo = _im2col(x, 3, 3, 1)                           # 12 -> 10
    N = x.shape[0]
    P = Ho * Wo
    patches = patches.astype(jnp.bfloat16)
    w_mat = _conv_weight_matrix(w4, Cout4)
    scale, shift = _fold_bn(params["bn4"], b4, Cout4)
    # pool[n, m] = 1/P if row m belongs to image n else 0  -> matmul == global mean
    pool = jnp.kron(jnp.eye(N, dtype=jnp.float32),
                    jnp.full((1, P), 1.0 / P, jnp.float32))         # (N, N*P)

    fc1_w, fc1_b = params["fc1"]
    fc_w, fc_b = params["fc"]
    return conv4_head(patches, w_mat, scale, shift, pool,
                      fc1_w, fc1_b.reshape(1, -1), fc_w, fc_b.reshape(1, -1))


if __name__ == "__main__":
    key = jax.random.PRNGKey(0)
    k_x, k_p = jax.random.split(key)
    # CIFAR10-shaped input, small batch
    x = jax.random.normal(k_x, (2, 3, 32, 32), jnp.float32)
    params = init_params(k_p)

    out = mynet_forward(x, params)
    out = jax.block_until_ready(out)
    assert out.shape == (2, 10) and out.dtype == jnp.float32
    print("KERNEL_OK")
</pallas_src>

<mosaic_0001>
module attributes {stable_mosaic.version = 11 : i64} {
  func.func @_matmul_bn_relu_kernel(%arg0: i32, %arg1: memref<256x27xbf16, #tpu.memory_space<vmem>>, %arg2: memref<27x128xbf16, #tpu.memory_space<vmem>>, %arg3: memref<1x128xf32, #tpu.memory_space<vmem>>, %arg4: memref<1x128xf32, #tpu.memory_space<vmem>>, %arg5: memref<256x128xbf16, #tpu.memory_space<vmem>>) attributes {dimension_semantics = [#tpu.dimension_semantics<parallel>], iteration_bounds = array<i64: 8>, scalar_prefetch = 0 : i64, scratch_operands = 0 : i64, tpu.core_type = #tpu.core_type<tc>, window_params = [{transform_indices = @transform_0, window_bounds = array<i64: 256, 27>}, {pipeline_mode = #tpu.pipeline_mode<synchronous>, transform_indices = @transform_1, window_bounds = array<i64: 27, 128>}, {pipeline_mode = #tpu.pipeline_mode<synchronous>, transform_indices = @transform_2, window_bounds = array<i64: 1, 128>}, {pipeline_mode = #tpu.pipeline_mode<synchronous>, transform_indices = @transform_3, window_bounds = array<i64: 1, 128>}, {transform_indices = @transform_4, window_bounds = array<i64: 256, 128>}]} {
    %c0 = arith.constant 0 : index
    %c0_0 = arith.constant 0 : index
    %0 = vector.load %arg1[%c0, %c0_0] : memref<256x27xbf16, #tpu.memory_space<vmem>>, vector<256x27xbf16>
    %c0_1 = arith.constant 0 : index
    %c0_2 = arith.constant 0 : index
    %1 = vector.load %arg2[%c0_1, %c0_2] : memref<27x128xbf16, #tpu.memory_space<vmem>>, vector<27x128xbf16>
    %cst = arith.constant dense<0.000000e+00> : vector<256x128xf32>
    %2 = tpu.matmul %0, %1, %cst {dimension_numbers = #tpu.dot_dimension_numbers<[1], [0], [0], [1], [0, 0, 1, 1], [], []>} : vector<256x27xbf16>, vector<27x128xbf16>, vector<256x128xf32> -> vector<256x128xf32>
    %c0_3 = arith.constant 0 : index
    %c0_4 = arith.constant 0 : index
    %3 = vector.load %arg3[%c0_3, %c0_4] : memref<1x128xf32, #tpu.memory_space<vmem>>, vector<1x128xf32>
    %4 = vector.broadcast %3 : vector<1x128xf32> to vector<256x128xf32>
    %5 = arith.mulf %2, %4 : vector<256x128xf32>
    %c0_5 = arith.constant 0 : index
    %c0_6 = arith.constant 0 : index
    %6 = vector.load %arg4[%c0_5, %c0_6] : memref<1x128xf32, #tpu.memory_space<vmem>>, vector<1x128xf32>
    %7 = vector.broadcast %6 : vector<1x128xf32> to vector<256x128xf32>
    %8 = arith.addf %5, %7 : vector<256x128xf32>
    %cst_7 = arith.constant 0.000000e+00 : f32
    %9 = vector.broadcast %cst_7 : f32 to vector<256x128xf32>
    %10 = arith.maximumf %8, %9 : vector<256x128xf32>
    %11 = arith.truncf %10 : vector<256x128xf32> to vector<256x128xbf16>
    %c0_8 = arith.constant 0 : index
    %c0_9 = arith.constant 0 : index
    %12 = vector.load %arg5[%c0_8, %c0_9] : memref<256x128xbf16, #tpu.memory_space<vmem>>, vector<256x128xbf16>
    tpu.vector_store %arg5[%c0_8, %c0_9], %11 {strides = array<i32>} : memref<256x128xbf16, #tpu.memory_space<vmem>>, vector<256x128xbf16>,
    return
  }
  func.func @transform_0(%arg0: i32) -> (i32, i32) {
    %c0_i32 = arith.constant 0 : i32
    %c0_i32_0 = arith.constant 0 : i32
    return %arg0, %c0_i32 : i32, i32
  }
  func.func @transform_1(%arg0: i32) -> (i32, i32) {
    %c0_i32 = arith.constant 0 : i32
    %c0_i32_0 = arith.constant 0 : i32
    %c0_i32_1 = arith.constant 0 : i32
    return %c0_i32, %c0_i32_0 : i32, i32
  }
  func.func @transform_2(%arg0: i32) -> (i32, i32) {
    %c0_i32 = arith.constant 0 : i32
    %c0_i32_0 = arith.constant 0 : i32
    %c0_i32_1 = arith.constant 0 : i32
    return %c0_i32, %c0_i32_0 : i32, i32
  }
  func.func @transform_3(%arg0: i32) -> (i32, i32) {
    %c0_i32 = arith.constant 0 : i32
    %c0_i32_0 = arith.constant 0 : i32
    %c0_i32_1 = arith.constant 0 : i32
    return %c0_i32, %c0_i32_0 : i32, i32
  }
  func.func @transform_4(%arg0: i32) -> (i32, i32) {
    %c0_i32 = arith.constant 0 : i32
    %c0_i32_0 = arith.constant 0 : i32
    return %arg0, %c0_i32 : i32, i32
  }
}

module attributes {stable_mosaic.version = 11 : i64} {
  func.func @_matmul_bn_relu_kernel(%arg0: i32, %arg1: memref<256x288xbf16, #tpu.memory_space<vmem>>, %arg2: memref<288x128xbf16, #tpu.memory_space<vmem>>, %arg3: memref<1x128xf32, #tpu.memory_space<vmem>>, %arg4: memref<1x128xf32, #tpu.memory_space<vmem>>, %arg5: memref<256x128xbf16, #tpu.memory_space<vmem>>) attributes {dimension_semantics = [#tpu.dimension_semantics<parallel>], iteration_bounds = array<i64: 2>, scalar_prefetch = 0 : i64, scratch_operands = 0 : i64, tpu.core_type = #tpu.core_type<tc>, window_params = [{transform_indices = @transform_0, window_bounds = array<i64: 256, 288>}, {pipeline_mode = #tpu.pipeline_mode<synchronous>, transform_indices = @transform_1, window_bounds = array<i64: 288, 128>}, {pipeline_mode = #tpu.pipeline_mode<synchronous>, transform_indices = @transform_2, window_bounds = array<i64: 1, 128>}, {pipeline_mode = #tpu.pipeline_mode<synchronous>, transform_indices = @transform_3, window_bounds = array<i64: 1, 128>}, {transform_indices = @transform_4, window_bounds = array<i64: 256, 128>}]} {
    %c0 = arith.constant 0 : index
    %c0_0 = arith.constant 0 : index
    %0 = vector.load %arg1[%c0, %c0_0] : memref<256x288xbf16, #tpu.memory_space<vmem>>, vector<256x288xbf16>
    %c0_1 = arith.constant 0 : index
    %c0_2 = arith.constant 0 : index
    %1 = vector.load %arg2[%c0_1, %c0_2] : memref<288x128xbf16, #tpu.memory_space<vmem>>, vector<288x128xbf16>
    %cst = arith.constant dense<0.000000e+00> : vector<256x128xf32>
    %2 = tpu.matmul %0, %1, %cst {dimension_numbers = #tpu.dot_dimension_numbers<[1], [0], [0], [1], [0, 0, 1, 1], [], []>} : vector<256x288xbf16>, vector<288x128xbf16>, vector<256x128xf32> -> vector<256x128xf32>
    %c0_3 = arith.constant 0 : index
    %c0_4 = arith.constant 0 : index
    %3 = vector.load %arg3[%c0_3, %c0_4] : memref<1x128xf32, #tpu.memory_space<vmem>>, vector<1x128xf32>
    %4 = vector.broadcast %3 : vector<1x128xf32> to vector<256x128xf32>
    %5 = arith.mulf %2, %4 : vector<256x128xf32>
    %c0_5 = arith.constant 0 : index
    %c0_6 = arith.constant 0 : index
    %6 = vector.load %arg4[%c0_5, %c0_6] : memref<1x128xf32, #tpu.memory_space<vmem>>, vector<1x128xf32>
    %7 = vector.broadcast %6 : vector<1x128xf32> to vector<256x128xf32>
    %8 = arith.addf %5, %7 : vector<256x128xf32>
    %cst_7 = arith.constant 0.000000e+00 : f32
    %9 = vector.broadcast %cst_7 : f32 to vector<256x128xf32>
    %10 = arith.maximumf %8, %9 : vector<256x128xf32>
    %11 = arith.truncf %10 : vector<256x128xf32> to vector<256x128xbf16>
    %c0_8 = arith.constant 0 : index
    %c0_9 = arith.constant 0 : index
    %12 = vector.load %arg5[%c0_8, %c0_9] : memref<256x128xbf16, #tpu.memory_space<vmem>>, vector<256x128xbf16>
    tpu.vector_store %arg5[%c0_8, %c0_9], %11 {strides = array<i32>} : memref<256x128xbf16, #tpu.memory_space<vmem>>, vector<256x128xbf16>,
    return
  }
  func.func @transform_0(%arg0: i32) -> (i32, i32) {
    %c0_i32 = arith.constant 0 : i32
    %c0_i32_0 = arith.constant 0 : i32
    return %arg0, %c0_i32 : i32, i32
  }
  func.func @transform_1(%arg0: i32) -> (i32, i32) {
    %c0_i32 = arith.constant 0 : i32
    %c0_i32_0 = arith.constant 0 : i32
    %c0_i32_1 = arith.constant 0 : i32
    return %c0_i32, %c0_i32_0 : i32, i32
  }
  func.func @transform_2(%arg0: i32) -> (i32, i32) {
    %c0_i32 = arith.constant 0 : i32
    %c0_i32_0 = arith.constant 0 : i32
    %c0_i32_1 = arith.constant 0 : i32
    return %c0_i32, %c0_i32_0 : i32, i32
  }
  func.func @transform_3(%arg0: i32) -> (i32, i32) {
    %c0_i32 = arith.constant 0 : i32
    %c0_i32_0 = arith.constant 0 : i32
    %c0_i32_1 = arith.constant 0 : i32
    return %c0_i32, %c0_i32_0 : i32, i32
  }
  func.func @transform_4(%arg0: i32) -> (i32, i32) {
    %c0_i32 = arith.constant 0 : i32
    %c0_i32_0 = arith.constant 0 : i32
    return %arg0, %c0_i32 : i32, i32
  }
}

module attributes {stable_mosaic.version = 11 : i64} {
  func.func @_matmul_bn_relu_kernel(%arg0: i32, %arg1: memref<256x1152xbf16, #tpu.memory_space<vmem>>, %arg2: memref<1152x256xbf16, #tpu.memory_space<vmem>>, %arg3: memref<1x256xf32, #tpu.memory_space<vmem>>, %arg4: memref<1x256xf32, #tpu.memory_space<vmem>>, %arg5: memref<256x256xbf16, #tpu.memory_space<vmem>>) attributes {dimension_semantics = [#tpu.dimension_semantics<parallel>], iteration_bounds = array<i64: 2>, scalar_prefetch = 0 : i64, scratch_operands = 0 : i64, tpu.core_type = #tpu.core_type<tc>, window_params = [{transform_indices = @transform_0, window_bounds = array<i64: 256, 1152>}, {pipeline_mode = #tpu.pipeline_mode<synchronous>, transform_indices = @transform_1, window_bounds = array<i64: 1152, 256>}, {pipeline_mode = #tpu.pipeline_mode<synchronous>, transform_indices = @transform_2, window_bounds = array<i64: 1, 256>}, {pipeline_mode = #tpu.pipeline_mode<synchronous>, transform_indices = @transform_3, window_bounds = array<i64: 1, 256>}, {transform_indices = @transform_4, window_bounds = array<i64: 256, 256>}]} {
    %c0 = arith.constant 0 : index
    %c0_0 = arith.constant 0 : index
    %0 = vector.load %arg1[%c0, %c0_0] : memref<256x1152xbf16, #tpu.memory_space<vmem>>, vector<256x1152xbf16>
    %c0_1 = arith.constant 0 : index
    %c0_2 = arith.constant 0 : index
    %1 = vector.load %arg2[%c0_1, %c0_2] : memref<1152x256xbf16, #tpu.memory_space<vmem>>, vector<1152x256xbf16>
    %cst = arith.constant dense<0.000000e+00> : vector<256x256xf32>
    %2 = tpu.matmul %0, %1, %cst {dimension_numbers = #tpu.dot_dimension_numbers<[1], [0], [0], [1], [0, 0, 1, 1], [], []>} : vector<256x1152xbf16>, vector<1152x256xbf16>, vector<256x256xf32> -> vector<256x256xf32>
    %c0_3 = arith.constant 0 : index
    %c0_4 = arith.constant 0 : index
    %3 = vector.load %arg3[%c0_3, %c0_4] : memref<1x256xf32, #tpu.memory_space<vmem>>, vector<1x256xf32>
    %4 = vector.broadcast %3 : vector<1x256xf32> to vector<256x256xf32>
    %5 = arith.mulf %2, %4 : vector<256x256xf32>
    %c0_5 = arith.constant 0 : index
    %c0_6 = arith.constant 0 : index
    %6 = vector.load %arg4[%c0_5, %c0_6] : memref<1x256xf32, #tpu.memory_space<vmem>>, vector<1x256xf32>
    %7 = vector.broadcast %6 : vector<1x256xf32> to vector<256x256xf32>
    %8 = arith.addf %5, %7 : vector<256x256xf32>
    %cst_7 = arith.constant 0.000000e+00 : f32
    %9 = vector.broadcast %cst_7 : f32 to vector<256x256xf32>
    %10 = arith.maximumf %8, %9 : vector<256x256xf32>
    %11 = arith.truncf %10 : vector<256x256xf32> to vector<256x256xbf16>
    %c0_8 = arith.constant 0 : index
    %c0_9 = arith.constant 0 : index
    %12 = vector.load %arg5[%c0_8, %c0_9] : memref<256x256xbf16, #tpu.memory_space<vmem>>, vector<256x256xbf16>
    tpu.vector_store %arg5[%c0_8, %c0_9], %11 {strides = array<i32>} : memref<256x256xbf16, #tpu.memory_space<vmem>>, vector<256x256xbf16>,
    return
  }
  func.func @transform_0(%arg0: i32) -> (i32, i32) {
    %c0_i32 = arith.constant 0 : i32
    %c0_i32_0 = arith.constant 0 : i32
    return %arg0, %c0_i32 : i32, i32
  }
  func.func @transform_1(%arg0: i32) -> (i32, i32) {
    %c0_i32 = arith.constant 0 : i32
    %c0_i32_0 = arith.constant 0 : i32
    %c0_i32_1 = arith.constant 0 : i32
    return %c0_i32, %c0_i32_0 : i32, i32
  }
  func.func @transform_2(%arg0: i32) -> (i32, i32) {
    %c0_i32 = arith.constant 0 : i32
    %c0_i32_0 = arith.constant 0 : i32
    %c0_i32_1 = arith.constant 0 : i32
    return %c0_i32, %c0_i32_0 : i32, i32
  }
  func.func @transform_3(%arg0: i32) -> (i32, i32) {
    %c0_i32 = arith.constant 0 : i32
    %c0_i32_0 = arith.constant 0 : i32
    %c0_i32_1 = arith.constant 0 : i32
    return %c0_i32, %c0_i32_0 : i32, i32
  }
  func.func @transform_4(%arg0: i32) -> (i32, i32) {
    %c0_i32 = arith.constant 0 : i32
    %c0_i32_0 = arith.constant 0 : i32
    return %arg0, %c0_i32 : i32, i32
  }
}

module attributes {stable_mosaic.version = 11 : i64} {
  func.func @_conv4_head_kernel(%arg0: memref<200x2304xbf16, #tpu.memory_space<vmem>>, %arg1: memref<2304x512xbf16, #tpu.memory_space<vmem>>, %arg2: memref<1x512xf32, #tpu.memory_space<vmem>>, %arg3: memref<1x512xf32, #tpu.memory_space<vmem>>, %arg4: memref<2x200xf32, #tpu.memory_space<vmem>>, %arg5: memref<512x32xf32, #tpu.memory_space<vmem>>, %arg6: memref<1x32xf32, #tpu.memory_space<vmem>>, %arg7: memref<32x10xf32, #tpu.memory_space<vmem>>, %arg8: memref<1x10xf32, #tpu.memory_space<vmem>>, %arg9: memref<2x10xf32, #tpu.memory_space<vmem>>) attributes {dimension_semantics = [], scalar_prefetch = 0 : i64, scratch_operands = 0 : i64, tpu.core_type = #tpu.core_type<tc>} {
    %c0 = arith.constant 0 : index
    %c0_0 = arith.constant 0 : index
    %0 = vector.load %arg0[%c0, %c0_0] : memref<200x2304xbf16, #tpu.memory_space<vmem>>, vector<200x2304xbf16>
    %c0_1 = arith.constant 0 : index
    %c0_2 = arith.constant 0 : index
    %1 = vector.load %arg1[%c0_1, %c0_2] : memref<2304x512xbf16, #tpu.memory_space<vmem>>, vector<2304x512xbf16>
    %cst = arith.constant dense<0.000000e+00> : vector<200x512xf32>
    %2 = tpu.matmul %0, %1, %cst {dimension_numbers = #tpu.dot_dimension_numbers<[1], [0], [0], [1], [0, 0, 1, 1], [], []>} : vector<200x2304xbf16>, vector<2304x512xbf16>, vector<200x512xf32> -> vector<200x512xf32>
    %c0_3 = arith.constant 0 : index
    %c0_4 = arith.constant 0 : index
    %3 = vector.load %arg2[%c0_3, %c0_4] : memref<1x512xf32, #tpu.memory_space<vmem>>, vector<1x512xf32>
    %4 = vector.broadcast %3 : vector<1x512xf32> to vector<200x512xf32>
    %5 = arith.mulf %2, %4 : vector<200x512xf32>
    %c0_5 = arith.constant 0 : index
    %c0_6 = arith.constant 0 : index
    %6 = vector.load %arg3[%c0_5, %c0_6] : memref<1x512xf32, #tpu.memory_space<vmem>>, vector<1x512xf32>
    %7 = vector.broadcast %6 : vector<1x512xf32> to vector<200x512xf32>
    %8 = arith.addf %5, %7 : vector<200x512xf32>
    %cst_7 = arith.constant 0.000000e+00 : f32
    %9 = vector.broadcast %cst_7 : f32 to vector<200x512xf32>
    %10 = arith.maximumf %8, %9 : vector<200x512xf32>
    %c0_8 = arith.constant 0 : index
    %c0_9 = arith.constant 0 : index
    %11 = vector.load %arg4[%c0_8, %c0_9] : memref<2x200xf32, #tpu.memory_space<vmem>>, vector<2x200xf32>
    %cst_10 = arith.constant dense<0.000000e+00> : vector<2x512xf32>
    %12 = tpu.matmul %11, %10, %cst_10 {dimension_numbers = #tpu.dot_dimension_numbers<[1], [0], [0], [1], [0, 0, 1, 1], [], []>} : vector<2x200xf32>, vector<200x512xf32>, vector<2x512xf32> -> vector<2x512xf32>
    %c0_11 = arith.constant 0 : index
    %c0_12 = arith.constant 0 : index
    %13 = vector.load %arg5[%c0_11, %c0_12] : memref<512x32xf32, #tpu.memory_space<vmem>>, vector<512x32xf32>
    %cst_13 = arith.constant dense<0.000000e+00> : vector<2x32xf32>
    %14 = tpu.matmul %12, %13, %cst_13 {dimension_numbers = #tpu.dot_dimension_numbers<[1], [0], [0], [1], [0, 0, 1, 1], [], []>} : vector<2x512xf32>, vector<512x32xf32>, vector<2x32xf32> -> vector<2x32xf32>
    %c0_14 = arith.constant 0 : index
    %c0_15 = arith.constant 0 : index
    %15 = vector.load %arg6[%c0_14, %c0_15] : memref<1x32xf32, #tpu.memory_space<vmem>>, vector<1x32xf32>
    %16 = vector.broadcast %15 : vector<1x32xf32> to vector<2x32xf32>
    %17 = arith.addf %14, %16 : vector<2x32xf32>
    %c0_16 = arith.constant 0 : index
    %c0_17 = arith.constant 0 : index
    %18 = vector.load %arg7[%c0_16, %c0_17] : memref<32x10xf32, #tpu.memory_space<vmem>>, vector<32x10xf32>
    %cst_18 = arith.constant dense<0.000000e+00> : vector<2x10xf32>
    %19 = tpu.matmul %17, %18, %cst_18 {dimension_numbers = #tpu.dot_dimension_numbers<[1], [0], [0], [1], [0, 0, 1, 1], [], []>} : vector<2x32xf32>, vector<32x10xf32>, vector<2x10xf32> -> vector<2x10xf32>
    %c0_19 = arith.constant 0 : index
    %c0_20 = arith.constant 0 : index
    %20 = vector.load %arg8[%c0_19, %c0_20] : memref<1x10xf32, #tpu.memory_space<vmem>>, vector<1x10xf32>
    %21 = vector.broadcast %20 : vector<1x10xf32> to vector<2x10xf32>
    %22 = arith.addf %19, %21 : vector<2x10xf32>
    %c0_21 = arith.constant 0 : index
    %c0_22 = arith.constant 0 : index
    %23 = vector.load %arg9[%c0_21, %c0_22] : memref<2x10xf32, #tpu.memory_space<vmem>>, vector<2x10xf32>
    tpu.vector_store %arg9[%c0_21, %c0_22], %22 {strides = array<i32>} : memref<2x10xf32, #tpu.memory_space<vmem>>, vector<2x10xf32>,
    return
  }
}

</mosaic_0001>

<bundles_post_ra>
// kernel: mynet_forward.4
= control target key start
LH: loop header
LB: loop body
LE: loop exit
PB: predicated region body
PF: predicated region fallthrough
CT: control target
= control target key end

     0   :  { %s1197_s15 = smov 0   ;;  %s1353_s0 = inlined_call_operand.vmem [shape: bf16[2048,27], index: 0, kind: input, shape index: {}]   ;;  %s1354_s1 = inlined_call_operand.vmem [shape: bf16[27,128], index: 1, kind: input, shape index: {}]   ;;  %s1355_s2 = inlined_call_operand.vmem [shape: f32[1,128], index: 2, kind: input, shape index: {}]   ;;  %s1356_s3 = inlined_call_operand.vmem [shape: f32[1,128], index: 3, kind: input, shape index: {}]   ;;  %s1357_s4 = inlined_call_operand.vmem [shape: bf16[2048,128], index: 4, kind: output, shape index: {}]  }
   0x1 LB: > { %s872_s16 = sadd.s32 4294967295, %s1169_s15   ;;  %p876_p0 = scmp.ge.s32.totalorder %s1169_s15, 1  ;;  %s1169_s15 = sphi %s1197_s15, %s14_s15  }
   0x2   : > { %p163_p1 = scmp.lt.s32.totalorder %s1169_s15, 9 }
   0x4   : > { %p164_p2 = pnand %p876_p0, %p163_p1 }
   0x5   : > { %s877_s19 = sshll.u32 (!%p164_p2), %s872_s16, 5 }
   0x6   : > { %167 = sbr.rel (%p164_p2) target bundleno = 256 (0x100), region = 36  ;;  %p190_p3 = scmp.lt.s32.totalorder (!%p164_p2), %s877_s19, 255 }
   0xb   : > { %v1145_v0 = vld [vmem:[%s1354_s1 + $0x8] sm:$0x3f]   ;;  %vm378_vm0 = vcmask 1044480   ;;  %vm379_vm1 = vcmask 1045504   ;;  %v1171_v1 = vmov 65535   ;;  %v1146_v5 = vld [vmem:[%s1354_s1] sm:$0xff]  }
   0xc   : > { %v380_v2 = vsel %vm378_vm0, 4294967295, %v1171_v1  ;;  %s1359_s19 = smov (!%p190_p3, %s877_s19), 255  ;;  %vm329_vm2 = vcmask 220160   ;;  %v1256_v22 = vld [vmem:[%s1355_s2] ss:$0 sm:$0xff] }
   0xd   : > { %v381_v3 = vsel %vm379_vm1, %v380_v2, 0  ;;  %s878_s22 = sshll.u32 %s1359_s19, 2  ;;  %v1263_v27 = vld [vmem:[%s1356_s3] ss:$0 sm:$0xff] }
   0xe   : > { %v383_v4 = vand.u32 %v1145_v0, %v381_v3  ;;  %s1219_s25 = scalar_lea.vmem %s1353_s0, %s878_s22  ;;  %s1286_s6 = scalar_lea.vmem %s1357_s4, %s878_s22 }
   0xf   : > { %v1147_v6 = vld [vmem:[%s1219_s25] sm:$0xff]   ;;  %v1149_v8 = vld [vmem:[%s1219_s25 + $0x8] sm:$0xff]   ;;  %v1151_v10 = vld [vmem:[%s1219_s25 + $0x10] sm:$0xff]  }
  0x10   : > { %1096 = vmatprep.subr.bf16.mxu0 %v383_v4  ;;  %1132 = vmatprep.subr.bf16.mxu1 %v383_v4  ;;  %v1148_v7 = vld [vmem:[%s1219_s25 + $0x40] sm:$0xff]   ;;  %v1150_v9 = vld [vmem:[%s1219_s25 + $0x48] sm:$0xff]   ;;  %v1152_v11 = vld [vmem:[%s1219_s25 + $0x50] sm:$0xff]  }
  0x11   : > { %1097 = vmatpush3.bf16.msra.mxu0 %v383_v4  ;;  %1134 = vmatpush3.bf16.msra.mxu1 %v383_v4  ;;  %v1153_v12 = vld [vmem:[%s1219_s25 + $0x18] sm:$0xff]   ;;  %v1155_v14 = vld [vmem:[%s1219_s25 + $0x20] sm:$0xff]   ;;  %v1157_v16 = vld [vmem:[%s1219_s25 + $0x28] sm:$0xff]  }
  0x12   : > { %1098 = vmatprep.subr.bf16.mxu0 %v1146_v5  ;;  %1133 = vmatprep.subr.bf16.mxu1 %v1146_v5  ;;  %v1154_v13 = vld [vmem:[%s1219_s25 + $0x58] sm:$0xff]   ;;  %v1156_v15 = vld [vmem:[%s1219_s25 + $0x60] sm:$0xff]   ;;  %v1158_v17 = vld [vmem:[%s1219_s25 + $0x68] sm:$0xff]  }
  0x13   : > { %1100 = vmatprep.mubr.msk.bf16.mxu0 %vm329_vm2, %v1147_v6  ;;  %1116 = vmatprep.mubr.msk.bf16.mxu1 %vm329_vm2, %v1148_v7  ;;  %v1159_v18 = vld [vmem:[%s1219_s25 + $0x30] sm:$0xff]   ;;  %v1161_v20 = vld [vmem:[%s1219_s25 + $0x38] sm:$0xff]  }
  0x14   : > { %v1160_v19 = vld [vmem:[%s1219_s25 + $0x70] sm:$0xff]   ;;  %v1162_v21 = vld [vmem:[%s1219_s25 + $0x78] sm:$0xff]  }
  0x15   : > { %1099 = vmatpush3.bf16.msra.mxu0 %v1146_v5  ;;  %1135 = vmatpush3.bf16.msra.mxu1 %v1146_v5 }
  0x18   : > { %1101 = vmatmul.mubr.msk.bf16.vlgmr.msra.gmra.mxu0 %vm329_vm2, %v1149_v8  ;;  %1117 = vmatmul.mubr.msk.bf16.vlgmr.msra.gmra.mxu1 %vm329_vm2, %v1150_v9 }
  0x19   : > { %1104 = vmatprep.mubr.msk.bf16.mxu0 %vm329_vm2, %v1151_v10  ;;  %1120 = vmatprep.mubr.msk.bf16.mxu1 %vm329_vm2, %v1152_v11 }
  0x20   : > { %1105 = vmatmul.mubr.msk.bf16.gmra.mxu0 %vm329_vm2, %v1153_v12  ;;  %1121 = vmatmul.mubr.msk.bf16.gmra.mxu1 %vm329_vm2, %v1154_v13 }
  0x21   : > { %1108 = vmatprep.mubr.msk.bf16.mxu0 %vm329_vm2, %v1155_v14  ;;  %1124 = vmatprep.mubr.msk.bf16.mxu1 %vm329_vm2, %v1156_v15 }
  0x28   : > { %1109 = vmatmul.mubr.msk.bf16.gmra.mxu0 %vm329_vm2, %v1157_v16  ;;  %1125 = vmatmul.mubr.msk.bf16.gmra.mxu1 %vm329_vm2, %v1158_v17 }
  0x29   : > { %1112 = vmatprep.mubr.msk.bf16.mxu0 %vm329_vm2, %v1159_v18  ;;  %1128 = vmatprep.mubr.msk.bf16.mxu1 %vm329_vm2, %v1160_v19 }
  0x30   : > { %1113 = vmatmul.mubr.msk.bf16.gmra.mxu0 %vm329_vm2, %v1161_v20  ;;  %1129 = vmatmul.mubr.msk.bf16.gmra.mxu1 %vm329_vm2, %v1162_v21 }
  0xd8   : > { %v1102_v23 = vpop.f32.mrf.mxu0  ;;  %v1118_v24 = vpop.f32.mrf.mxu1 }
  0xd9   : > { %v555_v25 = vmul.f32 %v1102_v23, %v1256_v22  ;;  %v571_v26 = vmul.f32 %v1118_v24, %v1256_v22 }
  0xda   : > { %v419_v28 = vpop.f32.mrf.mxu0  ;;  %v483_v29 = vpop.f32.mrf.mxu1 }
  0xdb   : > { %v553_v30 = vmul.f32 %v1256_v22, %v419_v28  ;;  %v569_v31 = vmul.f32 %v1256_v22, %v483_v29  ;;  %v594_v34 = vadd.f32 %v1263_v27, %v555_v25  ;;  %v610_v35 = vadd.f32 %v1263_v27, %v571_v26 }
  0xdc   : > { %v1103_v32 = vpop.f32.mrf.mxu0  ;;  %v1119_v33 = vpop.f32.mrf.mxu1 }
  0xdd   : > { %v556_v36 = vmul.f32 %v1103_v32, %v1256_v22  ;;  %v572_v37 = vmul.f32 %v1119_v33, %v1256_v22  ;;  %v592_v40 = vadd.f32 %v1263_v27, %v553_v30  ;;  %v608_v41 = vadd.f32 %v1263_v27, %v569_v31 }
  0xde   : > { %v422_v38 = vpop.f32.mrf.mxu0  ;;  %v486_v39 = vpop.f32.mrf.mxu1  ;;  %v626_v48 = vmax.f32 %v594_v34, 0.0  ;;  %v642_v49 = vmax.f32 %v610_v35, 0.0 }
  0xdf   : > { %v554_v42 = vmul.f32 %v1256_v22, %v422_v38  ;;  %v570_v43 = vmul.f32 %v1256_v22, %v486_v39  ;;  %v595_v44 = vadd.f32 %v1263_v27, %v556_v36  ;;  %v611_v45 = vadd.f32 %v1263_v27, %v572_v37 }
  0xe0   : > { %v1106_v46 = vpop.f32.mrf.mxu0  ;;  %v1122_v47 = vpop.f32.mrf.mxu1  ;;  %v624_v58 = vmax.f32 %v592_v40, 0.0  ;;  %v640_v59 = vmax.f32 %v608_v41, 0.0 }
  0xe1   : > { %v593_v50 = vadd.f32 %v1263_v27, %v554_v42  ;;  %v609_v51 = vadd.f32 %v1263_v27, %v570_v43  ;;  %v627_v52 = vmax.f32 %v595_v44, 0.0  ;;  %v643_v53 = vmax.f32 %v611_v45, 0.0 }
  0xe2   : > { %v559_v54 = vmul.f32 %v1106_v46, %v1256_v22  ;;  %v575_v55 = vmul.f32 %v1122_v47, %v1256_v22  ;;  %v435_v56 = vpop.f32.mrf.mxu0  ;;  %v499_v57 = vpop.f32.mrf.mxu1 }
  0xe3   : > { %v625_v60 = vmax.f32 %v593_v50, 0.0  ;;  %v641_v61 = vmax.f32 %v609_v51, 0.0  ;;  %v991_v62 = vpack.c.bf16 %v627_v52, %v626_v48  ;;  %v1031_v63 = vpack.c.bf16 %v643_v53, %v642_v49 }
  0xe4   : > { %v557_v0 = vmul.f32 %v1256_v22, %v435_v56  ;;  %v573_v1 = vmul.f32 %v1256_v22, %v499_v57  ;;  %v1107_v2 = vpop.f32.mrf.mxu0  ;;  %v1123_v3 = vpop.f32.mrf.mxu1  ;;  %v598_v6 = vadd.f32 %v1263_v27, %v559_v54  ;;  %v614_v7 = vadd.f32 %v1263_v27, %v575_v55 }
  0xe5   : > { %v986_v4 = vpack.c.bf16 %v625_v60, %v624_v58  ;;  %v1026_v5 = vpack.c.bf16 %v641_v61, %v640_v59  ;;  %1063 = vst [vmem:[%s1286_s6 + $0x8] sm:$0xff] %v991_v62   ;;  %1071 = vst [vmem:[%s1286_s6 + $0x48] sm:$0xff] %v1031_v63   ;;  %v560_v8 = vmul.f32 %v1107_v2, %v1256_v22 }
  0xe6   : > { %v576_v9 = vmul.f32 %v1123_v3, %v1256_v22  ;;  %v438_v10 = vpop.f32.mrf.mxu0  ;;  %v502_v11 = vpop.f32.mrf.mxu1  ;;  %v596_v12 = vadd.f32 %v1263_v27, %v557_v0  ;;  %v612_v13 = vadd.f32 %v1263_v27, %v573_v1  ;;  %v630_v25 = vmax.f32 %v598_v6, 0.0 }
  0xe7   : > { %987 = vst [vmem:[%s1286_s6] sm:$0xff] %v986_v4   ;;  %1070 = vst [vmem:[%s1286_s6 + $0x40] sm:$0xff] %v1026_v5   ;;  %v558_v14 = vmul.f32 %v1256_v22, %v438_v10  ;;  %v574_v15 = vmul.f32 %v1256_v22, %v502_v11  ;;  %v599_v16 = vadd.f32 %v1263_v27, %v560_v8  ;;  %v646_v26 = vmax.f32 %v614_v7, 0.0 }
  0xe8   : > { %v615_v17 = vadd.f32 %v1263_v27, %v576_v9  ;;  %v1110_v18 = vpop.f32.mrf.mxu0  ;;  %v1126_v19 = vpop.f32.mrf.mxu1  ;;  %v628_v32 = vmax.f32 %v596_v12, 0.0  ;;  %v644_v33 = vmax.f32 %v612_v13, 0.0 }
  0xe9   : > { %v597_v20 = vadd.f32 %v1263_v27, %v558_v14  ;;  %v613_v21 = vadd.f32 %v1263_v27, %v574_v15  ;;  %v563_v23 = vmul.f32 %v1110_v18, %v1256_v22  ;;  %v579_v24 = vmul.f32 %v1126_v19, %v1256_v22 }
  0xea   : > { %v631_v28 = vmax.f32 %v599_v16, 0.0  ;;  %v647_v29 = vmax.f32 %v615_v17, 0.0  ;;  %v451_v30 = vpop.f32.mrf.mxu0  ;;  %v515_v31 = vpop.f32.mrf.mxu1 }
  0xeb   : > { %v629_v34 = vmax.f32 %v597_v20, 0.0  ;;  %v645_v35 = vmax.f32 %v613_v21, 0.0  ;;  %v561_v38 = vmul.f32 %v1256_v22, %v451_v30  ;;  %v577_v39 = vmul.f32 %v1256_v22, %v515_v31 }
  0xec   : > { %v1001_v36 = vpack.c.bf16 %v631_v28, %v630_v25  ;;  %v1041_v37 = vpack.c.bf16 %v647_v29, %v646_v26  ;;  %v1111_v40 = vpop.f32.mrf.mxu0  ;;  %v1127_v41 = vpop.f32.mrf.mxu1  ;;  %v602_v44 = vadd.f32 %v1263_v27, %v563_v23  ;;  %v618_v45 = vadd.f32 %v1263_v27, %v579_v24 }
  0xed   : > { %v996_v42 = vpack.c.bf16 %v629_v34, %v628_v32  ;;  %v1036_v43 = vpack.c.bf16 %v645_v35, %v644_v33  ;;  %v564_v46 = vmul.f32 %v1111_v40, %v1256_v22  ;;  %v580_v47 = vmul.f32 %v1127_v41, %v1256_v22 }
  0xee   : > { %1065 = vst [vmem:[%s1286_s6 + $0x18] sm:$0xff] %v1001_v36   ;;  %1073 = vst [vmem:[%s1286_s6 + $0x58] sm:$0xff] %v1041_v37   ;;  %v454_v48 = vpop.f32.mrf.mxu0  ;;  %v518_v49 = vpop.f32.mrf.mxu1  ;;  %v600_v50 = vadd.f32 %v1263_v27, %v561_v38  ;;  %v616_v51 = vadd.f32 %v1263_v27, %v577_v39  ;;  %v634_v58 = vmax.f32 %v602_v44, 0.0  ;;  %v650_v59 = vmax.f32 %v618_v45, 0.0 }
  0xef   : > { %1064 = vst [vmem:[%s1286_s6 + $0x10] sm:$0xff] %v996_v42   ;;  %1072 = vst [vmem:[%s1286_s6 + $0x50] sm:$0xff] %v1036_v43   ;;  %v562_v52 = vmul.f32 %v1256_v22, %v454_v48  ;;  %v578_v53 = vmul.f32 %v1256_v22, %v518_v49  ;;  %v603_v54 = vadd.f32 %v1263_v27, %v564_v46 }
  0xf0   : > { %v619_v55 = vadd.f32 %v1263_v27, %v580_v47  ;;  %v1114_v56 = vpop.f32.mrf.mxu0  ;;  %v1130_v57 = vpop.f32.mrf.mxu1  ;;  %v632_v4 = vmax.f32 %v600_v50, 0.0  ;;  %v648_v5 = vmax.f32 %v616_v51, 0.0 }
  0xf1   : > { %v601_v60 = vadd.f32 %v1263_v27, %v562_v52  ;;  %v617_v61 = vadd.f32 %v1263_v27, %v578_v53  ;;  %v635_v62 = vmax.f32 %v603_v54, 0.0  ;;  %v567_v0 = vmul.f32 %v1114_v56, %v1256_v22 }
  0xf2   : > { %v651_v63 = vmax.f32 %v619_v55, 0.0  ;;  %v583_v1 = vmul.f32 %v1130_v57, %v1256_v22  ;;  %v467_v2 = vpop.f32.mrf.mxu0  ;;  %v531_v3 = vpop.f32.mrf.mxu1 }
  0xf3   : > { %v633_v6 = vmax.f32 %v601_v60, 0.0  ;;  %v649_v7 = vmax.f32 %v617_v61, 0.0  ;;  %v1011_v8 = vpack.c.bf16 %v635_v62, %v634_v58  ;;  %v565_v10 = vmul.f32 %v1256_v22, %v467_v2 }
  0xf4   : > { %v1051_v9 = vpack.c.bf16 %v651_v63, %v650_v59  ;;  %v581_v11 = vmul.f32 %v1256_v22, %v531_v3  ;;  %v1115_v12 = vpop.f32.mrf.mxu0  ;;  %v1131_v13 = vpop.f32.mrf.mxu1  ;;  %v606_v16 = vadd.f32 %v1263_v27, %v567_v0  ;;  %v622_v17 = vadd.f32 %v1263_v27, %v583_v1 }
  0xf5   : > { %v1006_v14 = vpack.c.bf16 %v633_v6, %v632_v4  ;;  %v1046_v15 = vpack.c.bf16 %v649_v7, %v648_v5  ;;  %1067 = vst [vmem:[%s1286_s6 + $0x28] sm:$0xff] %v1011_v8   ;;  %v568_v18 = vmul.f32 %v1115_v12, %v1256_v22  ;;  %v584_v19 = vmul.f32 %v1131_v13, %v1256_v22 }
  0xf6   : > { %1075 = vst [vmem:[%s1286_s6 + $0x68] sm:$0xff] %v1051_v9   ;;  %v470_v20 = vpop.f32.mrf.mxu0  ;;  %v534_v21 = vpop.f32.mrf.mxu1  ;;  %v604_v23 = vadd.f32 %v1263_v27, %v565_v10  ;;  %v620_v24 = vadd.f32 %v1263_v27, %v581_v11  ;;  %v638_v32 = vmax.f32 %v606_v16, 0.0  ;;  %v654_v33 = vmax.f32 %v622_v17, 0.0 }
  0xf7   : > { %1066 = vst [vmem:[%s1286_s6 + $0x20] sm:$0xff] %v1006_v14   ;;  %1074 = vst [vmem:[%s1286_s6 + $0x60] sm:$0xff] %v1046_v15   ;;  %v566_v25 = vmul.f32 %v1256_v22, %v470_v20  ;;  %v582_v26 = vmul.f32 %v1256_v22, %v534_v21  ;;  %v607_v28 = vadd.f32 %v1263_v27, %v568_v18 }
  0xf8   : > { %v623_v29 = vadd.f32 %v1263_v27, %v584_v19  ;;  %v636_v36 = vmax.f32 %v604_v23, 0.0  ;;  %v652_v37 = vmax.f32 %v620_v24, 0.0 }
  0xf9   : > { %v605_v30 = vadd.f32 %v1263_v27, %v566_v25  ;;  %v621_v31 = vadd.f32 %v1263_v27, %v582_v26  ;;  %v639_v34 = vmax.f32 %v607_v28, 0.0 }
  0xfa   : > { %v655_v35 = vmax.f32 %v623_v29, 0.0 }
  0xfb   : > { %v637_v38 = vmax.f32 %v605_v30, 0.0  ;;  %v653_v22 = vmax.f32 %v621_v31, 0.0  ;;  %v1021_v39 = vpack.c.bf16 %v639_v34, %v638_v32 }
  0xfc   : > { %v1061_v40 = vpack.c.bf16 %v655_v35, %v654_v33 }
  0xfd   : > { %v1016_v41 = vpack.c.bf16 %v637_v38, %v636_v36  ;;  %v1056_v42 = vpack.c.bf16 %v653_v22, %v652_v37  ;;  %1069 = vst [vmem:[%s1286_s6 + $0x38] sm:$0xff] %v1021_v39  }
  0xfe   : > { %1077 = vst [vmem:[%s1286_s6 + $0x78] sm:$0xff] %v1061_v40  }
  0xff   : > { %1068 = vst [vmem:[%s1286_s6 + $0x30] sm:$0xff] %v1016_v41   ;;  %1076 = vst [vmem:[%s1286_s6 + $0x70] sm:$0xff] %v1056_v42  }
 0x100 PF: > { %s14_s15 = sadd.s32 1, %s1169_s15  }
 0x101   : > { %p11_p4 = scmp.ge.s32.totalorder %s14_s15, 10  }
 0x103   :  { %13 = sbr.rel (!%p11_p4) target bundleno = 1 (0x1), region = 66 }

// kernel: mynet_forward.5
= control target key start
LH: loop header
LB: loop body
LE: loop exit
PB: predicated region body
PF: predicated region fallthrough
CT: control target
= control target key end

     0   :  { %s1910_s15 = smov 0   ;;  %s2179_s0 = inlined_call_operand.vmem [shape: bf16[512,288], index: 0, kind: input, shape index: {}]   ;;  %s2180_s1 = inlined_call_operand.vmem [shape: bf16[288,128], index: 1, kind: input, shape index: {}]   ;;  %s2181_s2 = inlined_call_operand.vmem [shape: f32[1,128], index: 2, kind: input, shape index: {}]   ;;  %s2182_s3 = inlined_call_operand.vmem [shape: f32[1,128], index: 3, kind: input, shape index: {}]   ;;  %s2183_s4 = inlined_call_operand.vmem [shape: bf16[512,128], index: 4, kind: output, shape index: {}]  }
   0x1 LB: > { %s1350_s16 = sadd.s32 4294967295, %s1883_s15   ;;  %p1354_p0 = scmp.ge.s32.totalorder %s1883_s15, 1  ;;  %s1883_s15 = sphi %s1910_s15, %s14_s15  }
   0x2   : > { %p164_p1 = scmp.lt.s32.totalorder %s1883_s15, 3 }
   0x4   : > { %p165_p2 = pnand %p1354_p0, %p164_p1 }
   0x5   : > { %s1355_s19 = sshll.u32 (!%p165_p2), %s1350_s16, 5 }
   0x6   : > { %168 = sbr.rel (%p165_p2) target bundleno = 344 (0x158), region = 36  ;;  %p192_p3 = scmp.lt.s32.totalorder (!%p165_p2), %s1355_s19, 63 }
   0xb   : > { %v1795_v0 = vld [vmem:[%s2180_s1 + $0x78] sm:$0xff]   ;;  %v1797_v2 = vld [vmem:[%s2180_s1 + $0x70] sm:$0xff]   ;;  %v1799_v4 = vld [vmem:[%s2180_s1 + $0x68] sm:$0xff]   ;;  %s2185_s19 = smov (!%p192_p3, %s1355_s19), 63  ;;  %vm653_vm0 = vcmask 261120  }
   0xc   : > { %v1796_v1 = vld [vmem:[%s2180_s1 + $0x38] sm:$0xff]   ;;  %1604 = vmatprep.subr.bf16.mxu0 %v1795_v0  ;;  %1770 = vmatprep.subr.bf16.mxu1 %v1795_v0  ;;  %v1798_v3 = vld [vmem:[%s2180_s1 + $0x30] sm:$0xff]   ;;  %v1800_v5 = vld [vmem:[%s2180_s1 + $0x28] sm:$0xff]   ;;  %s1786_s6 = smul.u32 12, %s2185_s19  ;;  %s1358_s12 = sshll.u32 %s2185_s19, 2 }
   0xd   : > { %1605 = vmatpush3.bf16.msra.mxu0 %v1796_v1  ;;  %1778 = vmatpush3.bf16.msra.mxu1 %v1796_v1  ;;  %v1801_v6 = vld [vmem:[%s2180_s1 + $0x60] sm:$0xff]   ;;  %v1803_v8 = vld [vmem:[%s2180_s1 + $0x58] sm:$0xff]   ;;  %v1805_v10 = vld [vmem:[%s2180_s1 + $0x50] sm:$0xff]   ;;  %s2086_s16 = scalar_lea.vmem %s2183_s4, %s1358_s12 }
   0xe   : > { %1606 = vmatprep.subr.bf16.mxu0 %v1797_v2  ;;  %1771 = vmatprep.subr.bf16.mxu1 %v1797_v2  ;;  %v1802_v7 = vld [vmem:[%s2180_s1 + $0x20] sm:$0xff]   ;;  %s1951_s13 = scalar_lea.vmem %s2179_s0, %s1786_s6  ;;  %v1804_v9 = vld [vmem:[%s2180_s1 + $0x18] sm:$0xff]   ;;  %v1806_v13 = vld [vmem:[%s2180_s1 + $0x10] sm:$0xff]  }
   0xf   : > { %v1813_v11 = vld [vmem:[%s1951_s13 + $0x4] ss:$12 sps:$4 sm:$0xff]   ;;  %v1807_v14 = vld [vmem:[%s2180_s1 + $0x48] sm:$0xff]   ;;  %v1824_v26 = vld [vmem:[%s1951_s13 + $0x34] ss:$12 sps:$4 sm:$0xff]  }
  0x10   : > { %v1816_v12 = vld [vmem:[%s1951_s13 + $0x124] ss:$12 sps:$4 sm:$0xff]   ;;  %734 = vmatprep.mubr.bf16.mxu0 %v1813_v11  ;;  %v1808_v15 = vld [vmem:[%s2180_s1 + $0x8] sm:$0xff]   ;;  %v1826_v27 = vld [vmem:[%s1951_s13 + $0x154] ss:$12 sps:$4 sm:$0xff]  }
  0x11   : > { %1607 = vmatpush3.bf16.msra.mxu0 %v1798_v3  ;;  %1779 = vmatpush3.bf16.msra.mxu1 %v1798_v3  ;;  %v1809_v16 = vld [vmem:[%s2180_s1 + $0x40] sm:$0xff]   ;;  %v1817_v18 = vld [vmem:[%s2180_s1 + $0x88] sm:$0xff]   ;;  %v1828_v28 = vld [vmem:[%s1951_s13 + $0x30] ss:$12 sps:$4 sm:$0xff]  }
  0x12   : > { %1608 = vmatprep.subr.bf16.mxu0 %v1799_v4  ;;  %1772 = vmatprep.subr.bf16.mxu1 %v1799_v4  ;;  %v1810_v17 = vld [vmem:[%s2180_s1] sm:$0xff]   ;;  %v1818_v21 = vld [vmem:[%s1951_s13 + $0x1c] ss:$12 sps:$4 sm:$0xff]   ;;  %v1831_v30 = vld [vmem:[%s1951_s13 + $0x4c] ss:$12 sps:$4 sm:$0xff]  }
  0x13   : > { %830 = vmatprep.mubr.bf16.mxu1 %v1816_v12  ;;  %v1811_v19 = vld [vmem:[%s1951_s13] ss:$12 sps:$4 sm:$0xff]   ;;  %v1820_v22 = vld [vmem:[%s1951_s13 + $0x13c] ss:$12 sps:$4 sm:$0xff]   ;;  %v1822_v24 = vld [vmem:[%s1951_s13 + $0x18] ss:$12 sps:$4 sm:$0xff]  }
  0x14   : > { %v1814_v20 = vld [vmem:[%s1951_s13 + $0x120] ss:$12 sps:$4 sm:$0xff]   ;;  %v1823_v25 = vld [vmem:[%s1951_s13 + $0x138] ss:$12 sps:$4 sm:$0xff]   ;;  %v1829_v29 = vld [vmem:[%s1951_s13 + $0x150] ss:$12 sps:$4 sm:$0xff]  }
  0x15   : > { %1609 = vmatpush3.bf16.msra.mxu0 %v1800_v5  ;;  %1780 = vmatpush3.bf16.msra.mxu1 %v1800_v5  ;;  %v1830_v23 = vld [vmem:[%s2180_s1 + $0x80] sm:$0xff]   ;;  %v1833_v31 = vld [vmem:[%s1951_s13 + $0x16c] ss:$12 sps:$4 sm:$0xff]   ;;  %v1835_v32 = vld [vmem:[%s1951_s13 + $0x48] ss:$12 sps:$4 sm:$0xff]  }
  0x16   : > { %1610 = vmatprep.subr.bf16.mxu0 %v1801_v6  ;;  %1773 = vmatprep.subr.bf16.mxu1 %v1801_v6  ;;  %v1836_v33 = vld [vmem:[%s1951_s13 + $0x168] ss:$12 sps:$4 sm:$0xff]   ;;  %v1837_v34 = vld [vmem:[%s1951_s13 + $0x64] ss:$12 sps:$4 sm:$0xff]   ;;  %v1840_v36 = vld [vmem:[%s1951_s13 + $0x60] ss:$12 sps:$4 sm:$0xff]  }
  0x17   : > { %v1839_v35 = vld [vmem:[%s1951_s13 + $0x8] ss:$12 sps:$4 sm:$0xff]   ;;  %v1841_v37 = vld [vmem:[%s1951_s13 + $0x20] ss:$12 sps:$4 sm:$0xff]   ;;  %v1844_v39 = vld [vmem:[%s1951_s13 + $0x38] ss:$12 sps:$4 sm:$0xff]  }
  0x18   : > { %v1842_v38 = vld [vmem:[%s1951_s13 + $0x7c] ss:$12 sps:$4 sm:$0xff]   ;;  %v1845_v40 = vld [vmem:[%s1951_s13 + $0x78] ss:$12 sps:$4 sm:$0xff]   ;;  %v1847_v42 = vld [vmem:[%s1951_s13 + $0x94] ss:$12 sps:$4 sm:$0xff]  }
  0x19   : > { %1611 = vmatpush3.bf16.msra.mxu0 %v1802_v7  ;;  %1781 = vmatpush3.bf16.msra.mxu1 %v1802_v7  ;;  %v1846_v41 = vld [vmem:[%s1951_s13 + $0x50] ss:$12 sps:$4 sm:$0xff]   ;;  %v1849_v43 = vld [vmem:[%s1951_s13 + $0x68] ss:$12 sps:$4 sm:$0xff]   ;;  %v1851_v45 = vld [vmem:[%s1951_s13 + $0x80] ss:$12 sps:$4 sm:$0xff]  }
  0x1a   : > { %1612 = vmatprep.subr.bf16.mxu0 %v1803_v8  ;;  %1774 = vmatprep.subr.bf16.mxu1 %v1803_v8  ;;  %v1850_v44 = vld [vmem:[%s1951_s13 + $0x90] ss:$12 sps:$4 sm:$0xff]   ;;  %v1852_v46 = vld [vmem:[%s1951_s13 + $0xac] ss:$12 sps:$4 sm:$0xff]   ;;  %v1855_v48 = vld [vmem:[%s1951_s13 + $0xa8] ss:$12 sps:$4 sm:$0xff]  }
  0x1b   : > { %v1854_v47 = vld [vmem:[%s1951_s13 + $0x98] ss:$12 sps:$4 sm:$0xff]   ;;  %v1856_v49 = vld [vmem:[%s1951_s13 + $0xb0] ss:$12 sps:$4 sm:$0xff]   ;;  %v1859_v51 = vld [vmem:[%s1951_s13 + $0xc8] ss:$12 sps:$4 sm:$0xff]  }
  0x1c   : > { %v1857_v50 = vld [vmem:[%s1951_s13 + $0xc4] ss:$12 sps:$4 sm:$0xff]   ;;  %v1860_v52 = vld [vmem:[%s1951_s13 + $0xc0] ss:$12 sps:$4 sm:$0xff]   ;;  %v1862_v54 = vld [vmem:[%s1951_s13 + $0xdc] ss:$12 sps:$4 sm:$0xff]  }
  0x1d   : > { %1613 = vmatpush3.bf16.msra.mxu0 %v1804_v9  ;;  %1782 = vmatpush3.bf16.msra.mxu1 %v1804_v9  ;;  %v1861_v53 = vld [vmem:[%s1951_s13 + $0xe0] ss:$12 sps:$4 sm:$0xff]   ;;  %v1864_v55 = vld [vmem:[%s1951_s13 + $0xf8] ss:$12 sps:$4 sm:$0xff]   ;;  %v1866_v57 = vld [vmem:[%s1951_s13 + $0x110] ss:$12 sps:$4 sm:$0xff]  }
  0x1e   : > { %1614 = vmatprep.subr.bf16.mxu0 %v1805_v10  ;;  %1775 = vmatprep.subr.bf16.mxu1 %v1805_v10  ;;  %v1865_v56 = vld [vmem:[%s1951_s13 + $0xd8] ss:$12 sps:$4 sm:$0xff]   ;;  %v1867_v58 = vld [vmem:[%s1951_s13 + $0xf4] ss:$12 sps:$4 sm:$0xff]   ;;  %v1870_v60 = vld [vmem:[%s1951_s13 + $0xf0] ss:$12 sps:$4 sm:$0xff]  }
  0x1f   : > { %v1869_v59 = vld [vmem:[%s1951_s13 + $0x128] ss:$12 sps:$4 sm:$0xff]   ;;  %v1871_v61 = vld [vmem:[%s1951_s13 + $0x140] ss:$12 sps:$4 sm:$0xff]   ;;  %v1874_v63 = vld [vmem:[%s1951_s13 + $0x158] ss:$12 sps:$4 sm:$0xff]  }
  0x20   : > { %v1872_v62 = vld [vmem:[%s1951_s13 + $0x10c] ss:$12 sps:$4 sm:$0xff]   ;;  %v1875_v0 = vld [vmem:[%s1951_s13 + $0x108] ss:$12 sps:$4 sm:$0xff]   ;;  %v1876_v1 = vld [vmem:[%s1951_s13 + $0x170] ss:$12 sps:$4 sm:$0xff]  }
  0x21   : > { %1615 = vmatpush3.bf16.msra.mxu0 %v1806_v13  ;;  %1783 = vmatpush3.bf16.msra.mxu1 %v1806_v13 }
  0x22   : > { %1616 = vmatprep.subr.bf16.mxu0 %v1807_v14  ;;  %1776 = vmatprep.subr.bf16.mxu1 %v1807_v14 }
  0x25   : > { %1617 = vmatpush3.bf16.msra.mxu0 %v1808_v15  ;;  %1784 = vmatpush3.bf16.msra.mxu1 %v1808_v15 }
  0x26   : > { %1618 = vmatprep.subr.bf16.mxu0 %v1809_v16  ;;  %1777 = vmatprep.subr.bf16.mxu1 %v1809_v16 }
  0x29   : > { %1619 = vmatpush3.bf16.msra.mxu0 %v1810_v17  ;;  %1785 = vmatpush3.bf16.msra.mxu1 %v1810_v17 }
  0x2a   : > { %1734 = vmatprep.subr.bf16.mxu1 %v1817_v18 }
  0x2c   : > { %735 = vmatmul.mubr.bf16.vlgmr.msra.gmra.mxu0 %v1811_v19  ;;  %831 = vmatmul.mubr.bf16.vlgmr.msra.gmra.mxu1 %v1814_v20 }
  0x2d   : > { %1735 = vmatpush3.bf16.msra.mxu1 %v1817_v18  ;;  %742 = vmatprep.mubr.bf16.mxu0 %v1818_v21 }
  0x2e   : > { %838 = vmatprep.mubr.bf16.mxu1 %v1820_v22  ;;  %1736 = vmatprep.subr.bf16.mxu1 %v1830_v23 }
  0x31   : > { %1737 = vmatpush3.bf16.msra.mxu1 %v1830_v23 }
  0x34   : > { %743 = vmatmul.mubr.bf16.gmra.mxu0 %v1822_v24  ;;  %839 = vmatmul.mubr.bf16.gmra.mxu1 %v1823_v25 }
  0x35   : > { %750 = vmatprep.mubr.bf16.mxu0 %v1824_v26  ;;  %846 = vmatprep.mubr.bf16.mxu1 %v1826_v27 }
  0x3c   : > { %751 = vmatmul.mubr.bf16.gmra.mxu0 %v1828_v28  ;;  %847 = vmatmul.mubr.bf16.gmra.mxu1 %v1829_v29 }
  0x3d   : > { %758 = vmatprep.mubr.bf16.mxu0 %v1831_v30  ;;  %854 = vmatprep.mubr.bf16.mxu1 %v1833_v31 }
  0x44   : > { %759 = vmatmul.mubr.bf16.gmra.mxu0 %v1835_v32  ;;  %855 = vmatmul.mubr.bf16.gmra.mxu1 %v1836_v33 }
  0x45   : > { %766 = vmatprep.mubr.bf16.mxu0 %v1837_v34  ;;  %1738 = vmatprep.mubr.msk.bf16.mxu1 %vm653_vm0, %v1839_v35 }
  0x4c   : > { %767 = vmatmul.mubr.bf16.gmra.mxu0 %v1840_v36  ;;  %1739 = vmatmul.mubr.msk.bf16.vlgmr.msra.gmra.mxu1 %vm653_vm0, %v1841_v37 }
  0x4d   : > { %774 = vmatprep.mubr.bf16.mxu0 %v1842_v38  ;;  %1742 = vmatprep.mubr.msk.bf16.mxu1 %vm653_vm0, %v1844_v39 }
  0x54   : > { %775 = vmatmul.mubr.bf16.gmra.mxu0 %v1845_v40  ;;  %1743 = vmatmul.mubr.msk.bf16.gmra.mxu1 %vm653_vm0, %v1846_v41 }
  0x55   : > { %782 = vmatprep.mubr.bf16.mxu0 %v1847_v42  ;;  %1746 = vmatprep.mubr.msk.bf16.mxu1 %vm653_vm0, %v1849_v43 }
  0x5c   : > { %783 = vmatmul.mubr.bf16.gmra.mxu0 %v1850_v44  ;;  %1747 = vmatmul.mubr.msk.bf16.gmra.mxu1 %vm653_vm0, %v1851_v45  ;;  %v2065_v44 = vld [vmem:[%s2181_s2] ss:$0 sm:$0xff] }
  0x5d   : > { %790 = vmatprep.mubr.bf16.mxu0 %v1852_v46  ;;  %1750 = vmatprep.mubr.msk.bf16.mxu1 %vm653_vm0, %v1854_v47 }
  0x64   : > { %791 = vmatmul.mubr.bf16.gmra.mxu0 %v1855_v48  ;;  %1751 = vmatmul.mubr.msk.bf16.gmra.mxu1 %vm653_vm0, %v1856_v49 }
  0x65   : > { %798 = vmatprep.mubr.bf16.mxu0 %v1857_v50  ;;  %1754 = vmatprep.mubr.msk.bf16.mxu1 %vm653_vm0, %v1859_v51 }
  0x6c   : > { %799 = vmatmul.mubr.bf16.gmra.mxu0 %v1860_v52  ;;  %1755 = vmatmul.mubr.msk.bf16.gmra.mxu1 %vm653_vm0, %v1861_v53  ;;  %v2071_v52 = vld [vmem:[%s2182_s3] ss:$0 sm:$0xff] }
  0x6d   : > { %806 = vmatprep.mubr.bf16.mxu0 %v1862_v54  ;;  %1758 = vmatprep.mubr.msk.bf16.mxu1 %vm653_vm0, %v1864_v55 }
  0x74   : > { %807 = vmatmul.mubr.bf16.gmra.mxu0 %v1865_v56  ;;  %1759 = vmatmul.mubr.msk.bf16.gmra.mxu1 %vm653_vm0, %v1866_v57 }
  0x75   : > { %814 = vmatprep.mubr.bf16.mxu0 %v1867_v58  ;;  %1762 = vmatprep.mubr.msk.bf16.mxu1 %vm653_vm0, %v1869_v59 }
  0x7c   : > { %815 = vmatmul.mubr.bf16.gmra.mxu0 %v1870_v60  ;;  %1763 = vmatmul.mubr.msk.bf16.gmra.mxu1 %vm653_vm0, %v1871_v61 }
  0x7d   : > { %822 = vmatprep.mubr.bf16.mxu0 %v1872_v62  ;;  %1766 = vmatprep.mubr.msk.bf16.mxu1 %vm653_vm0, %v1874_v63 }
  0x84   : > { %823 = vmatmul.mubr.bf16.gmra.mxu0 %v1875_v0  ;;  %1767 = vmatmul.mubr.msk.bf16.gmra.mxu1 %vm653_vm0, %v1876_v1 }
  0xec   : > { %v1620_v2 = vpop.f32.mrf.mxu0  ;;  %v1692_v3 = vpop.f32.mrf.mxu1 }
  0xee   : > { %v1621_v4 = vpop.f32.mrf.mxu0  ;;  %v1693_v5 = vpop.f32.mrf.mxu1 }
  0xef   : > { %v2044_v6 = vadd.f32 %v1693_v5, %v1692_v3  ;;  %v1622_v45 = vadd.f32 %v1621_v4, %v1620_v2 }
  0xf0   : > { %v1623_v7 = vpop.f32.mrf.mxu0  ;;  %v1695_v8 = vpop.f32.mrf.mxu1 }
  0xf2   : > { %v1624_v9 = vpop.f32.mrf.mxu0  ;;  %v1696_v10 = vpop.f32.mrf.mxu1 }
  0xf3   : > { %v2046_v11 = vadd.f32 %v1696_v10, %v1695_v8  ;;  %v1625_v56 = vadd.f32 %v1624_v9, %v1623_v7 }
  0xf4   : > { %v1626_v12 = vpop.f32.mrf.mxu0  ;;  %v1698_v13 = vpop.f32.mrf.mxu1 }
  0xf6   : > { %v1627_v14 = vpop.f32.mrf.mxu0  ;;  %v1699_v15 = vpop.f32.mrf.mxu1 }
  0xf7   : > { %v2048_v16 = vadd.f32 %v1699_v15, %v1698_v13  ;;  %v1628_v41 = vadd.f32 %v1627_v14, %v1626_v12 }
  0xf8   : > { %v1629_v17 = vpop.f32.mrf.mxu0  ;;  %v1701_v18 = vpop.f32.mrf.mxu1 }
  0xfa   : > { %v1630_v19 = vpop.f32.mrf.mxu0  ;;  %v1702_v20 = vpop.f32.mrf.mxu1 }
  0xfb   : > { %v2050_v21 = vadd.f32 %v1702_v20, %v1701_v18  ;;  %v1631_v49 = vadd.f32 %v1630_v19, %v1629_v17 }
  0xfc   : > { %v1632_v22 = vpop.f32.mrf.mxu0  ;;  %v1704_v23 = vpop.f32.mrf.mxu1 }
  0xfe   : > { %v1633_v24 = vpop.f32.mrf.mxu0  ;;  %v1705_v25 = vpop.f32.mrf.mxu1 }
  0xff   : > { %v2052_v26 = vadd.f32 %v1705_v25, %v1704_v23  ;;  %v1634_v2 = vadd.f32 %v1633_v24, %v1632_v22 }
 0x100   : > { %v1635_v27 = vpop.f32.mrf.mxu0  ;;  %v1707_v28 = vpop.f32.mrf.mxu1 }
 0x102   : > { %v1636_v29 = vpop.f32.mrf.mxu0  ;;  %v1708_v30 = vpop.f32.mrf.mxu1 }
 0x103   : > { %v2054_v31 = vadd.f32 %v1708_v30, %v1707_v28  ;;  %v1637_v20 = vadd.f32 %v1636_v29, %v1635_v27 }
 0x104   : > { %v1638_v32 = vpop.f32.mrf.mxu0  ;;  %v1710_v33 = vpop.f32.mrf.mxu1 }
 0x106   : > { %v1639_v34 = vpop.f32.mrf.mxu0  ;;  %v1711_v35 = vpop.f32.mrf.mxu1 }
 0x107   : > { %v2056_v36 = vadd.f32 %v1711_v35, %v1710_v33  ;;  %v1640_v60 = vadd.f32 %v1639_v34, %v1638_v32 }
 0x108   : > { %v1641_v37 = vpop.f32.mrf.mxu0  ;;  %v2058_v38 = vpop.f32.mrf.mxu1 }
 0x10a   : > { %v1642_v39 = vpop.f32.mrf.mxu0  ;;  %v2060_v40 = vpop.f32.mrf.mxu1 }
 0x10b   : > { %v1643_v5 = vadd.f32 %v1642_v39, %v1641_v37 }
 0x10c   : > { %v1644_v42 = vpop.f32.mrf.mxu0  ;;  %v1740_v43 = vpop.f32.mrf.mxu1 }
 0x10d   : > { %v906_v46 = vadd.f32 %v1740_v43, %v1628_v41 }
 0x10e   : > { %v1645_v47 = vpop.f32.mrf.mxu0  ;;  %v897_v48 = vpop.f32.mrf.mxu1 }
 0x10f   : > { %v1033_v50 = vmul.f32 %v2065_v44, %v906_v46  ;;  %v898_v51 = vadd.f32 %v1622_v45, %v897_v48  ;;  %v1646_v27 = vadd.f32 %v1645_v47, %v1644_v42 }
 0x110   : > { %v2073_v53 = vpop.f32.mrf.mxu0  ;;  %v1741_v54 = vpop.f32.mrf.mxu1 }
 0x111   : > { %v909_v55 = vadd.f32 %v1741_v54, %v1631_v49  ;;  %v1031_v57 = vmul.f32 %v2065_v44, %v898_v51  ;;  %v1072_v61 = vadd.f32 %v2071_v52, %v1033_v50 }
 0x112   : > { %v1648_v58 = vpop.f32.mrf.mxu0  ;;  %v900_v59 = vpop.f32.mrf.mxu1 }
 0x113   : > { %v1034_v62 = vmul.f32 %v2065_v44, %v909_v55  ;;  %v901_v63 = vadd.f32 %v1625_v56, %v900_v59  ;;  %v1070_v7 = vadd.f32 %v2071_v52, %v1031_v57  ;;  %v1104_v12 = vmax.f32 %v1072_v61, 0.0 }
 0x114   : > { %v1650_v0 = vpop.f32.mrf.mxu0  ;;  %v1744_v1 = vpop.f32.mrf.mxu1 }
 0x115   : > { %v1073_v3 = vadd.f32 %v2071_v52, %v1034_v62  ;;  %v922_v4 = vadd.f32 %v1744_v1, %v1640_v60  ;;  %v1032_v8 = vmul.f32 %v2065_v44, %v901_v63  ;;  %v1102_v24 = vmax.f32 %v1070_v7, 0.0 }
 0x116   : > { %v1651_v9 = vpop.f32.mrf.mxu0  ;;  %v913_v10 = vpop.f32.mrf.mxu1  ;;  %v1649_v62 = vadd.f32 %v1648_v58, %v2073_v53 }
 0x117   : > { %v1105_v13 = vmax.f32 %v1073_v3, 0.0  ;;  %v1037_v14 = vmul.f32 %v2065_v44, %v922_v4  ;;  %v914_v15 = vadd.f32 %v1634_v2, %v913_v10  ;;  %v1071_v17 = vadd.f32 %v2071_v52, %v1032_v8 }
 0x118   : > { %v1653_v18 = vpop.f32.mrf.mxu0  ;;  %v1745_v19 = vpop.f32.mrf.mxu1  ;;  %v1652_v34 = vadd.f32 %v1651_v9, %v1650_v0 }
 0x119   : > { %v1517_v22 = vpack.c.bf16 %v1105_v13, %v1104_v12  ;;  %v925_v23 = vadd.f32 %v1745_v19, %v1643_v5  ;;  %v1103_v25 = vmax.f32 %v1071_v17, 0.0  ;;  %v1076_v28 = vadd.f32 %v2071_v52, %v1037_v14 }
 0x11a   : > { %v1035_v30 = vmul.f32 %v2065_v44, %v914_v15  ;;  %v1654_v32 = vpop.f32.mrf.mxu0  ;;  %v916_v33 = vpop.f32.mrf.mxu1 }
 0x11b   : > { %1589 = vst [vmem:[%s2086_s16 + $0x8] sm:$0xff] %v1517_v22   ;;  %v1038_v35 = vmul.f32 %v2065_v44, %v925_v23  ;;  %v1512_v37 = vpack.c.bf16 %v1103_v25, %v1102_v24  ;;  %v917_v39 = vadd.f32 %v1637_v20, %v916_v33  ;;  %v1108_v46 = vmax.f32 %v1076_v28, 0.0 }
 0x11c   : > { %v1656_v41 = vpop.f32.mrf.mxu0  ;;  %v1748_v43 = vpop.f32.mrf.mxu1  ;;  %v1074_v48 = vadd.f32 %v2071_v52, %v1035_v30  ;;  %v1655_v55 = vadd.f32 %v1654_v32, %v1653_v18 }
 0x11d   : > { %v1077_v29 = vadd.f32 %v2071_v52, %v1038_v35  ;;  %v938_v45 = vadd.f32 %v1748_v43, %v1652_v34  ;;  %1513 = vst [vmem:[%s2086_s16] sm:$0xff] %v1512_v37   ;;  %v1036_v49 = vmul.f32 %v2065_v44, %v917_v39 }
 0x11e   : > { %v1657_v50 = vpop.f32.mrf.mxu0  ;;  %v929_v51 = vpop.f32.mrf.mxu1  ;;  %v1106_v63 = vmax.f32 %v1074_v48, 0.0 }
 0x11f   : > { %v1109_v54 = vmax.f32 %v1077_v29, 0.0  ;;  %v1041_v56 = vmul.f32 %v2065_v44, %v938_v45  ;;  %v930_v57 = vadd.f32 %v1646_v27, %v929_v51  ;;  %v1075_v59 = vadd.f32 %v2071_v52, %v1036_v49 }
 0x120   : > { %v1659_v42 = vpop.f32.mrf.mxu0  ;;  %v1749_v47 = vpop.f32.mrf.mxu1  ;;  %v1658_v12 = vadd.f32 %v1657_v50, %v1656_v41 }
 0x121   : > { %v1527_v60 = vpack.c.bf16 %v1109_v54, %v1108_v46  ;;  %v941_v61 = vadd.f32 %v1749_v47, %v1655_v55  ;;  %v1107_v0 = vmax.f32 %v1075_v59, 0.0  ;;  %v1039_v1 = vmul.f32 %v2065_v44, %v930_v57 }
 0x122   : > { %v1660_v2 = vpop.f32.mrf.mxu0  ;;  %v932_v3 = vpop.f32.mrf.mxu1  ;;  %v1080_v4 = vadd.f32 %v2071_v52, %v1041_v56 }
 0x123   : > { %1591 = vst [vmem:[%s2086_s16 + $0x18] sm:$0xff] %v1527_v60   ;;  %v1042_v5 = vmul.f32 %v2065_v44, %v941_v61  ;;  %v1522_v7 = vpack.c.bf16 %v1107_v0, %v1106_v63  ;;  %v933_v8 = vadd.f32 %v1649_v62, %v932_v3  ;;  %v1078_v53 = vadd.f32 %v2071_v52, %v1039_v1 }
 0x124   : > { %v1662_v9 = vpop.f32.mrf.mxu0  ;;  %v1752_v10 = vpop.f32.mrf.mxu1  ;;  %v1112_v17 = vmax.f32 %v1080_v4, 0.0  ;;  %v1661_v28 = vadd.f32 %v1660_v2, %v1659_v42 }
 0x125   : > { %v1081_v13 = vadd.f32 %v2071_v52, %v1042_v5  ;;  %1590 = vst [vmem:[%s2086_s16 + $0x10] sm:$0xff] %v1522_v7   ;;  %v1040_v58 = vmul.f32 %v2065_v44, %v933_v8  ;;  %v1110_v33 = vmax.f32 %v1078_v53, 0.0 }
 0x126   : > { %v1663_v14 = vpop.f32.mrf.mxu0  ;;  %v945_v15 = vpop.f32.mrf.mxu1 }
 0x127   : > { %v1113_v18 = vmax.f32 %v1081_v13, 0.0  ;;  %v1664_v19 = vadd.f32 %v1663_v14, %v1662_v9  ;;  %v946_v20 = vadd.f32 %v1658_v12, %v945_v15  ;;  %v1079_v22 = vadd.f32 %v2071_v52, %v1040_v58 }
 0x128   : > { %v1665_v23 = vpop.f32.mrf.mxu0  ;;  %v1753_v24 = vpop.f32.mrf.mxu1 }
 0x129   : > { %v1537_v25 = vpack.c.bf16 %v1113_v18, %v1112_v17  ;;  %v954_v30 = vadd.f32 %v1752_v10, %v1664_v19  ;;  %v1043_v32 = vmul.f32 %v2065_v44, %v946_v20  ;;  %v1111_v34 = vmax.f32 %v1079_v22, 0.0 }
 0x12a   : > { %v1666_v35 = vpop.f32.mrf.mxu0  ;;  %v948_v37 = vpop.f32.mrf.mxu1 }
 0x12b   : > { %1593 = vst [vmem:[%s2086_s16 + $0x28] sm:$0xff] %v1537_v25   ;;  %v1045_v39 = vmul.f32 %v2065_v44, %v954_v30  ;;  %v1667_v41 = vadd.f32 %v1666_v35, %v1665_v23  ;;  %v949_v43 = vadd.f32 %v1661_v28, %v948_v37  ;;  %v1532_v27 = vpack.c.bf16 %v1111_v34, %v1110_v33 }
 0x12c   : > { %v1668_v29 = vpop.f32.mrf.mxu0  ;;  %v1756_v45 = vpop.f32.mrf.mxu1  ;;  %v1082_v46 = vadd.f32 %v2071_v52, %v1043_v32 }
 0x12d   : > { %v957_v48 = vadd.f32 %v1753_v24, %v1667_v41  ;;  %v1044_v49 = vmul.f32 %v2065_v44, %v949_v43  ;;  %1592 = vst [vmem:[%s2086_s16 + $0x20] sm:$0xff] %v1532_v27   ;;  %v1084_v50 = vadd.f32 %v2071_v52, %v1045_v39 }
 0x12e   : > { %v1669_v51 = vpop.f32.mrf.mxu0  ;;  %v961_v54 = vpop.f32.mrf.mxu1  ;;  %v1114_v47 = vmax.f32 %v1082_v46, 0.0 }
 0x12f   : > { %v1046_v55 = vmul.f32 %v2065_v44, %v957_v48  ;;  %v1083_v56 = vadd.f32 %v2071_v52, %v1044_v49  ;;  %v1670_v57 = vadd.f32 %v1669_v51, %v1668_v29  ;;  %v1116_v63 = vmax.f32 %v1084_v50, 0.0 }
 0x130   : > { %v1671_v59 = vpop.f32.mrf.mxu0  ;;  %v1757_v42 = vpop.f32.mrf.mxu1 }
 0x131   : > { %v1085_v60 = vadd.f32 %v2071_v52, %v1046_v55  ;;  %v1115_v61 = vmax.f32 %v1083_v56, 0.0  ;;  %v962_v62 = vadd.f32 %v1670_v57, %v961_v54 }
 0x132   : > { %v1672_v0 = vpop.f32.mrf.mxu0  ;;  %v964_v1 = vpop.f32.mrf.mxu1 }
 0x133   : > { %v1117_v2 = vmax.f32 %v1085_v60, 0.0  ;;  %v1542_v3 = vpack.c.bf16 %v1115_v61, %v1114_v47  ;;  %v1047_v4 = vmul.f32 %v2065_v44, %v962_v62  ;;  %v1673_v5 = vadd.f32 %v1672_v0, %v1671_v59 }
 0x134   : > { %v1674_v7 = vpop.f32.mrf.mxu0  ;;  %v2120_v8 = vpop.f32.mrf.mxu1 }
 0x135   : > { %v1547_v9 = vpack.c.bf16 %v1117_v2, %v1116_v63  ;;  %1594 = vst [vmem:[%s2086_s16 + $0x30] sm:$0xff] %v1542_v3   ;;  %v965_v10 = vadd.f32 %v1673_v5, %v964_v1  ;;  %v1086_v53 = vadd.f32 %v2071_v52, %v1047_v4  ;;  %v1715_v1 = vadd.f32 %v2060_v40, %v2058_v38 }
 0x136   : > { %v1675_v12 = vpop.f32.mrf.mxu0  ;;  %v977_v13 = vpop.f32.mrf.mxu1 }
 0x137   : > { %1595 = vst [vmem:[%s2086_s16 + $0x38] sm:$0xff] %v1547_v9   ;;  %v1048_v58 = vmul.f32 %v2065_v44, %v965_v10  ;;  %v1676_v14 = vadd.f32 %v1675_v12, %v1674_v7  ;;  %v1118_v23 = vmax.f32 %v1086_v53, 0.0 }
 0x138   : > { %v1677_v15 = vpop.f32.mrf.mxu0  ;;  %v2126_v17 = vpop.f32.mrf.mxu1 }
 0x139   : > { %v1087_v18 = vadd.f32 %v2071_v52, %v1048_v58  ;;  %v970_v19 = vadd.f32 %v1756_v45, %v1676_v14 }
 0x13a   : > { %v1678_v20 = vpop.f32.mrf.mxu0  ;;  %v980_v22 = vpop.f32.mrf.mxu1 }
 0x13b   : > { %v1119_v24 = vmax.f32 %v1087_v18, 0.0  ;;  %v1049_v25 = vmul.f32 %v2065_v44, %v970_v19  ;;  %v1679_v28 = vadd.f32 %v1678_v20, %v1677_v15 }
 0x13c   : > { %v1680_v30 = vpop.f32.mrf.mxu0  ;;  %v1764_v32 = vpop.f32.mrf.mxu1 }
 0x13d   : > { %v1552_v33 = vpack.c.bf16 %v1119_v24, %v1118_v23  ;;  %v973_v34 = vadd.f32 %v1757_v42, %v1679_v28  ;;  %v1002_v35 = vadd.f32 %v1764_v32, %v2048_v16  ;;  %v1088_v41 = vadd.f32 %v2071_v52, %v1049_v25 }
 0x13e   : > { %v1681_v37 = vpop.f32.mrf.mxu0  ;;  %v993_v39 = vpop.f32.mrf.mxu1 }
 0x13f   : > { %1596 = vst [vmem:[%s2086_s16 + $0x40] sm:$0xff] %v1552_v33   ;;  %v1050_v43 = vmul.f32 %v2065_v44, %v973_v34  ;;  %v1057_v27 = vmul.f32 %v2065_v44, %v1002_v35  ;;  %v1682_v29 = vadd.f32 %v1681_v37, %v1680_v30  ;;  %v994_v45 = vadd.f32 %v2044_v6, %v993_v39 }
 0x140   : > { %v1683_v46 = vpop.f32.mrf.mxu0  ;;  %v1765_v48 = vpop.f32.mrf.mxu1  ;;  %v1120_v56 = vmax.f32 %v1088_v41, 0.0 }
 0x141   : > { %v1089_v49 = vadd.f32 %v2071_v52, %v1050_v43  ;;  %v978_v50 = vadd.f32 %v1682_v29, %v977_v13  ;;  %v1005_v51 = vadd.f32 %v1765_v48, %v2050_v21  ;;  %v1055_v16 = vmul.f32 %v2065_v44, %v994_v45 }
 0x142   : > { %v1684_v54 = vpop.f32.mrf.mxu0  ;;  %v996_v55 = vpop.f32.mrf.mxu1  ;;  %v1096_v59 = vadd.f32 %v2071_v52, %v1057_v27 }
 0x143   : > { %v1121_v57 = vmax.f32 %v1089_v49, 0.0  ;;  %v1058_v42 = vmul.f32 %v2065_v44, %v1005_v51  ;;  %v1051_v6 = vmul.f32 %v2065_v44, %v978_v50  ;;  %v1685_v47 = vadd.f32 %v1684_v54, %v1683_v46 }
 0x144   : > { %v997_v60 = vadd.f32 %v2046_v11, %v996_v55  ;;  %v1686_v61 = vpop.f32.mrf.mxu0  ;;  %v1768_v62 = vpop.f32.mrf.mxu1  ;;  %v1094_v2 = vadd.f32 %v2071_v52, %v1055_v16  ;;  %v1128_v9 = vmax.f32 %v1096_v59, 0.0 }
 0x145   : > { %v1557_v63 = vpack.c.bf16 %v1121_v57, %v1120_v56  ;;  %v1097_v21 = vadd.f32 %v2071_v52, %v1058_v42  ;;  %v1018_v0 = vadd.f32 %v1768_v62, %v2056_v36  ;;  %v981_v3 = vadd.f32 %v1685_v47, %v980_v22 }
 0x146   : > { %v1056_v4 = vmul.f32 %v2065_v44, %v997_v60  ;;  %v1687_v5 = vpop.f32.mrf.mxu0  ;;  %v1009_v7 = vpop.f32.mrf.mxu1  ;;  %v1090_v13 = vadd.f32 %v2071_v52, %v1051_v6  ;;  %v1126_v19 = vmax.f32 %v1094_v2, 0.0 }
 0x147   : > { %1597 = vst [vmem:[%s2086_s16 + $0x48] sm:$0xff] %v1557_v63   ;;  %v1129_v11 = vmax.f32 %v1097_v21, 0.0  ;;  %v1061_v10 = vmul.f32 %v2065_v44, %v1018_v0  ;;  %v1688_v12 = vadd.f32 %v1687_v5, %v1686_v61  ;;  %v1052_v36 = vmul.f32 %v2065_v44, %v981_v3 }
 0x148   : > { %v1095_v38 = vadd.f32 %v2071_v52, %v1056_v4  ;;  %v1010_v40 = vadd.f32 %v2052_v26, %v1009_v7  ;;  %v1689_v53 = vpop.f32.mrf.mxu0  ;;  %v1769_v58 = vpop.f32.mrf.mxu1 }
 0x149   : > { %v1577_v14 = vpack.c.bf16 %v1129_v11, %v1128_v9  ;;  %v986_v15 = vadd.f32 %v2120_v8, %v1688_v12  ;;  %v1021_v18 = vadd.f32 %v1769_v58, %v1715_v1  ;;  %v1091_v20 = vadd.f32 %v2071_v52, %v1052_v36 }
 0x14a   : > { %v1127_v22 = vmax.f32 %v1095_v38, 0.0  ;;  %v1059_v23 = vmul.f32 %v2065_v44, %v1010_v40  ;;  %v1690_v24 = vpop.f32.mrf.mxu0  ;;  %v1012_v25 = vpop.f32.mrf.mxu1  ;;  %v1100_v28 = vadd.f32 %v2071_v52, %v1061_v10  ;;  %v1122_v8 = vmax.f32 %v1090_v13, 0.0 }
 0x14b   : > { %1601 = vst [vmem:[%s2086_s16 + $0x68] sm:$0xff] %v1577_v14   ;;  %v1053_v26 = vmul.f32 %v2065_v44, %v986_v15  ;;  %v1062_v30 = vmul.f32 %v2065_v44, %v1021_v18  ;;  %v1691_v32 = vadd.f32 %v1690_v24, %v1689_v53  ;;  %v1123_v33 = vmax.f32 %v1091_v20, 0.0 }
 0x14c   : > { %v1572_v34 = vpack.c.bf16 %v1127_v22, %v1126_v19  ;;  %v1013_v35 = vadd.f32 %v2054_v31, %v1012_v25  ;;  %v1098_v43 = vadd.f32 %v2071_v52, %v1059_v23  ;;  %v1132_v29 = vmax.f32 %v1100_v28, 0.0 }
 0x14d   : > { %v1101_v37 = vadd.f32 %v2071_v52, %v1062_v30  ;;  %v989_v39 = vadd.f32 %v2126_v17, %v1691_v32  ;;  %v1562_v41 = vpack.c.bf16 %v1123_v33, %v1122_v8  ;;  %v1092_v45 = vadd.f32 %v2071_v52, %v1053_v26 }
 0x14e   : > { %1600 = vst [vmem:[%s2086_s16 + $0x60] sm:$0xff] %v1572_v34   ;;  %v1060_v27 = vmul.f32 %v2065_v44, %v1013_v35  ;;  %v1130_v50 = vmax.f32 %v1098_v43, 0.0 }
 0x14f   : > { %v1133_v46 = vmax.f32 %v1101_v37, 0.0  ;;  %v1054_v48 = vmul.f32 %v2065_v44, %v989_v39  ;;  %1598 = vst [vmem:[%s2086_s16 + $0x50] sm:$0xff] %v1562_v41   ;;  %v1124_v16 = vmax.f32 %v1092_v45, 0.0 }
 0x150   : > { %v1099_v31 = vadd.f32 %v2071_v52, %v1060_v27 }
 0x151   : > { %v1587_v49 = vpack.c.bf16 %v1133_v46, %v1132_v29  ;;  %v1093_v17 = vadd.f32 %v2071_v52, %v1054_v48 }
 0x152   : > { %v1131_v51 = vmax.f32 %v1099_v31, 0.0 }
 0x153   : > { %1603 = vst [vmem:[%s2086_s16 + $0x78] sm:$0xff] %v1587_v49   ;;  %v1125_v54 = vmax.f32 %v1093_v17, 0.0 }
 0x154   : > { %v1582_v55 = vpack.c.bf16 %v1131_v51, %v1130_v50 }
 0x155   : > { %v1567_v56 = vpack.c.bf16 %v1125_v54, %v1124_v16 }
 0x156   : > { %1602 = vst [vmem:[%s2086_s16 + $0x70] sm:$0xff] %v1582_v55  }
 0x157   : > { %1599 = vst [vmem:[%s2086_s16 + $0x58] sm:$0xff] %v1567_v56  }
 0x158 PF: > { %s14_s15 = sadd.s32 1, %s1883_s15  }
 0x159   : > { %p11_p4 = scmp.ge.s32.totalorder %s14_s15, 4  }
 0x15b   :  { %13 = sbr.rel (!%p11_p4) target bundleno = 1 (0x1), region = 66 }

// kernel: mynet_forward.6
= control target key start
LH: loop header
LB: loop body
LE: loop exit
PB: predicated region body
PF: predicated region fallthrough
CT: control target
= control target key end

     0   :  { %s4295_s15 = smov 0   ;;  %s5470_s0 = inlined_call_operand.vmem [shape: bf16[512,1152], index: 0, kind: input, shape index: {}]   ;;  %s5471_s1 = inlined_call_operand.vmem [shape: bf16[1152,256], index: 1, kind: input, shape index: {}]   ;;  %s5472_s2 = inlined_call_operand.vmem [shape: f32[1,256], index: 2, kind: input, shape index: {}]   ;;  %s5473_s3 = inlined_call_operand.vmem [shape: f32[1,256], index: 3, kind: input, shape index: {}]   ;;  %s5474_s4 = inlined_call_operand.vmem [shape: bf16[512,256], index: 4, kind: output, shape index: {}]  }
   0x1 LB: > { %s3430_s16 = sadd.s32 4294967295, %s4267_s15   ;;  %p3434_p0 = scmp.ge.s32.totalorder %s4267_s15, 1  ;;  %s4267_s15 = sphi %s4295_s15, %s14_s15  }
   0x2   : > { %p164_p1 = scmp.lt.s32.totalorder %s4267_s15, 3 }
   0x4   : > { %p165_p2 = pnand %p3434_p0, %p164_p1 }
   0x6   : > { %168 = sbr.rel (%p165_p2) target bundleno = 600 (0x258), region = 36 }
   0xb   : > { %v3837_v0 = vld [vmem:[%s5471_s1 + $0x74] ss:$8 sps:$4 sm:$0xff]   ;;  %v3839_v1 = vld [vmem:[%s5471_s1 + $0x70] ss:$8 sps:$4 sm:$0xff]   ;;  %v3840_v2 = vld [vmem:[%s5471_s1 + $0x64] ss:$8 sps:$4 sm:$0xff]  }
   0xc   : > { %1967 = vmatprep.subr.bf16.mxu0 %v3837_v0  ;;  %3795 = vmatprep.subr.bf16.mxu1 %v3837_v0  ;;  %v3842_v3 = vld [vmem:[%s5471_s1 + $0x60] ss:$8 sps:$4 sm:$0xff]   ;;  %v3843_v4 = vld [vmem:[%s5471_s1 + $0x54] ss:$8 sps:$4 sm:$0xff]   ;;  %s3435_s27 = sshll.u32 %s3430_s16, 5 }
   0xd   : > { %1968 = vmatpush1.bf16.msra.mxu0 %v3839_v1  ;;  %3811 = vmatpush1.bf16.msra.mxu1 %v3839_v1  ;;  %v3845_v5 = vld [vmem:[%s5471_s1 + $0x50] ss:$8 sps:$4 sm:$0xff]   ;;  %p193_p3 = scmp.lt.s32.totalorder %s3435_s27, 63  ;;  %v3846_v6 = vld [vmem:[%s5471_s1 + $0x44] ss:$8 sps:$4 sm:$0xff]  }
   0xe   : > { %1969 = vmatprep.subr.bf16.mxu0 %v3840_v2  ;;  %3796 = vmatprep.subr.bf16.mxu1 %v3840_v2  ;;  %v3848_v7 = vld [vmem:[%s5471_s1 + $0x40] ss:$8 sps:$4 sm:$0xff]   ;;  %v3849_v8 = vld [vmem:[%s5471_s1 + $0x34] ss:$8 sps:$4 sm:$0xff]   ;;  %v3851_v9 = vld [vmem:[%s5471_s1 + $0x30] ss:$8 sps:$4 sm:$0xff]  }
   0xf   : > { %s5555_s27 = smov (!%p193_p3, %s3435_s27), 63  ;;  %v3852_v10 = vld [vmem:[%s5471_s1 + $0x24] ss:$8 sps:$4 sm:$0xff]   ;;  %v3854_v11 = vld [vmem:[%s5471_s1 + $0x20] ss:$8 sps:$4 sm:$0xff]  }
  0x10   : > { %s3827_s12 = smul.u32 36, %s5555_s27  ;;  %v3855_v12 = vld [vmem:[%s5471_s1 + $0x14] ss:$8 sps:$4 sm:$0xff]   ;;  %v3857_v14 = vld [vmem:[%s5471_s1 + $0x10] ss:$8 sps:$4 sm:$0xff]   ;;  %s3762_s10 = sshll.u32 %s5555_s27, 3 }
  0x11   : > { %1970 = vmatpush1.bf16.msra.mxu0 %v3842_v3  ;;  %3812 = vmatpush1.bf16.msra.mxu1 %v3842_v3  ;;  %v3858_v16 = vld [vmem:[%s5471_s1 + $0x4] ss:$8 sps:$4 sm:$0xff]   ;;  %v3860_v17 = vld [vmem:[%s5471_s1] ss:$8 sps:$4 sm:$0xff]   ;;  %v3861_v18 = vld [vmem:[%s5471_s1 + $0xf4] ss:$8 sps:$4 sm:$0xff]   ;;  %s5254_s27 = scalar_lea.vmem %s5474_s4, %s3762_s10 }
  0x12   : > { %1971 = vmatprep.subr.bf16.mxu0 %v3843_v4  ;;  %3797 = vmatprep.subr.bf16.mxu1 %v3843_v4  ;;  %s4345_s20 = scalar_lea.vmem %s5470_s0, %s3827_s12  ;;  %v3863_v19 = vld [vmem:[%s5471_s1 + $0xf0] ss:$8 sps:$4 sm:$0xff]   ;;  %v3864_v20 = vld [vmem:[%s5471_s1 + $0xe4] ss:$8 sps:$4 sm:$0xff]   ;;  %v3866_v21 = vld [vmem:[%s5471_s1 + $0xe0] ss:$8 sps:$4 sm:$0xff]  }
  0x13   : > { %v3887_v13 = vld [vmem:[%s4345_s20 + $0x4] ss:$36 sps:$4 sm:$0xff]   ;;  %v3867_v22 = vld [vmem:[%s5471_s1 + $0xd4] ss:$8 sps:$4 sm:$0xff]   ;;  %v3869_v23 = vld [vmem:[%s5471_s1 + $0xd0] ss:$8 sps:$4 sm:$0xff]  }
  0x14   : > { %v3890_v15 = vld [vmem:[%s4345_s20 + $0x244] ss:$36 sps:$4 sm:$0xff]   ;;  %1999 = vmatprep.mubr.bf16.mxu0 %v3887_v13  ;;  %v3873_v26 = vld [vmem:[%s5471_s1 + $0xb4] ss:$8 sps:$4 sm:$0xff]   ;;  %v3875_v27 = vld [vmem:[%s5471_s1 + $0xb0] ss:$8 sps:$4 sm:$0xff]  }
  0x15   : > { %1972 = vmatpush1.bf16.msra.mxu0 %v3845_v5  ;;  %3813 = vmatpush1.bf16.msra.mxu1 %v3845_v5  ;;  %v3870_v24 = vld [vmem:[%s5471_s1 + $0xc4] ss:$8 sps:$4 sm:$0xff]   ;;  %v3872_v25 = vld [vmem:[%s5471_s1 + $0xc0] ss:$8 sps:$4 sm:$0xff]   ;;  %v3879_v30 = vld [vmem:[%s5471_s1 + $0x94] ss:$8 sps:$4 sm:$0xff]  }
  0x16   : > { %1973 = vmatprep.subr.bf16.mxu0 %v3846_v6  ;;  %3798 = vmatprep.subr.bf16.mxu1 %v3846_v6  ;;  %v3876_v28 = vld [vmem:[%s5471_s1 + $0xa4] ss:$8 sps:$4 sm:$0xff]   ;;  %v3878_v29 = vld [vmem:[%s5471_s1 + $0xa0] ss:$8 sps:$4 sm:$0xff]   ;;  %v3881_v31 = vld [vmem:[%s5471_s1 + $0x90] ss:$8 sps:$4 sm:$0xff]  }
  0x17   : > { %2079 = vmatprep.mubr.bf16.mxu1 %v3890_v15  ;;  %v3882_v32 = vld [vmem:[%s5471_s1 + $0x84] ss:$8 sps:$4 sm:$0xff]   ;;  %v3884_v33 = vld [vmem:[%s5471_s1 + $0x80] ss:$8 sps:$4 sm:$0xff]   ;;  %v3893_v34 = vld [vmem:[%s5471_s1 + $0x174] ss:$8 sps:$4 sm:$0xff]  }
  0x18   : > { %v3885_v35 = vld [vmem:[%s4345_s20] ss:$36 sps:$4 sm:$0xff]   ;;  %v3896_v36 = vld [vmem:[%s5471_s1 + $0x274] ss:$8 sps:$4 sm:$0xff]   ;;  %v3891_v38 = vld [vmem:[%s5471_s1 + $0x170] ss:$8 sps:$4 sm:$0xff]  }
  0x19   : > { %1974 = vmatpush1.bf16.msra.mxu0 %v3848_v7  ;;  %3814 = vmatpush1.bf16.msra.mxu1 %v3848_v7  ;;  %v3888_v37 = vld [vmem:[%s4345_s20 + $0x240] ss:$36 sps:$4 sm:$0xff]   ;;  %v3894_v39 = vld [vmem:[%s5471_s1 + $0x270] ss:$8 sps:$4 sm:$0xff]   ;;  %v3911_v46 = vld [vmem:[%s5471_s1 + $0x154] ss:$8 sps:$4 sm:$0xff]  }
  0x1a   : > { %1975 = vmatprep.subr.bf16.mxu0 %v3849_v8  ;;  %3799 = vmatprep.subr.bf16.mxu1 %v3849_v8  ;;  %v3899_v40 = vld [vmem:[%s5471_s1 + $0x164] ss:$8 sps:$4 sm:$0xff]   ;;  %v3897_v44 = vld [vmem:[%s5471_s1 + $0x160] ss:$8 sps:$4 sm:$0xff]   ;;  %v3914_v48 = vld [vmem:[%s5471_s1 + $0x254] ss:$8 sps:$4 sm:$0xff]  }
  0x1b   : > { %v3902_v41 = vld [vmem:[%s5471_s1 + $0x264] ss:$8 sps:$4 sm:$0xff]   ;;  %v3900_v45 = vld [vmem:[%s5471_s1 + $0x260] ss:$8 sps:$4 sm:$0xff]   ;;  %v3909_v50 = vld [vmem:[%s5471_s1 + $0x150] ss:$8 sps:$4 sm:$0xff]  }
  0x1c   : > { %v3903_v42 = vld [vmem:[%s4345_s20 + $0x4c] ss:$36 sps:$4 sm:$0xff]   ;;  %v3921_v54 = vld [vmem:[%s4345_s20 + $0x94] ss:$36 sps:$4 sm:$0xff]   ;;  %v3915_v56 = vld [vmem:[%s5471_s1 + $0x140] ss:$8 sps:$4 sm:$0xff]  }
  0x1d   : > { %1976 = vmatpush1.bf16.msra.mxu0 %v3851_v9  ;;  %3815 = vmatpush1.bf16.msra.mxu1 %v3851_v9  ;;  %v3905_v43 = vld [vmem:[%s4345_s20 + $0x28c] ss:$36 sps:$4 sm:$0xff]   ;;  %v3923_v55 = vld [vmem:[%s4345_s20 + $0x2d4] ss:$36 sps:$4 sm:$0xff]   ;;  %v3918_v57 = vld [vmem:[%s5471_s1 + $0x240] ss:$8 sps:$4 sm:$0xff]  }
  0x1e   : > { %1977 = vmatprep.subr.bf16.mxu0 %v3852_v10  ;;  %3800 = vmatprep.subr.bf16.mxu1 %v3852_v10  ;;  %v3907_v47 = vld [vmem:[%s4345_s20 + $0x48] ss:$36 sps:$4 sm:$0xff]   ;;  %v3912_v51 = vld [vmem:[%s5471_s1 + $0x250] ss:$8 sps:$4 sm:$0xff]   ;;  %v3929_v58 = vld [vmem:[%s5471_s1 + $0x134] ss:$8 sps:$4 sm:$0xff]  }
  0x1f   : > { %v3908_v49 = vld [vmem:[%s4345_s20 + $0x288] ss:$36 sps:$4 sm:$0xff]   ;;  %v3925_v59 = vld [vmem:[%s4345_s20 + $0x90] ss:$36 sps:$4 sm:$0xff]   ;;  %v3939_v2 = vld [vmem:[%s4345_s20 + $0xdc] ss:$36 sps:$4 sm:$0xff]  }
  0x20   : > { %v3917_v52 = vld [vmem:[%s5471_s1 + $0x144] ss:$8 sps:$4 sm:$0xff]   ;;  %v3932_v60 = vld [vmem:[%s5471_s1 + $0x234] ss:$8 sps:$4 sm:$0xff]   ;;  %v3927_v62 = vld [vmem:[%s5471_s1 + $0x130] ss:$8 sps:$4 sm:$0xff]  }
  0x21   : > { %1978 = vmatpush1.bf16.msra.mxu0 %v3854_v11  ;;  %3816 = vmatpush1.bf16.msra.mxu1 %v3854_v11  ;;  %v3920_v53 = vld [vmem:[%s5471_s1 + $0x244] ss:$8 sps:$4 sm:$0xff]   ;;  %v3926_v61 = vld [vmem:[%s4345_s20 + $0x2d0] ss:$36 sps:$4 sm:$0xff]   ;;  %v3941_v3 = vld [vmem:[%s4345_s20 + $0x31c] ss:$36 sps:$4 sm:$0xff]  }
  0x22   : > { %1979 = vmatprep.subr.bf16.mxu0 %v3855_v12  ;;  %3801 = vmatprep.subr.bf16.mxu1 %v3855_v12  ;;  %v3930_v63 = vld [vmem:[%s5471_s1 + $0x230] ss:$8 sps:$4 sm:$0xff]   ;;  %v3935_v0 = vld [vmem:[%s5471_s1 + $0x124] ss:$8 sps:$4 sm:$0xff]   ;;  %v3933_v4 = vld [vmem:[%s5471_s1 + $0x120] ss:$8 sps:$4 sm:$0xff]  }
  0x23   : > { %v3938_v1 = vld [vmem:[%s5471_s1 + $0x224] ss:$8 sps:$4 sm:$0xff]   ;;  %v3936_v5 = vld [vmem:[%s5471_s1 + $0x220] ss:$8 sps:$4 sm:$0xff]   ;;  %v3947_v6 = vld [vmem:[%s5471_s1 + $0x114] ss:$8 sps:$4 sm:$0xff]  }
  0x24   : > { %v3943_v7 = vld [vmem:[%s4345_s20 + $0xd8] ss:$36 sps:$4 sm:$0xff]   ;;  %v3953_v12 = vld [vmem:[%s5471_s1 + $0x104] ss:$8 sps:$4 sm:$0xff]  }
  0x25   : > { %1980 = vmatpush1.bf16.msra.mxu0 %v3857_v14  ;;  %3817 = vmatpush1.bf16.msra.mxu1 %v3857_v14  ;;  %v3950_v8 = vld [vmem:[%s5471_s1 + $0x214] ss:$8 sps:$4 sm:$0xff]   ;;  %v3945_v10 = vld [vmem:[%s5471_s1 + $0x110] ss:$8 sps:$4 sm:$0xff]   ;;  %v3956_v13 = vld [vmem:[%s5471_s1 + $0x204] ss:$8 sps:$4 sm:$0xff]  }
  0x26   : > { %1981 = vmatprep.subr.bf16.mxu0 %v3858_v16  ;;  %3802 = vmatprep.subr.bf16.mxu1 %v3858_v16  ;;  %v3944_v9 = vld [vmem:[%s4345_s20 + $0x318] ss:$36 sps:$4 sm:$0xff]   ;;  %v3957_v14 = vld [vmem:[%s4345_s20 + $0x124] ss:$36 sps:$4 sm:$0xff]  }
  0x27   : > { %v3948_v11 = vld [vmem:[%s5471_s1 + $0x210] ss:$8 sps:$4 sm:$0xff]   ;;  %v3959_v15 = vld [vmem:[%s4345_s20 + $0x364] ss:$36 sps:$4 sm:$0xff]  }
  0x28   : > { %v3951_v16 = vld [vmem:[%s5471_s1 + $0x100] ss:$8 sps:$4 sm:$0xff]  }
  0x29   : > { %1982 = vmatpush1.bf16.msra.mxu0 %v3860_v17  ;;  %3818 = vmatpush1.bf16.msra.mxu1 %v3860_v17  ;;  %v3954_v17 = vld [vmem:[%s5471_s1 + $0x200] ss:$8 sps:$4 sm:$0xff]  }
  0x2a   : > { %1983 = vmatprep.subr.bf16.mxu0 %v3861_v18  ;;  %3803 = vmatprep.subr.bf16.mxu1 %v3861_v18  ;;  %v3961_v18 = vld [vmem:[%s4345_s20 + $0x120] ss:$36 sps:$4 sm:$0xff]  }
  0x2d   : > { %1984 = vmatpush2.bf16.msra.mxu0 %v3863_v19  ;;  %3819 = vmatpush2.bf16.msra.mxu1 %v3863_v19  ;;  %v3965_v19 = vld [vmem:[%s5471_s1 + $0x1f4] ss:$8 sps:$4 sm:$0xff]  }
  0x2e   : > { %1985 = vmatprep.subr.bf16.mxu0 %v3864_v20  ;;  %3804 = vmatprep.subr.bf16.mxu1 %v3864_v20  ;;  %v3968_v20 = vld [vmem:[%s5471_s1 + $0x2f4] ss:$8 sps:$4 sm:$0xff]  }
  0x31   : > { %1986 = vmatpush2.bf16.msra.mxu0 %v3866_v21  ;;  %3820 = vmatpush2.bf16.msra.mxu1 %v3866_v21  ;;  %v3962_v21 = vld [vmem:[%s4345_s20 + $0x360] ss:$36 sps:$4 sm:$0xff]  }
  0x32   : > { %1987 = vmatprep.subr.bf16.mxu0 %v3867_v22  ;;  %3805 = vmatprep.subr.bf16.mxu1 %v3867_v22  ;;  %v3963_v22 = vld [vmem:[%s5471_s1 + $0x1f0] ss:$8 sps:$4 sm:$0xff]  }
  0x35   : > { %1988 = vmatpush2.bf16.msra.mxu0 %v3869_v23  ;;  %3821 = vmatpush2.bf16.msra.mxu1 %v3869_v23  ;;  %v3966_v23 = vld [vmem:[%s5471_s1 + $0x2f0] ss:$8 sps:$4 sm:$0xff]  }
  0x36   : > { %1989 = vmatprep.subr.bf16.mxu0 %v3870_v24  ;;  %3806 = vmatprep.subr.bf16.mxu1 %v3870_v24  ;;  %v3971_v24 = vld [vmem:[%s5471_s1 + $0x1e4] ss:$8 sps:$4 sm:$0xff]  }
  0x39   : > { %1990 = vmatpush2.bf16.msra.mxu0 %v3872_v25  ;;  %3822 = vmatpush2.bf16.msra.mxu1 %v3872_v25  ;;  %v3974_v25 = vld [vmem:[%s5471_s1 + $0x2e4] ss:$8 sps:$4 sm:$0xff]  }
  0x3a   : > { %1991 = vmatprep.subr.bf16.mxu0 %v3873_v26  ;;  %3807 = vmatprep.subr.bf16.mxu1 %v3873_v26  ;;  %v3975_v26 = vld [vmem:[%s4345_s20 + $0x16c] ss:$36 sps:$4 sm:$0xff]  }
  0x3d   : > { %1992 = vmatpush2.bf16.msra.mxu0 %v3875_v27  ;;  %3823 = vmatpush2.bf16.msra.mxu1 %v3875_v27  ;;  %v3977_v27 = vld [vmem:[%s4345_s20 + $0x3ac] ss:$36 sps:$4 sm:$0xff]  }
  0x3e   : > { %1993 = vmatprep.subr.bf16.mxu0 %v3876_v28  ;;  %3808 = vmatprep.subr.bf16.mxu1 %v3876_v28  ;;  %v3969_v28 = vld [vmem:[%s5471_s1 + $0x1e0] ss:$8 sps:$4 sm:$0xff]  }
  0x41   : > { %1994 = vmatpush2.bf16.msra.mxu0 %v3878_v29  ;;  %3824 = vmatpush2.bf16.msra.mxu1 %v3878_v29  ;;  %v3972_v29 = vld [vmem:[%s5471_s1 + $0x2e0] ss:$8 sps:$4 sm:$0xff]  }
  0x42   : > { %1995 = vmatprep.subr.bf16.mxu0 %v3879_v30  ;;  %3809 = vmatprep.subr.bf16.mxu1 %v3879_v30  ;;  %v3983_v30 = vld [vmem:[%s5471_s1 + $0x1d4] ss:$8 sps:$4 sm:$0xff]  }
  0x45   : > { %1996 = vmatpush2.bf16.msra.mxu0 %v3881_v31  ;;  %3825 = vmatpush2.bf16.msra.mxu1 %v3881_v31  ;;  %v3979_v31 = vld [vmem:[%s4345_s20 + $0x168] ss:$36 sps:$4 sm:$0xff]  }
  0x46   : > { %1997 = vmatprep.subr.bf16.mxu0 %v3882_v32  ;;  %3810 = vmatprep.subr.bf16.mxu1 %v3882_v32  ;;  %v3986_v32 = vld [vmem:[%s5471_s1 + $0x2d4] ss:$8 sps:$4 sm:$0xff]  }
  0x49   : > { %1998 = vmatpush2.bf16.msra.mxu0 %v3884_v33  ;;  %3826 = vmatpush2.bf16.msra.mxu1 %v3884_v33  ;;  %v3980_v33 = vld [vmem:[%s4345_s20 + $0x3a8] ss:$36 sps:$4 sm:$0xff]  }
  0x4a   : > { %2160 = vmatprep.subr.bf16.mxu1 %v3893_v34  ;;  %2353 = vmatprep.subr.bf16.mxu0 %v3896_v36  ;;  %v3981_v34 = vld [vmem:[%s5471_s1 + $0x1d0] ss:$8 sps:$4 sm:$0xff]   ;;  %v3989_v36 = vld [vmem:[%s5471_s1 + $0x1c4] ss:$8 sps:$4 sm:$0xff]  }
  0x4c   : > { %2000 = vmatmul.mubr.bf16.vlgmr.msra.gmra.mxu0 %v3885_v35  ;;  %2080 = vmatmul.mubr.bf16.vlgmr.msra.gmra.mxu1 %v3888_v37  ;;  %v3984_v35 = vld [vmem:[%s5471_s1 + $0x2d0] ss:$8 sps:$4 sm:$0xff]   ;;  %v3992_v37 = vld [vmem:[%s5471_s1 + $0x2c4] ss:$8 sps:$4 sm:$0xff]  }
  0x4d   : > { %2161 = vmatpush1.bf16.msra.mxu1 %v3891_v38  ;;  %2354 = vmatpush1.bf16.msra.mxu0 %v3894_v39  ;;  %v3993_v38 = vld [vmem:[%s4345_s20 + $0x1b4] ss:$36 sps:$4 sm:$0xff]  }
  0x4e   : > { %2162 = vmatprep.subr.bf16.mxu1 %v3899_v40  ;;  %2355 = vmatprep.subr.bf16.mxu0 %v3902_v41  ;;  %v3995_v39 = vld [vmem:[%s4345_s20 + $0x3f4] ss:$36 sps:$4 sm:$0xff]   ;;  %v3987_v40 = vld [vmem:[%s5471_s1 + $0x1c0] ss:$8 sps:$4 sm:$0xff]  }
  0x4f   : > { %2009 = vmatprep.mubr.bf16.mxu0 %v3903_v42  ;;  %2089 = vmatprep.mubr.bf16.mxu1 %v3905_v43  ;;  %v3990_v41 = vld [vmem:[%s5471_s1 + $0x2c0] ss:$8 sps:$4 sm:$0xff]   ;;  %v4001_v42 = vld [vmem:[%s5471_s1 + $0x1b4] ss:$8 sps:$4 sm:$0xff]  }
  0x50   : > { %v3997_v43 = vld [vmem:[%s4345_s20 + $0x1b0] ss:$36 sps:$4 sm:$0xff]  }
  0x51   : > { %2163 = vmatpush1.bf16.msra.mxu1 %v3897_v44  ;;  %2356 = vmatpush1.bf16.msra.mxu0 %v3900_v45  ;;  %v4004_v44 = vld [vmem:[%s5471_s1 + $0x2b4] ss:$8 sps:$4 sm:$0xff]  }
  0x52   : > { %2164 = vmatprep.subr.bf16.mxu1 %v3911_v46  ;;  %2357 = vmatprep.subr.bf16.mxu0 %v3914_v48  ;;  %v3998_v45 = vld [vmem:[%s4345_s20 + $0x3f0] ss:$36 sps:$4 sm:$0xff]   ;;  %v4007_v48 = vld [vmem:[%s5471_s1 + $0x1a4] ss:$8 sps:$4 sm:$0xff]  }
  0x53   : > { %v3999_v46 = vld [vmem:[%s5471_s1 + $0x1b0] ss:$8 sps:$4 sm:$0xff]  }
  0x54   : > { %2010 = vmatmul.mubr.bf16.gmra.mxu0 %v3907_v47  ;;  %2090 = vmatmul.mubr.bf16.gmra.mxu1 %v3908_v49  ;;  %v4002_v47 = vld [vmem:[%s5471_s1 + $0x2b0] ss:$8 sps:$4 sm:$0xff]   ;;  %v4010_v49 = vld [vmem:[%s5471_s1 + $0x2a4] ss:$8 sps:$4 sm:$0xff]  }
  0x55   : > { %2165 = vmatpush1.bf16.msra.mxu1 %v3909_v50  ;;  %2358 = vmatpush1.bf16.msra.mxu0 %v3912_v51  ;;  %v4011_v50 = vld [vmem:[%s4345_s20 + $0x1fc] ss:$36 sps:$4 sm:$0xff]  }
  0x56   : > { %2166 = vmatprep.subr.bf16.mxu1 %v3917_v52  ;;  %2359 = vmatprep.subr.bf16.mxu0 %v3920_v53  ;;  %v4013_v51 = vld [vmem:[%s4345_s20 + $0x43c] ss:$36 sps:$4 sm:$0xff]  }
  0x57   : > { %2019 = vmatprep.mubr.bf16.mxu0 %v3921_v54  ;;  %2099 = vmatprep.mubr.bf16.mxu1 %v3923_v55  ;;  %v4005_v52 = vld [vmem:[%s5471_s1 + $0x1a0] ss:$8 sps:$4 sm:$0xff]   ;;  %v4019_v54 = vld [vmem:[%s5471_s1 + $0x194] ss:$8 sps:$4 sm:$0xff]  }
  0x58   : > { %v4008_v53 = vld [vmem:[%s5471_s1 + $0x2a0] ss:$8 sps:$4 sm:$0xff]   ;;  %v4015_v55 = vld [vmem:[%s4345_s20 + $0x1f8] ss:$36 sps:$4 sm:$0xff]  }
  0x59   : > { %2167 = vmatpush1.bf16.msra.mxu1 %v3915_v56  ;;  %2360 = vmatpush1.bf16.msra.mxu0 %v3918_v57  ;;  %v4022_v56 = vld [vmem:[%s5471_s1 + $0x294] ss:$8 sps:$4 sm:$0xff]  }
  0x5a   : > { %2168 = vmatprep.subr.bf16.mxu1 %v3929_v58  ;;  %2361 = vmatprep.subr.bf16.mxu0 %v3932_v60  ;;  %v4016_v57 = vld [vmem:[%s4345_s20 + $0x438] ss:$36 sps:$4 sm:$0xff]   ;;  %v4025_v60 = vld [vmem:[%s5471_s1 + $0x184] ss:$8 sps:$4 sm:$0xff]  }
  0x5b   : > { %v4017_v58 = vld [vmem:[%s5471_s1 + $0x190] ss:$8 sps:$4 sm:$0xff]  }
  0x5c   : > { %2020 = vmatmul.mubr.bf16.gmra.mxu0 %v3925_v59  ;;  %2100 = vmatmul.mubr.bf16.gmra.mxu1 %v3926_v61  ;;  %v4020_v59 = vld [vmem:[%s5471_s1 + $0x290] ss:$8 sps:$4 sm:$0xff]   ;;  %v4028_v61 = vld [vmem:[%s5471_s1 + $0x284] ss:$8 sps:$4 sm:$0xff]  }
  0x5d   : > { %2169 = vmatpush1.bf16.msra.mxu1 %v3927_v62  ;;  %2362 = vmatpush1.bf16.msra.mxu0 %v3930_v63  ;;  %v4031_v62 = vld [vmem:[%s4345_s20 + $0xc] ss:$36 sps:$4 sm:$0xff]   ;;  %v4034_v63 = vld [vmem:[%s4345_s20 + $0x14] ss:$36 sps:$4 sm:$0xff]  }
  0x5e   : > { %2170 = vmatprep.subr.bf16.mxu1 %v3935_v0  ;;  %2363 = vmatprep.subr.bf16.mxu0 %v3938_v1  ;;  %v4023_v0 = vld [vmem:[%s5471_s1 + $0x180] ss:$8 sps:$4 sm:$0xff]  }
  0x5f   : > { %2029 = vmatprep.mubr.bf16.mxu0 %v3939_v2  ;;  %2109 = vmatprep.mubr.bf16.mxu1 %v3941_v3  ;;  %v4026_v1 = vld [vmem:[%s5471_s1 + $0x280] ss:$8 sps:$4 sm:$0xff]   ;;  %v4037_v3 = vld [vmem:[%s5471_s1 + $0x374] ss:$8 sps:$4 sm:$0xff]  }
  0x60   : > { %v4029_v2 = vld [vmem:[%s4345_s20 + $0x8] ss:$36 sps:$4 sm:$0xff]  }
  0x61   : > { %2171 = vmatpush1.bf16.msra.mxu1 %v3933_v4  ;;  %2364 = vmatpush1.bf16.msra.mxu0 %v3936_v5  ;;  %v4040_v4 = vld [vmem:[%s5471_s1 + $0x474] ss:$8 sps:$4 sm:$0xff]  }
  0x62   : > { %2172 = vmatprep.subr.bf16.mxu1 %v3947_v6  ;;  %2365 = vmatprep.subr.bf16.mxu0 %v3950_v8  ;;  %v4032_v5 = vld [vmem:[%s4345_s20 + $0x10] ss:$36 sps:$4 sm:$0xff]  }
  0x63   : > { %v4035_v6 = vld [vmem:[%s5471_s1 + $0x370] ss:$8 sps:$4 sm:$0xff]  }
  0x64   : > { %2030 = vmatmul.mubr.bf16.gmra.mxu0 %v3943_v7  ;;  %2110 = vmatmul.mubr.bf16.gmra.mxu1 %v3944_v9  ;;  %v4038_v7 = vld [vmem:[%s5471_s1 + $0x470] ss:$8 sps:$4 sm:$0xff]   ;;  %v4043_v9 = vld [vmem:[%s4345_s20 + $0x5c] ss:$36 sps:$4 sm:$0xff]  }
  0x65   : > { %2173 = vmatpush1.bf16.msra.mxu1 %v3945_v10  ;;  %2366 = vmatpush1.bf16.msra.mxu0 %v3948_v11  ;;  %v4041_v8 = vld [vmem:[%s4345_s20 + $0x54] ss:$36 sps:$4 sm:$0xff]   ;;  %v4049_v10 = vld [vmem:[%s5471_s1 + $0x364] ss:$8 sps:$4 sm:$0xff]  }
  0x66   : > { %2174 = vmatprep.subr.bf16.mxu1 %v3953_v12  ;;  %2367 = vmatprep.subr.bf16.mxu0 %v3956_v13  ;;  %v4061_v11 = vld [vmem:[%s5471_s1 + $0x464] ss:$8 sps:$4 sm:$0xff]   ;;  %v4047_v12 = vld [vmem:[%s5471_s1 + $0x360] ss:$8 sps:$4 sm:$0xff]   ;;  %v4058_v13 = vld [vmem:[%s5471_s1 + $0x354] ss:$8 sps:$4 sm:$0xff]  }
  0x67   : > { %2039 = vmatprep.mubr.bf16.mxu0 %v3957_v14  ;;  %2119 = vmatprep.mubr.bf16.mxu1 %v3959_v15  ;;  %v4059_v14 = vld [vmem:[%s5471_s1 + $0x460] ss:$8 sps:$4 sm:$0xff]   ;;  %v4045_v15 = vld [vmem:[%s4345_s20 + $0x50] ss:$36 sps:$4 sm:$0xff]  }
  0x69   : > { %2175 = vmatpush1.bf16.msra.mxu1 %v3951_v16  ;;  %2368 = vmatpush1.bf16.msra.mxu0 %v3954_v17  ;;  %v4082_v16 = vld [vmem:[%s5471_s1 + $0x454] ss:$8 sps:$4 sm:$0xff]  }
  0x6a   : > { %2176 = vmatprep.subr.bf16.mxu1 %v3965_v19  ;;  %2369 = vmatprep.subr.bf16.mxu0 %v3968_v20  ;;  %v4046_v17 = vld [vmem:[%s4345_s20 + $0x58] ss:$36 sps:$4 sm:$0xff]   ;;  %v4052_v19 = vld [vmem:[%s4345_s20 + $0xa4] ss:$36 sps:$4 sm:$0xff]  }
  0x6b   : > { %v4056_v20 = vld [vmem:[%s5471_s1 + $0x350] ss:$8 sps:$4 sm:$0xff]  }
  0x6c   : > { %2040 = vmatmul.mubr.bf16.gmra.mxu0 %v3961_v18  ;;  %2120 = vmatmul.mubr.bf16.gmra.mxu1 %v3962_v21  ;;  %v4050_v18 = vld [vmem:[%s4345_s20 + $0x9c] ss:$36 sps:$4 sm:$0xff]   ;;  %v4070_v21 = vld [vmem:[%s5471_s1 + $0x344] ss:$8 sps:$4 sm:$0xff]  }
  0x6d   : > { %2177 = vmatpush2.bf16.msra.mxu1 %v3963_v22  ;;  %2370 = vmatpush2.bf16.msra.mxu0 %v3966_v23  ;;  %v4080_v22 = vld [vmem:[%s5471_s1 + $0x450] ss:$8 sps:$4 sm:$0xff]   ;;  %v4103_v23 = vld [vmem:[%s5471_s1 + $0x444] ss:$8 sps:$4 sm:$0xff]  }
  0x6e   : > { %2178 = vmatprep.subr.bf16.mxu1 %v3971_v24  ;;  %2371 = vmatprep.subr.bf16.mxu0 %v3974_v25  ;;  %v4068_v24 = vld [vmem:[%s5471_s1 + $0x340] ss:$8 sps:$4 sm:$0xff]   ;;  %v4079_v25 = vld [vmem:[%s5471_s1 + $0x334] ss:$8 sps:$4 sm:$0xff]  }
  0x6f   : > { %2049 = vmatprep.mubr.bf16.mxu0 %v3975_v26  ;;  %2129 = vmatprep.mubr.bf16.mxu1 %v3977_v27  ;;  %v4054_v26 = vld [vmem:[%s4345_s20 + $0x98] ss:$36 sps:$4 sm:$0xff]   ;;  %v4055_v27 = vld [vmem:[%s4345_s20 + $0xa0] ss:$36 sps:$4 sm:$0xff]  }
  0x71   : > { %2179 = vmatpush2.bf16.msra.mxu1 %v3969_v28  ;;  %2372 = vmatpush2.bf16.msra.mxu0 %v3972_v29  ;;  %v4101_v28 = vld [vmem:[%s5471_s1 + $0x440] ss:$8 sps:$4 sm:$0xff]   ;;  %v4124_v29 = vld [vmem:[%s5471_s1 + $0x434] ss:$8 sps:$4 sm:$0xff]  }
  0x72   : > { %2180 = vmatprep.subr.bf16.mxu1 %v3983_v30  ;;  %2373 = vmatprep.subr.bf16.mxu0 %v3986_v32  ;;  %v4062_v30 = vld [vmem:[%s4345_s20 + $0xe4] ss:$36 sps:$4 sm:$0xff]   ;;  %v4077_v32 = vld [vmem:[%s5471_s1 + $0x330] ss:$8 sps:$4 sm:$0xff]  }
  0x74   : > { %2050 = vmatmul.mubr.bf16.gmra.mxu0 %v3979_v31  ;;  %2130 = vmatmul.mubr.bf16.gmra.mxu1 %v3980_v33  ;;  %v4064_v31 = vld [vmem:[%s4345_s20 + $0xec] ss:$36 sps:$4 sm:$0xff]  }
  0x75   : > { %2181 = vmatpush2.bf16.msra.mxu1 %v3981_v34  ;;  %2374 = vmatpush2.bf16.msra.mxu0 %v3984_v35  ;;  %v4091_v33 = vld [vmem:[%s5471_s1 + $0x324] ss:$8 sps:$4 sm:$0xff]   ;;  %v4122_v34 = vld [vmem:[%s5471_s1 + $0x430] ss:$8 sps:$4 sm:$0xff]  }
  0x76   : > { %2182 = vmatprep.subr.bf16.mxu1 %v3989_v36  ;;  %2375 = vmatprep.subr.bf16.mxu0 %v3992_v37  ;;  %v4145_v35 = vld [vmem:[%s5471_s1 + $0x424] ss:$8 sps:$4 sm:$0xff]   ;;  %v4089_v36 = vld [vmem:[%s5471_s1 + $0x320] ss:$8 sps:$4 sm:$0xff]  }
  0x77   : > { %2059 = vmatprep.mubr.bf16.mxu0 %v3993_v38  ;;  %2139 = vmatprep.mubr.bf16.mxu1 %v3995_v39  ;;  %v4066_v37 = vld [vmem:[%s4345_s20 + $0xe0] ss:$36 sps:$4 sm:$0xff]   ;;  %v4100_v38 = vld [vmem:[%s5471_s1 + $0x314] ss:$8 sps:$4 sm:$0xff]  }
  0x78   : > { %v4143_v39 = vld [vmem:[%s5471_s1 + $0x420] ss:$8 sps:$4 sm:$0xff]  }
  0x79   : > { %2183 = vmatpush2.bf16.msra.mxu1 %v3987_v40  ;;  %2376 = vmatpush2.bf16.msra.mxu0 %v3990_v41  ;;  %v4166_v40 = vld [vmem:[%s5471_s1 + $0x414] ss:$8 sps:$4 sm:$0xff]   ;;  %v4067_v41 = vld [vmem:[%s4345_s20 + $0xe8] ss:$36 sps:$4 sm:$0xff]  }
  0x7a   : > { %2184 = vmatprep.subr.bf16.mxu1 %v4001_v42  ;;  %2377 = vmatprep.subr.bf16.mxu0 %v4004_v44  ;;  %v4071_v42 = vld [vmem:[%s4345_s20 + $0x12c] ss:$36 sps:$4 sm:$0xff]  }
  0x7b   : > { %v4098_v44 = vld [vmem:[%s5471_s1 + $0x310] ss:$8 sps:$4 sm:$0xff]  }
  0x7c   : > { %2060 = vmatmul.mubr.bf16.gmra.mxu0 %v3997_v43  ;;  %2140 = vmatmul.mubr.bf16.gmra.mxu1 %v3998_v45  ;;  %v4073_v43 = vld [vmem:[%s4345_s20 + $0x134] ss:$36 sps:$4 sm:$0xff]  }
  0x7d   : > { %2185 = vmatpush2.bf16.msra.mxu1 %v3999_v46  ;;  %2378 = vmatpush2.bf16.msra.mxu0 %v4002_v47  ;;  %v4164_v45 = vld [vmem:[%s5471_s1 + $0x410] ss:$8 sps:$4 sm:$0xff]   ;;  %v4112_v46 = vld [vmem:[%s5471_s1 + $0x304] ss:$8 sps:$4 sm:$0xff]   ;;  %v4110_v47 = vld [vmem:[%s5471_s1 + $0x300] ss:$8 sps:$4 sm:$0xff]  }
  0x7e   : > { %2186 = vmatprep.subr.bf16.mxu1 %v4007_v48  ;;  %2379 = vmatprep.subr.bf16.mxu0 %v4010_v49  ;;  %v4187_v48 = vld [vmem:[%s5471_s1 + $0x404] ss:$8 sps:$4 sm:$0xff]   ;;  %v4185_v49 = vld [vmem:[%s5471_s1 + $0x400] ss:$8 sps:$4 sm:$0xff]  }
  0x7f   : > { %2069 = vmatprep.mubr.bf16.mxu0 %v4011_v50  ;;  %2149 = vmatprep.mubr.bf16.mxu1 %v4013_v51  ;;  %v4121_v50 = vld [vmem:[%s5471_s1 + $0x3f4] ss:$8 sps:$4 sm:$0xff]   ;;  %v4075_v51 = vld [vmem:[%s4345_s20 + $0x128] ss:$36 sps:$4 sm:$0xff]  }
  0x81   : > { %2187 = vmatpush2.bf16.msra.mxu1 %v4005_v52  ;;  %2380 = vmatpush2.bf16.msra.mxu0 %v4008_v53  ;;  %v4076_v52 = vld [vmem:[%s4345_s20 + $0x130] ss:$36 sps:$4 sm:$0xff]  }
  0x82   : > { %2188 = vmatprep.subr.bf16.mxu1 %v4019_v54  ;;  %2381 = vmatprep.subr.bf16.mxu0 %v4022_v56  ;;  %v4083_v53 = vld [vmem:[%s4345_s20 + $0x174] ss:$36 sps:$4 sm:$0xff]   ;;  %v4085_v54 = vld [vmem:[%s4345_s20 + $0x17c] ss:$36 sps:$4 sm:$0xff]   ;;  %v4133_v56 = vld [vmem:[%s5471_s1 + $0x3e4] ss:$8 sps:$4 sm:$0xff]  }
  0x84   : > { %2070 = vmatmul.mubr.bf16.gmra.mxu0 %v4015_v55  ;;  %2150 = vmatmul.mubr.bf16.gmra.mxu1 %v4016_v57  ;;  %v4119_v55 = vld [vmem:[%s5471_s1 + $0x3f0] ss:$8 sps:$4 sm:$0xff]  }
  0x85   : > { %2189 = vmatpush2.bf16.msra.mxu1 %v4017_v58  ;;  %2382 = vmatpush2.bf16.msra.mxu0 %v4020_v59  ;;  %v4087_v57 = vld [vmem:[%s4345_s20 + $0x170] ss:$36 sps:$4 sm:$0xff]   ;;  %v4131_v58 = vld [vmem:[%s5471_s1 + $0x3e0] ss:$8 sps:$4 sm:$0xff]   ;;  %v4088_v59 = vld [vmem:[%s4345_s20 + $0x178] ss:$36 sps:$4 sm:$0xff]  }
  0x86   : > { %2190 = vmatprep.subr.bf16.mxu1 %v4025_v60  ;;  %2383 = vmatprep.subr.bf16.mxu0 %v4028_v61  ;;  %v4142_v60 = vld [vmem:[%s5471_s1 + $0x3d4] ss:$8 sps:$4 sm:$0xff]  }
  0x87   : > { %2192 = vmatprep.mubr.bf16.mxu1 %v4031_v62  ;;  %2385 = vmatprep.mubr.bf16.mxu0 %v4034_v63  ;;  %v4092_v61 = vld [vmem:[%s4345_s20 + $0x1bc] ss:$36 sps:$4 sm:$0xff]   ;;  %v4094_v62 = vld [vmem:[%s4345_s20 + $0x1c4] ss:$36 sps:$4 sm:$0xff]   ;;  %v4140_v63 = vld [vmem:[%s5471_s1 + $0x3d0] ss:$8 sps:$4 sm:$0xff]  }
  0x89   : > { %2191 = vmatpush2.bf16.msra.mxu1 %v4023_v0  ;;  %2384 = vmatpush2.bf16.msra.mxu0 %v4026_v1  ;;  %v4154_v0 = vld [vmem:[%s5471_s1 + $0x3c4] ss:$8 sps:$4 sm:$0xff]   ;;  %v4096_v1 = vld [vmem:[%s4345_s20 + $0x1b8] ss:$36 sps:$4 sm:$0xff]  }
  0x8a   : > { %2546 = vmatprep.subr.bf16.mxu1 %v4037_v3  ;;  %2739 = vmatprep.subr.bf16.mxu0 %v4040_v4  ;;  %v4152_v3 = vld [vmem:[%s5471_s1 + $0x3c0] ss:$8 sps:$4 sm:$0xff]  }
  0x8b   : > { %v4104_v4 = vld [vmem:[%s4345_s20 + $0x204] ss:$36 sps:$4 sm:$0xff]  }
  0x8c   : > { %2193 = vmatmul.mubr.bf16.vlgmr.msra.gmra.mxu1 %v4029_v2  ;;  %2386 = vmatmul.mubr.bf16.vlgmr.msra.gmra.mxu0 %v4032_v5  ;;  %v4097_v2 = vld [vmem:[%s4345_s20 + $0x1c0] ss:$36 sps:$4 sm:$0xff]   ;;  %v4163_v5 = vld [vmem:[%s5471_s1 + $0x3b4] ss:$8 sps:$4 sm:$0xff]  }
  0x8d   : > { %2547 = vmatpush1.bf16.msra.mxu1 %v4035_v6  ;;  %2740 = vmatpush1.bf16.msra.mxu0 %v4038_v7  ;;  %v4106_v6 = vld [vmem:[%s4345_s20 + $0x20c] ss:$36 sps:$4 sm:$0xff]  }
  0x8e   : > { %2202 = vmatprep.mubr.bf16.mxu1 %v4041_v8  ;;  %2395 = vmatprep.mubr.bf16.mxu0 %v4043_v9  ;;  %v4161_v7 = vld [vmem:[%s5471_s1 + $0x3b0] ss:$8 sps:$4 sm:$0xff]   ;;  %v4175_v8 = vld [vmem:[%s5471_s1 + $0x3a4] ss:$8 sps:$4 sm:$0xff]   ;;  %v4173_v9 = vld [vmem:[%s5471_s1 + $0x3a0] ss:$8 sps:$4 sm:$0xff]  }
  0x8f   : > { %2548 = vmatprep.subr.bf16.mxu1 %v4049_v10  ;;  %2741 = vmatprep.subr.bf16.mxu0 %v4061_v11  ;;  %v4184_v10 = vld [vmem:[%s5471_s1 + $0x394] ss:$8 sps:$4 sm:$0xff]   ;;  %v4108_v11 = vld [vmem:[%s4345_s20 + $0x200] ss:$36 sps:$4 sm:$0xff]  }
  0x91   : > { %2549 = vmatpush1.bf16.msra.mxu1 %v4047_v12  ;;  %2742 = vmatpush1.bf16.msra.mxu0 %v4059_v14  ;;  %v4109_v12 = vld [vmem:[%s4345_s20 + $0x208] ss:$36 sps:$4 sm:$0xff]   ;;  %v4115_v14 = vld [vmem:[%s4345_s20 + $0x254] ss:$36 sps:$4 sm:$0xff]  }
  0x92   : > { %2550 = vmatprep.subr.bf16.mxu1 %v4058_v13  ;;  %2743 = vmatprep.subr.bf16.mxu0 %v4082_v16  ;;  %v4113_v13 = vld [vmem:[%s4345_s20 + $0x24c] ss:$36 sps:$4 sm:$0xff]  }
  0x93   : > { %v4196_v16 = vld [vmem:[%s5471_s1 + $0x384] ss:$8 sps:$4 sm:$0xff]  }
  0x94   : > { %2203 = vmatmul.mubr.bf16.gmra.mxu1 %v4045_v15  ;;  %2396 = vmatmul.mubr.bf16.gmra.mxu0 %v4046_v17  ;;  %v4182_v15 = vld [vmem:[%s5471_s1 + $0x390] ss:$8 sps:$4 sm:$0xff]   ;;  %v4194_v17 = vld [vmem:[%s5471_s1 + $0x380] ss:$8 sps:$4 sm:$0xff]  }
  0x95   : > { %2212 = vmatprep.mubr.bf16.mxu1 %v4050_v18  ;;  %2405 = vmatprep.mubr.bf16.mxu0 %v4052_v19  ;;  %v4117_v18 = vld [vmem:[%s4345_s20 + $0x248] ss:$36 sps:$4 sm:$0xff]   ;;  %v4118_v19 = vld [vmem:[%s4345_s20 + $0x250] ss:$36 sps:$4 sm:$0xff]  }
  0x96   : > { %2551 = vmatpush1.bf16.msra.mxu1 %v4056_v20  ;;  %2744 = vmatpush1.bf16.msra.mxu0 %v4080_v22  ;;  %v4125_v20 = vld [vmem:[%s4345_s20 + $0x294] ss:$36 sps:$4 sm:$0xff]  }
  0x97   : > { %2552 = vmatprep.subr.bf16.mxu1 %v4070_v21  ;;  %2745 = vmatprep.subr.bf16.mxu0 %v4103_v23  ;;  %v4127_v21 = vld [vmem:[%s4345_s20 + $0x29c] ss:$36 sps:$4 sm:$0xff]   ;;  %v4129_v22 = vld [vmem:[%s4345_s20 + $0x290] ss:$36 sps:$4 sm:$0xff]  }
  0x98   : > { %v4130_v23 = vld [vmem:[%s4345_s20 + $0x298] ss:$36 sps:$4 sm:$0xff]  }
  0x9a   : > { %2553 = vmatpush1.bf16.msra.mxu1 %v4068_v24  ;;  %2746 = vmatpush1.bf16.msra.mxu0 %v4101_v28  ;;  %v4134_v24 = vld [vmem:[%s4345_s20 + $0x2dc] ss:$36 sps:$4 sm:$0xff]   ;;  %v4146_v28 = vld [vmem:[%s4345_s20 + $0x324] ss:$36 sps:$4 sm:$0xff]  }
  0x9b   : > { %2554 = vmatprep.subr.bf16.mxu1 %v4079_v25  ;;  %2747 = vmatprep.subr.bf16.mxu0 %v4124_v29  ;;  %v4136_v25 = vld [vmem:[%s4345_s20 + $0x2e4] ss:$36 sps:$4 sm:$0xff]   ;;  %v4148_v29 = vld [vmem:[%s4345_s20 + $0x32c] ss:$36 sps:$4 sm:$0xff]  }
  0x9c   : > { %2213 = vmatmul.mubr.bf16.gmra.mxu1 %v4054_v26  ;;  %2406 = vmatmul.mubr.bf16.gmra.mxu0 %v4055_v27  ;;  %v4138_v26 = vld [vmem:[%s4345_s20 + $0x2d8] ss:$36 sps:$4 sm:$0xff]   ;;  %v4139_v27 = vld [vmem:[%s4345_s20 + $0x2e0] ss:$36 sps:$4 sm:$0xff]  }
  0x9d   : > { %2222 = vmatprep.mubr.bf16.mxu1 %v4062_v30  ;;  %2415 = vmatprep.mubr.bf16.mxu0 %v4064_v31  ;;  %v4150_v30 = vld [vmem:[%s4345_s20 + $0x320] ss:$36 sps:$4 sm:$0xff]   ;;  %v4151_v31 = vld [vmem:[%s4345_s20 + $0x328] ss:$36 sps:$4 sm:$0xff]  }
  0x9e   : > { %2555 = vmatpush1.bf16.msra.mxu1 %v4077_v32  ;;  %2748 = vmatpush1.bf16.msra.mxu0 %v4122_v34  ;;  %v4155_v32 = vld [vmem:[%s4345_s20 + $0x36c] ss:$36 sps:$4 sm:$0xff]  }
  0x9f   : > { %2556 = vmatprep.subr.bf16.mxu1 %v4091_v33  ;;  %2749 = vmatprep.subr.bf16.mxu0 %v4145_v35  ;;  %v4157_v33 = vld [vmem:[%s4345_s20 + $0x374] ss:$36 sps:$4 sm:$0xff]   ;;  %v4159_v34 = vld [vmem:[%s4345_s20 + $0x368] ss:$36 sps:$4 sm:$0xff]  }
  0xa0   : > { %v4160_v35 = vld [vmem:[%s4345_s20 + $0x370] ss:$36 sps:$4 sm:$0xff]  }
  0xa2   : > { %2557 = vmatpush1.bf16.msra.mxu1 %v4089_v36  ;;  %2750 = vmatpush1.bf16.msra.mxu0 %v4143_v39  ;;  %v4167_v36 = vld [vmem:[%s4345_s20 + $0x3b4] ss:$36 sps:$4 sm:$0xff]  }
  0xa3   : > { %2558 = vmatprep.subr.bf16.mxu1 %v4100_v38  ;;  %2751 = vmatprep.subr.bf16.mxu0 %v4166_v40  ;;  %v4171_v38 = vld [vmem:[%s4345_s20 + $0x3b0] ss:$36 sps:$4 sm:$0xff]   ;;  %v4172_v39 = vld [vmem:[%s4345_s20 + $0x3b8] ss:$36 sps:$4 sm:$0xff]  }
  0xa4   : > { %2223 = vmatmul.mubr.bf16.gmra.mxu1 %v4066_v37  ;;  %2416 = vmatmul.mubr.bf16.gmra.mxu0 %v4067_v41  ;;  %v4169_v37 = vld [vmem:[%s4345_s20 + $0x3bc] ss:$36 sps:$4 sm:$0xff]   ;;  %v4178_v41 = vld [vmem:[%s4345_s20 + $0x404] ss:$36 sps:$4 sm:$0xff]  }
  0xa5   : > { %2232 = vmatprep.mubr.bf16.mxu1 %v4071_v42  ;;  %2425 = vmatprep.mubr.bf16.mxu0 %v4073_v43  ;;  %v4176_v40 = vld [vmem:[%s4345_s20 + $0x3fc] ss:$36 sps:$4 sm:$0xff]  }
  0xa6   : > { %2559 = vmatpush1.bf16.msra.mxu1 %v4098_v44  ;;  %2752 = vmatpush1.bf16.msra.mxu0 %v4164_v45  ;;  %v4180_v42 = vld [vmem:[%s4345_s20 + $0x3f8] ss:$36 sps:$4 sm:$0xff]   ;;  %v4181_v43 = vld [vmem:[%s4345_s20 + $0x400] ss:$36 sps:$4 sm:$0xff]   ;;  %v4190_v45 = vld [vmem:[%s4345_s20 + $0x44c] ss:$36 sps:$4 sm:$0xff]  }
  0xa7   : > { %2560 = vmatprep.subr.bf16.mxu1 %v4112_v46  ;;  %2753 = vmatprep.subr.bf16.mxu0 %v4187_v48  ;;  %v4188_v44 = vld [vmem:[%s4345_s20 + $0x444] ss:$36 sps:$4 sm:$0xff]   ;;  %v4199_v48 = vld [vmem:[%s4345_s20 + $0x1c] ss:$36 sps:$4 sm:$0xff]  }
  0xa8   : > { %v4192_v46 = vld [vmem:[%s4345_s20 + $0x440] ss:$36 sps:$4 sm:$0xff]  }
  0xaa   : > { %2561 = vmatpush1.bf16.msra.mxu1 %v4110_v47  ;;  %2754 = vmatpush1.bf16.msra.mxu0 %v4185_v49  ;;  %v4193_v47 = vld [vmem:[%s4345_s20 + $0x448] ss:$36 sps:$4 sm:$0xff]   ;;  %v5475_v49 = vmov 0  }
  0xab   : > { %2562 = vmatprep.subr.bf16.mxu1 %v4121_v50  ;;  %v4197_v50 = vld [vmem:[%s4345_s20 + $0x18] ss:$36 sps:$4 sm:$0xff]  }
  0xac   : > { %2233 = vmatmul.mubr.bf16.gmra.mxu1 %v4075_v51  ;;  %2426 = vmatmul.mubr.bf16.gmra.mxu0 %v4076_v52  ;;  %v4200_v51 = vld [vmem:[%s4345_s20 + $0x20] ss:$36 sps:$4 sm:$0xff]  }
  0xad   : > { %2242 = vmatprep.mubr.bf16.mxu1 %v4083_v53  ;;  %2435 = vmatprep.mubr.bf16.mxu0 %v4085_v54  ;;  %v4201_v52 = vld [vmem:[%s4345_s20 + $0x64] ss:$36 sps:$4 sm:$0xff]  }
  0xae   : > { %2563 = vmatpush2.bf16.msra.mxu1 %v4119_v55 }
  0xaf   : > { %2564 = vmatprep.subr.bf16.mxu1 %v4133_v56 }
  0xb2   : > { %2565 = vmatpush2.bf16.msra.mxu1 %v4131_v58 }
  0xb3   : > { %2566 = vmatprep.subr.bf16.mxu1 %v4142_v60  ;;  %v4204_v60 = vld [vmem:[%s4345_s20 + $0x68] ss:$36 sps:$4 sm:$0xff]  }
  0xb4   : > { %2243 = vmatmul.mubr.bf16.gmra.mxu1 %v4087_v57  ;;  %2436 = vmatmul.mubr.bf16.gmra.mxu0 %v4088_v59  ;;  %v4203_v59 = vld [vmem:[%s4345_s20 + $0x60] ss:$36 sps:$4 sm:$0xff]  }
  0xb5   : > { %2252 = vmatprep.mubr.bf16.mxu1 %v4092_v61  ;;  %2445 = vmatprep.mubr.bf16.mxu0 %v4094_v62  ;;  %v4205_v61 = vld [vmem:[%s4345_s20 + $0xac] ss:$36 sps:$4 sm:$0xff]  }
  0xb6   : > { %2567 = vmatpush2.bf16.msra.mxu1 %v4140_v63 }
  0xb7   : > { %2568 = vmatprep.subr.bf16.mxu1 %v4154_v0 }
  0xba   : > { %2569 = vmatpush2.bf16.msra.mxu1 %v4152_v3 }
  0xbb   : > { %2570 = vmatprep.subr.bf16.mxu1 %v4163_v5 }
  0xbc   : > { %2253 = vmatmul.mubr.bf16.gmra.mxu1 %v4096_v1  ;;  %2446 = vmatmul.mubr.bf16.gmra.mxu0 %v4097_v2 }
  0xbd   : > { %2262 = vmatprep.mubr.bf16.mxu1 %v4104_v4  ;;  %2455 = vmatprep.mubr.bf16.mxu0 %v4106_v6  ;;  %v4207_v6 = vld [vmem:[%s4345_s20 + $0xa8] ss:$36 sps:$4 sm:$0xff]  }
  0xbe   : > { %2571 = vmatpush2.bf16.msra.mxu1 %v4161_v7  ;;  %v4208_v7 = vld [vmem:[%s4345_s20 + $0xb0] ss:$36 sps:$4 sm:$0xff]  }
  0xbf   : > { %2572 = vmatprep.subr.bf16.mxu1 %v4175_v8  ;;  %v4209_v8 = vld [vmem:[%s4345_s20 + $0xf4] ss:$36 sps:$4 sm:$0xff]  }
  0xc2   : > { %2573 = vmatpush2.bf16.msra.mxu1 %v4173_v9 }
  0xc3   : > { %2574 = vmatprep.subr.bf16.mxu1 %v4184_v10 }
  0xc4   : > { %2263 = vmatmul.mubr.bf16.gmra.mxu1 %v4108_v11  ;;  %2456 = vmatmul.mubr.bf16.gmra.mxu0 %v4109_v12 }
  0xc5   : > { %2272 = vmatprep.mubr.bf16.mxu1 %v4113_v13  ;;  %2465 = vmatprep.mubr.bf16.mxu0 %v4115_v14 }
  0xc6   : > { %2575 = vmatpush2.bf16.msra.mxu1 %v4182_v15 }
  0xc7   : > { %2576 = vmatprep.subr.bf16.mxu1 %v4196_v16 }
  0xca   : > { %2577 = vmatpush2.bf16.msra.mxu1 %v4194_v17  ;;  %v4211_v17 = vld [vmem:[%s4345_s20 + $0xf0] ss:$36 sps:$4 sm:$0xff]  }
  0xcc   : > { %2273 = vmatmul.mubr.bf16.gmra.mxu1 %v4117_v18  ;;  %2466 = vmatmul.mubr.bf16.gmra.mxu0 %v4118_v19  ;;  %v4212_v18 = vld [vmem:[%s4345_s20 + $0xf8] ss:$36 sps:$4 sm:$0xff]  }
  0xcd   : > { %2282 = vmatprep.mubr.bf16.mxu1 %v4125_v20  ;;  %2475 = vmatprep.mubr.bf16.mxu0 %v4127_v21  ;;  %v4215_v19 = vld [vmem:[%s4345_s20 + $0x13c] ss:$36 sps:$4 sm:$0xff]  }
  0xd4   : > { %2283 = vmatmul.mubr.bf16.gmra.mxu1 %v4129_v22  ;;  %2476 = vmatmul.mubr.bf16.gmra.mxu0 %v4130_v23 }
  0xd5   : > { %2292 = vmatprep.mubr.bf16.mxu1 %v4134_v24  ;;  %2485 = vmatprep.mubr.bf16.mxu0 %v4136_v25 }
  0xdc   : > { %2293 = vmatmul.mubr.bf16.gmra.mxu1 %v4138_v26  ;;  %2486 = vmatmul.mubr.bf16.gmra.mxu0 %v4139_v27 }
  0xdd   : > { %2302 = vmatprep.mubr.bf16.mxu1 %v4146_v28  ;;  %2495 = vmatprep.mubr.bf16.mxu0 %v4148_v29  ;;  %v4213_v28 = vld [vmem:[%s4345_s20 + $0x138] ss:$36 sps:$4 sm:$0xff]   ;;  %v4216_v29 = vld [vmem:[%s4345_s20 + $0x140] ss:$36 sps:$4 sm:$0xff]  }
  0xe4   : > { %2303 = vmatmul.mubr.bf16.gmra.mxu1 %v4150_v30  ;;  %2496 = vmatmul.mubr.bf16.gmra.mxu0 %v4151_v31  ;;  %v4219_v30 = vld [vmem:[%s4345_s20 + $0x184] ss:$36 sps:$4 sm:$0xff]  }
  0xe5   : > { %2312 = vmatprep.mubr.bf16.mxu1 %v4155_v32  ;;  %2505 = vmatprep.mubr.bf16.mxu0 %v4157_v33 }
  0xec   : > { %2313 = vmatmul.mubr.bf16.gmra.mxu1 %v4159_v34  ;;  %2506 = vmatmul.mubr.bf16.gmra.mxu0 %v4160_v35 }
  0xed   : > { %2322 = vmatprep.mubr.bf16.mxu1 %v4167_v36  ;;  %2515 = vmatprep.mubr.bf16.mxu0 %v4169_v37 }
  0xf4   : > { %2323 = vmatmul.mubr.bf16.gmra.mxu1 %v4171_v38  ;;  %2516 = vmatmul.mubr.bf16.gmra.mxu0 %v4172_v39  ;;  %v4217_v39 = vld [vmem:[%s4345_s20 + $0x180] ss:$36 sps:$4 sm:$0xff]  }
  0xf5   : > { %2332 = vmatprep.mubr.bf16.mxu1 %v4176_v40  ;;  %2525 = vmatprep.mubr.bf16.mxu0 %v4178_v41  ;;  %v4220_v40 = vld [vmem:[%s4345_s20 + $0x188] ss:$36 sps:$4 sm:$0xff]  }
  0xf6   : > { %v4223_v41 = vld [vmem:[%s4345_s20 + $0x1cc] ss:$36 sps:$4 sm:$0xff]  }
  0xfc   : > { %2333 = vmatmul.mubr.bf16.gmra.mxu1 %v4180_v42  ;;  %2526 = vmatmul.mubr.bf16.gmra.mxu0 %v4181_v43 }
  0xfd   : > { %2342 = vmatprep.mubr.bf16.mxu1 %v4188_v44  ;;  %2535 = vmatprep.mubr.bf16.mxu0 %v4190_v45 }
 0x104   : > { %2343 = vmatmul.mubr.bf16.gmra.mxu1 %v4192_v46  ;;  %2536 = vmatmul.mubr.bf16.gmra.mxu0 %v4193_v47 }
 0x105   : > { %2578 = vmatprep.mubr.bf16.mxu1 %v4199_v48  ;;  %2771 = vmatprep.mubr.bf16.mxu0 %v5475_v49 }
 0x10c   : > { %v4844_v53 = vpop.f32.mrf.mxu0  ;;  %v4846_v54 = vpop.f32.mrf.mxu1  ;;  %2579 = vmatmul.mubr.bf16.vlgmr.msra.gmra.mxu1 %v4197_v50  ;;  %2772 = vmatmul.mubr.bf16.vlgmr.msra.gmra.mxu0 %v4200_v51  ;;  %v4221_v51 = vld [vmem:[%s4345_s20 + $0x1c8] ss:$36 sps:$4 sm:$0xff]  }
 0x10d   : > { %2588 = vmatprep.mubr.bf16.mxu1 %v4201_v52  ;;  %2781 = vmatprep.mubr.bf16.mxu0 %v5475_v49  ;;  %v4224_v52 = vld [vmem:[%s4345_s20 + $0x1d0] ss:$36 sps:$4 sm:$0xff]  }
 0x10e   : > { %v4849_v55 = vpop.f32.mrf.mxu0  ;;  %v4851_v56 = vpop.f32.mrf.mxu1 }
 0x110   : > { %v4853_v57 = vpop.f32.mrf.mxu0  ;;  %v4855_v58 = vpop.f32.mrf.mxu1 }
 0x112   : > { %v4860_v62 = vpop.f32.mrf.mxu0  ;;  %v4862_v63 = vpop.f32.mrf.mxu1 }
 0x114   : > { %v4864_v0 = vpop.f32.mrf.mxu0  ;;  %v4866_v1 = vpop.f32.mrf.mxu1  ;;  %2589 = vmatmul.mubr.bf16.gmra.mxu1 %v4203_v59  ;;  %2782 = vmatmul.mubr.bf16.gmra.mxu0 %v4204_v60  ;;  %v4227_v59 = vld [vmem:[%s4345_s20 + $0x214] ss:$36 sps:$4 sm:$0xff]  }
 0x115   : > { %2598 = vmatprep.mubr.bf16.mxu1 %v4205_v61  ;;  %2791 = vmatprep.mubr.bf16.mxu0 %v5475_v49 }
 0x116   : > { %v4869_v2 = vpop.f32.mrf.mxu0  ;;  %v4871_v3 = vpop.f32.mrf.mxu1 }
 0x118   : > { %v4873_v4 = vpop.f32.mrf.mxu0  ;;  %v4875_v5 = vpop.f32.mrf.mxu1 }
 0x11a   : > { %v4880_v9 = vpop.f32.mrf.mxu0  ;;  %v4882_v10 = vpop.f32.mrf.mxu1 }
 0x11c   : > { %v4884_v11 = vpop.f32.mrf.mxu0  ;;  %v4886_v12 = vpop.f32.mrf.mxu1  ;;  %2599 = vmatmul.mubr.bf16.gmra.mxu1 %v4207_v6  ;;  %2792 = vmatmul.mubr.bf16.gmra.mxu0 %v4208_v7 }
 0x11d   : > { %2608 = vmatprep.mubr.bf16.mxu1 %v4209_v8  ;;  %2801 = vmatprep.mubr.bf16.mxu0 %v5475_v49 }
 0x11e   : > { %v4889_v13 = vpop.f32.mrf.mxu0  ;;  %v4891_v14 = vpop.f32.mrf.mxu1 }
 0x120   : > { %v4893_v15 = vpop.f32.mrf.mxu0  ;;  %v4895_v16 = vpop.f32.mrf.mxu1 }
 0x122   : > { %v4900_v20 = vpop.f32.mrf.mxu0  ;;  %v4902_v21 = vpop.f32.mrf.mxu1 }
 0x124   : > { %v4904_v22 = vpop.f32.mrf.mxu0  ;;  %v4906_v23 = vpop.f32.mrf.mxu1  ;;  %2609 = vmatmul.mubr.bf16.gmra.mxu1 %v4211_v17  ;;  %2802 = vmatmul.mubr.bf16.gmra.mxu0 %v4212_v18 }
 0x125   : > { %2618 = vmatprep.mubr.bf16.mxu1 %v4215_v19  ;;  %2811 = vmatprep.mubr.bf16.mxu0 %v5475_v49 }
 0x126   : > { %v4909_v24 = vpop.f32.mrf.mxu0  ;;  %v4911_v25 = vpop.f32.mrf.mxu1 }
 0x128   : > { %v4913_v26 = vpop.f32.mrf.mxu0  ;;  %v4915_v27 = vpop.f32.mrf.mxu1 }
 0x12a   : > { %v4920_v31 = vpop.f32.mrf.mxu0  ;;  %v4922_v32 = vpop.f32.mrf.mxu1 }
 0x12b   : > { %5477 = vst [vmem:[#allocation2_spill] sm:$0xff] %v4922_v32 }
 0x12c   : > { %v4924_v33 = vpop.f32.mrf.mxu0  ;;  %v4926_v34 = vpop.f32.mrf.mxu1  ;;  %2619 = vmatmul.mubr.bf16.gmra.mxu1 %v4213_v28  ;;  %2812 = vmatmul.mubr.bf16.gmra.mxu0 %v4216_v29  ;;  %v4225_v28 = vld [vmem:[%s4345_s20 + $0x210] ss:$36 sps:$4 sm:$0xff]   ;;  %v4228_v29 = vld [vmem:[%s4345_s20 + $0x218] ss:$36 sps:$4 sm:$0xff]  }
 0x12d   : > { %5478 = vst [vmem:[#allocation3_spill] sm:$0xff] %v4926_v34  ;;  %2628 = vmatprep.mubr.bf16.mxu1 %v4219_v30  ;;  %2821 = vmatprep.mubr.bf16.mxu0 %v5475_v49  ;;  %v4231_v30 = vld [vmem:[%s4345_s20 + $0x25c] ss:$36 sps:$4 sm:$0xff]  }
 0x12e   : > { %v4929_v35 = vpop.f32.mrf.mxu0  ;;  %v4931_v36 = vpop.f32.mrf.mxu1 }
 0x12f   : > { %5479 = vst [vmem:[#allocation4_spill] sm:$0xff] %v4931_v36  ;;  %v4233_v36 = vld [vmem:[%s4345_s20 + $0x2a0] ss:$36 sps:$4 sm:$0xff]  }
 0x130   : > { %v4933_v37 = vpop.f32.mrf.mxu0  ;;  %v4935_v38 = vpop.f32.mrf.mxu1 }
 0x131   : > { %5480 = vst [vmem:[#allocation5_spill] sm:$0xff] %v4935_v38 }
 0x132   : > { %v4940_v42 = vpop.f32.mrf.mxu0  ;;  %v4942_v43 = vpop.f32.mrf.mxu1 }
 0x133   : > { %5481 = vst [vmem:[#allocation6_spill] sm:$0xff] %v4942_v43 }
 0x134   : > { %v4944_v44 = vpop.f32.mrf.mxu0  ;;  %v4946_v45 = vpop.f32.mrf.mxu1  ;;  %2629 = vmatmul.mubr.bf16.gmra.mxu1 %v4217_v39  ;;  %2822 = vmatmul.mubr.bf16.gmra.mxu0 %v4220_v40 }
 0x135   : > { %5482 = vst [vmem:[#allocation7_spill] sm:$0xff] %v4946_v45  ;;  %2638 = vmatprep.mubr.bf16.mxu1 %v4223_v41  ;;  %2831 = vmatprep.mubr.bf16.mxu0 %v5475_v49 }
 0x136   : > { %v4949_v46 = vpop.f32.mrf.mxu0  ;;  %v4951_v47 = vpop.f32.mrf.mxu1 }
 0x137   : > { %5483 = vst [vmem:[#allocation8_spill] sm:$0xff] %v4951_v47 }
 0x138   : > { %v4953_v48 = vpop.f32.mrf.mxu0  ;;  %v4955_v50 = vpop.f32.mrf.mxu1 }
 0x139   : > { %5484 = vst [vmem:[#allocation9_spill] sm:$0xff] %v4955_v50 }
 0x13a   : > { %v4960_v60 = vpop.f32.mrf.mxu0  ;;  %v4962_v61 = vpop.f32.mrf.mxu1 }
 0x13b   : > { %5485 = vst [vmem:[#allocation10_spill] sm:$0xff] %v4962_v61  ;;  %v4232_v61 = vld [vmem:[%s4345_s20 + $0x260] ss:$36 sps:$4 sm:$0xff]  }
 0x13c   : > { %v4964_v6 = vpop.f32.mrf.mxu0  ;;  %v4966_v7 = vpop.f32.mrf.mxu1  ;;  %2639 = vmatmul.mubr.bf16.gmra.mxu1 %v4221_v51  ;;  %2832 = vmatmul.mubr.bf16.gmra.mxu0 %v4224_v52 }
 0x13d   : > { %5486 = vst [vmem:[#allocation11_spill] sm:$0xff] %v4966_v7  ;;  %2648 = vmatprep.mubr.bf16.mxu1 %v4227_v59  ;;  %2841 = vmatprep.mubr.bf16.mxu0 %v5475_v49  ;;  %v4229_v7 = vld [vmem:[%s4345_s20 + $0x258] ss:$36 sps:$4 sm:$0xff]  }
 0x13e   : > { %v4969_v8 = vpop.f32.mrf.mxu0  ;;  %v4971_v17 = vpop.f32.mrf.mxu1 }
 0x13f   : > { %5487 = vst [vmem:[#allocation12_spill] sm:$0xff] %v4971_v17 }
 0x140   : > { %v4973_v18 = vpop.f32.mrf.mxu0  ;;  %v4975_v19 = vpop.f32.mrf.mxu1 }
 0x141   : > { %5488 = vst [vmem:[#allocation13_spill] sm:$0xff] %v4975_v19 }
 0x142   : > { %v4980_v39 = vpop.f32.mrf.mxu0  ;;  %v4982_v40 = vpop.f32.mrf.mxu1 }
 0x143   : > { %5489 = vst [vmem:[#allocation14_spill] sm:$0xff] %v4982_v40  ;;  %v4235_v40 = vld [vmem:[%s4345_s20 + $0x2a4] ss:$36 sps:$4 sm:$0xff]  }
 0x144   : > { %v4984_v41 = vpop.f32.mrf.mxu0  ;;  %v4986_v51 = vpop.f32.mrf.mxu1  ;;  %2649 = vmatmul.mubr.bf16.gmra.mxu1 %v4225_v28  ;;  %2842 = vmatmul.mubr.bf16.gmra.mxu0 %v4228_v29 }
 0x145   : > { %5490 = vst [vmem:[#allocation15_spill] sm:$0xff] %v4986_v51  ;;  %2658 = vmatprep.mubr.bf16.mxu1 %v4231_v30  ;;  %2851 = vmatprep.mubr.bf16.mxu0 %v5475_v49 }
 0x146   : > { %v4989_v52 = vpop.f32.mrf.mxu0  ;;  %v4991_v59 = vpop.f32.mrf.mxu1 }
 0x147   : > { %5491 = vst [vmem:[#allocation16_spill] sm:$0xff] %v4991_v59  ;;  %v5494_v59 = vmov 0  }
 0x148   : > { %v4993_v19 = vpop.f32.mrf.mxu0  ;;  %v4995_v17 = vpop.f32.mrf.mxu1 }
 0x149   : > { %5492 = vst [vmem:[#allocation17_spill] sm:$0xff] %v4995_v17 }
 0x14a   : > { %v5000_v50 = vpop.f32.mrf.mxu0  ;;  %v5002_v28 = vpop.f32.mrf.mxu1 }
 0x14b   : > { %5493 = vst [vmem:[#allocation18_spill] sm:$0xff] %v5002_v28  ;;  %v4236_v28 = vld [vmem:[%s4345_s20 + $0x2a8] ss:$36 sps:$4 sm:$0xff]  }
 0x14c   : > { %v2194_v29 = vpop.f32.mrf.mxu1  ;;  %v2387_v30 = vpop.f32.mrf.mxu0  ;;  %2659 = vmatmul.mubr.bf16.gmra.mxu1 %v4229_v7  ;;  %2852 = vmatmul.mubr.bf16.gmra.mxu0 %v4232_v61  ;;  %v4239_v61 = vld [vmem:[%s4345_s20 + $0x2ec] ss:$36 sps:$4 sm:$0xff]  }
 0x14d   : > { %v2195_v49 = vadd.f32 %v2194_v29, %v4844_v53  ;;  %2668 = vmatprep.mubr.bf16.mxu1 %v4235_v40  ;;  %2861 = vmatprep.mubr.bf16.mxu0 %v5494_v59 }
 0x14e   : > { %v2196_v17 = vpop.f32.mrf.mxu1  ;;  %v2389_v51 = vpop.f32.mrf.mxu0 }
 0x14f   : > { %v5006_v47 = vadd.f32 %v2387_v30, %v2195_v49  ;;  %v2197_v45 = vadd.f32 %v2196_v17, %v4849_v55 }
 0x150   : > { %v2198_v43 = vpop.f32.mrf.mxu1  ;;  %v2391_v38 = vpop.f32.mrf.mxu0 }
 0x151   : > { %v5011_v34 = vadd.f32 %v2389_v51, %v2197_v45  ;;  %v2199_v7 = vadd.f32 %v2198_v43, %v4853_v57  ;;  %v4237_v51 = vld [vmem:[%s4345_s20 + $0x2e8] ss:$36 sps:$4 sm:$0xff]  }
 0x152   : > { %v2200_v32 = vpop.f32.mrf.mxu1  ;;  %v2393_v53 = vpop.f32.mrf.mxu0 }
 0x153   : > { %v5015_v40 = vadd.f32 %v2391_v38, %v2199_v7  ;;  %v2201_v29 = vadd.f32 %v2200_v32, %v4860_v62  ;;  %v4240_v7 = vld [vmem:[%s4345_s20 + $0x2f0] ss:$36 sps:$4 sm:$0xff]  }
 0x154   : > { %v2204_v49 = vpop.f32.mrf.mxu1  ;;  %v2397_v30 = vpop.f32.mrf.mxu0  ;;  %2669 = vmatmul.mubr.bf16.gmra.mxu1 %v4233_v36  ;;  %2862 = vmatmul.mubr.bf16.gmra.mxu0 %v4236_v28 }
 0x155   : > { %v5018_v55 = vadd.f32 %v2393_v53, %v2201_v29  ;;  %v2205_v45 = vadd.f32 %v2204_v49, %v4864_v0  ;;  %2678 = vmatprep.mubr.bf16.mxu1 %v4239_v61  ;;  %2871 = vmatprep.mubr.bf16.mxu0 %v5494_v59  ;;  %v4243_v53 = vld [vmem:[%s4345_s20 + $0x334] ss:$36 sps:$4 sm:$0xff]  }
 0x156   : > { %v2206_v57 = vpop.f32.mrf.mxu1  ;;  %v2399_v43 = vpop.f32.mrf.mxu0 }
 0x157   : > { %v5022_v38 = vadd.f32 %v2397_v30, %v2205_v45  ;;  %v2207_v17 = vadd.f32 %v2206_v57, %v4869_v2 }
 0x158   : > { %v2208_v62 = vpop.f32.mrf.mxu1  ;;  %v2401_v32 = vpop.f32.mrf.mxu0 }
 0x159   : > { %v5027_v36 = vadd.f32 %v2399_v43, %v2207_v17  ;;  %v2209_v28 = vadd.f32 %v2208_v62, %v4873_v4 }
 0x15a   : > { %v2210_v29 = vpop.f32.mrf.mxu1  ;;  %v2403_v0 = vpop.f32.mrf.mxu0 }
 0x15b   : > { %v5031_v61 = vadd.f32 %v2401_v32, %v2209_v28  ;;  %v2211_v49 = vadd.f32 %v2210_v29, %v4880_v9  ;;  %v4241_v28 = vld [vmem:[%s4345_s20 + $0x330] ss:$36 sps:$4 sm:$0xff]   ;;  %v4244_v29 = vld [vmem:[%s4345_s20 + $0x338] ss:$36 sps:$4 sm:$0xff]  }
 0x15c   : > { %v2214_v30 = vpop.f32.mrf.mxu1  ;;  %v2407_v45 = vpop.f32.mrf.mxu0  ;;  %2679 = vmatmul.mubr.bf16.gmra.mxu1 %v4237_v51  ;;  %2872 = vmatmul.mubr.bf16.gmra.mxu0 %v4240_v7 }
 0x15d   : > { %v5034_v2 = vadd.f32 %v2403_v0, %v2211_v49  ;;  %v2215_v57 = vadd.f32 %v2214_v30, %v4884_v11  ;;  %2688 = vmatprep.mubr.bf16.mxu1 %v4243_v53  ;;  %2881 = vmatprep.mubr.bf16.mxu0 %v5494_v59  ;;  %v4247_v0 = vld [vmem:[%s4345_s20 + $0x37c] ss:$36 sps:$4 sm:$0xff]  }
 0x15e   : > { %v2216_v4 = vpop.f32.mrf.mxu1  ;;  %v2409_v43 = vpop.f32.mrf.mxu0 }
 0x15f   : > { %v5038_v17 = vadd.f32 %v2407_v45, %v2215_v57  ;;  %v2217_v62 = vadd.f32 %v2216_v4, %v4889_v13 }
 0x160   : > { %v2218_v9 = vpop.f32.mrf.mxu1  ;;  %v2411_v32 = vpop.f32.mrf.mxu0 }
 0x161   : > { %v5043_v51 = vadd.f32 %v2409_v43, %v2217_v62  ;;  %v2219_v7 = vadd.f32 %v2218_v9, %v4893_v15 }
 0x162   : > { %v2220_v49 = vpop.f32.mrf.mxu1  ;;  %v2413_v11 = vpop.f32.mrf.mxu0 }
 0x163   : > { %v5047_v53 = vadd.f32 %v2411_v32, %v2219_v7  ;;  %v2221_v30 = vadd.f32 %v2220_v49, %v4900_v20  ;;  %v4245_v7 = vld [vmem:[%s4345_s20 + $0x378] ss:$36 sps:$4 sm:$0xff]   ;;  %v4248_v49 = vld [vmem:[%s4345_s20 + $0x380] ss:$36 sps:$4 sm:$0xff]  }
 0x164   : > { %v2224_v45 = vpop.f32.mrf.mxu1  ;;  %v2417_v57 = vpop.f32.mrf.mxu0  ;;  %2689 = vmatmul.mubr.bf16.gmra.mxu1 %v4241_v28  ;;  %2882 = vmatmul.mubr.bf16.gmra.mxu0 %v4244_v29 }
 0x165   : > { %v5050_v13 = vadd.f32 %v2413_v11, %v2221_v30  ;;  %v2225_v4 = vadd.f32 %v2224_v45, %v4904_v22  ;;  %2698 = vmatprep.mubr.bf16.mxu1 %v4247_v0  ;;  %2891 = vmatprep.mubr.bf16.mxu0 %v5494_v59  ;;  %v4251_v11 = vld [vmem:[%s4345_s20 + $0x3c4] ss:$36 sps:$4 sm:$0xff]  }
 0x166   : > { %v2226_v15 = vpop.f32.mrf.mxu1  ;;  %v2419_v43 = vpop.f32.mrf.mxu0 }
 0x167   : > { %v5054_v62 = vadd.f32 %v2417_v57, %v2225_v4  ;;  %v2227_v9 = vadd.f32 %v2226_v15, %v4909_v24 }
 0x168   : > { %v2228_v20 = vpop.f32.mrf.mxu1  ;;  %v2421_v32 = vpop.f32.mrf.mxu0 }
 0x169   : > { %v5059_v28 = vadd.f32 %v2419_v43, %v2227_v9  ;;  %v2229_v29 = vadd.f32 %v2228_v20, %v4913_v26 }
 0x16a   : > { %v2230_v30 = vpop.f32.mrf.mxu1  ;;  %v2423_v22 = vpop.f32.mrf.mxu0 }
 0x16b   : > { %v5063_v0 = vadd.f32 %v2421_v32, %v2229_v29  ;;  %v2231_v45 = vadd.f32 %v2230_v30, %v4920_v31  ;;  %v4249_v29 = vld [vmem:[%s4345_s20 + $0x3c0] ss:$36 sps:$4 sm:$0xff]   ;;  %v4252_v30 = vld [vmem:[%s4345_s20 + $0x3c8] ss:$36 sps:$4 sm:$0xff]  }
 0x16c   : > { %v2234_v57 = vpop.f32.mrf.mxu1  ;;  %v2427_v4 = vpop.f32.mrf.mxu0  ;;  %2699 = vmatmul.mubr.bf16.gmra.mxu1 %v4245_v7  ;;  %2892 = vmatmul.mubr.bf16.gmra.mxu0 %v4248_v49 }
 0x16d   : > { %v5066_v24 = vadd.f32 %v2423_v22, %v2231_v45  ;;  %v2235_v15 = vadd.f32 %v2234_v57, %v4924_v33  ;;  %2708 = vmatprep.mubr.bf16.mxu1 %v4251_v11  ;;  %2901 = vmatprep.mubr.bf16.mxu0 %v5494_v59  ;;  %v4255_v22 = vld [vmem:[%s4345_s20 + $0x40c] ss:$36 sps:$4 sm:$0xff]  }
 0x16e   : > { %v2236_v26 = vpop.f32.mrf.mxu1  ;;  %v2429_v43 = vpop.f32.mrf.mxu0 }
 0x16f   : > { %v5070_v9 = vadd.f32 %v2427_v4, %v2235_v15  ;;  %v2237_v20 = vadd.f32 %v2236_v26, %v4929_v35 }
 0x170   : > { %v2238_v31 = vpop.f32.mrf.mxu1  ;;  %v2431_v32 = vpop.f32.mrf.mxu0 }
 0x171   : > { %v5075_v7 = vadd.f32 %v2429_v43, %v2237_v20  ;;  %v2239_v49 = vadd.f32 %v2238_v31, %v4933_v37 }
 0x172   : > { %v2240_v45 = vpop.f32.mrf.mxu1  ;;  %v2433_v33 = vpop.f32.mrf.mxu0 }
 0x173   : > { %v5079_v11 = vadd.f32 %v2431_v32, %v2239_v49  ;;  %v2241_v57 = vadd.f32 %v2240_v45, %v4940_v42  ;;  %v4253_v49 = vld [vmem:[%s4345_s20 + $0x408] ss:$36 sps:$4 sm:$0xff]   ;;  %v4256_v45 = vld [vmem:[%s4345_s20 + $0x410] ss:$36 sps:$4 sm:$0xff]  }
 0x174   : > { %v2244_v4 = vpop.f32.mrf.mxu1  ;;  %v2437_v15 = vpop.f32.mrf.mxu0  ;;  %2709 = vmatmul.mubr.bf16.gmra.mxu1 %v4249_v29  ;;  %2902 = vmatmul.mubr.bf16.gmra.mxu0 %v4252_v30 }
 0x175   : > { %v5082_v35 = vadd.f32 %v2433_v33, %v2241_v57  ;;  %v2245_v26 = vadd.f32 %v2244_v4, %v4944_v44  ;;  %2718 = vmatprep.mubr.bf16.mxu1 %v4255_v22  ;;  %2911 = vmatprep.mubr.bf16.mxu0 %v5494_v59  ;;  %v4259_v33 = vld [vmem:[%s4345_s20 + $0x454] ss:$36 sps:$4 sm:$0xff]  }
 0x176   : > { %v2246_v37 = vpop.f32.mrf.mxu1  ;;  %v2439_v43 = vpop.f32.mrf.mxu0 }
 0x177   : > { %v5086_v20 = vadd.f32 %v2437_v15, %v2245_v26  ;;  %v2247_v31 = vadd.f32 %v2246_v37, %v4949_v46 }
 0x178   : > { %v2248_v42 = vpop.f32.mrf.mxu1  ;;  %v2441_v32 = vpop.f32.mrf.mxu0 }
 0x179   : > { %v5091_v29 = vadd.f32 %v2439_v43, %v2247_v31  ;;  %v2249_v30 = vadd.f32 %v2248_v42, %v4953_v48 }
 0x17a   : > { %v2250_v57 = vpop.f32.mrf.mxu1  ;;  %v2443_v44 = vpop.f32.mrf.mxu0 }
 0x17b   : > { %v5095_v22 = vadd.f32 %v2441_v32, %v2249_v30  ;;  %v2251_v4 = vadd.f32 %v2250_v57, %v4960_v60  ;;  %v4257_v30 = vld [vmem:[%s4345_s20 + $0x450] ss:$36 sps:$4 sm:$0xff]   ;;  %v4260_v57 = vld [vmem:[%s4345_s20 + $0x458] ss:$36 sps:$4 sm:$0xff]  }
 0x17c   : > { %v2254_v15 = vpop.f32.mrf.mxu1  ;;  %v2447_v26 = vpop.f32.mrf.mxu0  ;;  %2719 = vmatmul.mubr.bf16.gmra.mxu1 %v4253_v49  ;;  %2912 = vmatmul.mubr.bf16.gmra.mxu0 %v4256_v45 }
 0x17d   : > { %5495 = vst [vmem:[#allocation19_spill] sm:$0xff] %v5095_v22  ;;  %v5098_v46 = vadd.f32 %v2443_v44, %v2251_v4  ;;  %v2255_v37 = vadd.f32 %v2254_v15, %v4964_v6  ;;  %2728 = vmatprep.mubr.bf16.mxu1 %v4259_v33  ;;  %2921 = vmatprep.mubr.bf16.mxu0 %v5494_v59 }
 0x17e   : > { %v2256_v48 = vpop.f32.mrf.mxu1  ;;  %v2449_v43 = vpop.f32.mrf.mxu0 }
 0x17f   : > { %v5102_v31 = vadd.f32 %v2447_v26, %v2255_v37  ;;  %v2257_v42 = vadd.f32 %v2256_v48, %v4969_v8 }
 0x180   : > { %v2258_v32 = vpop.f32.mrf.mxu1  ;;  %v2451_v60 = vpop.f32.mrf.mxu0 }
 0x181   : > { %v5107_v22 = vadd.f32 %v2449_v43, %v2257_v42  ;;  %v2259_v49 = vadd.f32 %v2258_v32, %v4973_v18 }
 0x182   : > { %v2260_v45 = vpop.f32.mrf.mxu1  ;;  %v2453_v44 = vpop.f32.mrf.mxu0 }
 0x183   : > { %v5110_v6 = vadd.f32 %v2451_v60, %v2259_v49  ;;  %v2261_v59 = vadd.f32 %v2260_v45, %v4980_v39 }
 0x184   : > { %v2264_v33 = vpop.f32.mrf.mxu1  ;;  %v2457_v4 = vpop.f32.mrf.mxu0  ;;  %2729 = vmatmul.mubr.bf16.gmra.mxu1 %v4257_v30  ;;  %2922 = vmatmul.mubr.bf16.gmra.mxu0 %v4260_v57 }
 0x185   : > { %v5113_v15 = vadd.f32 %v2453_v44, %v2261_v59  ;;  %v2265_v8 = vadd.f32 %v2264_v33, %v4984_v41 }
 0x186   : > { %v2266_v26 = vpop.f32.mrf.mxu1  ;;  %v2459_v37 = vpop.f32.mrf.mxu0 }
 0x187   : > { %v5116_v48 = vadd.f32 %v2457_v4, %v2265_v8  ;;  %v2267_v18 = vadd.f32 %v2266_v26, %v4989_v52 }
 0x188   : > { %v2268_v43 = vpop.f32.mrf.mxu1  ;;  %v2461_v42 = vpop.f32.mrf.mxu0 }
 0x189   : > { %v5119_v32 = vadd.f32 %v2459_v37, %v2267_v18  ;;  %v2269_v39 = vadd.f32 %v2268_v43, %v4993_v19 }
 0x18a   : > { %v2270_v60 = vpop.f32.mrf.mxu1  ;;  %v2463_v49 = vpop.f32.mrf.mxu0 }
 0x18b   : > { %v5122_v30 = vadd.f32 %v2461_v42, %v2269_v39  ;;  %v2271_v57 = vadd.f32 %v2270_v60, %v5000_v50 }
 0x18c   : > { %v2274_v45 = vpop.f32.mrf.mxu1  ;;  %v2467_v41 = vpop.f32.mrf.mxu0 }
 0x18d   : > { %v5125_v44 = vadd.f32 %v2463_v49, %v2271_v57  ;;  %v2275_v59 = vadd.f32 %v2274_v45, %v4846_v54 }
 0x18e   : > { %v2276_v33 = vpop.f32.mrf.mxu1  ;;  %v2469_v52 = vpop.f32.mrf.mxu0 }
 0x18f   : > { %v5128_v4 = vadd.f32 %v2467_v41, %v2275_v59  ;;  %v2277_v8 = vadd.f32 %v2276_v33, %v4851_v56 }
 0x190   : > { %v2278_v26 = vpop.f32.mrf.mxu1  ;;  %v2471_v19 = vpop.f32.mrf.mxu0 }
 0x191   : > { %v5131_v37 = vadd.f32 %v2469_v52, %v2277_v8  ;;  %v2279_v18 = vadd.f32 %v2278_v26, %v4855_v58 }
 0x192   : > { %v2280_v43 = vpop.f32.mrf.mxu1  ;;  %v2473_v50 = vpop.f32.mrf.mxu0 }
 0x193   : > { %v5134_v42 = vadd.f32 %v2471_v19, %v2279_v18  ;;  %v2281_v39 = vadd.f32 %v2280_v43, %v4862_v63 }
 0x194   : > { %v2284_v60 = vpop.f32.mrf.mxu1  ;;  %v2477_v54 = vpop.f32.mrf.mxu0 }
 0x195   : > { %v5137_v49 = vadd.f32 %v2473_v50, %v2281_v39  ;;  %v2285_v57 = vadd.f32 %v2284_v60, %v4866_v1 }
 0x196   : > { %v2286_v45 = vpop.f32.mrf.mxu1  ;;  %v2479_v56 = vpop.f32.mrf.mxu0 }
 0x197   : > { %v5140_v41 = vadd.f32 %v2477_v54, %v2285_v57  ;;  %v2287_v59 = vadd.f32 %v2286_v45, %v4871_v3 }
 0x198   : > { %v2288_v33 = vpop.f32.mrf.mxu1  ;;  %v2481_v58 = vpop.f32.mrf.mxu0 }
 0x199   : > { %v5143_v52 = vadd.f32 %v2479_v56, %v2287_v59  ;;  %v2289_v8 = vadd.f32 %v2288_v33, %v4875_v5 }
 0x19a   : > { %v2290_v26 = vpop.f32.mrf.mxu1  ;;  %v2483_v63 = vpop.f32.mrf.mxu0 }
 0x19b   : > { %v5146_v19 = vadd.f32 %v2481_v58, %v2289_v8  ;;  %v2291_v18 = vadd.f32 %v2290_v26, %v4882_v10 }
 0x19c   : > { %v2294_v43 = vpop.f32.mrf.mxu1  ;;  %v2487_v1 = vpop.f32.mrf.mxu0 }
 0x19d   : > { %v5149_v50 = vadd.f32 %v2483_v63, %v2291_v18  ;;  %v2295_v39 = vadd.f32 %v2294_v43, %v4886_v12 }
 0x19e   : > { %v2296_v60 = vpop.f32.mrf.mxu1  ;;  %v2489_v3 = vpop.f32.mrf.mxu0 }
 0x19f   : > { %v5152_v54 = vadd.f32 %v2487_v1, %v2295_v39  ;;  %v2297_v57 = vadd.f32 %v2296_v60, %v4891_v14 }
 0x1a0   : > { %v2298_v45 = vpop.f32.mrf.mxu1  ;;  %v2491_v5 = vpop.f32.mrf.mxu0 }
 0x1a1   : > { %v5155_v56 = vadd.f32 %v2489_v3, %v2297_v57  ;;  %v2299_v59 = vadd.f32 %v2298_v45, %v4895_v16 }
 0x1a2   : > { %v2300_v33 = vpop.f32.mrf.mxu1  ;;  %v2493_v10 = vpop.f32.mrf.mxu0 }
 0x1a3   : > { %v5158_v58 = vadd.f32 %v2491_v5, %v2299_v59  ;;  %v2301_v8 = vadd.f32 %v2300_v33, %v4902_v21  ;;  %v5500_v59 = vld [vmem:[#allocation2_spill] sm:$0xff] }
 0x1a4   : > { %v2304_v26 = vpop.f32.mrf.mxu1  ;;  %v2497_v12 = vpop.f32.mrf.mxu0 }
 0x1a5   : > { %v5161_v63 = vadd.f32 %v2493_v10, %v2301_v8  ;;  %v2305_v18 = vadd.f32 %v2304_v26, %v4906_v23  ;;  %v5502_v26 = vld [vmem:[#allocation3_spill] sm:$0xff] }
 0x1a6   : > { %v2306_v43 = vpop.f32.mrf.mxu1  ;;  %v2499_v14 = vpop.f32.mrf.mxu0 }
 0x1a7   : > { %5496 = vst [vmem:[#allocation20_spill] sm:$0xff] %v5161_v63  ;;  %v5164_v1 = vadd.f32 %v2497_v12, %v2305_v18  ;;  %v2307_v39 = vadd.f32 %v2306_v43, %v4911_v25 }
 0x1a8   : > { %v2308_v60 = vpop.f32.mrf.mxu1  ;;  %v2501_v16 = vpop.f32.mrf.mxu0 }
 0x1a9   : > { %5497 = vst [vmem:[#allocation21_spill] sm:$0xff] %v5164_v1  ;;  %v5167_v3 = vadd.f32 %v2499_v14, %v2307_v39  ;;  %v2309_v57 = vadd.f32 %v2308_v60, %v4915_v27  ;;  %v5504_v14 = vld [vmem:[#allocation4_spill] sm:$0xff] }
 0x1aa   : > { %v2310_v45 = vpop.f32.mrf.mxu1  ;;  %v2503_v21 = vpop.f32.mrf.mxu0 }
 0x1ab   : > { %5498 = vst [vmem:[#allocation22_spill] sm:$0xff] %v5167_v3  ;;  %v5170_v5 = vadd.f32 %v2501_v16, %v2309_v57  ;;  %v2311_v33 = vadd.f32 %v2310_v45, %v5500_v59  ;;  %v5506_v16 = vld [vmem:[#allocation5_spill] sm:$0xff] }
 0x1ac   : > { %v2314_v10 = vpop.f32.mrf.mxu1  ;;  %v2507_v23 = vpop.f32.mrf.mxu0 }
 0x1ad   : > { %5499 = vst [vmem:[#allocation23_spill] sm:$0xff] %v5170_v5  ;;  %v5173_v8 = vadd.f32 %v2503_v21, %v2311_v33  ;;  %v2315_v12 = vadd.f32 %v2314_v10, %v5502_v26  ;;  %v5508_v21 = vld [vmem:[#allocation6_spill] sm:$0xff] }
 0x1ae   : > { %v2316_v18 = vpop.f32.mrf.mxu1  ;;  %v2509_v25 = vpop.f32.mrf.mxu0 }
 0x1af   : > { %5501 = vst [vmem:[#allocation2_spill] sm:$0xff] %v5173_v8  ;;  %v5176_v43 = vadd.f32 %v2507_v23, %v2315_v12  ;;  %v2317_v39 = vadd.f32 %v2316_v18, %v5504_v14  ;;  %v5510_v23 = vld [vmem:[#allocation7_spill] sm:$0xff] }
 0x1b0   : > { %v2318_v3 = vpop.f32.mrf.mxu1  ;;  %v2511_v27 = vpop.f32.mrf.mxu0 }
 0x1b1   : > { %5503 = vst [vmem:[#allocation3_spill] sm:$0xff] %v5176_v43  ;;  %v5179_v60 = vadd.f32 %v2509_v25, %v2317_v39  ;;  %v2319_v57 = vadd.f32 %v2318_v3, %v5506_v16  ;;  %v5512_v25 = vld [vmem:[#allocation8_spill] sm:$0xff] }
 0x1b2   : > { %v2320_v5 = vpop.f32.mrf.mxu1  ;;  %v2513_v45 = vpop.f32.mrf.mxu0 }
 0x1b3   : > { %5505 = vst [vmem:[#allocation4_spill] sm:$0xff] %v5179_v60  ;;  %v5182_v59 = vadd.f32 %v2511_v27, %v2319_v57  ;;  %v2321_v33 = vadd.f32 %v2320_v5, %v5508_v21  ;;  %v5514_v27 = vld [vmem:[#allocation9_spill] sm:$0xff] }
 0x1b4   : > { %v2324_v8 = vpop.f32.mrf.mxu1  ;;  %v2517_v10 = vpop.f32.mrf.mxu0 }
 0x1b5   : > { %5507 = vst [vmem:[#allocation5_spill] sm:$0xff] %v5182_v59  ;;  %v5185_v26 = vadd.f32 %v2513_v45, %v2321_v33  ;;  %v2325_v12 = vadd.f32 %v2324_v8, %v5510_v23  ;;  %v5516_v45 = vld [vmem:[#allocation10_spill] sm:$0xff] }
 0x1b6   : > { %v2326_v43 = vpop.f32.mrf.mxu1  ;;  %v2519_v18 = vpop.f32.mrf.mxu0 }
 0x1b7   : > { %5509 = vst [vmem:[#allocation6_spill] sm:$0xff] %v5185_v26  ;;  %v5188_v14 = vadd.f32 %v2517_v10, %v2325_v12  ;;  %v2327_v39 = vadd.f32 %v2326_v43, %v5512_v25  ;;  %v5518_v10 = vld [vmem:[#allocation11_spill] sm:$0xff] }
 0x1b8   : > { %v2328_v60 = vpop.f32.mrf.mxu1  ;;  %v2521_v3 = vpop.f32.mrf.mxu0 }
 0x1b9   : > { %5511 = vst [vmem:[#allocation7_spill] sm:$0xff] %v5188_v14  ;;  %v5191_v16 = vadd.f32 %v2519_v18, %v2327_v39  ;;  %v2329_v57 = vadd.f32 %v2328_v60, %v5514_v27  ;;  %v5520_v18 = vld [vmem:[#allocation12_spill] sm:$0xff] }
 0x1ba   : > { %v2330_v59 = vpop.f32.mrf.mxu1  ;;  %v2523_v5 = vpop.f32.mrf.mxu0 }
 0x1bb   : > { %5513 = vst [vmem:[#allocation8_spill] sm:$0xff] %v5191_v16  ;;  %v5194_v21 = vadd.f32 %v2521_v3, %v2329_v57  ;;  %v2331_v33 = vadd.f32 %v2330_v59, %v5516_v45  ;;  %v5522_v3 = vld [vmem:[#allocation13_spill] sm:$0xff] }
 0x1bc   : > { %v2334_v26 = vpop.f32.mrf.mxu1  ;;  %v2527_v8 = vpop.f32.mrf.mxu0 }
 0x1bd   : > { %5515 = vst [vmem:[#allocation9_spill] sm:$0xff] %v5194_v21  ;;  %v5197_v23 = vadd.f32 %v2523_v5, %v2331_v33  ;;  %v2335_v12 = vadd.f32 %v2334_v26, %v5518_v10  ;;  %v2934_v21 = vlaneseq  ;;  %v5524_v5 = vld [vmem:[#allocation14_spill] sm:$0xff] }
 0x1be   : > { %v2336_v14 = vpop.f32.mrf.mxu1  ;;  %v2529_v43 = vpop.f32.mrf.mxu0 }
 0x1bf   : > { %5517 = vst [vmem:[#allocation10_spill] sm:$0xff] %v5197_v23  ;;  %v5200_v25 = vadd.f32 %v2527_v8, %v2335_v12  ;;  %v2337_v39 = vadd.f32 %v2336_v14, %v5520_v18  ;;  %v5525_v8 = vld [vmem:[#allocation15_spill] sm:$0xff]  ;;  %v2935_v14 = vshrl.u32 %v2934_v21, 7 }
 0x1c0   : > { %v2338_v16 = vpop.f32.mrf.mxu1  ;;  %v2531_v60 = vpop.f32.mrf.mxu0 }
 0x1c1   : > { %5519 = vst [vmem:[#allocation11_spill] sm:$0xff] %v5200_v25  ;;  %v5203_v27 = vadd.f32 %v2529_v43, %v2337_v39  ;;  %v2339_v57 = vadd.f32 %v2338_v16, %v5522_v3  ;;  %v5527_v39 = vld [vmem:[#allocation16_spill] sm:$0xff] }
 0x1c2   : > { %v2340_v59 = vpop.f32.mrf.mxu1  ;;  %v2533_v45 = vpop.f32.mrf.mxu0 }
 0x1c3   : > { %5521 = vst [vmem:[#allocation12_spill] sm:$0xff] %v5203_v27  ;;  %v5206_v1 = vadd.f32 %v2531_v60, %v2339_v57  ;;  %v2341_v33 = vadd.f32 %v2340_v59, %v5524_v5  ;;  %v5529_v60 = vld [vmem:[#allocation17_spill] sm:$0xff]  ;;  %v2936_v59 = vsub.s32 0, %v2935_v14 }
 0x1c4   : > { %v2344_v26 = vpop.f32.mrf.mxu1  ;;  %v2537_v10 = vpop.f32.mrf.mxu0 }
 0x1c5   : > { %5523 = vst [vmem:[#allocation13_spill] sm:$0xff] %v5206_v1  ;;  %v5209_v23 = vadd.f32 %v2533_v45, %v2341_v33  ;;  %v2345_v12 = vadd.f32 %v2344_v26, %v5525_v8  ;;  %v2932_v45 = vld [vmem:[%s5472_s2] sm:$0x3] }
 0x1c6   : > { %v2346_v18 = vpop.f32.mrf.mxu1  ;;  %v2539_v25 = vpop.f32.mrf.mxu0  ;;  %v5531_v33 = vld [vmem:[#allocation18_spill] sm:$0xff] }
 0x1c7   : > { %v5212_v43 = vadd.f32 %v2537_v10, %v2345_v12  ;;  %v2347_v16 = vadd.f32 %v2346_v18, %v5527_v39  ;;  %v2940_v10 = vsub.s32 1, %v2935_v14 }
 0x1c8   : > { %v2348_v3 = vpop.f32.mrf.mxu1  ;;  %v2541_v27 = vpop.f32.mrf.mxu0 }
 0x1c9   : > { %5526 = vst [vmem:[#allocation14_spill] sm:$0xff] %v5212_v43  ;;  %v5215_v63 = vadd.f32 %v2539_v25, %v2347_v16  ;;  %v2349_v57 = vadd.f32 %v2348_v3, %v5529_v60  ;;  %v3008_v25 = vld [vmem:[%s5473_s3] sm:$0x3]  ;;  %v5230_v16 = vrot.slane %v2932_v45, %v2936_v59  ;;  %v5235_v14 = vrot.slane %v2932_v45, %v2940_v10 }
 0x1ca   : > { %v2350_v5 = vpop.f32.mrf.mxu1  ;;  %v2543_v1 = vpop.f32.mrf.mxu0 }
 0x1cb   : > { %5528 = vst [vmem:[#allocation15_spill] sm:$0xff] %v5215_v63  ;;  %v5221_v21 = vadd.f32 %v2541_v27, %v2349_v57  ;;  %v2351_v26 = vadd.f32 %v2350_v5, %v5531_v33  ;;  %v5232_v27 = vrot.slane %v3008_v25, %v2936_v59 }
 0x1cc   : > { %v2580_v8 = vpop.f32.mrf.mxu1  ;;  %v2773_v12 = vpop.f32.mrf.mxu0 }
 0x1cd   : > { %5530 = vst [vmem:[#allocation16_spill] sm:$0xff] %v5221_v21  ;;  %v5227_v18 = vadd.f32 %v2543_v1, %v2351_v26  ;;  %v2581_v39 = vadd.f32 %v2580_v8, %v5006_v47  ;;  %v5238_v26 = vrot.slane %v3008_v25, %v2940_v10 }
 0x1ce   : > { %v2582_v3 = vpop.f32.mrf.mxu1  ;;  %v2775_v60 = vpop.f32.mrf.mxu0 }
 0x1cf   : > { %5532 = vst [vmem:[#allocation17_spill] sm:$0xff] %v5227_v18  ;;  %v2774_v63 = vadd.f32 %v2773_v12, %v2581_v39  ;;  %v2583_v57 = vadd.f32 %v2582_v3, %v5011_v34 }
 0x1d0   : > { %v2584_v5 = vpop.f32.mrf.mxu1  ;;  %v2777_v33 = vpop.f32.mrf.mxu0 }
 0x1d1   : > { %v2944_v21 = vmul.f32 %v5230_v16, %v2774_v63  ;;  %v2776_v1 = vadd.f32 %v2775_v60, %v2583_v57  ;;  %v2585_v47 = vadd.f32 %v2584_v5, %v5015_v40 }
 0x1d2   : > { %v2586_v8 = vpop.f32.mrf.mxu1  ;;  %v2779_v18 = vpop.f32.mrf.mxu0 }
 0x1d3   : > { %v3020_v12 = vadd.f32 %v5232_v27, %v2944_v21  ;;  %v2945_v59 = vmul.f32 %v5235_v14, %v2776_v1  ;;  %v2778_v39 = vadd.f32 %v2777_v33, %v2585_v47  ;;  %v2587_v34 = vadd.f32 %v2586_v8, %v5018_v55 }
 0x1d4   : > { %v2590_v45 = vpop.f32.mrf.mxu1  ;;  %v2783_v3 = vpop.f32.mrf.mxu0 }
 0x1d5   : > { %v3021_v43 = vadd.f32 %v5238_v26, %v2945_v59  ;;  %v2946_v63 = vmul.f32 %v5230_v16, %v2778_v39  ;;  %v2780_v10 = vadd.f32 %v2779_v18, %v2587_v34  ;;  %v3084_v25 = vmax.f32 %v3020_v12, 0.0 }
 0x1d6   : > { %v2591_v40 = vadd.f32 %v2590_v45, %v5022_v38  ;;  %v2592_v60 = vpop.f32.mrf.mxu1  ;;  %v2785_v57 = vpop.f32.mrf.mxu0 }
 0x1d7   : > { %v3085_v5 = vmax.f32 %v3021_v43, 0.0  ;;  %v3022_v21 = vadd.f32 %v5232_v27, %v2946_v63  ;;  %v2947_v33 = vmul.f32 %v5235_v14, %v2780_v10  ;;  %v2593_v55 = vadd.f32 %v2592_v60, %v5027_v36 }
 0x1d8   : > { %v2784_v1 = vadd.f32 %v2783_v3, %v2591_v40  ;;  %v2594_v18 = vpop.f32.mrf.mxu1  ;;  %v2787_v47 = vpop.f32.mrf.mxu0 }
 0x1d9   : > { %v3763_v8 = vpack.c.bf16 %v3085_v5, %v3084_v25  ;;  %v3023_v38 = vadd.f32 %v5238_v26, %v2947_v33  ;;  %v2786_v12 = vadd.f32 %v2785_v57, %v2593_v55  ;;  %v2595_v59 = vadd.f32 %v2594_v18, %v5031_v61 }
 0x1da   : > { %v2948_v43 = vmul.f32 %v5230_v16, %v2784_v1  ;;  %v2596_v39 = vpop.f32.mrf.mxu1  ;;  %v2789_v34 = vpop.f32.mrf.mxu0  ;;  %v3086_v36 = vmax.f32 %v3022_v21, 0.0 }
 0x1db   : > { %3340 = vst [vmem:[%s5254_s27] sm:$0xff] %v3763_v8  ;;  %v3087_v45 = vmax.f32 %v3023_v38, 0.0  ;;  %v2949_v63 = vmul.f32 %v5235_v14, %v2786_v12  ;;  %v2597_v3 = vadd.f32 %v2596_v39, %v5034_v2  ;;  %v2788_v25 = vadd.f32 %v2787_v47, %v2595_v59 }
 0x1dc   : > { %v3024_v10 = vadd.f32 %v5232_v27, %v2948_v43  ;;  %v2600_v40 = vpop.f32.mrf.mxu1  ;;  %v2793_v60 = vpop.f32.mrf.mxu0 }
 0x1dd   : > { %v3764_v57 = vpack.c.bf16 %v3087_v45, %v3086_v36  ;;  %v3025_v5 = vadd.f32 %v5238_v26, %v2949_v63  ;;  %v2790_v33 = vadd.f32 %v2789_v34, %v2597_v3  ;;  %v2601_v61 = vadd.f32 %v2600_v40, %v5038_v17 }
 0x1de   : > { %v3088_v55 = vmax.f32 %v3024_v10, 0.0  ;;  %v2950_v21 = vmul.f32 %v5230_v16, %v2788_v25  ;;  %v2602_v1 = vpop.f32.mrf.mxu1  ;;  %v2795_v18 = vpop.f32.mrf.mxu0 }
 0x1df   : > { %3341 = vst [vmem:[%s5254_s27 + $0x8] sm:$0xff] %v3764_v57  ;;  %v3089_v8 = vmax.f32 %v3025_v5, 0.0  ;;  %v2951_v2 = vmul.f32 %v5235_v14, %v2790_v33  ;;  %v2794_v38 = vadd.f32 %v2793_v60, %v2601_v61  ;;  %v2603_v47 = vadd.f32 %v2602_v1, %v5043_v51 }
 0x1e0   : > { %v3026_v12 = vadd.f32 %v5232_v27, %v2950_v21  ;;  %v2604_v43 = vpop.f32.mrf.mxu1  ;;  %v2797_v59 = vpop.f32.mrf.mxu0 }
 0x1e1   : > { %v3765_v39 = vpack.c.bf16 %v3089_v8, %v3088_v55  ;;  %v3027_v17 = vadd.f32 %v5238_v26, %v2951_v2  ;;  %v2952_v34 = vmul.f32 %v5230_v16, %v2794_v38  ;;  %v2796_v36 = vadd.f32 %v2795_v18, %v2603_v47 }
 0x1e2   : > { %v3090_v45 = vmax.f32 %v3026_v12, 0.0  ;;  %v2605_v63 = vadd.f32 %v2604_v43, %v5047_v53  ;;  %v2606_v3 = vpop.f32.mrf.mxu1  ;;  %v2799_v10 = vpop.f32.mrf.mxu0 }
 0x1e3   : > { %3342 = vst [vmem:[%s5254_s27 + $0x10] sm:$0xff] %v3765_v39  ;;  %v3091_v25 = vmax.f32 %v3027_v17, 0.0  ;;  %v3028_v51 = vadd.f32 %v5232_v27, %v2952_v34  ;;  %v2953_v40 = vmul.f32 %v5235_v14, %v2796_v36  ;;  %v2607_v60 = vadd.f32 %v2606_v3, %v5050_v13 }
 0x1e4   : > { %v2798_v57 = vadd.f32 %v2797_v59, %v2605_v63  ;;  %v2610_v5 = vpop.f32.mrf.mxu1  ;;  %v2803_v33 = vpop.f32.mrf.mxu0 }
 0x1e5   : > { %v3766_v61 = vpack.c.bf16 %v3091_v25, %v3090_v45  ;;  %v3029_v55 = vadd.f32 %v5238_v26, %v2953_v40  ;;  %v2800_v21 = vadd.f32 %v2799_v10, %v2607_v60  ;;  %v2611_v1 = vadd.f32 %v2610_v5, %v5054_v62 }
 0x1e6   : > { %v2954_v53 = vmul.f32 %v5230_v16, %v2798_v57  ;;  %v2612_v18 = vpop.f32.mrf.mxu1  ;;  %v2805_v8 = vpop.f32.mrf.mxu0  ;;  %v3092_v2 = vmax.f32 %v3028_v51, 0.0 }
 0x1e7   : > { %3343 = vst [vmem:[%s5254_s27 + $0x18] sm:$0xff] %v3766_v61  ;;  %v3093_v38 = vmax.f32 %v3029_v55, 0.0  ;;  %v2955_v47 = vmul.f32 %v5235_v14, %v2800_v21  ;;  %v2613_v13 = vadd.f32 %v2612_v18, %v5059_v28  ;;  %v2804_v43 = vadd.f32 %v2803_v33, %v2611_v1 }
 0x1e8   : > { %v3030_v12 = vadd.f32 %v5232_v27, %v2954_v53  ;;  %v2614_v59 = vpop.f32.mrf.mxu1  ;;  %v2807_v39 = vpop.f32.mrf.mxu0 }
 0x1e9   : > { %v3767_v17 = vpack.c.bf16 %v3093_v38, %v3092_v2  ;;  %v3031_v34 = vadd.f32 %v5238_v26, %v2955_v47  ;;  %v2806_v36 = vadd.f32 %v2805_v8, %v2613_v13  ;;  %v2615_v62 = vadd.f32 %v2614_v59, %v5063_v0 }
 0x1ea   : > { %v3094_v45 = vmax.f32 %v3030_v12, 0.0  ;;  %v2956_v63 = vmul.f32 %v5230_v16, %v2804_v43  ;;  %v2616_v3 = vpop.f32.mrf.mxu1  ;;  %v2809_v10 = vpop.f32.mrf.mxu0 }
 0x1eb   : > { %3344 = vst [vmem:[%s5254_s27 + $0x20] sm:$0xff] %v3767_v17  ;;  %v3095_v25 = vmax.f32 %v3031_v34, 0.0  ;;  %v2957_v28 = vmul.f32 %v5235_v14, %v2806_v36  ;;  %v2808_v51 = vadd.f32 %v2807_v39, %v2615_v62  ;;  %v2617_v40 = vadd.f32 %v2616_v3, %v5066_v24 }
 0x1ec   : > { %v3032_v60 = vadd.f32 %v5232_v27, %v2956_v63  ;;  %v2620_v57 = vpop.f32.mrf.mxu1  ;;  %v2813_v5 = vpop.f32.mrf.mxu0 }
 0x1ed   : > { %v3768_v33 = vpack.c.bf16 %v3095_v25, %v3094_v45  ;;  %v3033_v0 = vadd.f32 %v5238_v26, %v2957_v28  ;;  %v2958_v61 = vmul.f32 %v5230_v16, %v2808_v51  ;;  %v2810_v55 = vadd.f32 %v2809_v10, %v2617_v40 }
 0x1ee   : > { %v3096_v21 = vmax.f32 %v3032_v60, 0.0  ;;  %v2621_v53 = vadd.f32 %v2620_v57, %v5070_v9  ;;  %v2622_v1 = vpop.f32.mrf.mxu1  ;;  %v2815_v18 = vpop.f32.mrf.mxu0 }
 0x1ef   : > { %3345 = vst [vmem:[%s5254_s27 + $0x28] sm:$0xff] %v3768_v33  ;;  %v3097_v8 = vmax.f32 %v3033_v0, 0.0  ;;  %v3034_v24 = vadd.f32 %v5232_v27, %v2958_v61  ;;  %v2959_v2 = vmul.f32 %v5235_v14, %v2810_v55  ;;  %v2623_v38 = vadd.f32 %v2622_v1, %v5075_v7 }
 0x1f0   : > { %v2814_v47 = vadd.f32 %v2813_v5, %v2621_v53  ;;  %v2624_v13 = vpop.f32.mrf.mxu1  ;;  %v2817_v12 = vpop.f32.mrf.mxu0 }
 0x1f1   : > { %v3769_v43 = vpack.c.bf16 %v3097_v8, %v3096_v21  ;;  %v3035_v59 = vadd.f32 %v5238_v26, %v2959_v2  ;;  %v2816_v39 = vadd.f32 %v2815_v18, %v2623_v38  ;;  %v2625_v17 = vadd.f32 %v2624_v13, %v5079_v11 }
 0x1f2   : > { %v2960_v9 = vmul.f32 %v5230_v16, %v2814_v47  ;;  %v2626_v34 = vpop.f32.mrf.mxu1  ;;  %v2819_v36 = vpop.f32.mrf.mxu0  ;;  %v3098_v62 = vmax.f32 %v3034_v24, 0.0  ;;  %v5533_v47 = vld [vmem:[#allocation19_spill] sm:$0xff] }
 0x1f3   : > { %3346 = vst [vmem:[%s5254_s27 + $0x30] sm:$0xff] %v3769_v43  ;;  %v3099_v45 = vmax.f32 %v3035_v59, 0.0  ;;  %v2961_v63 = vmul.f32 %v5235_v14, %v2816_v39  ;;  %v2627_v7 = vadd.f32 %v2626_v34, %v5082_v35  ;;  %v2818_v10 = vadd.f32 %v2817_v12, %v2625_v17 }
 0x1f4   : > { %v3036_v3 = vadd.f32 %v5232_v27, %v2960_v9  ;;  %v2630_v25 = vpop.f32.mrf.mxu1  ;;  %v2823_v28 = vpop.f32.mrf.mxu0 }
 0x1f5   : > { %v3770_v51 = vpack.c.bf16 %v3099_v45, %v3098_v62  ;;  %v3037_v40 = vadd.f32 %v5238_v26, %v2961_v63  ;;  %v2820_v60 = vadd.f32 %v2819_v36, %v2627_v7  ;;  %v2631_v11 = vadd.f32 %v2630_v25, %v5086_v20 }
 0x1f6   : > { %v3100_v57 = vmax.f32 %v3036_v3, 0.0  ;;  %v2962_v5 = vmul.f32 %v5230_v16, %v2818_v10  ;;  %v2632_v33 = vpop.f32.mrf.mxu1  ;;  %v2825_v0 = vpop.f32.mrf.mxu0 }
 0x1f7   : > { %3347 = vst [vmem:[%s5254_s27 + $0x38] sm:$0xff] %v3770_v51  ;;  %v3101_v61 = vmax.f32 %v3037_v40, 0.0  ;;  %v2963_v35 = vmul.f32 %v5235_v14, %v2820_v60  ;;  %v2824_v55 = vadd.f32 %v2823_v28, %v2631_v11  ;;  %v2633_v21 = vadd.f32 %v2632_v33, %v5091_v29 }
 0x1f8   : > { %v3038_v53 = vadd.f32 %v5232_v27, %v2962_v5  ;;  %v2634_v1 = vpop.f32.mrf.mxu1  ;;  %v2827_v18 = vpop.f32.mrf.mxu0 }
 0x1f9   : > { %v3771_v8 = vpack.c.bf16 %v3101_v61, %v3100_v57  ;;  %v3039_v20 = vadd.f32 %v5238_v26, %v2963_v35  ;;  %v2964_v24 = vmul.f32 %v5230_v16, %v2824_v55  ;;  %v2826_v2 = vadd.f32 %v2825_v0, %v2633_v21 }
 0x1fa   : > { %v3102_v38 = vmax.f32 %v3038_v53, 0.0  ;;  %v2635_v13 = vadd.f32 %v2634_v1, %v5533_v47  ;;  %v2636_v12 = vpop.f32.mrf.mxu1  ;;  %v2829_v43 = vpop.f32.mrf.mxu0 }
 0x1fb   : > { %3348 = vst [vmem:[%s5254_s27 + $0x40] sm:$0xff] %v3771_v8  ;;  %v3103_v59 = vmax.f32 %v3039_v20, 0.0  ;;  %v3040_v29 = vadd.f32 %v5232_v27, %v2964_v24  ;;  %v2965_v39 = vmul.f32 %v5235_v14, %v2826_v2  ;;  %v2637_v9 = vadd.f32 %v2636_v12, %v5098_v46 }
 0x1fc   : > { %v2828_v17 = vadd.f32 %v2827_v18, %v2635_v13  ;;  %v2640_v34 = vpop.f32.mrf.mxu1  ;;  %v2833_v36 = vpop.f32.mrf.mxu0 }
 0x1fd   : > { %v3772_v62 = vpack.c.bf16 %v3103_v59, %v3102_v38  ;;  %v3041_v45 = vadd.f32 %v5238_v26, %v2965_v39  ;;  %v2830_v63 = vadd.f32 %v2829_v43, %v2637_v9  ;;  %v2641_v3 = vadd.f32 %v2640_v34, %v5102_v31 }
 0x1fe   : > { %v2966_v7 = vmul.f32 %v5230_v16, %v2828_v17  ;;  %v2642_v10 = vpop.f32.mrf.mxu1  ;;  %v2835_v25 = vpop.f32.mrf.mxu0  ;;  %v3104_v28 = vmax.f32 %v3040_v29, 0.0 }
 0x1ff   : > { %3349 = vst [vmem:[%s5254_s27 + $0x48] sm:$0xff] %v3772_v62  ;;  %v3105_v51 = vmax.f32 %v3041_v45, 0.0  ;;  %v2967_v40 = vmul.f32 %v5235_v14, %v2830_v63  ;;  %v2643_v46 = vadd.f32 %v2642_v10, %v5107_v22  ;;  %v2834_v11 = vadd.f32 %v2833_v36, %v2641_v3 }
 0x200   : > { %v3042_v60 = vadd.f32 %v5232_v27, %v2966_v7  ;;  %v2644_v57 = vpop.f32.mrf.mxu1  ;;  %v2837_v5 = vpop.f32.mrf.mxu0 }
 0x201   : > { %v3773_v33 = vpack.c.bf16 %v3105_v51, %v3104_v28  ;;  %v3043_v0 = vadd.f32 %v5238_v26, %v2967_v40  ;;  %v2836_v61 = vadd.f32 %v2835_v25, %v2643_v46  ;;  %v2645_v31 = vadd.f32 %v2644_v57, %v5110_v6 }
 0x202   : > { %v3106_v35 = vmax.f32 %v3042_v60, 0.0  ;;  %v2968_v55 = vmul.f32 %v5230_v16, %v2834_v11  ;;  %v2646_v21 = vpop.f32.mrf.mxu1  ;;  %v2839_v53 = vpop.f32.mrf.mxu0 }
 0x203   : > { %3350 = vst [vmem:[%s5254_s27 + $0x50] sm:$0xff] %v3773_v33  ;;  %v3107_v1 = vmax.f32 %v3043_v0, 0.0  ;;  %v2969_v22 = vmul.f32 %v5235_v14, %v2836_v61  ;;  %v2838_v18 = vadd.f32 %v2837_v5, %v2645_v31  ;;  %v2647_v8 = vadd.f32 %v2646_v21, %v5113_v15 }
 0x204   : > { %v3044_v20 = vadd.f32 %v5232_v27, %v2968_v55  ;;  %v2650_v24 = vpop.f32.mrf.mxu1  ;;  %v2843_v2 = vpop.f32.mrf.mxu0 }
 0x205   : > { %v3774_v38 = vpack.c.bf16 %v3107_v1, %v3106_v35  ;;  %v3045_v6 = vadd.f32 %v5238_v26, %v2969_v22  ;;  %v2970_v47 = vmul.f32 %v5230_v16, %v2838_v18  ;;  %v2840_v13 = vadd.f32 %v2839_v53, %v2647_v8 }
 0x206   : > { %v3108_v12 = vmax.f32 %v3044_v20, 0.0  ;;  %v2651_v43 = vadd.f32 %v2650_v24, %v5116_v48  ;;  %v2652_v59 = vpop.f32.mrf.mxu1  ;;  %v2845_v29 = vpop.f32.mrf.mxu0 }
 0x207   : > { %3351 = vst [vmem:[%s5254_s27 + $0x58] sm:$0xff] %v3774_v38  ;;  %v3109_v39 = vmax.f32 %v3045_v6, 0.0  ;;  %v3046_v15 = vadd.f32 %v5232_v27, %v2970_v47  ;;  %v2971_v9 = vmul.f32 %v5235_v14, %v2840_v13  ;;  %v2653_v17 = vadd.f32 %v2652_v59, %v5119_v32 }
 0x208   : > { %v2844_v34 = vadd.f32 %v2843_v2, %v2651_v43  ;;  %v2654_v36 = vpop.f32.mrf.mxu1  ;;  %v2847_v62 = vpop.f32.mrf.mxu0 }
 0x209   : > { %v3775_v45 = vpack.c.bf16 %v3109_v39, %v3108_v12  ;;  %v3047_v63 = vadd.f32 %v5238_v26, %v2971_v9  ;;  %v2846_v7 = vadd.f32 %v2845_v29, %v2653_v17  ;;  %v2655_v3 = vadd.f32 %v2654_v36, %v5122_v30 }
 0x20a   : > { %v2972_v48 = vmul.f32 %v5230_v16, %v2844_v34  ;;  %v2656_v10 = vpop.f32.mrf.mxu1  ;;  %v2849_v25 = vpop.f32.mrf.mxu0  ;;  %v3110_v28 = vmax.f32 %v3046_v15, 0.0 }
 0x20b   : > { %3352 = vst [vmem:[%s5254_s27 + $0x60] sm:$0xff] %v3775_v45  ;;  %v3111_v51 = vmax.f32 %v3047_v63, 0.0  ;;  %v2973_v40 = vmul.f32 %v5235_v14, %v2846_v7  ;;  %v2657_v32 = vadd.f32 %v2656_v10, %v5125_v44  ;;  %v2848_v60 = vadd.f32 %v2847_v62, %v2655_v3 }
 0x20c   : > { %v3048_v46 = vadd.f32 %v5232_v27, %v2972_v48  ;;  %v2660_v11 = vpop.f32.mrf.mxu1  ;;  %v2853_v57 = vpop.f32.mrf.mxu0 }
 0x20d   : > { %v3776_v5 = vpack.c.bf16 %v3111_v51, %v3110_v28  ;;  %v3049_v33 = vadd.f32 %v5238_v26, %v2973_v40  ;;  %v2850_v0 = vadd.f32 %v2849_v25, %v2657_v32  ;;  %v2661_v30 = vadd.f32 %v2660_v11, %v5128_v4 }
 0x20e   : > { %v3112_v61 = vmax.f32 %v3048_v46, 0.0  ;;  %v2974_v31 = vmul.f32 %v5230_v16, %v2848_v60  ;;  %v2662_v35 = vpop.f32.mrf.mxu1  ;;  %v2855_v55 = vpop.f32.mrf.mxu0 }
 0x20f   : > { %3353 = vst [vmem:[%s5254_s27 + $0x68] sm:$0xff] %v3776_v5  ;;  %v3113_v21 = vmax.f32 %v3049_v33, 0.0  ;;  %v2975_v44 = vmul.f32 %v5235_v14, %v2850_v0  ;;  %v2854_v53 = vadd.f32 %v2853_v57, %v2661_v30  ;;  %v2663_v1 = vadd.f32 %v2662_v35, %v5131_v37 }
 0x210   : > { %v3050_v22 = vadd.f32 %v5232_v27, %v2974_v31  ;;  %v2664_v18 = vpop.f32.mrf.mxu1  ;;  %v2857_v8 = vpop.f32.mrf.mxu0 }
 0x211   : > { %v3777_v20 = vpack.c.bf16 %v3113_v21, %v3112_v61  ;;  %v3051_v4 = vadd.f32 %v5238_v26, %v2975_v44  ;;  %v2976_v24 = vmul.f32 %v5230_v16, %v2854_v53  ;;  %v2856_v2 = vadd.f32 %v2855_v55, %v2663_v1 }
 0x212   : > { %v3114_v38 = vmax.f32 %v3050_v22, 0.0  ;;  %v2665_v6 = vadd.f32 %v2664_v18, %v5134_v42  ;;  %v2666_v47 = vpop.f32.mrf.mxu1  ;;  %v2859_v13 = vpop.f32.mrf.mxu0 }
 0x213   : > { %3354 = vst [vmem:[%s5254_s27 + $0x70] sm:$0xff] %v3777_v20  ;;  %v3115_v12 = vmax.f32 %v3051_v4, 0.0  ;;  %v3052_v37 = vadd.f32 %v5232_v27, %v2976_v24  ;;  %v2977_v43 = vmul.f32 %v5235_v14, %v2856_v2  ;;  %v2667_v59 = vadd.f32 %v2666_v47, %v5137_v49 }
 0x214   : > { %v2858_v29 = vadd.f32 %v2857_v8, %v2665_v6  ;;  %v2670_v39 = vpop.f32.mrf.mxu1  ;;  %v2863_v15 = vpop.f32.mrf.mxu0 }
 0x215   : > { %v3778_v9 = vpack.c.bf16 %v3115_v12, %v3114_v38  ;;  %v3053_v17 = vadd.f32 %v5238_v26, %v2977_v43  ;;  %v2860_v34 = vadd.f32 %v2859_v13, %v2667_v59  ;;  %v2671_v36 = vadd.f32 %v2670_v39, %v5140_v41 }
 0x216   : > { %v2978_v42 = vmul.f32 %v5230_v16, %v2858_v29  ;;  %v2672_v62 = vpop.f32.mrf.mxu1  ;;  %v2865_v45 = vpop.f32.mrf.mxu0  ;;  %v3116_v63 = vmax.f32 %v3052_v37, 0.0 }
 0x217   : > { %3355 = vst [vmem:[%s5254_s27 + $0x78] sm:$0xff] %v3778_v9  ;;  %v3117_v7 = vmax.f32 %v3053_v17, 0.0  ;;  %v2979_v48 = vmul.f32 %v5235_v14, %v2860_v34  ;;  %v2673_v49 = vadd.f32 %v2672_v62, %v5143_v52  ;;  %v2864_v10 = vadd.f32 %v2863_v15, %v2671_v36 }
 0x218   : > { %v3054_v3 = vadd.f32 %v5232_v27, %v2978_v42  ;;  %v2674_v25 = vpop.f32.mrf.mxu1  ;;  %v2867_v28 = vpop.f32.mrf.mxu0 }
 0x219   : > { %v3779_v51 = vpack.c.bf16 %v3117_v7, %v3116_v63  ;;  %v3055_v40 = vadd.f32 %v5238_v26, %v2979_v48  ;;  %v2866_v32 = vadd.f32 %v2865_v45, %v2673_v49  ;;  %v2675_v41 = vadd.f32 %v2674_v25, %v5146_v19 }
 0x21a   : > { %v3118_v46 = vmax.f32 %v3054_v3, 0.0  ;;  %v2980_v60 = vmul.f32 %v5230_v16, %v2864_v10  ;;  %v2676_v11 = vpop.f32.mrf.mxu1  ;;  %v2869_v57 = vpop.f32.mrf.mxu0 }
 0x21b   : > { %3356 = vst [vmem:[%s5254_s27 + $0x80] sm:$0xff] %v3779_v51  ;;  %v3119_v5 = vmax.f32 %v3055_v40, 0.0  ;;  %v2981_v52 = vmul.f32 %v5235_v14, %v2866_v32  ;;  %v2868_v33 = vadd.f32 %v2867_v28, %v2675_v41  ;;  %v2677_v0 = vadd.f32 %v2676_v11, %v5149_v50  ;;  %v5536_v28 = vld [vmem:[#allocation22_spill] sm:$0xff] }
 0x21c   : > { %v3056_v30 = vadd.f32 %v5232_v27, %v2980_v60  ;;  %v2680_v61 = vpop.f32.mrf.mxu1  ;;  %v2873_v31 = vpop.f32.mrf.mxu0 }
 0x21d   : > { %v3780_v35 = vpack.c.bf16 %v3119_v5, %v3118_v46  ;;  %v3057_v19 = vadd.f32 %v5238_v26, %v2981_v52  ;;  %v2982_v55 = vmul.f32 %v5230_v16, %v2868_v33  ;;  %v2870_v21 = vadd.f32 %v2869_v57, %v2677_v0  ;;  %v5537_v52 = vld [vmem:[#allocation23_spill] sm:$0xff] }
 0x21e   : > { %v3120_v44 = vmax.f32 %v3056_v30, 0.0  ;;  %v2681_v53 = vadd.f32 %v2680_v61, %v5152_v54  ;;  %v2682_v1 = vpop.f32.mrf.mxu1  ;;  %v2875_v22 = vpop.f32.mrf.mxu0 }
 0x21f   : > { %3357 = vst [vmem:[%s5254_s27 + $0x88] sm:$0xff] %v3780_v35  ;;  %v3121_v18 = vmax.f32 %v3057_v19, 0.0  ;;  %v3058_v50 = vadd.f32 %v5232_v27, %v2982_v55  ;;  %v2983_v8 = vmul.f32 %v5235_v14, %v2870_v21  ;;  %v2683_v20 = vadd.f32 %v2682_v1, %v5155_v56  ;;  %v5534_v56 = vld [vmem:[#allocation20_spill] sm:$0xff]  ;;  %v5538_v19 = vld [vmem:[#allocation2_spill] sm:$0xff] }
 0x220   : > { %v2874_v4 = vadd.f32 %v2873_v31, %v2681_v53  ;;  %v2684_v24 = vpop.f32.mrf.mxu1  ;;  %v2877_v2 = vpop.f32.mrf.mxu0 }
 0x221   : > { %v3781_v38 = vpack.c.bf16 %v3121_v18, %v3120_v44  ;;  %v3059_v6 = vadd.f32 %v5238_v26, %v2983_v8  ;;  %v2876_v47 = vadd.f32 %v2875_v22, %v2683_v20  ;;  %v2685_v13 = vadd.f32 %v2684_v24, %v5158_v58  ;;  %v5535_v58 = vld [vmem:[#allocation21_spill] sm:$0xff]  ;;  %v5539_v8 = vld [vmem:[#allocation3_spill] sm:$0xff] }
 0x222   : > { %v2984_v54 = vmul.f32 %v5230_v16, %v2874_v4  ;;  %v2686_v12 = vpop.f32.mrf.mxu1  ;;  %v2879_v37 = vpop.f32.mrf.mxu0  ;;  %v3122_v43 = vmax.f32 %v3058_v50, 0.0 }
 0x223   : > { %3358 = vst [vmem:[%s5254_s27 + $0x90] sm:$0xff] %v3781_v38  ;;  %v3123_v59 = vmax.f32 %v3059_v6, 0.0  ;;  %v2985_v29 = vmul.f32 %v5235_v14, %v2876_v47  ;;  %v2687_v39 = vadd.f32 %v2686_v12, %v5534_v56  ;;  %v2878_v9 = vadd.f32 %v2877_v2, %v2685_v13  ;;  %v5540_v47 = vld [vmem:[#allocation4_spill] sm:$0xff] }
 0x224   : > { %v3060_v15 = vadd.f32 %v5232_v27, %v2984_v54  ;;  %v2690_v17 = vpop.f32.mrf.mxu1  ;;  %v2883_v34 = vpop.f32.mrf.mxu0 }
 0x225   : > { %v3782_v42 = vpack.c.bf16 %v3123_v59, %v3122_v43  ;;  %v3061_v36 = vadd.f32 %v5238_v26, %v2985_v29  ;;  %v2880_v62 = vadd.f32 %v2879_v37, %v2687_v39  ;;  %v2691_v45 = vadd.f32 %v2690_v17, %v5535_v58  ;;  %v5541_v39 = vld [vmem:[#allocation5_spill] sm:$0xff] }
 0x226   : > { %v3124_v63 = vmax.f32 %v3060_v15, 0.0  ;;  %v2986_v7 = vmul.f32 %v5230_v16, %v2878_v9  ;;  %v2692_v48 = vpop.f32.mrf.mxu1  ;;  %v2885_v49 = vpop.f32.mrf.mxu0 }
 0x227   : > { %3359 = vst [vmem:[%s5254_s27 + $0x98] sm:$0xff] %v3782_v42  ;;  %v3125_v3 = vmax.f32 %v3061_v36, 0.0  ;;  %v2987_v10 = vmul.f32 %v5235_v14, %v2880_v62  ;;  %v2884_v25 = vadd.f32 %v2883_v34, %v2691_v45  ;;  %v2693_v51 = vadd.f32 %v2692_v48, %v5536_v28  ;;  %v5542_v45 = vld [vmem:[#allocation6_spill] sm:$0xff] }
 0x228   : > { %v3062_v40 = vadd.f32 %v5232_v27, %v2986_v7  ;;  %v2694_v32 = vpop.f32.mrf.mxu1  ;;  %v2887_v41 = vpop.f32.mrf.mxu0 }
 0x229   : > { %v3783_v46 = vpack.c.bf16 %v3125_v3, %v3124_v63  ;;  %v3063_v60 = vadd.f32 %v5238_v26, %v2987_v10  ;;  %v2988_v11 = vmul.f32 %v5230_v16, %v2884_v25  ;;  %v2886_v57 = vadd.f32 %v2885_v49, %v2693_v51 }
 0x22a   : > { %v3126_v5 = vmax.f32 %v3062_v40, 0.0  ;;  %v2695_v33 = vadd.f32 %v2694_v32, %v5537_v52  ;;  %v2696_v0 = vpop.f32.mrf.mxu1  ;;  %v2889_v30 = vpop.f32.mrf.mxu0  ;;  %v5543_v40 = vld [vmem:[#allocation7_spill] sm:$0xff] }
 0x22b   : > { %3360 = vst [vmem:[%s5254_s27 + $0xa0] sm:$0xff] %v3783_v46  ;;  %v3127_v61 = vmax.f32 %v3063_v60, 0.0  ;;  %v3064_v31 = vadd.f32 %v5232_v27, %v2988_v11  ;;  %v2989_v35 = vmul.f32 %v5235_v14, %v2886_v57  ;;  %v2697_v55 = vadd.f32 %v2696_v0, %v5538_v19 }
 0x22c   : > { %v2888_v21 = vadd.f32 %v2887_v41, %v2695_v33  ;;  %v2700_v44 = vpop.f32.mrf.mxu1  ;;  %v2893_v53 = vpop.f32.mrf.mxu0 }
 0x22d   : > { %v3784_v1 = vpack.c.bf16 %v3127_v61, %v3126_v5  ;;  %v3065_v22 = vadd.f32 %v5238_v26, %v2989_v35  ;;  %v2890_v18 = vadd.f32 %v2889_v30, %v2697_v55  ;;  %v2701_v20 = vadd.f32 %v2700_v44, %v5539_v8  ;;  %v5544_v5 = vld [vmem:[#allocation8_spill] sm:$0xff]  ;;  %v5545_v55 = vld [vmem:[#allocation9_spill] sm:$0xff] }
 0x22e   : > { %v2990_v50 = vmul.f32 %v5230_v16, %v2888_v21  ;;  %v2702_v4 = vpop.f32.mrf.mxu1  ;;  %v2895_v24 = vpop.f32.mrf.mxu0  ;;  %v3128_v2 = vmax.f32 %v3064_v31, 0.0 }
 0x22f   : > { %3361 = vst [vmem:[%s5254_s27 + $0xa8] sm:$0xff] %v3784_v1  ;;  %v3129_v38 = vmax.f32 %v3065_v22, 0.0  ;;  %v2991_v6 = vmul.f32 %v5235_v14, %v2890_v18  ;;  %v2703_v54 = vadd.f32 %v2702_v4, %v5540_v47  ;;  %v2894_v12 = vadd.f32 %v2893_v53, %v2701_v20 }
 0x230   : > { %v3066_v13 = vadd.f32 %v5232_v27, %v2990_v50  ;;  %v2704_v37 = vpop.f32.mrf.mxu1  ;;  %v2897_v43 = vpop.f32.mrf.mxu0  ;;  %v5546_v50 = vld [vmem:[#allocation10_spill] sm:$0xff] }
 0x231   : > { %v3785_v59 = vpack.c.bf16 %v3129_v38, %v3128_v2  ;;  %v3067_v29 = vadd.f32 %v5238_v26, %v2991_v6  ;;  %v2896_v56 = vadd.f32 %v2895_v24, %v2703_v54  ;;  %v2705_v15 = vadd.f32 %v2704_v37, %v5541_v39  ;;  %v5547_v54 = vld [vmem:[#allocation11_spill] sm:$0xff] }
 0x232   : > { %v3130_v9 = vmax.f32 %v3066_v13, 0.0  ;;  %v2992_v17 = vmul.f32 %v5230_v16, %v2894_v12  ;;  %v2706_v34 = vpop.f32.mrf.mxu1  ;;  %v2899_v42 = vpop.f32.mrf.mxu0 }
 0x233   : > { %3362 = vst [vmem:[%s5254_s27 + $0xb0] sm:$0xff] %v3785_v59  ;;  %v3131_v36 = vmax.f32 %v3067_v29, 0.0  ;;  %v2993_v62 = vmul.f32 %v5235_v14, %v2896_v56  ;;  %v2898_v58 = vadd.f32 %v2897_v43, %v2705_v15  ;;  %v2707_v63 = vadd.f32 %v2706_v34, %v5542_v45  ;;  %v5548_v15 = vld [vmem:[#allocation12_spill] sm:$0xff] }
 0x234   : > { %v3068_v7 = vadd.f32 %v5232_v27, %v2992_v17  ;;  %v2710_v48 = vpop.f32.mrf.mxu1  ;;  %v2903_v49 = vpop.f32.mrf.mxu0 }
 0x235   : > { %v3786_v3 = vpack.c.bf16 %v3131_v36, %v3130_v9  ;;  %v3069_v10 = vadd.f32 %v5238_v26, %v2993_v62  ;;  %v2994_v25 = vmul.f32 %v5230_v16, %v2898_v58  ;;  %v2900_v28 = vadd.f32 %v2899_v42, %v2707_v63 }
 0x236   : > { %v3132_v51 = vmax.f32 %v3068_v7, 0.0  ;;  %v2711_v32 = vadd.f32 %v2710_v48, %v5543_v40  ;;  %v2712_v41 = vpop.f32.mrf.mxu1  ;;  %v2905_v46 = vpop.f32.mrf.mxu0  ;;  %v5549_v7 = vld [vmem:[#allocation13_spill] sm:$0xff] }
 0x237   : > { %3363 = vst [vmem:[%s5254_s27 + $0xb8] sm:$0xff] %v3786_v3  ;;  %v3133_v60 = vmax.f32 %v3069_v10, 0.0  ;;  %v3070_v11 = vadd.f32 %v5232_v27, %v2994_v25  ;;  %v2995_v57 = vmul.f32 %v5235_v14, %v2900_v28  ;;  %v2713_v52 = vadd.f32 %v2712_v41, %v5544_v5  ;;  %v5550_v5 = vld [vmem:[#allocation14_spill] sm:$0xff] }
 0x238   : > { %v2904_v33 = vadd.f32 %v2903_v49, %v2711_v32  ;;  %v2714_v0 = vpop.f32.mrf.mxu1  ;;  %v2907_v30 = vpop.f32.mrf.mxu0 }
 0x239   : > { %v3787_v61 = vpack.c.bf16 %v3133_v60, %v3132_v51  ;;  %v3071_v31 = vadd.f32 %v5238_v26, %v2995_v57  ;;  %v2906_v35 = vadd.f32 %v2905_v46, %v2713_v52  ;;  %v2715_v21 = vadd.f32 %v2714_v0, %v5545_v55 }
 0x23a   : > { %v2996_v19 = vmul.f32 %v5230_v16, %v2904_v33  ;;  %v2716_v44 = vpop.f32.mrf.mxu1  ;;  %v2909_v53 = vpop.f32.mrf.mxu0  ;;  %v3134_v1 = vmax.f32 %v3070_v11, 0.0 }
 0x23b   : > { %3364 = vst [vmem:[%s5254_s27 + $0xc0] sm:$0xff] %v3787_v61  ;;  %v3135_v22 = vmax.f32 %v3071_v31, 0.0  ;;  %v2997_v18 = vmul.f32 %v5235_v14, %v2906_v35  ;;  %v2717_v8 = vadd.f32 %v2716_v44, %v5546_v50  ;;  %v2908_v4 = vadd.f32 %v2907_v30, %v2715_v21 }
 0x23c   : > { %v3072_v20 = vadd.f32 %v5232_v27, %v2996_v19  ;;  %v2720_v24 = vpop.f32.mrf.mxu1  ;;  %v2913_v2 = vpop.f32.mrf.mxu0 }
 0x23d   : > { %v3788_v38 = vpack.c.bf16 %v3135_v22, %v3134_v1  ;;  %v3073_v6 = vadd.f32 %v5238_v26, %v2997_v18  ;;  %v2910_v47 = vadd.f32 %v2909_v53, %v2717_v8  ;;  %v2721_v13 = vadd.f32 %v2720_v24, %v5547_v54  ;;  %v5552_v18 = vld [vmem:[#allocation16_spill] sm:$0xff] }
 0x23e   : > { %v3136_v12 = vmax.f32 %v3072_v20, 0.0  ;;  %v2998_v37 = vmul.f32 %v5230_v16, %v2908_v4  ;;  %v2722_v43 = vpop.f32.mrf.mxu1  ;;  %v2915_v59 = vpop.f32.mrf.mxu0 }
 0x23f   : > { %3365 = vst [vmem:[%s5254_s27 + $0xc8] sm:$0xff] %v3788_v38  ;;  %v3137_v29 = vmax.f32 %v3073_v6, 0.0  ;;  %v2999_v56 = vmul.f32 %v5235_v14, %v2910_v47  ;;  %v2914_v39 = vadd.f32 %v2913_v2, %v2721_v13  ;;  %v2723_v9 = vadd.f32 %v2722_v43, %v5548_v15  ;;  %v5553_v6 = vld [vmem:[#allocation17_spill] sm:$0xff] }
 0x240   : > { %v3074_v17 = vadd.f32 %v5232_v27, %v2998_v37  ;;  %v2724_v34 = vpop.f32.mrf.mxu1  ;;  %v2917_v42 = vpop.f32.mrf.mxu0 }
 0x241   : > { %v3789_v36 = vpack.c.bf16 %v3137_v29, %v3136_v12  ;;  %v3075_v62 = vadd.f32 %v5238_v26, %v2999_v56  ;;  %v3000_v58 = vmul.f32 %v5230_v16, %v2914_v39  ;;  %v2916_v45 = vadd.f32 %v2915_v59, %v2723_v9 }
 0x242   : > { %v3138_v63 = vmax.f32 %v3074_v17, 0.0  ;;  %v2725_v48 = vadd.f32 %v2724_v34, %v5549_v7  ;;  %v2726_v49 = vpop.f32.mrf.mxu1  ;;  %v2919_v3 = vpop.f32.mrf.mxu0 }
 0x243   : > { %3366 = vst [vmem:[%s5254_s27 + $0xd0] sm:$0xff] %v3789_v36  ;;  %v3139_v10 = vmax.f32 %v3075_v62, 0.0  ;;  %v3076_v25 = vadd.f32 %v5232_v27, %v3000_v58  ;;  %v3001_v28 = vmul.f32 %v5235_v14, %v2916_v45  ;;  %v2727_v51 = vadd.f32 %v2726_v49, %v5209_v23  ;;  %v5551_v23 = vld [vmem:[#allocation15_spill] sm:$0xff] }
 0x244   : > { %v2918_v40 = vadd.f32 %v2917_v42, %v2725_v48  ;;  %v2730_v32 = vpop.f32.mrf.mxu1  ;;  %v2923_v41 = vpop.f32.mrf.mxu0 }
 0x245   : > { %v3790_v46 = vpack.c.bf16 %v3139_v10, %v3138_v63  ;;  %v3077_v60 = vadd.f32 %v5238_v26, %v3001_v28  ;;  %v2920_v11 = vadd.f32 %v2919_v3, %v2727_v51  ;;  %v2731_v52 = vadd.f32 %v2730_v32, %v5550_v5 }
 0x246   : > { %v3002_v57 = vmul.f32 %v5230_v16, %v2918_v40  ;;  %v2732_v33 = vpop.f32.mrf.mxu1  ;;  %v2925_v0 = vpop.f32.mrf.mxu0  ;;  %v3140_v30 = vmax.f32 %v3076_v25, 0.0 }
 0x247   : > { %3367 = vst [vmem:[%s5254_s27 + $0xd8] sm:$0xff] %v3790_v46  ;;  %v3141_v61 = vmax.f32 %v3077_v60, 0.0  ;;  %v3003_v31 = vmul.f32 %v5235_v14, %v2920_v11  ;;  %v2733_v35 = vadd.f32 %v2732_v33, %v5551_v23  ;;  %v2924_v55 = vadd.f32 %v2923_v41, %v2731_v52 }
 0x248   : > { %v3078_v19 = vadd.f32 %v5232_v27, %v3002_v57  ;;  %v2734_v21 = vpop.f32.mrf.mxu1  ;;  %v2927_v44 = vpop.f32.mrf.mxu0 }
 0x249   : > { %v3791_v53 = vpack.c.bf16 %v3141_v61, %v3140_v30  ;;  %v3079_v1 = vadd.f32 %v5238_v26, %v3003_v31  ;;  %v2926_v22 = vadd.f32 %v2925_v0, %v2733_v35  ;;  %v2735_v50 = vadd.f32 %v2734_v21, %v5552_v18 }
 0x24a   : > { %v3142_v8 = vmax.f32 %v3078_v19, 0.0  ;;  %v3004_v20 = vmul.f32 %v5230_v16, %v2924_v55  ;;  %v2736_v4 = vpop.f32.mrf.mxu1  ;;  %v2929_v13 = vpop.f32.mrf.mxu0 }
 0x24b   : > { %3368 = vst [vmem:[%s5254_s27 + $0xe0] sm:$0xff] %v3791_v53  ;;  %v3143_v24 = vmax.f32 %v3079_v1, 0.0  ;;  %v3005_v2 = vmul.f32 %v5235_v14, %v2926_v22  ;;  %v2928_v38 = vadd.f32 %v2927_v44, %v2735_v50  ;;  %v2737_v47 = vadd.f32 %v2736_v4, %v5553_v6 }
 0x24c   : > { %v3080_v54 = vadd.f32 %v5232_v27, %v3004_v20 }
 0x24d   : > { %v3792_v12 = vpack.c.bf16 %v3143_v24, %v3142_v8  ;;  %v3081_v37 = vadd.f32 %v5238_v26, %v3005_v2  ;;  %v3006_v43 = vmul.f32 %v5230_v16, %v2928_v38  ;;  %v2930_v59 = vadd.f32 %v2929_v13, %v2737_v47 }
 0x24e   : > { %v3144_v29 = vmax.f32 %v3080_v54, 0.0 }
 0x24f   : > { %3369 = vst [vmem:[%s5254_s27 + $0xe8] sm:$0xff] %v3792_v12  ;;  %v3145_v56 = vmax.f32 %v3081_v37, 0.0  ;;  %v3082_v39 = vadd.f32 %v5232_v27, %v3006_v43  ;;  %v3007_v15 = vmul.f32 %v5235_v14, %v2930_v59 }
 0x251   : > { %v3793_v9 = vpack.c.bf16 %v3145_v56, %v3144_v29  ;;  %v3083_v17 = vadd.f32 %v5238_v26, %v3007_v15  ;;  %v3146_v34 = vmax.f32 %v3082_v39, 0.0 }
 0x253   : > { %3370 = vst [vmem:[%s5254_s27 + $0xf0] sm:$0xff] %v3793_v9  ;;  %v3147_v42 = vmax.f32 %v3083_v17, 0.0 }
 0x255   : > { %v3794_v36 = vpack.c.bf16 %v3147_v42, %v3146_v34 }
 0x257   : > { %3371 = vst [vmem:[%s5254_s27 + $0xf8] sm:$0xff] %v3794_v36 }
 0x258 PF: > { %s14_s15 = sadd.s32 1, %s4267_s15  }
 0x259   : > { %p11_p4 = scmp.ge.s32.totalorder %s14_s15, 4  }
 0x25b   :  { %13 = sbr.rel (!%p11_p4) target bundleno = 1 (0x1), region = 66 }

// kernel: mynet_forward.7
= control target key start
LH: loop header
LB: loop body
LE: loop exit
PB: predicated region body
PF: predicated region fallthrough
CT: control target
= control target key end

     0   :  { %s16105_s0 = inlined_call_operand.vmem [shape: bf16[200,2304], index: 0, kind: input, shape index: {}]   ;;  %s16106_s1 = inlined_call_operand.vmem [shape: bf16[2304,512], index: 1, kind: input, shape index: {}]   ;;  %s16107_s2 = inlined_call_operand.vmem [shape: f32[1,512], index: 2, kind: input, shape index: {}]   ;;  %s16108_s3 = inlined_call_operand.vmem [shape: f32[1,512], index: 3, kind: input, shape index: {}]   ;;  %s16109_s4 = inlined_call_operand.vmem [shape: f32[2,200], index: 4, kind: input, shape index: {}]   ;;  %s16110_s5 = inlined_call_operand.vmem [shape: f32[512,32], index: 5, kind: input, shape index: {}]   ;;  %s16111_s6 = inlined_call_operand.vmem [shape: f32[1,32], index: 6, kind: input, shape index: {}]   ;;  %s16112_s7 = inlined_call_operand.vmem [shape: f32[32,10], index: 7, kind: input, shape index: {}]   ;;  %s16113_s8 = inlined_call_operand.vmem [shape: f32[1,10], index: 8, kind: input, shape index: {}]   ;;  %s16114_s9 = inlined_call_operand.hbm [shape: f32[2,10], index: 9, kind: output, shape index: {}]  }
   0x1   :  { %v9472_v0 = vld [vmem:[%s16106_s1 + $0xe4] ss:$16 sps:$4 sm:$0xff]   ;;  %v9476_v2 = vld [vmem:[%s16106_s1 + $0xe0] ss:$16 sps:$4 sm:$0xff]  }
   0x2   :  { %v9474_v1 = vld [vmem:[%s16106_s1 + $0x2e4] ss:$16 sps:$4 sm:$0xff]   ;;  %4857 = vmatprep.subr.bf16.mxu0 %v9472_v0  ;;  %v9477_v3 = vld [vmem:[%s16106_s1 + $0x2e0] ss:$16 sps:$4 sm:$0xff]  }
   0x3   :  { %5018 = vmatprep.subr.bf16.mxu1 %v9474_v1  ;;  %v9478_v4 = vld [vmem:[%s16106_s1 + $0xc4] ss:$16 sps:$4 sm:$0xff]   ;;  %4858 = vmatpush1.bf16.msra.mxu0 %v9476_v2  ;;  %v9482_v6 = vld [vmem:[%s16106_s1 + $0xc0] ss:$16 sps:$4 sm:$0xff]  }
   0x4   :  { %5019 = vmatpush1.bf16.msra.mxu1 %v9477_v3  ;;  %v9480_v5 = vld [vmem:[%s16106_s1 + $0x2c4] ss:$16 sps:$4 sm:$0xff]   ;;  %4859 = vmatprep.subr.bf16.mxu0 %v9478_v4  ;;  %v9483_v7 = vld [vmem:[%s16106_s1 + $0x2c0] ss:$16 sps:$4 sm:$0xff]  }
   0x5   :  { %5020 = vmatprep.subr.bf16.mxu1 %v9480_v5  ;;  %v9484_v8 = vld [vmem:[%s16106_s1 + $0xa4] ss:$16 sps:$4 sm:$0xff]   ;;  %v9488_v10 = vld [vmem:[%s16106_s1 + $0xa0] ss:$16 sps:$4 sm:$0xff]  }
   0x6   :  { %v9486_v9 = vld [vmem:[%s16106_s1 + $0x2a4] ss:$16 sps:$4 sm:$0xff]   ;;  %v9489_v11 = vld [vmem:[%s16106_s1 + $0x2a0] ss:$16 sps:$4 sm:$0xff]  }
   0x7   :  { %4860 = vmatpush1.bf16.msra.mxu0 %v9482_v6  ;;  %v9490_v12 = vld [vmem:[%s16106_s1 + $0x84] ss:$16 sps:$4 sm:$0xff]   ;;  %v9494_v14 = vld [vmem:[%s16106_s1 + $0x80] ss:$16 sps:$4 sm:$0xff]  }
   0x8   :  { %5021 = vmatpush1.bf16.msra.mxu1 %v9483_v7  ;;  %4861 = vmatprep.subr.bf16.mxu0 %v9484_v8  ;;  %v9492_v13 = vld [vmem:[%s16106_s1 + $0x284] ss:$16 sps:$4 sm:$0xff]   ;;  %v9495_v15 = vld [vmem:[%s16106_s1 + $0x280] ss:$16 sps:$4 sm:$0xff]  }
   0x9   :  { %5022 = vmatprep.subr.bf16.mxu1 %v9486_v9  ;;  %v9496_v16 = vld [vmem:[%s16106_s1 + $0x64] ss:$16 sps:$4 sm:$0xff]   ;;  %v9500_v18 = vld [vmem:[%s16106_s1 + $0x60] ss:$16 sps:$4 sm:$0xff]  }
   0xa   :  { %v9498_v17 = vld [vmem:[%s16106_s1 + $0x264] ss:$16 sps:$4 sm:$0xff]   ;;  %v9501_v19 = vld [vmem:[%s16106_s1 + $0x260] ss:$16 sps:$4 sm:$0xff]  }
   0xb   :  { %4862 = vmatpush1.bf16.msra.mxu0 %v9488_v10  ;;  %v9502_v20 = vld [vmem:[%s16106_s1 + $0x44] ss:$16 sps:$4 sm:$0xff]   ;;  %v9506_v22 = vld [vmem:[%s16106_s1 + $0x40] ss:$16 sps:$4 sm:$0xff]  }
   0xc   :  { %5023 = vmatpush1.bf16.msra.mxu1 %v9489_v11  ;;  %4863 = vmatprep.subr.bf16.mxu0 %v9490_v12  ;;  %v9504_v21 = vld [vmem:[%s16106_s1 + $0x244] ss:$16 sps:$4 sm:$0xff]   ;;  %v9507_v23 = vld [vmem:[%s16106_s1 + $0x240] ss:$16 sps:$4 sm:$0xff]  }
   0xd   :  { %5024 = vmatprep.subr.bf16.mxu1 %v9492_v13  ;;  %v9508_v24 = vld [vmem:[%s16106_s1 + $0x24] ss:$16 sps:$4 sm:$0xff]   ;;  %v9512_v26 = vld [vmem:[%s16106_s1 + $0x20] ss:$16 sps:$4 sm:$0xff]  }
   0xe   :  { %v9510_v25 = vld [vmem:[%s16106_s1 + $0x224] ss:$16 sps:$4 sm:$0xff]   ;;  %v9513_v27 = vld [vmem:[%s16106_s1 + $0x220] ss:$16 sps:$4 sm:$0xff]  }
   0xf   :  { %4864 = vmatpush1.bf16.msra.mxu0 %v9494_v14  ;;  %v9514_v28 = vld [vmem:[%s16106_s1 + $0x4] ss:$16 sps:$4 sm:$0xff]   ;;  %v9518_v30 = vld [vmem:[%s16106_s1] ss:$16 sps:$4 sm:$0xff]  }
  0x10   :  { %5025 = vmatpush1.bf16.msra.mxu1 %v9495_v15  ;;  %4865 = vmatprep.subr.bf16.mxu0 %v9496_v16  ;;  %v9516_v29 = vld [vmem:[%s16106_s1 + $0x204] ss:$16 sps:$4 sm:$0xff]   ;;  %v9519_v31 = vld [vmem:[%s16106_s1 + $0x200] ss:$16 sps:$4 sm:$0xff]  }
  0x11   :  { %5026 = vmatprep.subr.bf16.mxu1 %v9498_v17  ;;  %v9520_v32 = vld [vmem:[%s16106_s1 + $0x1e4] ss:$16 sps:$4 sm:$0xff]   ;;  %v9524_v34 = vld [vmem:[%s16106_s1 + $0x1e0] ss:$16 sps:$4 sm:$0xff]  }
  0x12   :  { %v9522_v33 = vld [vmem:[%s16106_s1 + $0x3e4] ss:$16 sps:$4 sm:$0xff]   ;;  %v9525_v35 = vld [vmem:[%s16106_s1 + $0x3e0] ss:$16 sps:$4 sm:$0xff]  }
  0x13   :  { %4866 = vmatpush1.bf16.msra.mxu0 %v9500_v18  ;;  %v9526_v36 = vld [vmem:[%s16106_s1 + $0x1c4] ss:$16 sps:$4 sm:$0xff]   ;;  %v9530_v38 = vld [vmem:[%s16106_s1 + $0x1c0] ss:$16 sps:$4 sm:$0xff]  }
  0x14   :  { %5027 = vmatpush1.bf16.msra.mxu1 %v9501_v19  ;;  %4867 = vmatprep.subr.bf16.mxu0 %v9502_v20  ;;  %v9528_v37 = vld [vmem:[%s16106_s1 + $0x3c4] ss:$16 sps:$4 sm:$0xff]   ;;  %v9531_v39 = vld [vmem:[%s16106_s1 + $0x3c0] ss:$16 sps:$4 sm:$0xff]  }
  0x15   :  { %5028 = vmatprep.subr.bf16.mxu1 %v9504_v21  ;;  %v9532_v40 = vld [vmem:[%s16106_s1 + $0x1a4] ss:$16 sps:$4 sm:$0xff]   ;;  %v9536_v42 = vld [vmem:[%s16106_s1 + $0x1a0] ss:$16 sps:$4 sm:$0xff]  }
  0x16   :  { %v9534_v41 = vld [vmem:[%s16106_s1 + $0x3a4] ss:$16 sps:$4 sm:$0xff]   ;;  %v9537_v43 = vld [vmem:[%s16106_s1 + $0x3a0] ss:$16 sps:$4 sm:$0xff]  }
  0x17   :  { %4868 = vmatpush1.bf16.msra.mxu0 %v9506_v22  ;;  %v9538_v44 = vld [vmem:[%s16106_s1 + $0x184] ss:$16 sps:$4 sm:$0xff]   ;;  %v9542_v46 = vld [vmem:[%s16106_s1 + $0x180] ss:$16 sps:$4 sm:$0xff]  }
  0x18   :  { %5029 = vmatpush1.bf16.msra.mxu1 %v9507_v23  ;;  %4869 = vmatprep.subr.bf16.mxu0 %v9508_v24  ;;  %v9540_v45 = vld [vmem:[%s16106_s1 + $0x384] ss:$16 sps:$4 sm:$0xff]   ;;  %v9543_v47 = vld [vmem:[%s16106_s1 + $0x380] ss:$16 sps:$4 sm:$0xff]  }
  0x19   :  { %5030 = vmatprep.subr.bf16.mxu1 %v9510_v25  ;;  %v9544_v48 = vld [vmem:[%s16106_s1 + $0x164] ss:$16 sps:$4 sm:$0xff]   ;;  %v9548_v52 = vld [vmem:[%s16106_s1 + $0x160] ss:$16 sps:$4 sm:$0xff]  }
  0x1a   :  { %v9570_v49 = vld [vmem:[%s16105_s0 + $0x4] ss:$72 sps:$4 sm:$0xff]   ;;  %v9549_v53 = vld [vmem:[%s16106_s1 + $0x360] ss:$16 sps:$4 sm:$0xff]   ;;  %v9574_v6 = vld [vmem:[%s16105_s0 + $0x94] ss:$72 sps:$4 sm:$0xff]  }
  0x1b   :  { %4870 = vmatpush1.bf16.msra.mxu0 %v9512_v26  ;;  %v9546_v50 = vld [vmem:[%s16106_s1 + $0x364] ss:$16 sps:$4 sm:$0xff]   ;;  %4889 = vmatprep.mubr.bf16.mxu0 %v9570_v49  ;;  %v9554_v56 = vld [vmem:[%s16106_s1 + $0x140] ss:$16 sps:$4 sm:$0xff]  }
  0x1c   :  { %5031 = vmatpush1.bf16.msra.mxu1 %v9513_v27  ;;  %4871 = vmatprep.subr.bf16.mxu0 %v9514_v28  ;;  %v9573_v51 = vld [vmem:[%s16105_s0 + $0xc] ss:$72 sps:$4 sm:$0xff]   ;;  %v9555_v57 = vld [vmem:[%s16106_s1 + $0x340] ss:$16 sps:$4 sm:$0xff]   ;;  %v9576_v7 = vld [vmem:[%s16105_s0 + $0x9c] ss:$72 sps:$4 sm:$0xff]  }
  0x1d   :  { %5032 = vmatprep.subr.bf16.mxu1 %v9516_v29  ;;  %5050 = vmatprep.mubr.bf16.mxu1 %v9573_v51  ;;  %v9550_v54 = vld [vmem:[%s16106_s1 + $0x144] ss:$16 sps:$4 sm:$0xff]   ;;  %v9560_v60 = vld [vmem:[%s16106_s1 + $0x120] ss:$16 sps:$4 sm:$0xff]  }
  0x1e   :  { %v9552_v55 = vld [vmem:[%s16106_s1 + $0x344] ss:$16 sps:$4 sm:$0xff]   ;;  %v9561_v61 = vld [vmem:[%s16106_s1 + $0x320] ss:$16 sps:$4 sm:$0xff]  }
  0x1f   :  { %4872 = vmatpush1.bf16.msra.mxu0 %v9518_v30  ;;  %v9556_v58 = vld [vmem:[%s16106_s1 + $0x124] ss:$16 sps:$4 sm:$0xff]   ;;  %v9566_v0 = vld [vmem:[%s16106_s1 + $0x100] ss:$16 sps:$4 sm:$0xff]  }
  0x20   :  { %5033 = vmatpush1.bf16.msra.mxu1 %v9519_v31  ;;  %4873 = vmatprep.subr.bf16.mxu0 %v9520_v32  ;;  %v9558_v59 = vld [vmem:[%s16106_s1 + $0x324] ss:$16 sps:$4 sm:$0xff]   ;;  %v9567_v1 = vld [vmem:[%s16106_s1 + $0x300] ss:$16 sps:$4 sm:$0xff]  }
  0x21   :  { %5034 = vmatprep.subr.bf16.mxu1 %v9522_v33  ;;  %v9562_v62 = vld [vmem:[%s16106_s1 + $0x104] ss:$16 sps:$4 sm:$0xff]   ;;  %v9568_v4 = vld [vmem:[%s16105_s0] ss:$72 sps:$4 sm:$0xff]   ;;  %v9578_v13 = vld [vmem:[%s16105_s0 + $0x90] ss:$72 sps:$4 sm:$0xff]  }
  0x22   :  { %v9564_v63 = vld [vmem:[%s16106_s1 + $0x304] ss:$16 sps:$4 sm:$0xff]   ;;  %v9571_v5 = vld [vmem:[%s16105_s0 + $0x8] ss:$72 sps:$4 sm:$0xff]   ;;  %v9579_v14 = vld [vmem:[%s16105_s0 + $0x98] ss:$72 sps:$4 sm:$0xff]  }
  0x23   :  { %4874 = vmatpush2.bf16.msra.mxu0 %v9524_v34  ;;  %v9606_v2 = vld [vmem:[%s16106_s1 + $0x4e4] ss:$16 sps:$4 sm:$0xff]   ;;  %v9604_v8 = vld [vmem:[%s16106_s1 + $0x4e0] ss:$16 sps:$4 sm:$0xff]  }
  0x24   :  { %5035 = vmatpush2.bf16.msra.mxu1 %v9525_v35  ;;  %4875 = vmatprep.subr.bf16.mxu0 %v9526_v36  ;;  %v9609_v3 = vld [vmem:[%s16106_s1 + $0x6e4] ss:$16 sps:$4 sm:$0xff]   ;;  %v9607_v9 = vld [vmem:[%s16106_s1 + $0x6e0] ss:$16 sps:$4 sm:$0xff]  }
  0x25   :  { %5036 = vmatprep.subr.bf16.mxu1 %v9528_v37  ;;  %v9612_v10 = vld [vmem:[%s16106_s1 + $0x4c4] ss:$16 sps:$4 sm:$0xff]   ;;  %v9610_v12 = vld [vmem:[%s16106_s1 + $0x4c0] ss:$16 sps:$4 sm:$0xff]  }
  0x26   :  { %v9615_v11 = vld [vmem:[%s16106_s1 + $0x6c4] ss:$16 sps:$4 sm:$0xff]   ;;  %v9613_v15 = vld [vmem:[%s16106_s1 + $0x6c0] ss:$16 sps:$4 sm:$0xff]  }
  0x27   :  { %4876 = vmatpush2.bf16.msra.mxu0 %v9530_v38  ;;  %v9624_v16 = vld [vmem:[%s16106_s1 + $0x4a4] ss:$16 sps:$4 sm:$0xff]   ;;  %v9622_v20 = vld [vmem:[%s16106_s1 + $0x4a0] ss:$16 sps:$4 sm:$0xff]  }
  0x28   :  { %5037 = vmatpush2.bf16.msra.mxu1 %v9531_v39  ;;  %4877 = vmatprep.subr.bf16.mxu0 %v9532_v40  ;;  %v9627_v17 = vld [vmem:[%s16106_s1 + $0x6a4] ss:$16 sps:$4 sm:$0xff]   ;;  %v9625_v21 = vld [vmem:[%s16106_s1 + $0x6a0] ss:$16 sps:$4 sm:$0xff]  }
  0x29   :  { %5038 = vmatprep.subr.bf16.mxu1 %v9534_v41  ;;  %v9580_v18 = vld [vmem:[%s16105_s0 + $0x124] ss:$72 sps:$4 sm:$0xff]   ;;  %v9628_v24 = vld [vmem:[%s16106_s1 + $0x480] ss:$16 sps:$4 sm:$0xff]   ;;  %v9586_v30 = vld [vmem:[%s16105_s0 + $0x1b4] ss:$72 sps:$4 sm:$0xff]  }
  0x2a   :  { %v9582_v19 = vld [vmem:[%s16105_s0 + $0x12c] ss:$72 sps:$4 sm:$0xff]   ;;  %v9584_v25 = vld [vmem:[%s16105_s0 + $0x120] ss:$72 sps:$4 sm:$0xff]   ;;  %v9588_v31 = vld [vmem:[%s16105_s0 + $0x1bc] ss:$72 sps:$4 sm:$0xff]  }
  0x2b   :  { %4878 = vmatpush2.bf16.msra.mxu0 %v9536_v42  ;;  %v9630_v22 = vld [vmem:[%s16106_s1 + $0x484] ss:$16 sps:$4 sm:$0xff]   ;;  %v9585_v26 = vld [vmem:[%s16105_s0 + $0x128] ss:$72 sps:$4 sm:$0xff]   ;;  %v9591_v38 = vld [vmem:[%s16105_s0 + $0x1b8] ss:$72 sps:$4 sm:$0xff]  }
  0x2c   :  { %5039 = vmatpush2.bf16.msra.mxu1 %v9537_v43  ;;  %4879 = vmatprep.subr.bf16.mxu0 %v9538_v44  ;;  %v9633_v23 = vld [vmem:[%s16106_s1 + $0x684] ss:$16 sps:$4 sm:$0xff]   ;;  %v9631_v27 = vld [vmem:[%s16106_s1 + $0x680] ss:$16 sps:$4 sm:$0xff]  }
  0x2d   :  { %5040 = vmatprep.subr.bf16.mxu1 %v9540_v45  ;;  %v9642_v28 = vld [vmem:[%s16106_s1 + $0x464] ss:$16 sps:$4 sm:$0xff]   ;;  %v9640_v32 = vld [vmem:[%s16106_s1 + $0x460] ss:$16 sps:$4 sm:$0xff]  }
  0x2e   :  { %v9645_v29 = vld [vmem:[%s16106_s1 + $0x664] ss:$16 sps:$4 sm:$0xff]   ;;  %v9643_v33 = vld [vmem:[%s16106_s1 + $0x660] ss:$16 sps:$4 sm:$0xff]  }
  0x2f   :  { %4880 = vmatpush2.bf16.msra.mxu0 %v9542_v46  ;;  %v9648_v34 = vld [vmem:[%s16106_s1 + $0x444] ss:$16 sps:$4 sm:$0xff]   ;;  %v9646_v36 = vld [vmem:[%s16106_s1 + $0x440] ss:$16 sps:$4 sm:$0xff]  }
  0x30   :  { %5041 = vmatpush2.bf16.msra.mxu1 %v9543_v47  ;;  %4881 = vmatprep.subr.bf16.mxu0 %v9544_v48  ;;  %v9651_v35 = vld [vmem:[%s16106_s1 + $0x644] ss:$16 sps:$4 sm:$0xff]   ;;  %v9590_v37 = vld [vmem:[%s16105_s0 + $0x1b0] ss:$72 sps:$4 sm:$0xff]   ;;  %v9596_v49 = vld [vmem:[%s16105_s0 + $0x240] ss:$72 sps:$4 sm:$0xff]  }
  0x31   :  { %5042 = vmatprep.subr.bf16.mxu1 %v9546_v50  ;;  %v9649_v39 = vld [vmem:[%s16106_s1 + $0x640] ss:$16 sps:$4 sm:$0xff]   ;;  %v9660_v40 = vld [vmem:[%s16106_s1 + $0x424] ss:$16 sps:$4 sm:$0xff]  }
  0x32   :  { %v9663_v41 = vld [vmem:[%s16106_s1 + $0x624] ss:$16 sps:$4 sm:$0xff]   ;;  %v9658_v44 = vld [vmem:[%s16106_s1 + $0x420] ss:$16 sps:$4 sm:$0xff]  }
  0x33   :  { %4882 = vmatpush2.bf16.msra.mxu0 %v9548_v52  ;;  %v9592_v42 = vld [vmem:[%s16105_s0 + $0x244] ss:$72 sps:$4 sm:$0xff]   ;;  %v9661_v45 = vld [vmem:[%s16106_s1 + $0x620] ss:$16 sps:$4 sm:$0xff]  }
  0x34   :  { %5043 = vmatpush2.bf16.msra.mxu1 %v9549_v53  ;;  %4883 = vmatprep.subr.bf16.mxu0 %v9550_v54  ;;  %v9594_v43 = vld [vmem:[%s16105_s0 + $0x24c] ss:$72 sps:$4 sm:$0xff]   ;;  %v9664_v48 = vld [vmem:[%s16106_s1 + $0x400] ss:$16 sps:$4 sm:$0xff]  }
  0x35   :  { %5044 = vmatprep.subr.bf16.mxu1 %v9552_v55  ;;  %v9666_v46 = vld [vmem:[%s16106_s1 + $0x404] ss:$16 sps:$4 sm:$0xff]   ;;  %v9597_v50 = vld [vmem:[%s16105_s0 + $0x248] ss:$72 sps:$4 sm:$0xff]  }
  0x36   :  { %v9669_v47 = vld [vmem:[%s16106_s1 + $0x604] ss:$16 sps:$4 sm:$0xff]   ;;  %v9667_v51 = vld [vmem:[%s16106_s1 + $0x600] ss:$16 sps:$4 sm:$0xff]  }
  0x37   :  { %4884 = vmatpush2.bf16.msra.mxu0 %v9554_v56  ;;  %v9678_v52 = vld [vmem:[%s16106_s1 + $0x5e4] ss:$16 sps:$4 sm:$0xff]   ;;  %v9676_v56 = vld [vmem:[%s16106_s1 + $0x5e0] ss:$16 sps:$4 sm:$0xff]  }
  0x38   :  { %5045 = vmatpush2.bf16.msra.mxu1 %v9555_v57  ;;  %4885 = vmatprep.subr.bf16.mxu0 %v9556_v58  ;;  %v9681_v53 = vld [vmem:[%s16106_s1 + $0x7e4] ss:$16 sps:$4 sm:$0xff]   ;;  %v9679_v57 = vld [vmem:[%s16106_s1 + $0x7e0] ss:$16 sps:$4 sm:$0xff]  }
  0x39   :  { %5046 = vmatprep.subr.bf16.mxu1 %v9558_v59  ;;  %v9598_v54 = vld [vmem:[%s16105_s0 + $0x2d4] ss:$72 sps:$4 sm:$0xff]  }
  0x3a   :  { %v9600_v55 = vld [vmem:[%s16105_s0 + $0x2dc] ss:$72 sps:$4 sm:$0xff]  }
  0x3b   :  { %4886 = vmatpush2.bf16.msra.mxu0 %v9560_v60  ;;  %v9684_v58 = vld [vmem:[%s16106_s1 + $0x5c4] ss:$16 sps:$4 sm:$0xff]   ;;  %v9682_v60 = vld [vmem:[%s16106_s1 + $0x5c0] ss:$16 sps:$4 sm:$0xff]  }
  0x3c   :  { %5047 = vmatpush2.bf16.msra.mxu1 %v9561_v61  ;;  %4887 = vmatprep.subr.bf16.mxu0 %v9562_v62  ;;  %v9687_v59 = vld [vmem:[%s16106_s1 + $0x7c4] ss:$16 sps:$4 sm:$0xff]   ;;  %v9602_v61 = vld [vmem:[%s16105_s0 + $0x2d0] ss:$72 sps:$4 sm:$0xff]  }
  0x3d   :  { %5048 = vmatprep.subr.bf16.mxu1 %v9564_v63  ;;  %v9603_v62 = vld [vmem:[%s16105_s0 + $0x2d8] ss:$72 sps:$4 sm:$0xff]  }
  0x3e   :  { %v9685_v63 = vld [vmem:[%s16106_s1 + $0x7c0] ss:$16 sps:$4 sm:$0xff]  }
  0x3f   :  { %4888 = vmatpush2.bf16.msra.mxu0 %v9566_v0  ;;  %v9696_v0 = vld [vmem:[%s16106_s1 + $0x5a4] ss:$16 sps:$4 sm:$0xff]  }
  0x40   :  { %5049 = vmatpush2.bf16.msra.mxu1 %v9567_v1  ;;  %5179 = vmatprep.subr.bf16.mxu0 %v9606_v2  ;;  %v9699_v1 = vld [vmem:[%s16106_s1 + $0x7a4] ss:$16 sps:$4 sm:$0xff]  }
  0x41   :  { %5340 = vmatprep.subr.bf16.mxu1 %v9609_v3  ;;  %v9616_v2 = vld [vmem:[%s16105_s0 + $0x364] ss:$72 sps:$4 sm:$0xff]  }
  0x42   :  { %4890 = vmatmul.mubr.bf16.vlgmr.msra.gmra.mxu0 %v9568_v4  ;;  %v9618_v3 = vld [vmem:[%s16105_s0 + $0x36c] ss:$72 sps:$4 sm:$0xff]   ;;  %v9694_v4 = vld [vmem:[%s16106_s1 + $0x5a0] ss:$16 sps:$4 sm:$0xff]  }
  0x43   :  { %5051 = vmatmul.mubr.bf16.vlgmr.msra.gmra.mxu1 %v9571_v5  ;;  %4899 = vmatprep.mubr.bf16.mxu0 %v9574_v6  ;;  %v9697_v5 = vld [vmem:[%s16106_s1 + $0x7a0] ss:$16 sps:$4 sm:$0xff]   ;;  %v9702_v6 = vld [vmem:[%s16106_s1 + $0x584] ss:$16 sps:$4 sm:$0xff]  }
  0x44   :  { %5060 = vmatprep.mubr.bf16.mxu1 %v9576_v7  ;;  %5180 = vmatpush1.bf16.msra.mxu0 %v9604_v8  ;;  %v9705_v7 = vld [vmem:[%s16106_s1 + $0x784] ss:$16 sps:$4 sm:$0xff]   ;;  %v9700_v8 = vld [vmem:[%s16106_s1 + $0x580] ss:$16 sps:$4 sm:$0xff]  }
  0x45   :  { %5341 = vmatpush1.bf16.msra.mxu1 %v9607_v9  ;;  %5181 = vmatprep.subr.bf16.mxu0 %v9612_v10  ;;  %v9620_v9 = vld [vmem:[%s16105_s0 + $0x360] ss:$72 sps:$4 sm:$0xff]  }
  0x46   :  { %5342 = vmatprep.subr.bf16.mxu1 %v9615_v11  ;;  %v9703_v10 = vld [vmem:[%s16106_s1 + $0x780] ss:$16 sps:$4 sm:$0xff]   ;;  %v9714_v11 = vld [vmem:[%s16106_s1 + $0x564] ss:$16 sps:$4 sm:$0xff]  }
  0x48   :  { %5182 = vmatpush1.bf16.msra.mxu0 %v9610_v12  ;;  %v9717_v12 = vld [vmem:[%s16106_s1 + $0x764] ss:$16 sps:$4 sm:$0xff]  }
  0x49   :  { %5343 = vmatpush1.bf16.msra.mxu1 %v9613_v15  ;;  %5183 = vmatprep.subr.bf16.mxu0 %v9624_v16  ;;  %v9636_v15 = vld [vmem:[%s16105_s0 + $0x3fc] ss:$72 sps:$4 sm:$0xff]   ;;  %v9712_v16 = vld [vmem:[%s16106_s1 + $0x560] ss:$16 sps:$4 sm:$0xff]  }
  0x4a   :  { %5344 = vmatprep.subr.bf16.mxu1 %v9627_v17  ;;  %4900 = vmatmul.mubr.bf16.gmra.mxu0 %v9578_v13  ;;  %v9621_v13 = vld [vmem:[%s16105_s0 + $0x368] ss:$72 sps:$4 sm:$0xff]  }
  0x4b   :  { %5061 = vmatmul.mubr.bf16.gmra.mxu1 %v9579_v14  ;;  %4909 = vmatprep.mubr.bf16.mxu0 %v9580_v18  ;;  %v9634_v14 = vld [vmem:[%s16105_s0 + $0x3f4] ss:$72 sps:$4 sm:$0xff]   ;;  %v9715_v17 = vld [vmem:[%s16106_s1 + $0x760] ss:$16 sps:$4 sm:$0xff]  }
  0x4c   :  { %5070 = vmatprep.mubr.bf16.mxu1 %v9582_v19  ;;  %5184 = vmatpush1.bf16.msra.mxu0 %v9622_v20  ;;  %v9720_v18 = vld [vmem:[%s16106_s1 + $0x544] ss:$16 sps:$4 sm:$0xff]   ;;  %v9718_v20 = vld [vmem:[%s16106_s1 + $0x540] ss:$16 sps:$4 sm:$0xff]  }
  0x4d   :  { %5345 = vmatpush1.bf16.msra.mxu1 %v9625_v21  ;;  %5185 = vmatprep.subr.bf16.mxu0 %v9630_v22  ;;  %v9723_v19 = vld [vmem:[%s16106_s1 + $0x744] ss:$16 sps:$4 sm:$0xff]   ;;  %v9638_v21 = vld [vmem:[%s16105_s0 + $0x3f0] ss:$72 sps:$4 sm:$0xff]  }
  0x4e   :  { %5346 = vmatprep.subr.bf16.mxu1 %v9633_v23  ;;  %v9639_v22 = vld [vmem:[%s16105_s0 + $0x3f8] ss:$72 sps:$4 sm:$0xff]  }
  0x4f   :  { %v9721_v23 = vld [vmem:[%s16106_s1 + $0x740] ss:$16 sps:$4 sm:$0xff]  }
  0x50   :  { %5186 = vmatpush1.bf16.msra.mxu0 %v9628_v24  ;;  %v9730_v24 = vld [vmem:[%s16106_s1 + $0x524] ss:$16 sps:$4 sm:$0xff]  }
  0x51   :  { %5347 = vmatpush1.bf16.msra.mxu1 %v9631_v27  ;;  %5187 = vmatprep.subr.bf16.mxu0 %v9642_v28  ;;  %v9654_v27 = vld [vmem:[%s16105_s0 + $0x48c] ss:$72 sps:$4 sm:$0xff]   ;;  %v9728_v28 = vld [vmem:[%s16106_s1 + $0x520] ss:$16 sps:$4 sm:$0xff]  }
  0x52   :  { %5348 = vmatprep.subr.bf16.mxu1 %v9645_v29  ;;  %4910 = vmatmul.mubr.bf16.gmra.mxu0 %v9584_v25  ;;  %v9733_v25 = vld [vmem:[%s16106_s1 + $0x724] ss:$16 sps:$4 sm:$0xff]   ;;  %v9731_v29 = vld [vmem:[%s16106_s1 + $0x720] ss:$16 sps:$4 sm:$0xff]  }
  0x53   :  { %5071 = vmatmul.mubr.bf16.gmra.mxu1 %v9585_v26  ;;  %4919 = vmatprep.mubr.bf16.mxu0 %v9586_v30  ;;  %v9652_v26 = vld [vmem:[%s16105_s0 + $0x484] ss:$72 sps:$4 sm:$0xff]  }
  0x54   :  { %5080 = vmatprep.mubr.bf16.mxu1 %v9588_v31  ;;  %5188 = vmatpush1.bf16.msra.mxu0 %v9640_v32  ;;  %v9736_v30 = vld [vmem:[%s16106_s1 + $0x504] ss:$16 sps:$4 sm:$0xff]   ;;  %v9734_v32 = vld [vmem:[%s16106_s1 + $0x500] ss:$16 sps:$4 sm:$0xff]  }
  0x55   :  { %5349 = vmatpush1.bf16.msra.mxu1 %v9643_v33  ;;  %5189 = vmatprep.subr.bf16.mxu0 %v9648_v34  ;;  %v9739_v31 = vld [vmem:[%s16106_s1 + $0x704] ss:$16 sps:$4 sm:$0xff]   ;;  %v9737_v33 = vld [vmem:[%s16106_s1 + $0x700] ss:$16 sps:$4 sm:$0xff]  }
  0x56   :  { %5350 = vmatprep.subr.bf16.mxu1 %v9651_v35  ;;  %v9656_v34 = vld [vmem:[%s16105_s0 + $0x480] ss:$72 sps:$4 sm:$0xff]  }
  0x57   :  { %v9657_v35 = vld [vmem:[%s16105_s0 + $0x488] ss:$72 sps:$4 sm:$0xff]  }
  0x58   :  { %5190 = vmatpush1.bf16.msra.mxu0 %v9646_v36  ;;  %v9670_v36 = vld [vmem:[%s16105_s0 + $0x514] ss:$72 sps:$4 sm:$0xff]  }
  0x59   :  { %5351 = vmatpush1.bf16.msra.mxu1 %v9649_v39  ;;  %5191 = vmatprep.subr.bf16.mxu0 %v9660_v40  ;;  %v9675_v39 = vld [vmem:[%s16105_s0 + $0x518] ss:$72 sps:$4 sm:$0xff]   ;;  %v9688_v40 = vld [vmem:[%s16105_s0 + $0x5a4] ss:$72 sps:$4 sm:$0xff]  }
  0x5a   :  { %5352 = vmatprep.subr.bf16.mxu1 %v9663_v41  ;;  %4920 = vmatmul.mubr.bf16.gmra.mxu0 %v9590_v37  ;;  %v9672_v37 = vld [vmem:[%s16105_s0 + $0x51c] ss:$72 sps:$4 sm:$0xff]  }
  0x5b   :  { %5081 = vmatmul.mubr.bf16.gmra.mxu1 %v9591_v38  ;;  %4929 = vmatprep.mubr.bf16.mxu0 %v9592_v42  ;;  %v9674_v38 = vld [vmem:[%s16105_s0 + $0x510] ss:$72 sps:$4 sm:$0xff]   ;;  %v9778_v41 = vld [vmem:[%s16106_s1 + $0x8e4] ss:$16 sps:$4 sm:$0xff]  }
  0x5c   :  { %5090 = vmatprep.mubr.bf16.mxu1 %v9594_v43  ;;  %5192 = vmatpush1.bf16.msra.mxu0 %v9658_v44  ;;  %v9690_v42 = vld [vmem:[%s16105_s0 + $0x5ac] ss:$72 sps:$4 sm:$0xff]   ;;  %v9692_v44 = vld [vmem:[%s16105_s0 + $0x5a0] ss:$72 sps:$4 sm:$0xff]  }
  0x5d   :  { %5353 = vmatpush1.bf16.msra.mxu1 %v9661_v45  ;;  %5193 = vmatprep.subr.bf16.mxu0 %v9666_v46  ;;  %v9781_v43 = vld [vmem:[%s16106_s1 + $0xae4] ss:$16 sps:$4 sm:$0xff]   ;;  %v9693_v45 = vld [vmem:[%s16105_s0 + $0x5a8] ss:$72 sps:$4 sm:$0xff]  }
  0x5e   :  { %5354 = vmatprep.subr.bf16.mxu1 %v9669_v47  ;;  %v9706_v46 = vld [vmem:[%s16105_s0 + $0x634] ss:$72 sps:$4 sm:$0xff]  }
  0x5f   :  { %v9708_v47 = vld [vmem:[%s16105_s0 + $0x63c] ss:$72 sps:$4 sm:$0xff]  }
  0x60   :  { %5194 = vmatpush1.bf16.msra.mxu0 %v9664_v48  ;;  %v249_v48 = vld [vmem:[%s16105_s0 + $0x6c0] sm:$0xff] }
  0x61   :  { %5355 = vmatpush1.bf16.msra.mxu1 %v9667_v51  ;;  %5195 = vmatprep.subr.bf16.mxu0 %v9678_v52  ;;  %v9711_v51 = vld [vmem:[%s16105_s0 + $0x638] ss:$72 sps:$4 sm:$0xff]   ;;  %v11511_v52 = vcombine.high %v249_v48, %v249_v48 }
  0x62   :  { %5356 = vmatprep.subr.bf16.mxu1 %v9681_v53  ;;  %4930 = vmatmul.mubr.bf16.gmra.mxu0 %v9596_v49  ;;  %v250_v49 = vld [vmem:[%s16105_s0 + $0x6c8] sm:$0xff] }
  0x63   :  { %5091 = vmatmul.mubr.bf16.gmra.mxu1 %v9597_v50  ;;  %4939 = vmatprep.mubr.bf16.mxu0 %v9598_v54  ;;  %v9710_v50 = vld [vmem:[%s16105_s0 + $0x630] ss:$72 sps:$4 sm:$0xff]   ;;  %16136 = vst [vmem:[#allocation5_spill] sm:$0xff] %v11511_v52  ;;  %v11513_v53 = vcombine.high %v250_v49, %v250_v49  ;;  %v11517_v54 = vcombine.low %v249_v48, %v249_v48  ;;  %v9856_v48 = vld [vmem:[%s16106_s1 + $0x9c4] ss:$16 sps:$4 sm:$0xff]  }
  0x64   :  { %5100 = vmatprep.mubr.bf16.mxu1 %v9600_v55  ;;  %5196 = vmatpush2.bf16.msra.mxu0 %v9676_v56  ;;  %v11519_v55 = vcombine.low %v250_v49, %v250_v49  ;;  %v9742_v56 = vld [vmem:[%s16105_s0 + $0x14] ss:$72 sps:$4 sm:$0xff]  }
  0x65   :  { %5357 = vmatpush2.bf16.msra.mxu1 %v9679_v57  ;;  %5197 = vmatprep.subr.bf16.mxu0 %v9684_v58  ;;  %16137 = vst [vmem:[#allocation6_spill] sm:$0xff] %v11513_v53  ;;  %16138 = vst [vmem:[#allocation7_spill] sm:$0xff] %v11517_v54  ;;  %v9745_v57 = vld [vmem:[%s16105_s0 + $0x1c] ss:$72 sps:$4 sm:$0xff]   ;;  %v9740_v58 = vld [vmem:[%s16105_s0 + $0x10] ss:$72 sps:$4 sm:$0xff]  }
  0x66   :  { %5358 = vmatprep.subr.bf16.mxu1 %v9687_v59  ;;  %16139 = vst [vmem:[#allocation8_spill] sm:$0xff] %v11519_v55  ;;  %v9743_v59 = vld [vmem:[%s16105_s0 + $0x18] ss:$72 sps:$4 sm:$0xff]   ;;  %v9859_v49 = vld [vmem:[%s16106_s1 + $0xbc4] ss:$16 sps:$4 sm:$0xff]  }
  0x68   :  { %5198 = vmatpush2.bf16.msra.mxu0 %v9682_v60  ;;  %v9746_v60 = vld [vmem:[%s16105_s0 + $0xa4] ss:$72 sps:$4 sm:$0xff]  }
  0x69   :  { %5359 = vmatpush2.bf16.msra.mxu1 %v9685_v63  ;;  %5199 = vmatprep.subr.bf16.mxu0 %v9696_v0  ;;  %v9779_v63 = vld [vmem:[%s16106_s1 + $0xae0] ss:$16 sps:$4 sm:$0xff]   ;;  %v9784_v0 = vld [vmem:[%s16106_s1 + $0x8c4] ss:$16 sps:$4 sm:$0xff]  }
  0x6a   :  { %5360 = vmatprep.subr.bf16.mxu1 %v9699_v1  ;;  %4940 = vmatmul.mubr.bf16.gmra.mxu0 %v9602_v61  ;;  %v9748_v61 = vld [vmem:[%s16105_s0 + $0xac] ss:$72 sps:$4 sm:$0xff]  }
  0x6b   :  { %5101 = vmatmul.mubr.bf16.gmra.mxu1 %v9603_v62  ;;  %4949 = vmatprep.mubr.bf16.mxu0 %v9616_v2  ;;  %v9776_v62 = vld [vmem:[%s16106_s1 + $0x8e0] ss:$16 sps:$4 sm:$0xff]   ;;  %v9787_v1 = vld [vmem:[%s16106_s1 + $0xac4] ss:$16 sps:$4 sm:$0xff]  }
  0x6c   :  { %5110 = vmatprep.mubr.bf16.mxu1 %v9618_v3  ;;  %5200 = vmatpush2.bf16.msra.mxu0 %v9694_v4  ;;  %v9750_v2 = vld [vmem:[%s16105_s0 + $0xa0] ss:$72 sps:$4 sm:$0xff]  }
  0x6d   :  { %5361 = vmatpush2.bf16.msra.mxu1 %v9697_v5  ;;  %5201 = vmatprep.subr.bf16.mxu0 %v9702_v6  ;;  %v9751_v3 = vld [vmem:[%s16105_s0 + $0xa8] ss:$72 sps:$4 sm:$0xff]   ;;  %v9796_v6 = vld [vmem:[%s16106_s1 + $0x8a4] ss:$16 sps:$4 sm:$0xff]  }
  0x6e   :  { %5362 = vmatprep.subr.bf16.mxu1 %v9705_v7  ;;  %v9782_v4 = vld [vmem:[%s16106_s1 + $0x8c0] ss:$16 sps:$4 sm:$0xff]   ;;  %v9799_v7 = vld [vmem:[%s16106_s1 + $0xaa4] ss:$16 sps:$4 sm:$0xff]  }
  0x6f   :  { %v9785_v5 = vld [vmem:[%s16106_s1 + $0xac0] ss:$16 sps:$4 sm:$0xff]  }
  0x70   :  { %5202 = vmatpush2.bf16.msra.mxu0 %v9700_v8  ;;  %v9752_v8 = vld [vmem:[%s16105_s0 + $0x134] ss:$72 sps:$4 sm:$0xff]  }
  0x71   :  { %5363 = vmatpush2.bf16.msra.mxu1 %v9703_v10  ;;  %5203 = vmatprep.subr.bf16.mxu0 %v9714_v11  ;;  %v9794_v10 = vld [vmem:[%s16106_s1 + $0x8a0] ss:$16 sps:$4 sm:$0xff]  }
  0x72   :  { %5364 = vmatprep.subr.bf16.mxu1 %v9717_v12  ;;  %4950 = vmatmul.mubr.bf16.gmra.mxu0 %v9620_v9  ;;  %v9754_v9 = vld [vmem:[%s16105_s0 + $0x13c] ss:$72 sps:$4 sm:$0xff]   ;;  %v9797_v11 = vld [vmem:[%s16106_s1 + $0xaa0] ss:$16 sps:$4 sm:$0xff]  }
  0x73   :  { %5111 = vmatmul.mubr.bf16.gmra.mxu1 %v9621_v13  ;;  %4959 = vmatprep.mubr.bf16.mxu0 %v9634_v14  ;;  %v9802_v12 = vld [vmem:[%s16106_s1 + $0x884] ss:$16 sps:$4 sm:$0xff]   ;;  %v9756_v14 = vld [vmem:[%s16105_s0 + $0x130] ss:$72 sps:$4 sm:$0xff]  }
  0x74   :  { %5120 = vmatprep.mubr.bf16.mxu1 %v9636_v15  ;;  %5204 = vmatpush2.bf16.msra.mxu0 %v9712_v16  ;;  %v9805_v13 = vld [vmem:[%s16106_s1 + $0xa84] ss:$16 sps:$4 sm:$0xff]   ;;  %v9757_v15 = vld [vmem:[%s16105_s0 + $0x138] ss:$72 sps:$4 sm:$0xff]  }
  0x75   :  { %5365 = vmatpush2.bf16.msra.mxu1 %v9715_v17  ;;  %5205 = vmatprep.subr.bf16.mxu0 %v9720_v18  ;;  %v9800_v16 = vld [vmem:[%s16106_s1 + $0x880] ss:$16 sps:$4 sm:$0xff]   ;;  %v9814_v18 = vld [vmem:[%s16106_s1 + $0x864] ss:$16 sps:$4 sm:$0xff]  }
  0x76   :  { %5366 = vmatprep.subr.bf16.mxu1 %v9723_v19  ;;  %v9803_v17 = vld [vmem:[%s16106_s1 + $0xa80] ss:$16 sps:$4 sm:$0xff]   ;;  %v9817_v19 = vld [vmem:[%s16106_s1 + $0xa64] ss:$16 sps:$4 sm:$0xff]  }
  0x78   :  { %5206 = vmatpush2.bf16.msra.mxu0 %v9718_v20  ;;  %v9758_v20 = vld [vmem:[%s16105_s0 + $0x1c4] ss:$72 sps:$4 sm:$0xff]  }
  0x79   :  { %5367 = vmatpush2.bf16.msra.mxu1 %v9721_v23  ;;  %5207 = vmatprep.subr.bf16.mxu0 %v9730_v24  ;;  %v9815_v23 = vld [vmem:[%s16106_s1 + $0xa60] ss:$16 sps:$4 sm:$0xff]   ;;  %v9820_v24 = vld [vmem:[%s16106_s1 + $0x844] ss:$16 sps:$4 sm:$0xff]  }
  0x7a   :  { %5368 = vmatprep.subr.bf16.mxu1 %v9733_v25  ;;  %4960 = vmatmul.mubr.bf16.gmra.mxu0 %v9638_v21  ;;  %v9760_v21 = vld [vmem:[%s16105_s0 + $0x1cc] ss:$72 sps:$4 sm:$0xff]  }
  0x7b   :  { %5121 = vmatmul.mubr.bf16.gmra.mxu1 %v9639_v22  ;;  %4969 = vmatprep.mubr.bf16.mxu0 %v9652_v26  ;;  %v9812_v22 = vld [vmem:[%s16106_s1 + $0x860] ss:$16 sps:$4 sm:$0xff]   ;;  %v9823_v25 = vld [vmem:[%s16106_s1 + $0xa44] ss:$16 sps:$4 sm:$0xff]  }
  0x7c   :  { %5130 = vmatprep.mubr.bf16.mxu1 %v9654_v27  ;;  %5208 = vmatpush2.bf16.msra.mxu0 %v9728_v28  ;;  %v9818_v26 = vld [vmem:[%s16106_s1 + $0x840] ss:$16 sps:$4 sm:$0xff]  }
  0x7d   :  { %5369 = vmatpush2.bf16.msra.mxu1 %v9731_v29  ;;  %5209 = vmatprep.subr.bf16.mxu0 %v9736_v30  ;;  %v9762_v27 = vld [vmem:[%s16105_s0 + $0x1c0] ss:$72 sps:$4 sm:$0xff]   ;;  %v9832_v30 = vld [vmem:[%s16106_s1 + $0x824] ss:$16 sps:$4 sm:$0xff]  }
  0x7e   :  { %5370 = vmatprep.subr.bf16.mxu1 %v9739_v31  ;;  %v9763_v28 = vld [vmem:[%s16105_s0 + $0x1c8] ss:$72 sps:$4 sm:$0xff]   ;;  %v9835_v31 = vld [vmem:[%s16106_s1 + $0xa24] ss:$16 sps:$4 sm:$0xff]  }
  0x7f   :  { %v9821_v29 = vld [vmem:[%s16106_s1 + $0xa40] ss:$16 sps:$4 sm:$0xff]  }
  0x80   :  { %5210 = vmatpush2.bf16.msra.mxu0 %v9734_v32  ;;  %v9764_v32 = vld [vmem:[%s16105_s0 + $0x254] ss:$72 sps:$4 sm:$0xff]  }
  0x81   :  { %5371 = vmatpush2.bf16.msra.mxu1 %v9737_v33  ;;  %5501 = vmatprep.subr.bf16.mxu0 %v9778_v41  ;;  %v9766_v33 = vld [vmem:[%s16105_s0 + $0x25c] ss:$72 sps:$4 sm:$0xff]   ;;  %v9839_v41 = vld [vmem:[%s16106_s1 + $0xa00] ss:$16 sps:$4 sm:$0xff]  }
  0x82   :  { %4970 = vmatmul.mubr.bf16.gmra.mxu0 %v9656_v34  ;;  %5662 = vmatprep.subr.bf16.mxu1 %v9781_v43  ;;  %v9830_v34 = vld [vmem:[%s16106_s1 + $0x820] ss:$16 sps:$4 sm:$0xff]   ;;  %v9853_v43 = vld [vmem:[%s16106_s1 + $0xbe4] ss:$16 sps:$4 sm:$0xff]  }
  0x83   :  { %5131 = vmatmul.mubr.bf16.gmra.mxu1 %v9657_v35  ;;  %4979 = vmatprep.mubr.bf16.mxu0 %v9670_v36  ;;  %v9833_v35 = vld [vmem:[%s16106_s1 + $0xa20] ss:$16 sps:$4 sm:$0xff]   ;;  %v9838_v36 = vld [vmem:[%s16106_s1 + $0x804] ss:$16 sps:$4 sm:$0xff]  }
  0x84   :  { %5140 = vmatprep.mubr.bf16.mxu1 %v9672_v37  ;;  %v9841_v37 = vld [vmem:[%s16106_s1 + $0xa04] ss:$16 sps:$4 sm:$0xff]  }
  0x8a   :  { %4980 = vmatmul.mubr.bf16.gmra.mxu0 %v9674_v38  ;;  %v9836_v38 = vld [vmem:[%s16106_s1 + $0x800] ss:$16 sps:$4 sm:$0xff]  }
  0x8b   :  { %5141 = vmatmul.mubr.bf16.gmra.mxu1 %v9675_v39  ;;  %4989 = vmatprep.mubr.bf16.mxu0 %v9688_v40  ;;  %v9768_v39 = vld [vmem:[%s16105_s0 + $0x250] ss:$72 sps:$4 sm:$0xff]  }
  0x8c   :  { %5150 = vmatprep.mubr.bf16.mxu1 %v9690_v42  ;;  %v9769_v40 = vld [vmem:[%s16105_s0 + $0x258] ss:$72 sps:$4 sm:$0xff]   ;;  %v9850_v42 = vld [vmem:[%s16106_s1 + $0x9e4] ss:$16 sps:$4 sm:$0xff]  }
  0x92   :  { %4990 = vmatmul.mubr.bf16.gmra.mxu0 %v9692_v44  ;;  %v9770_v44 = vld [vmem:[%s16105_s0 + $0x2e4] ss:$72 sps:$4 sm:$0xff]  }
  0x93   :  { %5151 = vmatmul.mubr.bf16.gmra.mxu1 %v9693_v45  ;;  %4999 = vmatprep.mubr.bf16.mxu0 %v9706_v46  ;;  %v9772_v45 = vld [vmem:[%s16105_s0 + $0x2ec] ss:$72 sps:$4 sm:$0xff]   ;;  %v9848_v46 = vld [vmem:[%s16106_s1 + $0x9e0] ss:$16 sps:$4 sm:$0xff]  }
  0x94   :  { %5160 = vmatprep.mubr.bf16.mxu1 %v9708_v47  ;;  %v9851_v47 = vld [vmem:[%s16106_s1 + $0xbe0] ss:$16 sps:$4 sm:$0xff]  }
  0x9a   :  { %5000 = vmatmul.mubr.bf16.gmra.mxu0 %v9710_v50  ;;  %v9854_v50 = vld [vmem:[%s16106_s1 + $0x9c0] ss:$16 sps:$4 sm:$0xff]  }
  0x9b   :  { %5161 = vmatmul.mubr.bf16.gmra.mxu1 %v9711_v51  ;;  %5009 = vmatprep.mubr.bf16.mxu0 %v11511_v52  ;;  %v9774_v51 = vld [vmem:[%s16105_s0 + $0x2e0] ss:$72 sps:$4 sm:$0xff]  }
  0x9c   :  { %5170 = vmatprep.mubr.bf16.mxu1 %v11513_v53 }
  0xa2   :  { %5010 = vmatmul.mubr.bf16.gmra.mxu0 %v11517_v54 }
  0xa3   :  { %5171 = vmatmul.mubr.bf16.gmra.mxu1 %v11519_v55  ;;  %5211 = vmatprep.mubr.bf16.mxu0 %v9742_v56  ;;  %v9775_v56 = vld [vmem:[%s16105_s0 + $0x2e8] ss:$72 sps:$4 sm:$0xff]  }
  0xa4   :  { %5372 = vmatprep.mubr.bf16.mxu1 %v9745_v57  ;;  %v9857_v57 = vld [vmem:[%s16106_s1 + $0xbc0] ss:$16 sps:$4 sm:$0xff]  }
  0xaa   :  { %5212 = vmatmul.mubr.bf16.vlgmr.msra.gmra.mxu0 %v9740_v58  ;;  %v9868_v58 = vld [vmem:[%s16106_s1 + $0x9a4] ss:$16 sps:$4 sm:$0xff]  }
  0xab   :  { %5373 = vmatmul.mubr.bf16.vlgmr.msra.gmra.mxu1 %v9743_v59  ;;  %5221 = vmatprep.mubr.bf16.mxu0 %v9746_v60  ;;  %v9871_v59 = vld [vmem:[%s16106_s1 + $0xba4] ss:$16 sps:$4 sm:$0xff]  }
  0xac   :  { %5382 = vmatprep.mubr.bf16.mxu1 %v9748_v61  ;;  %5502 = vmatpush1.bf16.msra.mxu0 %v9776_v62  ;;  %v9788_v60 = vld [vmem:[%s16105_s0 + $0x374] ss:$72 sps:$4 sm:$0xff]   ;;  %v9866_v62 = vld [vmem:[%s16106_s1 + $0x9a0] ss:$16 sps:$4 sm:$0xff]  }
  0xad   :  { %5663 = vmatpush1.bf16.msra.mxu1 %v9779_v63  ;;  %5503 = vmatprep.subr.bf16.mxu0 %v9784_v0  ;;  %v9790_v61 = vld [vmem:[%s16105_s0 + $0x37c] ss:$72 sps:$4 sm:$0xff]   ;;  %v9869_v63 = vld [vmem:[%s16106_s1 + $0xba0] ss:$16 sps:$4 sm:$0xff]  }
  0xae   :  { %5664 = vmatprep.subr.bf16.mxu1 %v9787_v1  ;;  %v9874_v0 = vld [vmem:[%s16106_s1 + $0x984] ss:$16 sps:$4 sm:$0xff]  }
  0xaf   :  { %v9877_v1 = vld [vmem:[%s16106_s1 + $0xb84] ss:$16 sps:$4 sm:$0xff]  }
  0xb0   :  { %5504 = vmatpush1.bf16.msra.mxu0 %v9782_v4  ;;  %v9793_v4 = vld [vmem:[%s16105_s0 + $0x378] ss:$72 sps:$4 sm:$0xff]  }
  0xb1   :  { %5665 = vmatpush1.bf16.msra.mxu1 %v9785_v5  ;;  %5505 = vmatprep.subr.bf16.mxu0 %v9796_v6  ;;  %v9875_v5 = vld [vmem:[%s16106_s1 + $0xb80] ss:$16 sps:$4 sm:$0xff]   ;;  %v9886_v6 = vld [vmem:[%s16106_s1 + $0x964] ss:$16 sps:$4 sm:$0xff]  }
  0xb2   :  { %5666 = vmatprep.subr.bf16.mxu1 %v9799_v7  ;;  %5222 = vmatmul.mubr.bf16.gmra.mxu0 %v9750_v2  ;;  %v9872_v2 = vld [vmem:[%s16106_s1 + $0x980] ss:$16 sps:$4 sm:$0xff]   ;;  %v9889_v7 = vld [vmem:[%s16106_s1 + $0xb64] ss:$16 sps:$4 sm:$0xff]  }
  0xb3   :  { %5383 = vmatmul.mubr.bf16.gmra.mxu1 %v9751_v3  ;;  %5231 = vmatprep.mubr.bf16.mxu0 %v9752_v8  ;;  %v9792_v3 = vld [vmem:[%s16105_s0 + $0x370] ss:$72 sps:$4 sm:$0xff]   ;;  %v9806_v8 = vld [vmem:[%s16105_s0 + $0x404] ss:$72 sps:$4 sm:$0xff]  }
  0xb4   :  { %5392 = vmatprep.mubr.bf16.mxu1 %v9754_v9  ;;  %5506 = vmatpush1.bf16.msra.mxu0 %v9794_v10  ;;  %v9808_v9 = vld [vmem:[%s16105_s0 + $0x40c] ss:$72 sps:$4 sm:$0xff]   ;;  %v9884_v10 = vld [vmem:[%s16106_s1 + $0x960] ss:$16 sps:$4 sm:$0xff]  }
  0xb5   :  { %5667 = vmatpush1.bf16.msra.mxu1 %v9797_v11  ;;  %5507 = vmatprep.subr.bf16.mxu0 %v9802_v12  ;;  %v9887_v11 = vld [vmem:[%s16106_s1 + $0xb60] ss:$16 sps:$4 sm:$0xff]   ;;  %v9892_v12 = vld [vmem:[%s16106_s1 + $0x944] ss:$16 sps:$4 sm:$0xff]  }
  0xb6   :  { %5668 = vmatprep.subr.bf16.mxu1 %v9805_v13  ;;  %v9895_v13 = vld [vmem:[%s16106_s1 + $0xb44] ss:$16 sps:$4 sm:$0xff]  }
  0xb8   :  { %5508 = vmatpush1.bf16.msra.mxu0 %v9800_v16  ;;  %v9811_v16 = vld [vmem:[%s16105_s0 + $0x408] ss:$72 sps:$4 sm:$0xff]  }
  0xb9   :  { %5669 = vmatpush1.bf16.msra.mxu1 %v9803_v17  ;;  %5509 = vmatprep.subr.bf16.mxu0 %v9814_v18  ;;  %v9893_v17 = vld [vmem:[%s16106_s1 + $0xb40] ss:$16 sps:$4 sm:$0xff]   ;;  %v9902_v18 = vld [vmem:[%s16106_s1 + $0x924] ss:$16 sps:$4 sm:$0xff]  }
  0xba   :  { %5670 = vmatprep.subr.bf16.mxu1 %v9817_v19  ;;  %5232 = vmatmul.mubr.bf16.gmra.mxu0 %v9756_v14  ;;  %v9890_v14 = vld [vmem:[%s16106_s1 + $0x940] ss:$16 sps:$4 sm:$0xff]   ;;  %v9905_v19 = vld [vmem:[%s16106_s1 + $0xb24] ss:$16 sps:$4 sm:$0xff]  }
  0xbb   :  { %5393 = vmatmul.mubr.bf16.gmra.mxu1 %v9757_v15  ;;  %5241 = vmatprep.mubr.bf16.mxu0 %v9758_v20  ;;  %v9810_v15 = vld [vmem:[%s16105_s0 + $0x400] ss:$72 sps:$4 sm:$0xff]   ;;  %v9824_v20 = vld [vmem:[%s16105_s0 + $0x494] ss:$72 sps:$4 sm:$0xff]  }
  0xbc   :  { %5402 = vmatprep.mubr.bf16.mxu1 %v9760_v21  ;;  %5510 = vmatpush1.bf16.msra.mxu0 %v9812_v22  ;;  %v9826_v21 = vld [vmem:[%s16105_s0 + $0x49c] ss:$72 sps:$4 sm:$0xff]   ;;  %v9900_v22 = vld [vmem:[%s16106_s1 + $0x920] ss:$16 sps:$4 sm:$0xff]  }
  0xbd   :  { %5671 = vmatpush1.bf16.msra.mxu1 %v9815_v23  ;;  %5511 = vmatprep.subr.bf16.mxu0 %v9820_v24  ;;  %v9903_v23 = vld [vmem:[%s16106_s1 + $0xb20] ss:$16 sps:$4 sm:$0xff]   ;;  %v9908_v24 = vld [vmem:[%s16106_s1 + $0x904] ss:$16 sps:$4 sm:$0xff]  }
  0xbe   :  { %5672 = vmatprep.subr.bf16.mxu1 %v9823_v25  ;;  %v9911_v25 = vld [vmem:[%s16106_s1 + $0xb04] ss:$16 sps:$4 sm:$0xff]  }
  0xc0   :  { %5512 = vmatpush1.bf16.msra.mxu0 %v9818_v26  ;;  %v9906_v26 = vld [vmem:[%s16106_s1 + $0x900] ss:$16 sps:$4 sm:$0xff]  }
  0xc1   :  { %5673 = vmatpush1.bf16.msra.mxu1 %v9821_v29  ;;  %5513 = vmatprep.subr.bf16.mxu0 %v9832_v30  ;;  %v9950_v29 = vld [vmem:[%s16106_s1 + $0xce4] ss:$16 sps:$4 sm:$0xff]  }
  0xc2   :  { %5674 = vmatprep.subr.bf16.mxu1 %v9835_v31  ;;  %5242 = vmatmul.mubr.bf16.gmra.mxu0 %v9762_v27  ;;  %v9828_v27 = vld [vmem:[%s16105_s0 + $0x490] ss:$72 sps:$4 sm:$0xff]   ;;  %v9953_v30 = vld [vmem:[%s16106_s1 + $0xee4] ss:$16 sps:$4 sm:$0xff]  }
  0xc3   :  { %5403 = vmatmul.mubr.bf16.gmra.mxu1 %v9763_v28  ;;  %5251 = vmatprep.mubr.bf16.mxu0 %v9764_v32  ;;  %v9909_v28 = vld [vmem:[%s16106_s1 + $0xb00] ss:$16 sps:$4 sm:$0xff]   ;;  %v9842_v32 = vld [vmem:[%s16105_s0 + $0x524] ss:$72 sps:$4 sm:$0xff]  }
  0xc4   :  { %5412 = vmatprep.mubr.bf16.mxu1 %v9766_v33  ;;  %5514 = vmatpush1.bf16.msra.mxu0 %v9830_v34  ;;  %v9829_v31 = vld [vmem:[%s16105_s0 + $0x498] ss:$72 sps:$4 sm:$0xff]   ;;  %v9844_v33 = vld [vmem:[%s16105_s0 + $0x52c] ss:$72 sps:$4 sm:$0xff]  }
  0xc5   :  { %5675 = vmatpush1.bf16.msra.mxu1 %v9833_v35  ;;  %5515 = vmatprep.subr.bf16.mxu0 %v9838_v36  ;;  %v9846_v34 = vld [vmem:[%s16105_s0 + $0x520] ss:$72 sps:$4 sm:$0xff]   ;;  %v9860_v36 = vld [vmem:[%s16105_s0 + $0x5b4] ss:$72 sps:$4 sm:$0xff]  }
  0xc6   :  { %5676 = vmatprep.subr.bf16.mxu1 %v9841_v37  ;;  %v9847_v35 = vld [vmem:[%s16105_s0 + $0x528] ss:$72 sps:$4 sm:$0xff]   ;;  %v9862_v37 = vld [vmem:[%s16105_s0 + $0x5bc] ss:$72 sps:$4 sm:$0xff]  }
  0xc8   :  { %5516 = vmatpush1.bf16.msra.mxu0 %v9836_v38  ;;  %v9864_v38 = vld [vmem:[%s16105_s0 + $0x5b0] ss:$72 sps:$4 sm:$0xff]  }
  0xc9   :  { %5677 = vmatpush1.bf16.msra.mxu1 %v9839_v41  ;;  %5517 = vmatprep.subr.bf16.mxu0 %v9850_v42  ;;  %v9880_v41 = vld [vmem:[%s16105_s0 + $0x64c] ss:$72 sps:$4 sm:$0xff]  }
  0xca   :  { %5678 = vmatprep.subr.bf16.mxu1 %v9853_v43  ;;  %5252 = vmatmul.mubr.bf16.gmra.mxu0 %v9768_v39  ;;  %v9865_v39 = vld [vmem:[%s16105_s0 + $0x5b8] ss:$72 sps:$4 sm:$0xff]   ;;  %v251_v42 = vld [vmem:[%s16105_s0 + $0x6d0] sm:$0xff] }
  0xcb   :  { %5413 = vmatmul.mubr.bf16.gmra.mxu1 %v9769_v40  ;;  %5261 = vmatprep.mubr.bf16.mxu0 %v9770_v44  ;;  %v9878_v40 = vld [vmem:[%s16105_s0 + $0x644] ss:$72 sps:$4 sm:$0xff]   ;;  %v252_v43 = vld [vmem:[%s16105_s0 + $0x6d8] sm:$0xff]  ;;  %v9882_v44 = vld [vmem:[%s16105_s0 + $0x640] ss:$72 sps:$4 sm:$0xff]  }
  0xcc   :  { %5422 = vmatprep.mubr.bf16.mxu1 %v9772_v45  ;;  %5518 = vmatpush2.bf16.msra.mxu0 %v9848_v46  ;;  %v9883_v45 = vld [vmem:[%s16105_s0 + $0x648] ss:$72 sps:$4 sm:$0xff]   ;;  %v11865_v46 = vcombine.high %v251_v42, %v251_v42 }
  0xcd   :  { %5679 = vmatpush2.bf16.msra.mxu1 %v9851_v47  ;;  %5519 = vmatprep.subr.bf16.mxu0 %v9856_v48  ;;  %v11867_v47 = vcombine.high %v252_v43, %v252_v43 }
  0xce   :  { %5680 = vmatprep.subr.bf16.mxu1 %v9859_v49  ;;  %16140 = vst [vmem:[#allocation9_spill] sm:$0xff] %v11865_v46 }
  0xcf   :  { %16141 = vst [vmem:[#allocation10_spill] sm:$0xff] %v11867_v47 }
  0xd0   :  { %5520 = vmatpush2.bf16.msra.mxu0 %v9854_v50 }
  0xd1   :  { %5681 = vmatpush2.bf16.msra.mxu1 %v9857_v57  ;;  %5521 = vmatprep.subr.bf16.mxu0 %v9868_v58 }
  0xd2   :  { %5682 = vmatprep.subr.bf16.mxu1 %v9871_v59  ;;  %5262 = vmatmul.mubr.bf16.gmra.mxu0 %v9774_v51 }
  0xd3   :  { %5423 = vmatmul.mubr.bf16.gmra.mxu1 %v9775_v56  ;;  %5271 = vmatprep.mubr.bf16.mxu0 %v9788_v60  ;;  %v11875_v60 = vcombine.low %v251_v42, %v251_v42 }
  0xd4   :  { %5432 = vmatprep.mubr.bf16.mxu1 %v9790_v61  ;;  %5522 = vmatpush2.bf16.msra.mxu0 %v9866_v62  ;;  %v11877_v61 = vcombine.low %v252_v43, %v252_v43 }
  0xd5   :  { %5683 = vmatpush2.bf16.msra.mxu1 %v9869_v63  ;;  %5523 = vmatprep.subr.bf16.mxu0 %v9874_v0  ;;  %16142 = vst [vmem:[#allocation11_spill] sm:$0xff] %v11875_v60  ;;  %v9914_v63 = vld [vmem:[%s16105_s0 + $0x24] ss:$72 sps:$4 sm:$0xff]  }
  0xd6   :  { %5684 = vmatprep.subr.bf16.mxu1 %v9877_v1  ;;  %16143 = vst [vmem:[#allocation12_spill] sm:$0xff] %v11877_v61  ;;  %v9917_v0 = vld [vmem:[%s16105_s0 + $0x2c] ss:$72 sps:$4 sm:$0xff]  }
  0xd8   :  { %5524 = vmatpush2.bf16.msra.mxu0 %v9872_v2 }
  0xd9   :  { %5685 = vmatpush2.bf16.msra.mxu1 %v9875_v5  ;;  %5525 = vmatprep.subr.bf16.mxu0 %v9886_v6 }
  0xda   :  { %5686 = vmatprep.subr.bf16.mxu1 %v9889_v7  ;;  %5272 = vmatmul.mubr.bf16.gmra.mxu0 %v9792_v3 }
  0xdb   :  { %5433 = vmatmul.mubr.bf16.gmra.mxu1 %v9793_v4  ;;  %5281 = vmatprep.mubr.bf16.mxu0 %v9806_v8 }
  0xdc   :  { %5442 = vmatprep.mubr.bf16.mxu1 %v9808_v9  ;;  %5526 = vmatpush2.bf16.msra.mxu0 %v9884_v10  ;;  %v9912_v9 = vld [vmem:[%s16105_s0 + $0x20] ss:$72 sps:$4 sm:$0xff]  }
  0xdd   :  { %5687 = vmatpush2.bf16.msra.mxu1 %v9887_v11  ;;  %5527 = vmatprep.subr.bf16.mxu0 %v9892_v12  ;;  %v9915_v11 = vld [vmem:[%s16105_s0 + $0x28] ss:$72 sps:$4 sm:$0xff]  }
  0xde   :  { %5688 = vmatprep.subr.bf16.mxu1 %v9895_v13 }
  0xe0   :  { %5528 = vmatpush2.bf16.msra.mxu0 %v9890_v14  ;;  %v9918_v14 = vld [vmem:[%s16105_s0 + $0xb4] ss:$72 sps:$4 sm:$0xff]  }
  0xe1   :  { %5689 = vmatpush2.bf16.msra.mxu1 %v9893_v17  ;;  %5529 = vmatprep.subr.bf16.mxu0 %v9902_v18  ;;  %v9948_v17 = vld [vmem:[%s16106_s1 + $0xce0] ss:$16 sps:$4 sm:$0xff]  }
  0xe2   :  { %5690 = vmatprep.subr.bf16.mxu1 %v9905_v19  ;;  %5282 = vmatmul.mubr.bf16.gmra.mxu0 %v9810_v15 }
  0xe3   :  { %5443 = vmatmul.mubr.bf16.gmra.mxu1 %v9811_v16  ;;  %5291 = vmatprep.mubr.bf16.mxu0 %v9824_v20  ;;  %v9920_v16 = vld [vmem:[%s16105_s0 + $0xbc] ss:$72 sps:$4 sm:$0xff]   ;;  %v9951_v20 = vld [vmem:[%s16106_s1 + $0xee0] ss:$16 sps:$4 sm:$0xff]  }
  0xe4   :  { %5452 = vmatprep.mubr.bf16.mxu1 %v9826_v21  ;;  %5530 = vmatpush2.bf16.msra.mxu0 %v9900_v22  ;;  %v9956_v21 = vld [vmem:[%s16106_s1 + $0xcc4] ss:$16 sps:$4 sm:$0xff]  }
  0xe5   :  { %5691 = vmatpush2.bf16.msra.mxu1 %v9903_v23  ;;  %5531 = vmatprep.subr.bf16.mxu0 %v9908_v24  ;;  %v9959_v23 = vld [vmem:[%s16106_s1 + $0xec4] ss:$16 sps:$4 sm:$0xff]  }
  0xe6   :  { %5692 = vmatprep.subr.bf16.mxu1 %v9911_v25 }
  0xe8   :  { %5532 = vmatpush2.bf16.msra.mxu0 %v9906_v26 }
  0xe9   :  { %5693 = vmatpush2.bf16.msra.mxu1 %v9909_v28  ;;  %5823 = vmatprep.subr.bf16.mxu0 %v9950_v29 }
  0xea   :  { %5984 = vmatprep.subr.bf16.mxu1 %v9953_v30  ;;  %5292 = vmatmul.mubr.bf16.gmra.mxu0 %v9828_v27  ;;  %v9954_v27 = vld [vmem:[%s16106_s1 + $0xcc0] ss:$16 sps:$4 sm:$0xff]  }
  0xeb   :  { %5453 = vmatmul.mubr.bf16.gmra.mxu1 %v9829_v31  ;;  %5301 = vmatprep.mubr.bf16.mxu0 %v9842_v32  ;;  %v9922_v30 = vld [vmem:[%s16105_s0 + $0xb0] ss:$72 sps:$4 sm:$0xff]  }
  0xec   :  { %5462 = vmatprep.mubr.bf16.mxu1 %v9844_v33  ;;  %v9923_v31 = vld [vmem:[%s16105_s0 + $0xb8] ss:$72 sps:$4 sm:$0xff]   ;;  %v9968_v33 = vld [vmem:[%s16106_s1 + $0xca4] ss:$16 sps:$4 sm:$0xff]  }
  0xed   :  { %v9957_v32 = vld [vmem:[%s16106_s1 + $0xec0] ss:$16 sps:$4 sm:$0xff]  }
  0xf2   :  { %5302 = vmatmul.mubr.bf16.gmra.mxu0 %v9846_v34 }
  0xf3   :  { %5463 = vmatmul.mubr.bf16.gmra.mxu1 %v9847_v35  ;;  %5311 = vmatprep.mubr.bf16.mxu0 %v9860_v36  ;;  %v9926_v35 = vld [vmem:[%s16105_s0 + $0x144] ss:$72 sps:$4 sm:$0xff]  }
  0xf4   :  { %5472 = vmatprep.mubr.bf16.mxu1 %v9862_v37  ;;  %v9971_v36 = vld [vmem:[%s16106_s1 + $0xea4] ss:$16 sps:$4 sm:$0xff]  }
  0xfa   :  { %5312 = vmatmul.mubr.bf16.gmra.mxu0 %v9864_v38 }
  0xfb   :  { %5473 = vmatmul.mubr.bf16.gmra.mxu1 %v9865_v39  ;;  %5321 = vmatprep.mubr.bf16.mxu0 %v9878_v40  ;;  %v9929_v39 = vld [vmem:[%s16105_s0 + $0x14c] ss:$72 sps:$4 sm:$0xff]  }
  0xfc   :  { %5482 = vmatprep.mubr.bf16.mxu1 %v9880_v41  ;;  %v9966_v41 = vld [vmem:[%s16106_s1 + $0xca0] ss:$16 sps:$4 sm:$0xff]  }
 0x102   :  { %v4891_v48 = vpop.f32.mrf.mxu0  ;;  %5322 = vmatmul.mubr.bf16.gmra.mxu0 %v9882_v44  ;;  %v9969_v44 = vld [vmem:[%s16106_s1 + $0xea0] ss:$16 sps:$4 sm:$0xff]  }
 0x103   :  { %v5052_v49 = vpop.f32.mrf.mxu1  ;;  %5483 = vmatmul.mubr.bf16.gmra.mxu1 %v9883_v45  ;;  %5331 = vmatprep.mubr.bf16.mxu0 %v11865_v46  ;;  %v9974_v45 = vld [vmem:[%s16106_s1 + $0xc84] ss:$16 sps:$4 sm:$0xff]  }
 0x104   :  { %v11869_v50 = vadd.f32 %v5052_v49, %v4891_v48  ;;  %5492 = vmatprep.mubr.bf16.mxu1 %v11867_v47  ;;  %v4893_v51 = vpop.f32.mrf.mxu0  ;;  %v9977_v48 = vld [vmem:[%s16106_s1 + $0xe84] ss:$16 sps:$4 sm:$0xff]   ;;  %v10032_v47 = vld [vmem:[%s16105_s0 + $0x5c0] ss:$72 sps:$4 sm:$0xff]  }
 0x105   :  { %v5054_v56 = vpop.f32.mrf.mxu1 }
 0x106   :  { %v11873_v57 = vadd.f32 %v5054_v56, %v4893_v51  ;;  %v4895_v58 = vpop.f32.mrf.mxu0 }
 0x107   :  { %v5056_v59 = vpop.f32.mrf.mxu1 }
 0x108   :  { %v11879_v62 = vadd.f32 %v5056_v59, %v4895_v58  ;;  %v4897_v1 = vpop.f32.mrf.mxu0  ;;  %v9972_v58 = vld [vmem:[%s16106_s1 + $0xc80] ss:$16 sps:$4 sm:$0xff]  }
 0x109   :  { %v5058_v2 = vpop.f32.mrf.mxu1  ;;  %v9975_v59 = vld [vmem:[%s16106_s1 + $0xe80] ss:$16 sps:$4 sm:$0xff]  }
 0x10a   :  { %v11887_v3 = vadd.f32 %v5058_v2, %v4897_v1  ;;  %v4901_v4 = vpop.f32.mrf.mxu0  ;;  %5332 = vmatmul.mubr.bf16.gmra.mxu0 %v11875_v60  ;;  %v9989_v1 = vld [vmem:[%s16106_s1 + $0xe64] ss:$16 sps:$4 sm:$0xff]  }
 0x10b   :  { %v5062_v5 = vpop.f32.mrf.mxu1  ;;  %5493 = vmatmul.mubr.bf16.gmra.mxu1 %v11877_v61  ;;  %5533 = vmatprep.mubr.bf16.mxu0 %v9914_v63  ;;  %v253_v60 = vld [vmem:[%s16105_s0 + $0x6e0] sm:$0xff] }
 0x10c   :  { %v11891_v6 = vadd.f32 %v5062_v5, %v4901_v4  ;;  %5694 = vmatprep.mubr.bf16.mxu1 %v9917_v0  ;;  %v4903_v7 = vpop.f32.mrf.mxu0  ;;  %v9986_v0 = vld [vmem:[%s16106_s1 + $0xc64] ss:$16 sps:$4 sm:$0xff]   ;;  %v9924_v5 = vld [vmem:[%s16105_s0 + $0x140] ss:$72 sps:$4 sm:$0xff]   ;;  %v12319_v54 = vcombine.high %v253_v60, %v253_v60 }
 0x10d   :  { %v5064_v8 = vpop.f32.mrf.mxu1 }
 0x10e   :  { %v11896_v10 = vadd.f32 %v5064_v8, %v4903_v7  ;;  %v4905_v12 = vpop.f32.mrf.mxu0  ;;  %v9927_v7 = vld [vmem:[%s16105_s0 + $0x148] ss:$72 sps:$4 sm:$0xff]   ;;  %16146 = vst [vmem:[#allocation15_spill] sm:$0xff] %v12319_v54 }
 0x10f   :  { %v5066_v13 = vpop.f32.mrf.mxu1 }
 0x110   :  { %v11904_v15 = vadd.f32 %v5066_v13, %v4905_v12  ;;  %v4907_v18 = vpop.f32.mrf.mxu0  ;;  %v9932_v13 = vld [vmem:[%s16105_s0 + $0x1d4] ss:$72 sps:$4 sm:$0xff]  }
 0x111   :  { %v5068_v19 = vpop.f32.mrf.mxu1 }
 0x112   :  { %v11918_v22 = vadd.f32 %v5068_v19, %v4907_v18  ;;  %v4911_v24 = vpop.f32.mrf.mxu0  ;;  %5534 = vmatmul.mubr.bf16.vlgmr.msra.gmra.mxu0 %v9912_v9  ;;  %v9984_v18 = vld [vmem:[%s16106_s1 + $0xc60] ss:$16 sps:$4 sm:$0xff]  }
 0x113   :  { %v5072_v25 = vpop.f32.mrf.mxu1  ;;  %5695 = vmatmul.mubr.bf16.vlgmr.msra.gmra.mxu1 %v9915_v11  ;;  %5543 = vmatprep.mubr.bf16.mxu0 %v9918_v14  ;;  %v9935_v14 = vld [vmem:[%s16105_s0 + $0x1dc] ss:$72 sps:$4 sm:$0xff]   ;;  %v9987_v19 = vld [vmem:[%s16106_s1 + $0xe60] ss:$16 sps:$4 sm:$0xff]  }
 0x114   :  { %v11923_v26 = vadd.f32 %v5072_v25, %v4911_v24  ;;  %5704 = vmatprep.mubr.bf16.mxu1 %v9920_v16  ;;  %v4913_v28 = vpop.f32.mrf.mxu0  ;;  %5824 = vmatpush1.bf16.msra.mxu0 %v9948_v17 }
 0x115   :  { %v5074_v29 = vpop.f32.mrf.mxu1  ;;  %5985 = vmatpush1.bf16.msra.mxu1 %v9951_v20  ;;  %5825 = vmatprep.subr.bf16.mxu0 %v9956_v21  ;;  %v9992_v21 = vld [vmem:[%s16106_s1 + $0xc44] ss:$16 sps:$4 sm:$0xff]  }
 0x116   :  { %v11940_v34 = vadd.f32 %v5074_v29, %v4913_v28  ;;  %5986 = vmatprep.subr.bf16.mxu1 %v9959_v23  ;;  %v4915_v37 = vpop.f32.mrf.mxu0  ;;  %v9995_v23 = vld [vmem:[%s16106_s1 + $0xe44] ss:$16 sps:$4 sm:$0xff]  }
 0x117   :  { %v5076_v38 = vpop.f32.mrf.mxu1 }
 0x118   :  { %v11951_v40 = vadd.f32 %v5076_v38, %v4915_v37  ;;  %v4917_v42 = vpop.f32.mrf.mxu0  ;;  %5826 = vmatpush1.bf16.msra.mxu0 %v9954_v27  ;;  %v10007_v37 = vld [vmem:[%s16106_s1 + $0xe24] ss:$16 sps:$4 sm:$0xff]  }
 0x119   :  { %v5078_v43 = vpop.f32.mrf.mxu1  ;;  %5987 = vmatpush1.bf16.msra.mxu1 %v9957_v32  ;;  %5827 = vmatprep.subr.bf16.mxu0 %v9968_v33  ;;  %v9990_v32 = vld [vmem:[%s16106_s1 + $0xc40] ss:$16 sps:$4 sm:$0xff]  }
 0x11a   :  { %v11965_v49 = vadd.f32 %v5078_v43, %v4917_v42  ;;  %5988 = vmatprep.subr.bf16.mxu1 %v9971_v36  ;;  %v4921_v51 = vpop.f32.mrf.mxu0  ;;  %5544 = vmatmul.mubr.bf16.gmra.mxu0 %v9922_v30  ;;  %v9930_v30 = vld [vmem:[%s16105_s0 + $0x1d0] ss:$72 sps:$4 sm:$0xff]   ;;  %v10004_v36 = vld [vmem:[%s16106_s1 + $0xc24] ss:$16 sps:$4 sm:$0xff]  }
 0x11b   :  { %v5082_v56 = vpop.f32.mrf.mxu1  ;;  %5705 = vmatmul.mubr.bf16.gmra.mxu1 %v9923_v31  ;;  %5553 = vmatprep.mubr.bf16.mxu0 %v9926_v35  ;;  %v9933_v31 = vld [vmem:[%s16105_s0 + $0x1d8] ss:$72 sps:$4 sm:$0xff]   ;;  %v9938_v42 = vld [vmem:[%s16105_s0 + $0x264] ss:$72 sps:$4 sm:$0xff]  }
 0x11c   :  { %v11973_v63 = vadd.f32 %v5082_v56, %v4921_v51  ;;  %5714 = vmatprep.mubr.bf16.mxu1 %v9929_v39  ;;  %v4923_v2 = vpop.f32.mrf.mxu0  ;;  %5828 = vmatpush1.bf16.msra.mxu0 %v9966_v41  ;;  %v9993_v33 = vld [vmem:[%s16106_s1 + $0xe40] ss:$16 sps:$4 sm:$0xff]   ;;  %v9941_v43 = vld [vmem:[%s16105_s0 + $0x26c] ss:$72 sps:$4 sm:$0xff]  }
 0x11d   :  { %v5084_v4 = vpop.f32.mrf.mxu1  ;;  %5989 = vmatpush1.bf16.msra.mxu1 %v9969_v44  ;;  %5829 = vmatprep.subr.bf16.mxu0 %v9974_v45  ;;  %v10005_v51 = vld [vmem:[%s16106_s1 + $0xe20] ss:$16 sps:$4 sm:$0xff]  }
 0x11e   :  { %v11987_v8 = vadd.f32 %v5084_v4, %v4923_v2  ;;  %5990 = vmatprep.subr.bf16.mxu1 %v9977_v48  ;;  %v4925_v9 = vpop.f32.mrf.mxu0  ;;  %v10002_v48 = vld [vmem:[%s16106_s1 + $0xc20] ss:$16 sps:$4 sm:$0xff]  }
 0x11f   :  { %v5086_v11 = vpop.f32.mrf.mxu1 }
 0x120   :  { %v11989_v12 = vadd.f32 %v5086_v11, %v4925_v9  ;;  %v4927_v16 = vpop.f32.mrf.mxu0  ;;  %5830 = vmatpush1.bf16.msra.mxu0 %v9972_v58  ;;  %v10010_v58 = vld [vmem:[%s16106_s1 + $0xc04] ss:$16 sps:$4 sm:$0xff]   ;;  %v9939_v9 = vld [vmem:[%s16105_s0 + $0x268] ss:$72 sps:$4 sm:$0xff]  }
 0x121   :  { %v5088_v17 = vpop.f32.mrf.mxu1  ;;  %5991 = vmatpush1.bf16.msra.mxu1 %v9975_v59  ;;  %5831 = vmatprep.subr.bf16.mxu0 %v9986_v0  ;;  %v10013_v59 = vld [vmem:[%s16106_s1 + $0xe04] ss:$16 sps:$4 sm:$0xff]   ;;  %v10008_v11 = vld [vmem:[%s16106_s1 + $0xc00] ss:$16 sps:$4 sm:$0xff]  }
 0x122   :  { %v12003_v20 = vadd.f32 %v5088_v17, %v4927_v16  ;;  %5992 = vmatprep.subr.bf16.mxu1 %v9989_v1  ;;  %v4931_v24 = vpop.f32.mrf.mxu0  ;;  %5554 = vmatmul.mubr.bf16.gmra.mxu0 %v9924_v5  ;;  %v10022_v16 = vld [vmem:[%s16106_s1 + $0xde4] ss:$16 sps:$4 sm:$0xff]  }
 0x123   :  { %v5092_v25 = vpop.f32.mrf.mxu1  ;;  %5715 = vmatmul.mubr.bf16.gmra.mxu1 %v9927_v7  ;;  %5563 = vmatprep.mubr.bf16.mxu0 %v9932_v13  ;;  %v9936_v7 = vld [vmem:[%s16105_s0 + $0x260] ss:$72 sps:$4 sm:$0xff]   ;;  %v10025_v17 = vld [vmem:[%s16106_s1 + $0xfe4] ss:$16 sps:$4 sm:$0xff]  }
 0x124   :  { %v12011_v27 = vadd.f32 %v5092_v25, %v4931_v24  ;;  %5724 = vmatprep.mubr.bf16.mxu1 %v9935_v14  ;;  %v4933_v28 = vpop.f32.mrf.mxu0  ;;  %5832 = vmatpush1.bf16.msra.mxu0 %v9984_v18  ;;  %v10011_v13 = vld [vmem:[%s16106_s1 + $0xe00] ss:$16 sps:$4 sm:$0xff]   ;;  %v9947_v24 = vld [vmem:[%s16105_s0 + $0x2fc] ss:$72 sps:$4 sm:$0xff]  }
 0x125   :  { %v5094_v29 = vpop.f32.mrf.mxu1  ;;  %5993 = vmatpush1.bf16.msra.mxu1 %v9987_v19  ;;  %5833 = vmatprep.subr.bf16.mxu0 %v9992_v21 }
 0x126   :  { %v12025_v35 = vadd.f32 %v5094_v29, %v4933_v28  ;;  %5994 = vmatprep.subr.bf16.mxu1 %v9995_v23  ;;  %v4935_v38 = vpop.f32.mrf.mxu0  ;;  %v9944_v23 = vld [vmem:[%s16105_s0 + $0x2f4] ss:$72 sps:$4 sm:$0xff]   ;;  %v10020_v29 = vld [vmem:[%s16106_s1 + $0xde0] ss:$16 sps:$4 sm:$0xff]  }
 0x127   :  { %v5096_v39 = vpop.f32.mrf.mxu1 }
 0x128   :  { %v12033_v41 = vadd.f32 %v5096_v39, %v4935_v38  ;;  %v4937_v44 = vpop.f32.mrf.mxu0  ;;  %5834 = vmatpush1.bf16.msra.mxu0 %v9990_v32  ;;  %v10028_v32 = vld [vmem:[%s16106_s1 + $0xdc4] ss:$16 sps:$4 sm:$0xff]  }
 0x129   :  { %v5098_v45 = vpop.f32.mrf.mxu1  ;;  %5995 = vmatpush1.bf16.msra.mxu1 %v9993_v33  ;;  %5835 = vmatprep.subr.bf16.mxu0 %v10004_v36  ;;  %v10031_v33 = vld [vmem:[%s16106_s1 + $0xfc4] ss:$16 sps:$4 sm:$0xff]  }
 0x12a   :  { %v12047_v56 = vadd.f32 %v5098_v45, %v4937_v44  ;;  %5996 = vmatprep.subr.bf16.mxu1 %v10007_v37  ;;  %v4941_v0 = vpop.f32.mrf.mxu0  ;;  %5564 = vmatmul.mubr.bf16.gmra.mxu0 %v9930_v30  ;;  %v10023_v30 = vld [vmem:[%s16106_s1 + $0xfe0] ss:$16 sps:$4 sm:$0xff]  }
 0x12b   :  { %v5102_v1 = vpop.f32.mrf.mxu1  ;;  %5725 = vmatmul.mubr.bf16.gmra.mxu1 %v9933_v31  ;;  %5573 = vmatprep.mubr.bf16.mxu0 %v9938_v42  ;;  %v9945_v44 = vld [vmem:[%s16105_s0 + $0x2f8] ss:$72 sps:$4 sm:$0xff]  }
 0x12c   :  { %v12055_v2 = vadd.f32 %v5102_v1, %v4941_v0  ;;  %5734 = vmatprep.mubr.bf16.mxu1 %v9941_v43  ;;  %v4943_v4 = vpop.f32.mrf.mxu0  ;;  %5836 = vmatpush1.bf16.msra.mxu0 %v10002_v48  ;;  %v9942_v43 = vld [vmem:[%s16105_s0 + $0x2f0] ss:$72 sps:$4 sm:$0xff]  }
 0x12d   :  { %v5104_v5 = vpop.f32.mrf.mxu1  ;;  %5997 = vmatpush1.bf16.msra.mxu1 %v10005_v51  ;;  %5837 = vmatprep.subr.bf16.mxu0 %v10010_v58  ;;  %v10026_v45 = vld [vmem:[%s16106_s1 + $0xdc0] ss:$16 sps:$4 sm:$0xff]   ;;  %v10040_v58 = vld [vmem:[%s16106_s1 + $0xda4] ss:$16 sps:$4 sm:$0xff]  }
 0x12e   :  { %v12069_v14 = vadd.f32 %v5104_v5, %v4943_v4  ;;  %5998 = vmatprep.subr.bf16.mxu1 %v10013_v59  ;;  %v4945_v18 = vpop.f32.mrf.mxu0  ;;  %v10029_v48 = vld [vmem:[%s16106_s1 + $0xfc0] ss:$16 sps:$4 sm:$0xff]   ;;  %v10043_v59 = vld [vmem:[%s16106_s1 + $0xfa4] ss:$16 sps:$4 sm:$0xff]  }
 0x12f   :  { %v5106_v19 = vpop.f32.mrf.mxu1  ;;  %v9962_v5 = vld [vmem:[%s16105_s0 + $0x384] ss:$72 sps:$4 sm:$0xff]  }
 0x130   :  { %v12077_v21 = vadd.f32 %v5106_v19, %v4945_v18  ;;  %v4947_v25 = vpop.f32.mrf.mxu0  ;;  %5838 = vmatpush1.bf16.msra.mxu0 %v10008_v11  ;;  %v10046_v18 = vld [vmem:[%s16106_s1 + $0xd84] ss:$16 sps:$4 sm:$0xff]  }
 0x131   :  { %v5108_v28 = vpop.f32.mrf.mxu1  ;;  %5999 = vmatpush1.bf16.msra.mxu1 %v10011_v13  ;;  %5839 = vmatprep.subr.bf16.mxu0 %v10022_v16  ;;  %v10038_v13 = vld [vmem:[%s16106_s1 + $0xda0] ss:$16 sps:$4 sm:$0xff]   ;;  %v10049_v19 = vld [vmem:[%s16106_s1 + $0xf84] ss:$16 sps:$4 sm:$0xff]  }
 0x132   :  { %v12091_v31 = vadd.f32 %v5108_v28, %v4947_v25  ;;  %6000 = vmatprep.subr.bf16.mxu1 %v10025_v17  ;;  %v4951_v36 = vpop.f32.mrf.mxu0  ;;  %5574 = vmatmul.mubr.bf16.gmra.mxu0 %v9936_v7  ;;  %v9965_v7 = vld [vmem:[%s16105_s0 + $0x38c] ss:$72 sps:$4 sm:$0xff]   ;;  %v10041_v16 = vld [vmem:[%s16106_s1 + $0xfa0] ss:$16 sps:$4 sm:$0xff]  }
 0x133   :  { %v5112_v37 = vpop.f32.mrf.mxu1  ;;  %5735 = vmatmul.mubr.bf16.gmra.mxu1 %v9939_v9  ;;  %5583 = vmatprep.mubr.bf16.mxu0 %v9944_v23 }
 0x134   :  { %v12099_v38 = vadd.f32 %v5112_v37, %v4951_v36  ;;  %5744 = vmatprep.mubr.bf16.mxu1 %v9947_v24  ;;  %v4953_v39 = vpop.f32.mrf.mxu0  ;;  %5840 = vmatpush2.bf16.msra.mxu0 %v10020_v29  ;;  %v10047_v36 = vld [vmem:[%s16106_s1 + $0xf80] ss:$16 sps:$4 sm:$0xff]  }
 0x135   :  { %v5114_v42 = vpop.f32.mrf.mxu1  ;;  %6001 = vmatpush2.bf16.msra.mxu1 %v10023_v30  ;;  %5841 = vmatprep.subr.bf16.mxu0 %v10028_v32  ;;  %v9960_v30 = vld [vmem:[%s16105_s0 + $0x380] ss:$72 sps:$4 sm:$0xff]  }
 0x136   :  { %v12113_v51 = vadd.f32 %v5114_v42, %v4953_v39  ;;  %6002 = vmatprep.subr.bf16.mxu1 %v10031_v33  ;;  %v4955_v0 = vpop.f32.mrf.mxu0  ;;  %v9963_v32 = vld [vmem:[%s16105_s0 + $0x388] ss:$72 sps:$4 sm:$0xff]   ;;  %v10058_v39 = vld [vmem:[%s16106_s1 + $0xd64] ss:$16 sps:$4 sm:$0xff]  }
 0x137   :  { %v5116_v1 = vpop.f32.mrf.mxu1  ;;  %v10044_v33 = vld [vmem:[%s16106_s1 + $0xd80] ss:$16 sps:$4 sm:$0xff]   ;;  %v10061_v42 = vld [vmem:[%s16106_s1 + $0xf64] ss:$16 sps:$4 sm:$0xff]  }
 0x138   :  { %v12121_v4 = vadd.f32 %v5116_v1, %v4955_v0  ;;  %v4957_v9 = vpop.f32.mrf.mxu0  ;;  %5842 = vmatpush2.bf16.msra.mxu0 %v10026_v45  ;;  %v10056_v1 = vld [vmem:[%s16106_s1 + $0xd60] ss:$16 sps:$4 sm:$0xff]  }
 0x139   :  { %v5118_v11 = vpop.f32.mrf.mxu1  ;;  %6003 = vmatpush2.bf16.msra.mxu1 %v10029_v48  ;;  %5843 = vmatprep.subr.bf16.mxu0 %v10040_v58  ;;  %v9980_v48 = vld [vmem:[%s16105_s0 + $0x414] ss:$72 sps:$4 sm:$0xff]  }
 0x13a   :  { %v12135_v17 = vadd.f32 %v5118_v11, %v4957_v9  ;;  %6004 = vmatprep.subr.bf16.mxu1 %v10043_v59  ;;  %v4961_v23 = vpop.f32.mrf.mxu0  ;;  %5584 = vmatmul.mubr.bf16.gmra.mxu0 %v9942_v43  ;;  %v9983_v58 = vld [vmem:[%s16105_s0 + $0x41c] ss:$72 sps:$4 sm:$0xff]  }
 0x13b   :  { %v5122_v24 = vpop.f32.mrf.mxu1  ;;  %5745 = vmatmul.mubr.bf16.gmra.mxu1 %v9945_v44  ;;  %5593 = vmatprep.mubr.bf16.mxu0 %v9962_v5  ;;  %v10059_v5 = vld [vmem:[%s16106_s1 + $0xf60] ss:$16 sps:$4 sm:$0xff]   ;;  %v10064_v9 = vld [vmem:[%s16106_s1 + $0xd44] ss:$16 sps:$4 sm:$0xff]  }
 0x13c   :  { %v12143_v25 = vadd.f32 %v5122_v24, %v4961_v23  ;;  %5754 = vmatprep.mubr.bf16.mxu1 %v9965_v7  ;;  %v4963_v28 = vpop.f32.mrf.mxu0  ;;  %5844 = vmatpush2.bf16.msra.mxu0 %v10038_v13  ;;  %v10067_v11 = vld [vmem:[%s16106_s1 + $0xf44] ss:$16 sps:$4 sm:$0xff]   ;;  %v9978_v24 = vld [vmem:[%s16105_s0 + $0x410] ss:$72 sps:$4 sm:$0xff]  }
 0x13d   :  { %v5124_v29 = vpop.f32.mrf.mxu1  ;;  %6005 = vmatpush2.bf16.msra.mxu1 %v10041_v16  ;;  %5845 = vmatprep.subr.bf16.mxu0 %v10046_v18 }
 0x13e   :  { %v12157_v37 = vadd.f32 %v5124_v29, %v4963_v28  ;;  %6006 = vmatprep.subr.bf16.mxu1 %v10049_v19  ;;  %v4965_v43 = vpop.f32.mrf.mxu0  ;;  %v9981_v28 = vld [vmem:[%s16105_s0 + $0x418] ss:$72 sps:$4 sm:$0xff]  }
 0x13f   :  { %v5126_v44 = vpop.f32.mrf.mxu1  ;;  %v10062_v29 = vld [vmem:[%s16106_s1 + $0xd40] ss:$16 sps:$4 sm:$0xff]  }
 0x140   :  { %v12165_v45 = vadd.f32 %v5126_v44, %v4965_v43  ;;  %v4967_v59 = vpop.f32.mrf.mxu0  ;;  %5846 = vmatpush2.bf16.msra.mxu0 %v10044_v33  ;;  %v10074_v33 = vld [vmem:[%s16106_s1 + $0xd24] ss:$16 sps:$4 sm:$0xff]  }
 0x141   :  { %v5128_v0 = vpop.f32.mrf.mxu1  ;;  %6007 = vmatpush2.bf16.msra.mxu1 %v10047_v36  ;;  %5847 = vmatprep.subr.bf16.mxu0 %v10058_v39  ;;  %v10077_v36 = vld [vmem:[%s16106_s1 + $0xf24] ss:$16 sps:$4 sm:$0xff]  }
 0x142   :  { %v12179_v7 = vadd.f32 %v5128_v0, %v4967_v59  ;;  %6008 = vmatprep.subr.bf16.mxu1 %v10061_v42  ;;  %v4971_v13 = vpop.f32.mrf.mxu0  ;;  %5594 = vmatmul.mubr.bf16.gmra.mxu0 %v9960_v30  ;;  %v10065_v30 = vld [vmem:[%s16106_s1 + $0xf40] ss:$16 sps:$4 sm:$0xff]   ;;  %v9998_v44 = vld [vmem:[%s16105_s0 + $0x4a4] ss:$72 sps:$4 sm:$0xff]  }
 0x143   :  { %v5132_v16 = vpop.f32.mrf.mxu1  ;;  %5755 = vmatmul.mubr.bf16.gmra.mxu1 %v9963_v32  ;;  %5603 = vmatprep.mubr.bf16.mxu0 %v9980_v48  ;;  %v10001_v48 = vld [vmem:[%s16105_s0 + $0x4ac] ss:$72 sps:$4 sm:$0xff]   ;;  %v10072_v0 = vld [vmem:[%s16106_s1 + $0xd20] ss:$16 sps:$4 sm:$0xff]  }
 0x144   :  { %v12187_v18 = vadd.f32 %v5132_v16, %v4971_v13  ;;  %5764 = vmatprep.mubr.bf16.mxu1 %v9983_v58  ;;  %v4973_v19 = vpop.f32.mrf.mxu0  ;;  %5848 = vmatpush2.bf16.msra.mxu0 %v10056_v1  ;;  %v10075_v1 = vld [vmem:[%s16106_s1 + $0xf20] ss:$16 sps:$4 sm:$0xff]  }
 0x145   :  { %v5134_v23 = vpop.f32.mrf.mxu1  ;;  %6009 = vmatpush2.bf16.msra.mxu1 %v10059_v5  ;;  %5849 = vmatprep.subr.bf16.mxu0 %v10064_v9  ;;  %v10080_v9 = vld [vmem:[%s16106_s1 + $0xd04] ss:$16 sps:$4 sm:$0xff]  }
 0x146   :  { %v12201_v32 = vadd.f32 %v5134_v23, %v4973_v19  ;;  %6010 = vmatprep.subr.bf16.mxu1 %v10067_v11  ;;  %v4975_v39 = vpop.f32.mrf.mxu0  ;;  %v10083_v11 = vld [vmem:[%s16106_s1 + $0xf04] ss:$16 sps:$4 sm:$0xff]  }
 0x147   :  { %v5136_v42 = vpop.f32.mrf.mxu1 }
 0x148   :  { %v12209_v43 = vadd.f32 %v5136_v42, %v4975_v39  ;;  %v4977_v58 = vpop.f32.mrf.mxu0  ;;  %5850 = vmatpush2.bf16.msra.mxu0 %v10062_v29  ;;  %v10122_v39 = vld [vmem:[%s16106_s1 + $0x10e4] ss:$16 sps:$4 sm:$0xff]   ;;  %v10125_v42 = vld [vmem:[%s16106_s1 + $0xec] ss:$16 sps:$4 sm:$0xff]  }
 0x149   :  { %v5138_v59 = vpop.f32.mrf.mxu1  ;;  %6011 = vmatpush2.bf16.msra.mxu1 %v10065_v30  ;;  %5851 = vmatprep.subr.bf16.mxu0 %v10074_v33  ;;  %v9996_v30 = vld [vmem:[%s16105_s0 + $0x4a0] ss:$72 sps:$4 sm:$0xff]  }
 0x14a   :  { %v12223_v5 = vadd.f32 %v5138_v59, %v4977_v58  ;;  %6012 = vmatprep.subr.bf16.mxu1 %v10077_v36  ;;  %v4981_v13 = vpop.f32.mrf.mxu0  ;;  %5604 = vmatmul.mubr.bf16.gmra.mxu0 %v9978_v24  ;;  %v9999_v33 = vld [vmem:[%s16105_s0 + $0x4a8] ss:$72 sps:$4 sm:$0xff]   ;;  %v10016_v59 = vld [vmem:[%s16105_s0 + $0x534] ss:$72 sps:$4 sm:$0xff]  }
 0x14b   :  { %v5142_v16 = vpop.f32.mrf.mxu1  ;;  %5765 = vmatmul.mubr.bf16.gmra.mxu1 %v9981_v28  ;;  %5613 = vmatprep.mubr.bf16.mxu0 %v9998_v44  ;;  %v10078_v24 = vld [vmem:[%s16106_s1 + $0xd00] ss:$16 sps:$4 sm:$0xff]  }
 0x14c   :  { %v12231_v19 = vadd.f32 %v5142_v16, %v4981_v13  ;;  %5774 = vmatprep.mubr.bf16.mxu1 %v10001_v48  ;;  %v4983_v23 = vpop.f32.mrf.mxu0  ;;  %5852 = vmatpush2.bf16.msra.mxu0 %v10072_v0  ;;  %v10081_v28 = vld [vmem:[%s16106_s1 + $0xf00] ss:$16 sps:$4 sm:$0xff]   ;;  %v10019_v0 = vld [vmem:[%s16105_s0 + $0x53c] ss:$72 sps:$4 sm:$0xff]  }
 0x14d   :  { %v5144_v29 = vpop.f32.mrf.mxu1  ;;  %6013 = vmatpush2.bf16.msra.mxu1 %v10075_v1  ;;  %5853 = vmatprep.subr.bf16.mxu0 %v10080_v9 }
 0x14e   :  { %v12245_v36 = vadd.f32 %v5144_v29, %v4983_v23  ;;  %6014 = vmatprep.subr.bf16.mxu1 %v10083_v11  ;;  %v4985_v44 = vpop.f32.mrf.mxu0 }
 0x14f   :  { %v5146_v48 = vpop.f32.mrf.mxu1 }
 0x150   :  { %v12253_v58 = vadd.f32 %v5146_v48, %v4985_v44  ;;  %v4987_v1 = vpop.f32.mrf.mxu0  ;;  %5854 = vmatpush2.bf16.msra.mxu0 %v10078_v24  ;;  %v10014_v24 = vld [vmem:[%s16105_s0 + $0x530] ss:$72 sps:$4 sm:$0xff]  }
 0x151   :  { %v5148_v9 = vpop.f32.mrf.mxu1  ;;  %6015 = vmatpush2.bf16.msra.mxu1 %v10081_v28  ;;  %6145 = vmatprep.subr.bf16.mxu0 %v10122_v39  ;;  %v10017_v28 = vld [vmem:[%s16105_s0 + $0x538] ss:$72 sps:$4 sm:$0xff]  }
 0x152   :  { %v12261_v11 = vadd.f32 %v5148_v9, %v4987_v1  ;;  %6306 = vmatprep.subr.bf16.mxu1 %v10125_v42  ;;  %v4991_v13 = vpop.f32.mrf.mxu0  ;;  %5614 = vmatmul.mubr.bf16.gmra.mxu0 %v9996_v30  ;;  %v10034_v30 = vld [vmem:[%s16105_s0 + $0x5c4] ss:$72 sps:$4 sm:$0xff]  }
 0x153   :  { %v5152_v16 = vpop.f32.mrf.mxu1  ;;  %5775 = vmatmul.mubr.bf16.gmra.mxu1 %v9999_v33  ;;  %5623 = vmatprep.mubr.bf16.mxu0 %v10016_v59  ;;  %v10037_v33 = vld [vmem:[%s16105_s0 + $0x5cc] ss:$72 sps:$4 sm:$0xff]  }
 0x154   :  { %v12263_v23 = vadd.f32 %v5152_v16, %v4991_v13  ;;  %5784 = vmatprep.mubr.bf16.mxu1 %v10019_v0  ;;  %v4993_v29 = vpop.f32.mrf.mxu0 }
 0x155   :  { %v5154_v44 = vpop.f32.mrf.mxu1 }
 0x156   :  { %v12265_v48 = vadd.f32 %v5154_v44, %v4993_v29  ;;  %v4995_v39 = vpop.f32.mrf.mxu0 }
 0x157   :  { %v5156_v42 = vpop.f32.mrf.mxu1 }
 0x158   :  { %v12279_v59 = vadd.f32 %v5156_v42, %v4995_v39  ;;  %v4997_v0 = vpop.f32.mrf.mxu0  ;;  %v10035_v42 = vld [vmem:[%s16105_s0 + $0x5c8] ss:$72 sps:$4 sm:$0xff]  }
 0x159   :  { %v5158_v1 = vpop.f32.mrf.mxu1 }
 0x15a   :  { %v12281_v9 = vadd.f32 %v5158_v1, %v4997_v0  ;;  %v5001_v13 = vpop.f32.mrf.mxu0  ;;  %5624 = vmatmul.mubr.bf16.gmra.mxu0 %v10014_v24  ;;  %v10052_v24 = vld [vmem:[%s16105_s0 + $0x654] ss:$72 sps:$4 sm:$0xff]  }
 0x15b   :  { %v5162_v16 = vpop.f32.mrf.mxu1  ;;  %5785 = vmatmul.mubr.bf16.gmra.mxu1 %v10017_v28  ;;  %5633 = vmatprep.mubr.bf16.mxu0 %v10034_v30 }
 0x15c   :  { %v12283_v29 = vadd.f32 %v5162_v16, %v5001_v13  ;;  %5794 = vmatprep.mubr.bf16.mxu1 %v10037_v33  ;;  %v5003_v44 = vpop.f32.mrf.mxu0  ;;  %v10055_v33 = vld [vmem:[%s16105_s0 + $0x65c] ss:$72 sps:$4 sm:$0xff]  }
 0x15d   :  { %v5164_v61 = vpop.f32.mrf.mxu1 }
 0x15e   :  { %v12288_v39 = vadd.f32 %v5164_v61, %v5003_v44  ;;  %v5005_v28 = vpop.f32.mrf.mxu0 }
 0x15f   :  { %v5166_v0 = vpop.f32.mrf.mxu1 }
 0x160   :  { %v12296_v30 = vadd.f32 %v5166_v0, %v5005_v28  ;;  %v5007_v1 = vpop.f32.mrf.mxu0  ;;  %v254_v28 = vld [vmem:[%s16105_s0 + $0x6e8] sm:$0xff] }
 0x161   :  { %v5168_v13 = vpop.f32.mrf.mxu1 }
 0x162   :  { %v12301_v61 = vadd.f32 %v5168_v13, %v5007_v1  ;;  %v5011_v16 = vpop.f32.mrf.mxu0  ;;  %5634 = vmatmul.mubr.bf16.gmra.mxu0 %v10032_v47  ;;  %v10050_v1 = vld [vmem:[%s16105_s0 + $0x650] ss:$72 sps:$4 sm:$0xff]  }
 0x163   :  { %v5172_v44 = vpop.f32.mrf.mxu1  ;;  %5795 = vmatmul.mubr.bf16.gmra.mxu1 %v10035_v42  ;;  %5643 = vmatprep.mubr.bf16.mxu0 %v10052_v24  ;;  %v10053_v47 = vld [vmem:[%s16105_s0 + $0x658] ss:$72 sps:$4 sm:$0xff]  }
 0x164   :  { %v12309_v0 = vadd.f32 %v5172_v44, %v5011_v16  ;;  %5804 = vmatprep.mubr.bf16.mxu1 %v10055_v33  ;;  %v5013_v55 = vpop.f32.mrf.mxu0  ;;  %v12321_v16 = vcombine.high %v254_v28, %v254_v28 }
 0x165   :  { %v5174_v46 = vpop.f32.mrf.mxu1 }
 0x166   :  { %16144 = vst [vmem:[#allocation13_spill] sm:$0xff] %v12309_v0  ;;  %v12317_v42 = vadd.f32 %v5174_v46, %v5013_v55  ;;  %v5015_v13 = vpop.f32.mrf.mxu0  ;;  %16147 = vst [vmem:[#allocation16_spill] sm:$0xff] %v12321_v16 }
 0x167   :  { %v5176_v53 = vpop.f32.mrf.mxu1 }
 0x168   :  { %16145 = vst [vmem:[#allocation14_spill] sm:$0xff] %v12317_v42  ;;  %v5016_v24 = vpop.f32.mrf.mxu0 }
 0x169   :  { %v5177_v33 = vpop.f32.mrf.mxu1  ;;  %v10086_v24 = vld [vmem:[%s16105_s0 + $0x34] ss:$72 sps:$4 sm:$0xff]  }
 0x16a   :  { %v5213_v44 = vpop.f32.mrf.mxu0  ;;  %5644 = vmatmul.mubr.bf16.gmra.mxu0 %v10050_v1  ;;  %v12332_v1 = vcombine.low %v253_v60, %v253_v60 }
 0x16b   :  { %v5374_v52 = vpop.f32.mrf.mxu1  ;;  %5805 = vmatmul.mubr.bf16.gmra.mxu1 %v10053_v47  ;;  %v5214_v0 = vadd.f32 %v5213_v44, %v11869_v50  ;;  %5653 = vmatprep.mubr.bf16.mxu0 %v12319_v54  ;;  %v12334_v47 = vcombine.low %v254_v28, %v254_v28 }
 0x16c   :  { %5814 = vmatprep.mubr.bf16.mxu1 %v12321_v16  ;;  %v5215_v55 = vpop.f32.mrf.mxu0  ;;  %16149 = vst [vmem:[#allocation18_spill] sm:$0xff] %v12332_v1 }
 0x16d   :  { %v5376_v46 = vpop.f32.mrf.mxu1  ;;  %v12326_v13 = vadd.f32 %v5374_v52, %v5214_v0  ;;  %v5216_v53 = vadd.f32 %v5215_v55, %v11873_v57  ;;  %16150 = vst [vmem:[#allocation19_spill] sm:$0xff] %v12334_v47  ;;  %v10089_v52 = vld [vmem:[%s16105_s0 + $0x3c] ss:$72 sps:$4 sm:$0xff]  }
 0x16e   :  { %v5217_v33 = vpop.f32.mrf.mxu0 }
 0x16f   :  { %16148 = vst [vmem:[#allocation17_spill] sm:$0xff] %v12326_v13  ;;  %v5378_v42 = vpop.f32.mrf.mxu1  ;;  %v12336_v50 = vadd.f32 %v5376_v46, %v5216_v53  ;;  %v5218_v44 = vadd.f32 %v5217_v33, %v11879_v62 }
 0x170   :  { %v5219_v0 = vpop.f32.mrf.mxu0 }
 0x171   :  { %v5380_v57 = vpop.f32.mrf.mxu1  ;;  %v12342_v55 = vadd.f32 %v5378_v42, %v5218_v44  ;;  %v5220_v16 = vadd.f32 %v5219_v0, %v11887_v3  ;;  %v10084_v42 = vld [vmem:[%s16105_s0 + $0x30] ss:$72 sps:$4 sm:$0xff]   ;;  %v10128_v0 = vld [vmem:[%s16106_s1 + $0x10c4] ss:$16 sps:$4 sm:$0xff]  }
 0x172   :  { %v5223_v54 = vpop.f32.mrf.mxu0  ;;  %5654 = vmatmul.mubr.bf16.gmra.mxu0 %v12332_v1  ;;  %v10087_v3 = vld [vmem:[%s16105_s0 + $0x38] ss:$72 sps:$4 sm:$0xff]  }
 0x173   :  { %v5384_v13 = vpop.f32.mrf.mxu1  ;;  %5815 = vmatmul.mubr.bf16.gmra.mxu1 %v12334_v47  ;;  %v12347_v60 = vadd.f32 %v5380_v57, %v5220_v16  ;;  %v5224_v62 = vadd.f32 %v5223_v54, %v11891_v6  ;;  %5855 = vmatprep.mubr.bf16.mxu0 %v10086_v24  ;;  %v10092_v54 = vld [vmem:[%s16105_s0 + $0xc4] ss:$72 sps:$4 sm:$0xff]   ;;  %v10120_v44 = vld [vmem:[%s16106_s1 + $0x10e0] ss:$16 sps:$4 sm:$0xff]  }
 0x174   :  { %6016 = vmatprep.mubr.bf16.mxu1 %v10089_v52  ;;  %v5225_v28 = vpop.f32.mrf.mxu0  ;;  %v10095_v6 = vld [vmem:[%s16105_s0 + $0xcc] ss:$72 sps:$4 sm:$0xff]  }
 0x175   :  { %16151 = vst [vmem:[#allocation20_spill] sm:$0xff] %v12347_v60  ;;  %v5386_v46 = vpop.f32.mrf.mxu1  ;;  %v12356_v53 = vadd.f32 %v5384_v13, %v5224_v62  ;;  %v5226_v33 = vadd.f32 %v5225_v28, %v11896_v10  ;;  %v10123_v13 = vld [vmem:[%s16106_s1 + $0xe8] ss:$16 sps:$4 sm:$0xff]   ;;  %v10131_v28 = vld [vmem:[%s16106_s1 + $0xcc] ss:$16 sps:$4 sm:$0xff]  }
 0x176   :  { %v5227_v16 = vpop.f32.mrf.mxu0 }
 0x177   :  { %16152 = vst [vmem:[#allocation21_spill] sm:$0xff] %v12356_v53  ;;  %v5388_v24 = vpop.f32.mrf.mxu1  ;;  %v12371_v52 = vadd.f32 %v5386_v46, %v5226_v33  ;;  %v5228_v10 = vadd.f32 %v5227_v16, %v11904_v15  ;;  %v10126_v15 = vld [vmem:[%s16106_s1 + $0x10c0] ss:$16 sps:$4 sm:$0xff]   ;;  %v10129_v46 = vld [vmem:[%s16106_s1 + $0xc8] ss:$16 sps:$4 sm:$0xff]  }
 0x178   :  { %v5229_v57 = vpop.f32.mrf.mxu0 }
 0x179   :  { %v5390_v62 = vpop.f32.mrf.mxu1  ;;  %v12380_v47 = vadd.f32 %v5388_v24, %v5228_v10  ;;  %v5230_v1 = vadd.f32 %v5229_v57, %v11918_v22  ;;  %v10140_v22 = vld [vmem:[%s16106_s1 + $0x10a4] ss:$16 sps:$4 sm:$0xff]   ;;  %v10090_v10 = vld [vmem:[%s16105_s0 + $0xc0] ss:$72 sps:$4 sm:$0xff]  }
 0x17a   :  { %v5233_v53 = vpop.f32.mrf.mxu0  ;;  %5856 = vmatmul.mubr.bf16.vlgmr.msra.gmra.mxu0 %v10084_v42  ;;  %v10143_v42 = vld [vmem:[%s16106_s1 + $0xac] ss:$16 sps:$4 sm:$0xff]  }
 0x17b   :  { %v5394_v60 = vpop.f32.mrf.mxu1  ;;  %6017 = vmatmul.mubr.bf16.vlgmr.msra.gmra.mxu1 %v10087_v3  ;;  %v12389_v33 = vadd.f32 %v5390_v62, %v5230_v1  ;;  %v5234_v16 = vadd.f32 %v5233_v53, %v11923_v26  ;;  %5865 = vmatprep.mubr.bf16.mxu0 %v10092_v54  ;;  %v10093_v26 = vld [vmem:[%s16105_s0 + $0xc8] ss:$72 sps:$4 sm:$0xff]   ;;  %v10098_v54 = vld [vmem:[%s16105_s0 + $0x154] ss:$72 sps:$4 sm:$0xff]  }
 0x17c   :  { %6026 = vmatprep.mubr.bf16.mxu1 %v10095_v6  ;;  %v5235_v3 = vpop.f32.mrf.mxu0  ;;  %6146 = vmatpush1.bf16.msra.mxu0 %v10120_v44  ;;  %v10101_v6 = vld [vmem:[%s16105_s0 + $0x15c] ss:$72 sps:$4 sm:$0xff]   ;;  %v10138_v44 = vld [vmem:[%s16106_s1 + $0x10a0] ss:$16 sps:$4 sm:$0xff]  }
 0x17d   :  { %16153 = vst [vmem:[#allocation22_spill] sm:$0xff] %v12389_v33  ;;  %v5396_v24 = vpop.f32.mrf.mxu1  ;;  %6307 = vmatpush1.bf16.msra.mxu1 %v10123_v13  ;;  %v12404_v1 = vadd.f32 %v5394_v60, %v5234_v16  ;;  %v5236_v53 = vadd.f32 %v5235_v3, %v11940_v34  ;;  %6147 = vmatprep.subr.bf16.mxu0 %v10128_v0  ;;  %v10141_v34 = vld [vmem:[%s16106_s1 + $0xa8] ss:$16 sps:$4 sm:$0xff]   ;;  %v10146_v16 = vld [vmem:[%s16106_s1 + $0x1084] ss:$16 sps:$4 sm:$0xff]  }
 0x17e   :  { %6308 = vmatprep.subr.bf16.mxu1 %v10131_v28  ;;  %v5237_v57 = vpop.f32.mrf.mxu0  ;;  %v10149_v3 = vld [vmem:[%s16106_s1 + $0x8c] ss:$16 sps:$4 sm:$0xff]  }
 0x17f   :  { %16154 = vst [vmem:[#allocation23_spill] sm:$0xff] %v12404_v1  ;;  %v5398_v62 = vpop.f32.mrf.mxu1  ;;  %v12419_v60 = vadd.f32 %v5396_v24, %v5236_v53  ;;  %v5238_v13 = vadd.f32 %v5237_v57, %v11951_v40  ;;  %v10144_v53 = vld [vmem:[%s16106_s1 + $0x1080] ss:$16 sps:$4 sm:$0xff]  }
 0x180   :  { %v5239_v0 = vpop.f32.mrf.mxu0  ;;  %6148 = vmatpush1.bf16.msra.mxu0 %v10126_v15  ;;  %v10147_v15 = vld [vmem:[%s16106_s1 + $0x88] ss:$16 sps:$4 sm:$0xff]  }
 0x181   :  { %v5400_v28 = vpop.f32.mrf.mxu1  ;;  %6309 = vmatpush1.bf16.msra.mxu1 %v10129_v46  ;;  %v12428_v1 = vadd.f32 %v5398_v62, %v5238_v13  ;;  %v5240_v33 = vadd.f32 %v5239_v0, %v11965_v49  ;;  %6149 = vmatprep.subr.bf16.mxu0 %v10140_v22  ;;  %v10158_v49 = vld [vmem:[%s16106_s1 + $0x1064] ss:$16 sps:$4 sm:$0xff]   ;;  %v10161_v22 = vld [vmem:[%s16106_s1 + $0x6c] ss:$16 sps:$4 sm:$0xff]  }
 0x182   :  { %6310 = vmatprep.subr.bf16.mxu1 %v10143_v42  ;;  %v5243_v24 = vpop.f32.mrf.mxu0  ;;  %5866 = vmatmul.mubr.bf16.gmra.mxu0 %v10090_v10 }
 0x183   :  { %v5404_v40 = vpop.f32.mrf.mxu1  ;;  %6027 = vmatmul.mubr.bf16.gmra.mxu1 %v10093_v26  ;;  %v12437_v46 = vadd.f32 %v5400_v28, %v5240_v33  ;;  %v5244_v57 = vadd.f32 %v5243_v24, %v11973_v63  ;;  %5875 = vmatprep.mubr.bf16.mxu0 %v10098_v54  ;;  %v10096_v26 = vld [vmem:[%s16105_s0 + $0x150] ss:$72 sps:$4 sm:$0xff]  }
 0x184   :  { %6036 = vmatprep.mubr.bf16.mxu1 %v10101_v6  ;;  %v5245_v42 = vpop.f32.mrf.mxu0  ;;  %v10099_v63 = vld [vmem:[%s16105_s0 + $0x158] ss:$72 sps:$4 sm:$0xff]   ;;  %6150 = vmatpush1.bf16.msra.mxu0 %v10138_v44  ;;  %v10104_v6 = vld [vmem:[%s16105_s0 + $0x1e4] ss:$72 sps:$4 sm:$0xff]  }
 0x185   :  { %v5406_v10 = vpop.f32.mrf.mxu1  ;;  %6311 = vmatpush1.bf16.msra.mxu1 %v10141_v34  ;;  %v12452_v33 = vadd.f32 %v5404_v40, %v5244_v57  ;;  %v5246_v54 = vadd.f32 %v5245_v42, %v11987_v8  ;;  %6151 = vmatprep.subr.bf16.mxu0 %v10146_v16  ;;  %v10107_v44 = vld [vmem:[%s16105_s0 + $0x1ec] ss:$72 sps:$4 sm:$0xff]   ;;  %v10156_v8 = vld [vmem:[%s16106_s1 + $0x1060] ss:$16 sps:$4 sm:$0xff]   ;;  %v10159_v16 = vld [vmem:[%s16106_s1 + $0x68] ss:$16 sps:$4 sm:$0xff]  }
 0x186   :  { %6312 = vmatprep.subr.bf16.mxu1 %v10149_v3  ;;  %v5247_v62 = vpop.f32.mrf.mxu0  ;;  %v10164_v40 = vld [vmem:[%s16106_s1 + $0x1044] ss:$16 sps:$4 sm:$0xff]  }
 0x187   :  { %v5408_v13 = vpop.f32.mrf.mxu1  ;;  %v12458_v0 = vadd.f32 %v5406_v10, %v5246_v54  ;;  %v5248_v28 = vadd.f32 %v5247_v62, %v11989_v12  ;;  %v10105_v54 = vld [vmem:[%s16105_s0 + $0x1e8] ss:$72 sps:$4 sm:$0xff]   ;;  %v10110_v62 = vld [vmem:[%s16105_s0 + $0x274] ss:$72 sps:$4 sm:$0xff]  }
 0x188   :  { %v5249_v34 = vpop.f32.mrf.mxu0  ;;  %6152 = vmatpush1.bf16.msra.mxu0 %v10144_v53  ;;  %v10167_v53 = vld [vmem:[%s16106_s1 + $0x4c] ss:$16 sps:$4 sm:$0xff]  }
 0x189   :  { %v5410_v24 = vpop.f32.mrf.mxu1  ;;  %6313 = vmatpush1.bf16.msra.mxu1 %v10147_v15  ;;  %v12470_v3 = vadd.f32 %v5408_v13, %v5248_v28  ;;  %v5250_v12 = vadd.f32 %v5249_v34, %v12003_v20  ;;  %6153 = vmatprep.subr.bf16.mxu0 %v10158_v49  ;;  %v10176_v13 = vld [vmem:[%s16106_s1 + $0x1024] ss:$16 sps:$4 sm:$0xff]   ;;  %v10179_v28 = vld [vmem:[%s16106_s1 + $0x2c] ss:$16 sps:$4 sm:$0xff]  }
 0x18a   :  { %6314 = vmatprep.subr.bf16.mxu1 %v10161_v22  ;;  %v5253_v15 = vpop.f32.mrf.mxu0  ;;  %5876 = vmatmul.mubr.bf16.gmra.mxu0 %v10096_v26  ;;  %v10102_v22 = vld [vmem:[%s16105_s0 + $0x1e0] ss:$72 sps:$4 sm:$0xff]  }
 0x18b   :  { %v5414_v57 = vpop.f32.mrf.mxu1  ;;  %6037 = vmatmul.mubr.bf16.gmra.mxu1 %v10099_v63  ;;  %v12479_v42 = vadd.f32 %v5410_v24, %v5250_v12  ;;  %v5254_v10 = vadd.f32 %v5253_v15, %v12011_v27  ;;  %5885 = vmatprep.mubr.bf16.mxu0 %v10104_v6  ;;  %v10162_v26 = vld [vmem:[%s16106_s1 + $0x1040] ss:$16 sps:$4 sm:$0xff]   ;;  %v10165_v27 = vld [vmem:[%s16106_s1 + $0x48] ss:$16 sps:$4 sm:$0xff]  }
 0x18c   :  { %6046 = vmatprep.mubr.bf16.mxu1 %v10107_v44  ;;  %v5255_v20 = vpop.f32.mrf.mxu0  ;;  %6154 = vmatpush1.bf16.msra.mxu0 %v10156_v8  ;;  %v10113_v8 = vld [vmem:[%s16105_s0 + $0x27c] ss:$72 sps:$4 sm:$0xff]  }
 0x18d   :  { %v5416_v49 = vpop.f32.mrf.mxu1  ;;  %6315 = vmatpush1.bf16.msra.mxu1 %v10159_v16  ;;  %v12494_v63 = vadd.f32 %v5414_v57, %v5254_v10  ;;  %v5256_v6 = vadd.f32 %v5255_v20, %v12025_v35  ;;  %6155 = vmatprep.subr.bf16.mxu0 %v10164_v40  ;;  %v10174_v40 = vld [vmem:[%s16106_s1 + $0x1020] ss:$16 sps:$4 sm:$0xff]   ;;  %v10182_v57 = vld [vmem:[%s16106_s1 + $0x1004] ss:$16 sps:$4 sm:$0xff]   ;;  %v10185_v10 = vld [vmem:[%s16106_s1 + $0xc] ss:$16 sps:$4 sm:$0xff]  }
 0x18e   :  { %6316 = vmatprep.subr.bf16.mxu1 %v10167_v53  ;;  %v5257_v44 = vpop.f32.mrf.mxu0  ;;  %v10177_v53 = vld [vmem:[%s16106_s1 + $0x28] ss:$16 sps:$4 sm:$0xff]  }
 0x18f   :  { %v5418_v34 = vpop.f32.mrf.mxu1  ;;  %v12506_v24 = vadd.f32 %v5416_v49, %v5256_v6  ;;  %v5258_v35 = vadd.f32 %v5257_v44, %v12033_v41  ;;  %v10116_v44 = vld [vmem:[%s16105_s0 + $0x304] ss:$72 sps:$4 sm:$0xff]  }
 0x190   :  { %v5259_v16 = vpop.f32.mrf.mxu0  ;;  %6156 = vmatpush1.bf16.msra.mxu0 %v10162_v26 }
 0x191   :  { %v5420_v12 = vpop.f32.mrf.mxu1  ;;  %6317 = vmatpush1.bf16.msra.mxu1 %v10165_v27  ;;  %v12518_v15 = vadd.f32 %v5418_v34, %v5258_v35  ;;  %v5260_v41 = vadd.f32 %v5259_v16, %v12047_v56  ;;  %6157 = vmatprep.subr.bf16.mxu0 %v10176_v13  ;;  %v10108_v13 = vld [vmem:[%s16105_s0 + $0x270] ss:$72 sps:$4 sm:$0xff]   ;;  %v10194_v34 = vld [vmem:[%s16106_s1 + $0x11e4] ss:$16 sps:$4 sm:$0xff]   ;;  %v10197_v35 = vld [vmem:[%s16106_s1 + $0x1ec] ss:$16 sps:$4 sm:$0xff]  }
 0x192   :  { %6318 = vmatprep.subr.bf16.mxu1 %v10179_v28  ;;  %v5263_v20 = vpop.f32.mrf.mxu0  ;;  %5886 = vmatmul.mubr.bf16.gmra.mxu0 %v10102_v22  ;;  %v10111_v28 = vld [vmem:[%s16105_s0 + $0x278] ss:$72 sps:$4 sm:$0xff]  }
 0x193   :  { %v5424_v49 = vpop.f32.mrf.mxu1  ;;  %6047 = vmatmul.mubr.bf16.gmra.mxu1 %v10105_v54  ;;  %v12527_v26 = vadd.f32 %v5420_v12, %v5260_v41  ;;  %v5264_v27 = vadd.f32 %v5263_v20, %v12055_v2  ;;  %5895 = vmatprep.mubr.bf16.mxu0 %v10110_v62  ;;  %v10180_v22 = vld [vmem:[%s16106_s1 + $0x1000] ss:$16 sps:$4 sm:$0xff]   ;;  %v10183_v2 = vld [vmem:[%s16106_s1 + $0x8] ss:$16 sps:$4 sm:$0xff]  }
 0x194   :  { %6056 = vmatprep.mubr.bf16.mxu1 %v10113_v8  ;;  %v5265_v56 = vpop.f32.mrf.mxu0  ;;  %6158 = vmatpush1.bf16.msra.mxu0 %v10174_v40  ;;  %v10119_v40 = vld [vmem:[%s16105_s0 + $0x30c] ss:$72 sps:$4 sm:$0xff]  }
 0x195   :  { %v5426_v6 = vpop.f32.mrf.mxu1  ;;  %6319 = vmatpush1.bf16.msra.mxu1 %v10177_v53  ;;  %v12542_v54 = vadd.f32 %v5424_v49, %v5264_v27  ;;  %v5266_v62 = vadd.f32 %v5265_v56, %v12069_v14  ;;  %6159 = vmatprep.subr.bf16.mxu0 %v10182_v57  ;;  %v10192_v57 = vld [vmem:[%s16106_s1 + $0x11e0] ss:$16 sps:$4 sm:$0xff]   ;;  %v10200_v49 = vld [vmem:[%s16106_s1 + $0x11c4] ss:$16 sps:$4 sm:$0xff]   ;;  %v10203_v27 = vld [vmem:[%s16106_s1 + $0x1cc] ss:$16 sps:$4 sm:$0xff]  }
 0x196   :  { %6320 = vmatprep.subr.bf16.mxu1 %v10185_v10  ;;  %v5267_v8 = vpop.f32.mrf.mxu0  ;;  %v10195_v10 = vld [vmem:[%s16106_s1 + $0x1e8] ss:$16 sps:$4 sm:$0xff]  }
 0x197   :  { %v5428_v16 = vpop.f32.mrf.mxu1  ;;  %v12554_v12 = vadd.f32 %v5426_v6, %v5266_v62  ;;  %v5268_v14 = vadd.f32 %v5267_v8, %v12077_v21  ;;  %v10134_v8 = vld [vmem:[%s16105_s0 + $0x394] ss:$72 sps:$4 sm:$0xff]  }
 0x198   :  { %v5269_v53 = vpop.f32.mrf.mxu0  ;;  %6160 = vmatpush1.bf16.msra.mxu0 %v10180_v22 }
 0x199   :  { %v5430_v41 = vpop.f32.mrf.mxu1  ;;  %6321 = vmatpush1.bf16.msra.mxu1 %v10183_v2  ;;  %v12566_v20 = vadd.f32 %v5428_v16, %v5268_v14  ;;  %v5270_v21 = vadd.f32 %v5269_v53, %v12091_v31  ;;  %6161 = vmatprep.subr.bf16.mxu0 %v10194_v34  ;;  %v10114_v34 = vld [vmem:[%s16105_s0 + $0x300] ss:$72 sps:$4 sm:$0xff]   ;;  %v10212_v16 = vld [vmem:[%s16106_s1 + $0x11a4] ss:$16 sps:$4 sm:$0xff]   ;;  %v10215_v14 = vld [vmem:[%s16106_s1 + $0x1ac] ss:$16 sps:$4 sm:$0xff]  }
 0x19a   :  { %6322 = vmatprep.subr.bf16.mxu1 %v10197_v35  ;;  %v5273_v56 = vpop.f32.mrf.mxu0  ;;  %5896 = vmatmul.mubr.bf16.gmra.mxu0 %v10108_v13  ;;  %v10117_v35 = vld [vmem:[%s16105_s0 + $0x308] ss:$72 sps:$4 sm:$0xff]  }
 0x19b   :  { %v5434_v6 = vpop.f32.mrf.mxu1  ;;  %6057 = vmatmul.mubr.bf16.gmra.mxu1 %v10111_v28  ;;  %v12575_v22 = vadd.f32 %v5430_v41, %v5270_v21  ;;  %v5274_v2 = vadd.f32 %v5273_v56, %v12099_v38  ;;  %5905 = vmatprep.mubr.bf16.mxu0 %v10116_v44  ;;  %v10198_v13 = vld [vmem:[%s16106_s1 + $0x11c0] ss:$16 sps:$4 sm:$0xff]   ;;  %v10201_v38 = vld [vmem:[%s16106_s1 + $0x1c8] ss:$16 sps:$4 sm:$0xff]  }
 0x19c   :  { %6066 = vmatprep.mubr.bf16.mxu1 %v10119_v40  ;;  %v5275_v31 = vpop.f32.mrf.mxu0  ;;  %6162 = vmatpush2.bf16.msra.mxu0 %v10192_v57  ;;  %v10137_v57 = vld [vmem:[%s16105_s0 + $0x39c] ss:$72 sps:$4 sm:$0xff]  }
 0x19d   :  { %v5436_v62 = vpop.f32.mrf.mxu1  ;;  %6323 = vmatpush2.bf16.msra.mxu1 %v10195_v10  ;;  %v12590_v28 = vadd.f32 %v5434_v6, %v5274_v2  ;;  %v5276_v44 = vadd.f32 %v5275_v31, %v12113_v51  ;;  %6163 = vmatprep.subr.bf16.mxu0 %v10200_v49  ;;  %v10210_v49 = vld [vmem:[%s16106_s1 + $0x11a0] ss:$16 sps:$4 sm:$0xff]   ;;  %v10218_v6 = vld [vmem:[%s16106_s1 + $0x1184] ss:$16 sps:$4 sm:$0xff]   ;;  %v10221_v2 = vld [vmem:[%s16106_s1 + $0x18c] ss:$16 sps:$4 sm:$0xff]  }
 0x19e   :  { %6324 = vmatprep.subr.bf16.mxu1 %v10203_v27  ;;  %v5277_v40 = vpop.f32.mrf.mxu0  ;;  %v10213_v27 = vld [vmem:[%s16106_s1 + $0x1a8] ss:$16 sps:$4 sm:$0xff]  }
 0x19f   :  { %v5438_v53 = vpop.f32.mrf.mxu1  ;;  %v12602_v41 = vadd.f32 %v5436_v62, %v5276_v44  ;;  %v5278_v51 = vadd.f32 %v5277_v40, %v12121_v4  ;;  %v10152_v40 = vld [vmem:[%s16105_s0 + $0x424] ss:$72 sps:$4 sm:$0xff]  }
 0x1a0   :  { %v5279_v10 = vpop.f32.mrf.mxu0  ;;  %6164 = vmatpush2.bf16.msra.mxu0 %v10198_v13 }
 0x1a1   :  { %v5440_v21 = vpop.f32.mrf.mxu1  ;;  %6325 = vmatpush2.bf16.msra.mxu1 %v10201_v38  ;;  %v12614_v56 = vadd.f32 %v5438_v53, %v5278_v51  ;;  %v5280_v4 = vadd.f32 %v5279_v10, %v12135_v17  ;;  %6165 = vmatprep.subr.bf16.mxu0 %v10212_v16  ;;  %v10132_v16 = vld [vmem:[%s16105_s0 + $0x390] ss:$72 sps:$4 sm:$0xff]   ;;  %v10230_v53 = vld [vmem:[%s16106_s1 + $0x1164] ss:$16 sps:$4 sm:$0xff]   ;;  %v10233_v51 = vld [vmem:[%s16106_s1 + $0x16c] ss:$16 sps:$4 sm:$0xff]  }
 0x1a2   :  { %6326 = vmatprep.subr.bf16.mxu1 %v10215_v14  ;;  %v5283_v31 = vpop.f32.mrf.mxu0  ;;  %5906 = vmatmul.mubr.bf16.gmra.mxu0 %v10114_v34  ;;  %v10135_v14 = vld [vmem:[%s16105_s0 + $0x398] ss:$72 sps:$4 sm:$0xff]  }
 0x1a3   :  { %v5444_v62 = vpop.f32.mrf.mxu1  ;;  %6067 = vmatmul.mubr.bf16.gmra.mxu1 %v10117_v35  ;;  %v12623_v13 = vadd.f32 %v5440_v21, %v5280_v4  ;;  %v5284_v38 = vadd.f32 %v5283_v31, %v12143_v25  ;;  %5915 = vmatprep.mubr.bf16.mxu0 %v10134_v8  ;;  %v10216_v34 = vld [vmem:[%s16106_s1 + $0x1180] ss:$16 sps:$4 sm:$0xff]   ;;  %v10219_v25 = vld [vmem:[%s16106_s1 + $0x188] ss:$16 sps:$4 sm:$0xff]  }
 0x1a4   :  { %6076 = vmatprep.mubr.bf16.mxu1 %v10137_v57  ;;  %v5285_v17 = vpop.f32.mrf.mxu0  ;;  %6166 = vmatpush2.bf16.msra.mxu0 %v10210_v49  ;;  %v10155_v49 = vld [vmem:[%s16105_s0 + $0x42c] ss:$72 sps:$4 sm:$0xff]  }
 0x1a5   :  { %v5446_v44 = vpop.f32.mrf.mxu1  ;;  %6327 = vmatpush2.bf16.msra.mxu1 %v10213_v27  ;;  %v12638_v35 = vadd.f32 %v5444_v62, %v5284_v38  ;;  %v5286_v8 = vadd.f32 %v5285_v17, %v12157_v37  ;;  %6167 = vmatprep.subr.bf16.mxu0 %v10218_v6  ;;  %v10228_v6 = vld [vmem:[%s16106_s1 + $0x1160] ss:$16 sps:$4 sm:$0xff]   ;;  %v10236_v62 = vld [vmem:[%s16106_s1 + $0x1144] ss:$16 sps:$4 sm:$0xff]   ;;  %v10239_v38 = vld [vmem:[%s16106_s1 + $0x14c] ss:$16 sps:$4 sm:$0xff]  }
 0x1a6   :  { %6328 = vmatprep.subr.bf16.mxu1 %v10221_v2  ;;  %v5287_v57 = vpop.f32.mrf.mxu0  ;;  %v10231_v2 = vld [vmem:[%s16106_s1 + $0x168] ss:$16 sps:$4 sm:$0xff]  }
 0x1a7   :  { %v5448_v10 = vpop.f32.mrf.mxu1  ;;  %v12650_v21 = vadd.f32 %v5446_v44, %v5286_v8  ;;  %v5288_v37 = vadd.f32 %v5287_v57, %v12165_v45  ;;  %v10170_v57 = vld [vmem:[%s16105_s0 + $0x4b4] ss:$72 sps:$4 sm:$0xff]  }
 0x1a8   :  { %v5289_v27 = vpop.f32.mrf.mxu0  ;;  %6168 = vmatpush2.bf16.msra.mxu0 %v10216_v34 }
 0x1a9   :  { %v5450_v4 = vpop.f32.mrf.mxu1  ;;  %6329 = vmatpush2.bf16.msra.mxu1 %v10219_v25  ;;  %v12662_v31 = vadd.f32 %v5448_v10, %v5288_v37  ;;  %v5290_v45 = vadd.f32 %v5289_v27, %v12179_v7  ;;  %6169 = vmatprep.subr.bf16.mxu0 %v10230_v53  ;;  %v10150_v53 = vld [vmem:[%s16105_s0 + $0x420] ss:$72 sps:$4 sm:$0xff]   ;;  %v10246_v10 = vld [vmem:[%s16106_s1 + $0x1124] ss:$16 sps:$4 sm:$0xff]   ;;  %v10249_v37 = vld [vmem:[%s16106_s1 + $0x12c] ss:$16 sps:$4 sm:$0xff]  }
 0x1aa   :  { %6330 = vmatprep.subr.bf16.mxu1 %v10233_v51  ;;  %v5293_v17 = vpop.f32.mrf.mxu0  ;;  %5916 = vmatmul.mubr.bf16.gmra.mxu0 %v10132_v16  ;;  %v10153_v51 = vld [vmem:[%s16105_s0 + $0x428] ss:$72 sps:$4 sm:$0xff]  }
 0x1ab   :  { %v5454_v44 = vpop.f32.mrf.mxu1  ;;  %6077 = vmatmul.mubr.bf16.gmra.mxu1 %v10135_v14  ;;  %v12671_v34 = vadd.f32 %v5450_v4, %v5290_v45  ;;  %v5294_v25 = vadd.f32 %v5293_v17, %v12187_v18  ;;  %5925 = vmatprep.mubr.bf16.mxu0 %v10152_v40  ;;  %v10234_v16 = vld [vmem:[%s16106_s1 + $0x1140] ss:$16 sps:$4 sm:$0xff]   ;;  %v10237_v18 = vld [vmem:[%s16106_s1 + $0x148] ss:$16 sps:$4 sm:$0xff]  }
 0x1ac   :  { %6086 = vmatprep.mubr.bf16.mxu1 %v10155_v49  ;;  %v5295_v7 = vpop.f32.mrf.mxu0  ;;  %6170 = vmatpush2.bf16.msra.mxu0 %v10228_v6  ;;  %v10173_v6 = vld [vmem:[%s16105_s0 + $0x4bc] ss:$72 sps:$4 sm:$0xff]  }
 0x1ad   :  { %v5456_v8 = vpop.f32.mrf.mxu1  ;;  %6331 = vmatpush2.bf16.msra.mxu1 %v10231_v2  ;;  %v12686_v14 = vadd.f32 %v5454_v44, %v5294_v25  ;;  %v5296_v40 = vadd.f32 %v5295_v7, %v12201_v32  ;;  %6171 = vmatprep.subr.bf16.mxu0 %v10236_v62  ;;  %v10244_v62 = vld [vmem:[%s16106_s1 + $0x1120] ss:$16 sps:$4 sm:$0xff]   ;;  %v10252_v44 = vld [vmem:[%s16106_s1 + $0x1104] ss:$16 sps:$4 sm:$0xff]   ;;  %v10255_v25 = vld [vmem:[%s16106_s1 + $0x10c] ss:$16 sps:$4 sm:$0xff]  }
 0x1ae   :  { %6332 = vmatprep.subr.bf16.mxu1 %v10239_v38  ;;  %v5297_v49 = vpop.f32.mrf.mxu0  ;;  %v10247_v38 = vld [vmem:[%s16106_s1 + $0x128] ss:$16 sps:$4 sm:$0xff]  }
 0x1af   :  { %v5458_v27 = vpop.f32.mrf.mxu1  ;;  %v12698_v4 = vadd.f32 %v5456_v8, %v5296_v40  ;;  %v5298_v32 = vadd.f32 %v5297_v49, %v12209_v43  ;;  %v10188_v49 = vld [vmem:[%s16105_s0 + $0x544] ss:$72 sps:$4 sm:$0xff]  }
 0x1b0   :  { %v5299_v2 = vpop.f32.mrf.mxu0  ;;  %6172 = vmatpush2.bf16.msra.mxu0 %v10234_v16 }
 0x1b1   :  { %v5460_v45 = vpop.f32.mrf.mxu1  ;;  %6333 = vmatpush2.bf16.msra.mxu1 %v10237_v18  ;;  %v12710_v17 = vadd.f32 %v5458_v27, %v5298_v32  ;;  %v5300_v43 = vadd.f32 %v5299_v2, %v12223_v5  ;;  %6173 = vmatprep.subr.bf16.mxu0 %v10246_v10  ;;  %v10168_v10 = vld [vmem:[%s16105_s0 + $0x4b0] ss:$72 sps:$4 sm:$0xff]   ;;  %v10276_v27 = vld [vmem:[%s16106_s1 + $0x2ec] ss:$16 sps:$4 sm:$0xff]  }
 0x1b2   :  { %6334 = vmatprep.subr.bf16.mxu1 %v10249_v37  ;;  %v5303_v7 = vpop.f32.mrf.mxu0  ;;  %5926 = vmatmul.mubr.bf16.gmra.mxu0 %v10150_v53  ;;  %v10171_v37 = vld [vmem:[%s16105_s0 + $0x4b8] ss:$72 sps:$4 sm:$0xff]   ;;  %v10279_v32 = vld [vmem:[%s16106_s1 + $0x4ec] ss:$16 sps:$4 sm:$0xff]  }
 0x1b3   :  { %v5464_v8 = vpop.f32.mrf.mxu1  ;;  %6087 = vmatmul.mubr.bf16.gmra.mxu1 %v10153_v51  ;;  %v12719_v16 = vadd.f32 %v5460_v45, %v5300_v43  ;;  %v5304_v18 = vadd.f32 %v5303_v7, %v12231_v19  ;;  %5935 = vmatprep.mubr.bf16.mxu0 %v10170_v57  ;;  %v10250_v53 = vld [vmem:[%s16106_s1 + $0x1100] ss:$16 sps:$4 sm:$0xff]   ;;  %v10253_v19 = vld [vmem:[%s16106_s1 + $0x108] ss:$16 sps:$4 sm:$0xff]  }
 0x1b4   :  { %6096 = vmatprep.mubr.bf16.mxu1 %v10173_v6  ;;  %v5305_v5 = vpop.f32.mrf.mxu0  ;;  %6174 = vmatpush2.bf16.msra.mxu0 %v10244_v62  ;;  %v10191_v62 = vld [vmem:[%s16105_s0 + $0x54c] ss:$72 sps:$4 sm:$0xff]  }
 0x1b5   :  { %v5466_v40 = vpop.f32.mrf.mxu1  ;;  %6335 = vmatpush2.bf16.msra.mxu1 %v10247_v38  ;;  %v12734_v51 = vadd.f32 %v5464_v8, %v5304_v18  ;;  %v5306_v57 = vadd.f32 %v5305_v5, %v12245_v36  ;;  %6175 = vmatprep.subr.bf16.mxu0 %v10252_v44 }
 0x1b6   :  { %6336 = vmatprep.subr.bf16.mxu1 %v10255_v25  ;;  %v5307_v6 = vpop.f32.mrf.mxu0 }
 0x1b7   :  { %v5468_v2 = vpop.f32.mrf.mxu1  ;;  %v12746_v45 = vadd.f32 %v5466_v40, %v5306_v57  ;;  %v5308_v36 = vadd.f32 %v5307_v6, %v12253_v58 }
 0x1b8   :  { %v5309_v38 = vpop.f32.mrf.mxu0  ;;  %6176 = vmatpush2.bf16.msra.mxu0 %v10250_v53  ;;  %v10186_v53 = vld [vmem:[%s16105_s0 + $0x540] ss:$72 sps:$4 sm:$0xff]  }
 0x1b9   :  { %v5470_v43 = vpop.f32.mrf.mxu1  ;;  %6337 = vmatpush2.bf16.msra.mxu1 %v10253_v19  ;;  %v12752_v44 = vadd.f32 %v5468_v2, %v5308_v36  ;;  %v5310_v25 = vadd.f32 %v5309_v38, %v12261_v11  ;;  %6467 = vmatprep.subr.bf16.mxu0 %v10276_v27 }
 0x1ba   :  { %6628 = vmatprep.subr.bf16.mxu1 %v10279_v32  ;;  %v5313_v7 = vpop.f32.mrf.mxu0  ;;  %5936 = vmatmul.mubr.bf16.gmra.mxu0 %v10168_v10  ;;  %v10189_v10 = vld [vmem:[%s16105_s0 + $0x548] ss:$72 sps:$4 sm:$0xff]  }
 0x1bb   :  { %v5474_v8 = vpop.f32.mrf.mxu1  ;;  %6097 = vmatmul.mubr.bf16.gmra.mxu1 %v10171_v37  ;;  %v12755_v18 = vadd.f32 %v5470_v43, %v5310_v25  ;;  %v5314_v58 = vadd.f32 %v5313_v7, %v12263_v23  ;;  %5945 = vmatprep.mubr.bf16.mxu0 %v10188_v49  ;;  %v10206_v23 = vld [vmem:[%s16105_s0 + $0x5d4] ss:$72 sps:$4 sm:$0xff]  }
 0x1bc   :  { %6106 = vmatprep.mubr.bf16.mxu1 %v10191_v62  ;;  %v5315_v5 = vpop.f32.mrf.mxu0  ;;  %v10209_v49 = vld [vmem:[%s16105_s0 + $0x5dc] ss:$72 sps:$4 sm:$0xff]  }
 0x1bd   :  { %v5476_v40 = vpop.f32.mrf.mxu1  ;;  %v12761_v19 = vadd.f32 %v5474_v8, %v5314_v58  ;;  %v5316_v11 = vadd.f32 %v5315_v5, %v12265_v48 }
 0x1be   :  { %v5317_v37 = vpop.f32.mrf.mxu0 }
 0x1bf   :  { %v5478_v57 = vpop.f32.mrf.mxu1  ;;  %v12773_v27 = vadd.f32 %v5476_v40, %v5316_v11  ;;  %v5318_v32 = vadd.f32 %v5317_v37, %v12279_v59  ;;  %v10204_v59 = vld [vmem:[%s16105_s0 + $0x5d0] ss:$72 sps:$4 sm:$0xff]   ;;  %v10227_v40 = vld [vmem:[%s16105_s0 + $0x66c] ss:$72 sps:$4 sm:$0xff]  }
 0x1c0   :  { %v5319_v6 = vpop.f32.mrf.mxu0 }
 0x1c1   :  { %v5480_v48 = vpop.f32.mrf.mxu1  ;;  %v12776_v2 = vadd.f32 %v5478_v57, %v5318_v32  ;;  %v5320_v36 = vadd.f32 %v5319_v6, %v12281_v9  ;;  %v10207_v9 = vld [vmem:[%s16105_s0 + $0x5d8] ss:$72 sps:$4 sm:$0xff]  }
 0x1c2   :  { %v5323_v62 = vpop.f32.mrf.mxu0  ;;  %5946 = vmatmul.mubr.bf16.gmra.mxu0 %v10186_v53 }
 0x1c3   :  { %v5484_v38 = vpop.f32.mrf.mxu1  ;;  %6107 = vmatmul.mubr.bf16.gmra.mxu1 %v10189_v10  ;;  %v12779_v43 = vadd.f32 %v5480_v48, %v5320_v36  ;;  %v5324_v25 = vadd.f32 %v5323_v62, %v12283_v29  ;;  %5955 = vmatprep.mubr.bf16.mxu0 %v10206_v23  ;;  %v10224_v29 = vld [vmem:[%s16105_s0 + $0x664] ss:$72 sps:$4 sm:$0xff]   ;;  %v255_v48 = vld [vmem:[%s16105_s0 + $0x6f0] sm:$0xff]  ;;  %v256_v36 = vld [vmem:[%s16105_s0 + $0x6f8] sm:$0xff] }
 0x1c4   :  { %6116 = vmatprep.mubr.bf16.mxu1 %v10209_v49  ;;  %v5325_v7 = vpop.f32.mrf.mxu0 }
 0x1c5   :  { %v5486_v8 = vpop.f32.mrf.mxu1  ;;  %v12788_v58 = vadd.f32 %v5484_v38, %v5324_v25  ;;  %v5326_v5 = vadd.f32 %v5325_v7, %v12288_v39  ;;  %v10222_v7 = vld [vmem:[%s16105_s0 + $0x660] ss:$72 sps:$4 sm:$0xff]  }
 0x1c6   :  { %v5327_v53 = vpop.f32.mrf.mxu0 }
 0x1c7   :  { %v5488_v11 = vpop.f32.mrf.mxu1  ;;  %v12797_v10 = vadd.f32 %v5486_v8, %v5326_v5  ;;  %v5328_v23 = vadd.f32 %v5327_v53, %v12296_v30  ;;  %v16155_v30 = vld [vmem:[#allocation13_spill] sm:$0xff] }
 0x1c8   :  { %v5329_v37 = vpop.f32.mrf.mxu0  ;;  %v10225_v8 = vld [vmem:[%s16105_s0 + $0x668] ss:$72 sps:$4 sm:$0xff]  }
 0x1c9   :  { %v5490_v57 = vpop.f32.mrf.mxu1  ;;  %v12800_v49 = vadd.f32 %v5488_v11, %v5328_v23  ;;  %v5330_v39 = vadd.f32 %v5329_v37, %v12301_v61 }
 0x1ca   :  { %v5333_v32 = vpop.f32.mrf.mxu0  ;;  %5956 = vmatmul.mubr.bf16.gmra.mxu0 %v10204_v59 }
 0x1cb   :  { %v5494_v6 = vpop.f32.mrf.mxu1  ;;  %6117 = vmatmul.mubr.bf16.gmra.mxu1 %v10207_v9  ;;  %v12809_v62 = vadd.f32 %v5490_v57, %v5330_v39  ;;  %v5334_v38 = vadd.f32 %v5333_v32, %v16155_v30  ;;  %5965 = vmatprep.mubr.bf16.mxu0 %v10224_v29  ;;  %v16156_v9 = vld [vmem:[#allocation14_spill] sm:$0xff]  ;;  %v12823_v29 = vcombine.high %v255_v48, %v255_v48 }
 0x1cc   :  { %6126 = vmatprep.mubr.bf16.mxu1 %v10227_v40  ;;  %v5335_v25 = vpop.f32.mrf.mxu0  ;;  %v12825_v40 = vcombine.high %v256_v36, %v256_v36 }
 0x1cd   :  { %v5496_v61 = vpop.f32.mrf.mxu1  ;;  %v12818_v59 = vadd.f32 %v5494_v6, %v5334_v38  ;;  %v5336_v5 = vadd.f32 %v5335_v25, %v16156_v9  ;;  %16157 = vst [vmem:[#allocation13_spill] sm:$0xff] %v12823_v29 }
 0x1ce   :  { %v5337_v53 = vpop.f32.mrf.mxu0  ;;  %16158 = vst [vmem:[#allocation14_spill] sm:$0xff] %v12825_v40 }
 0x1cf   :  { %v5498_v11 = vpop.f32.mrf.mxu1  ;;  %v12821_v23 = vadd.f32 %v5496_v61, %v5336_v5 }
 0x1d0   :  { %v5338_v37 = vpop.f32.mrf.mxu0 }
 0x1d1   :  { %v5499_v57 = vpop.f32.mrf.mxu1 }
 0x1d2   :  { %v5535_v39 = vpop.f32.mrf.mxu0  ;;  %5966 = vmatmul.mubr.bf16.gmra.mxu0 %v10222_v7 }
 0x1d3   :  { %v5696_v32 = vpop.f32.mrf.mxu1  ;;  %6127 = vmatmul.mubr.bf16.gmra.mxu1 %v10225_v8 }
 0x1d4   :  { %14 = vsyncpa [#allocation3], 0  ;;  %v16159_v30 = vld [vmem:[#allocation17_spill] sm:$0xff]  ;;  %5975 = vmatprep.mubr.bf16.mxu0 %v12823_v29  ;;  %6136 = vmatprep.mubr.bf16.mxu1 %v12825_v40  ;;  %v5537_v38 = vpop.f32.mrf.mxu0  ;;  %v12833_v11 = vcombine.low %v255_v48, %v255_v48  ;;  %v12835_v37 = vcombine.low %v256_v36, %v256_v36  ;;  %vm8110_vm0 = vcmask 588800   ;;  %vm10919_vm1 = vmmov 0  }
 0x1d5   :  { %v5536_v6 = vadd.f32 %v5535_v39, %v16159_v30  ;;  %v5698_v25 = vpop.f32.mrf.mxu1  ;;  %v5538_v9 = vadd.f32 %v5537_v38, %v12336_v50  ;;  %v10258_v57 = vld [vmem:[%s16105_s0 + $0x44] ss:$72 sps:$4 sm:$0xff]   ;;  %vm8477_vm2 = vcmask 261120   ;;  %vm8551_vm3 = vcmask 74752  }
 0x1d6   :  { %v5539_v5 = vpop.f32.mrf.mxu0  ;;  %16160 = vst [vmem:[#allocation17_spill] sm:$0xff] %v12833_v11  ;;  %16161 = vst [vmem:[#allocation24_spill] sm:$0xff] %v12835_v37  ;;  %v16163_v36 = vld [vmem:[#allocation21_spill] sm:$0xff] }
 0x1d7   :  { %v12830_v61 = vadd.f32 %v5696_v32, %v5536_v6  ;;  %v5700_v53 = vpop.f32.mrf.mxu1  ;;  %v12837_v7 = vadd.f32 %v5698_v25, %v5538_v9  ;;  %v5540_v8 = vadd.f32 %v5539_v5, %v12342_v55  ;;  %v16162_v6 = vld [vmem:[#allocation20_spill] sm:$0xff]  ;;  %v10678_v25 = vld [vmem:[%s16105_s0 + $0x4] ss:$72 sps:$4 sm:$0xff]  }
 0x1d8   :  { %v5541_v39 = vpop.f32.mrf.mxu0 }
 0x1d9   :  { %v5702_v30 = vpop.f32.mrf.mxu1  ;;  %v12843_v32 = vadd.f32 %v5700_v53, %v5540_v8  ;;  %v5542_v50 = vadd.f32 %v5541_v39, %v16162_v6 }
 0x1da   :  { %v5545_v38 = vpop.f32.mrf.mxu0  ;;  %5976 = vmatmul.mubr.bf16.gmra.mxu0 %v12833_v11  ;;  %v10679_v11 = vld [vmem:[%s16105_s0] ss:$72 sps:$4 sm:$0xff]  }
 0x1db   :  { %v5706_v40 = vpop.f32.mrf.mxu1  ;;  %6137 = vmatmul.mubr.bf16.gmra.mxu1 %v12835_v37  ;;  %v12848_v48 = vadd.f32 %v5702_v30, %v5542_v50  ;;  %v5546_v55 = vadd.f32 %v5545_v38, %v16163_v36  ;;  %6177 = vmatprep.mubr.bf16.mxu0 %v10258_v57  ;;  %v10256_v30 = vld [vmem:[%s16105_s0 + $0x40] ss:$72 sps:$4 sm:$0xff]   ;;  %v10261_v38 = vld [vmem:[%s16105_s0 + $0xd4] ss:$72 sps:$4 sm:$0xff]  }
 0x1dc   :  { %6338 = vmatprep.mubr.bf16.mxu1 %v10678_v25  ;;  %v5547_v9 = vpop.f32.mrf.mxu0 }
 0x1dd   :  { %v5708_v5 = vpop.f32.mrf.mxu1  ;;  %v12854_v53 = vadd.f32 %v5706_v40, %v5546_v55  ;;  %v5548_v8 = vadd.f32 %v5547_v9, %v12371_v52  ;;  %v10274_v52 = vld [vmem:[%s16106_s1 + $0x2e8] ss:$16 sps:$4 sm:$0xff]  }
 0x1de   :  { %v5549_v39 = vpop.f32.mrf.mxu0  ;;  %v10277_v40 = vld [vmem:[%s16106_s1 + $0x4e8] ss:$16 sps:$4 sm:$0xff]  }
 0x1df   :  { %v5710_v6 = vpop.f32.mrf.mxu1  ;;  %v12860_v50 = vadd.f32 %v5708_v5, %v5548_v8  ;;  %v5550_v57 = vadd.f32 %v5549_v39, %v12380_v47  ;;  %v16165_v9 = vld [vmem:[#allocation22_spill] sm:$0xff] }
 0x1e0   :  { %v5551_v36 = vpop.f32.mrf.mxu0  ;;  %v10282_v47 = vld [vmem:[%s16106_s1 + $0x2cc] ss:$16 sps:$4 sm:$0xff]  }
 0x1e1   :  { %v5712_v25 = vpop.f32.mrf.mxu1  ;;  %v12872_v55 = vadd.f32 %v5710_v6, %v5550_v57  ;;  %v5552_v5 = vadd.f32 %v5551_v36, %v16165_v9  ;;  %v10285_v8 = vld [vmem:[%s16106_s1 + $0x4cc] ss:$16 sps:$4 sm:$0xff]   ;;  %v16166_v57 = vld [vmem:[#allocation23_spill] sm:$0xff] }
 0x1e2   :  { %v5555_v39 = vpop.f32.mrf.mxu0  ;;  %6178 = vmatmul.mubr.bf16.vlgmr.msra.gmra.mxu0 %v10256_v30  ;;  %v10680_v9 = vld [vmem:[%s16105_s0 + $0x94] ss:$72 sps:$4 sm:$0xff]   ;;  %v10280_v30 = vld [vmem:[%s16106_s1 + $0x2c8] ss:$16 sps:$4 sm:$0xff]  }
 0x1e3   :  { %16164 = vst [vmem:[#allocation20_spill] sm:$0xff] %v12872_v55  ;;  %v5716_v37 = vpop.f32.mrf.mxu1  ;;  %6339 = vmatmul.mubr.bf16.vlgmr.msra.gmra.mxu1 %v10679_v11  ;;  %v12884_v6 = vadd.f32 %v5712_v25, %v5552_v5  ;;  %v5556_v36 = vadd.f32 %v5555_v39, %v16166_v57  ;;  %6187 = vmatprep.mubr.bf16.mxu0 %v10261_v38  ;;  %v10283_v11 = vld [vmem:[%s16106_s1 + $0x4c8] ss:$16 sps:$4 sm:$0xff]   ;;  %v10291_v5 = vld [vmem:[%s16106_s1 + $0x2ac] ss:$16 sps:$4 sm:$0xff]  }
 0x1e4   :  { %6348 = vmatprep.mubr.bf16.mxu1 %v10680_v9  ;;  %v5557_v29 = vpop.f32.mrf.mxu0  ;;  %6468 = vmatpush1.bf16.msra.mxu0 %v10274_v52  ;;  %v10294_v52 = vld [vmem:[%s16106_s1 + $0x4ac] ss:$16 sps:$4 sm:$0xff]   ;;  %v10259_v57 = vld [vmem:[%s16105_s0 + $0xd0] ss:$72 sps:$4 sm:$0xff]  }
 0x1e5   :  { %v5718_v55 = vpop.f32.mrf.mxu1  ;;  %6629 = vmatpush1.bf16.msra.mxu1 %v10277_v40  ;;  %v12896_v25 = vadd.f32 %v5716_v37, %v5556_v36  ;;  %v5558_v38 = vadd.f32 %v5557_v29, %v12419_v60  ;;  %6469 = vmatprep.subr.bf16.mxu0 %v10282_v47  ;;  %v10264_v29 = vld [vmem:[%s16105_s0 + $0x164] ss:$72 sps:$4 sm:$0xff]   ;;  %v10289_v36 = vld [vmem:[%s16106_s1 + $0x2a8] ss:$16 sps:$4 sm:$0xff]  }
 0x1e6   :  { %6630 = vmatprep.subr.bf16.mxu1 %v10285_v8  ;;  %v5559_v40 = vpop.f32.mrf.mxu0  ;;  %v10292_v9 = vld [vmem:[%s16106_s1 + $0x4a8] ss:$16 sps:$4 sm:$0xff]  }
 0x1e7   :  { %v5720_v39 = vpop.f32.mrf.mxu1  ;;  %v12908_v37 = vadd.f32 %v5718_v55, %v5558_v38  ;;  %v5560_v60 = vadd.f32 %v5559_v40, %v12428_v1  ;;  %v10297_v38 = vld [vmem:[%s16106_s1 + $0x28c] ss:$16 sps:$4 sm:$0xff]  }
 0x1e8   :  { %v5561_v47 = vpop.f32.mrf.mxu0  ;;  %6470 = vmatpush1.bf16.msra.mxu0 %v10280_v30  ;;  %v10300_v30 = vld [vmem:[%s16106_s1 + $0x48c] ss:$16 sps:$4 sm:$0xff]  }
 0x1e9   :  { %v5722_v8 = vpop.f32.mrf.mxu1  ;;  %6631 = vmatpush1.bf16.msra.mxu1 %v10283_v11  ;;  %v12920_v55 = vadd.f32 %v5720_v39, %v5560_v60  ;;  %v5562_v1 = vadd.f32 %v5561_v47, %v12437_v46  ;;  %6471 = vmatprep.subr.bf16.mxu0 %v10291_v5  ;;  %v10681_v39 = vld [vmem:[%s16105_s0 + $0x90] ss:$72 sps:$4 sm:$0xff]   ;;  %v10682_v5 = vld [vmem:[%s16105_s0 + $0x124] ss:$72 sps:$4 sm:$0xff]  }
 0x1ea   :  { %6632 = vmatprep.subr.bf16.mxu1 %v10294_v52  ;;  %v5565_v11 = vpop.f32.mrf.mxu0  ;;  %6188 = vmatmul.mubr.bf16.gmra.mxu0 %v10259_v57  ;;  %v10295_v57 = vld [vmem:[%s16106_s1 + $0x288] ss:$16 sps:$4 sm:$0xff]  }
 0x1eb   :  { %v5726_v40 = vpop.f32.mrf.mxu1  ;;  %6349 = vmatmul.mubr.bf16.gmra.mxu1 %v10681_v39  ;;  %v12932_v60 = vadd.f32 %v5722_v8, %v5562_v1  ;;  %v5566_v46 = vadd.f32 %v5565_v11, %v12452_v33  ;;  %6197 = vmatprep.mubr.bf16.mxu0 %v10264_v29  ;;  %v10298_v8 = vld [vmem:[%s16106_s1 + $0x488] ss:$16 sps:$4 sm:$0xff]   ;;  %v10306_v29 = vld [vmem:[%s16106_s1 + $0x26c] ss:$16 sps:$4 sm:$0xff]  }
 0x1ec   :  { %6358 = vmatprep.mubr.bf16.mxu1 %v10682_v5  ;;  %v5567_v52 = vpop.f32.mrf.mxu0  ;;  %6472 = vmatpush1.bf16.msra.mxu0 %v10289_v36  ;;  %v10309_v36 = vld [vmem:[%s16106_s1 + $0x46c] ss:$16 sps:$4 sm:$0xff]   ;;  %v10262_v39 = vld [vmem:[%s16105_s0 + $0x160] ss:$72 sps:$4 sm:$0xff]  }
 0x1ed   :  { %v5728_v47 = vpop.f32.mrf.mxu1  ;;  %6633 = vmatpush1.bf16.msra.mxu1 %v10292_v9  ;;  %v12944_v1 = vadd.f32 %v5726_v40, %v5566_v46  ;;  %v5568_v33 = vadd.f32 %v5567_v52, %v12458_v0  ;;  %6473 = vmatprep.subr.bf16.mxu0 %v10297_v38  ;;  %v10267_v38 = vld [vmem:[%s16105_s0 + $0x1f4] ss:$72 sps:$4 sm:$0xff]   ;;  %v10304_v5 = vld [vmem:[%s16106_s1 + $0x268] ss:$16 sps:$4 sm:$0xff]  }
 0x1ee   :  { %6634 = vmatprep.subr.bf16.mxu1 %v10300_v30  ;;  %v5569_v9 = vpop.f32.mrf.mxu0  ;;  %v10307_v52 = vld [vmem:[%s16106_s1 + $0x468] ss:$16 sps:$4 sm:$0xff]  }
 0x1ef   :  { %v5730_v11 = vpop.f32.mrf.mxu1  ;;  %v12956_v40 = vadd.f32 %v5728_v47, %v5568_v33  ;;  %v5570_v0 = vadd.f32 %v5569_v9, %v12470_v3  ;;  %v10312_v33 = vld [vmem:[%s16106_s1 + $0x24c] ss:$16 sps:$4 sm:$0xff]  }
 0x1f0   :  { %v5571_v30 = vpop.f32.mrf.mxu0  ;;  %6474 = vmatpush1.bf16.msra.mxu0 %v10295_v57  ;;  %v10315_v57 = vld [vmem:[%s16106_s1 + $0x44c] ss:$16 sps:$4 sm:$0xff]  }
 0x1f1   :  { %v5732_v46 = vpop.f32.mrf.mxu1  ;;  %6635 = vmatpush1.bf16.msra.mxu1 %v10298_v8  ;;  %v12968_v47 = vadd.f32 %v5730_v11, %v5570_v0  ;;  %v5572_v3 = vadd.f32 %v5571_v30, %v12479_v42  ;;  %6475 = vmatprep.subr.bf16.mxu0 %v10306_v29  ;;  %v10683_v11 = vld [vmem:[%s16105_s0 + $0x120] ss:$72 sps:$4 sm:$0xff]   ;;  %v10684_v29 = vld [vmem:[%s16105_s0 + $0x1b4] ss:$72 sps:$4 sm:$0xff]  }
 0x1f2   :  { %6636 = vmatprep.subr.bf16.mxu1 %v10309_v36  ;;  %v5575_v8 = vpop.f32.mrf.mxu0  ;;  %6198 = vmatmul.mubr.bf16.gmra.mxu0 %v10262_v39  ;;  %v10310_v39 = vld [vmem:[%s16106_s1 + $0x248] ss:$16 sps:$4 sm:$0xff]  }
 0x1f3   :  { %v5736_v9 = vpop.f32.mrf.mxu1  ;;  %6359 = vmatmul.mubr.bf16.gmra.mxu1 %v10683_v11  ;;  %v12980_v0 = vadd.f32 %v5732_v46, %v5572_v3  ;;  %v5576_v42 = vadd.f32 %v5575_v8, %v12494_v63  ;;  %6207 = vmatprep.mubr.bf16.mxu0 %v10267_v38  ;;  %v10313_v46 = vld [vmem:[%s16106_s1 + $0x448] ss:$16 sps:$4 sm:$0xff]   ;;  %v10321_v38 = vld [vmem:[%s16106_s1 + $0x22c] ss:$16 sps:$4 sm:$0xff]  }
 0x1f4   :  { %6368 = vmatprep.mubr.bf16.mxu1 %v10684_v29  ;;  %v5577_v36 = vpop.f32.mrf.mxu0  ;;  %6476 = vmatpush1.bf16.msra.mxu0 %v10304_v5  ;;  %v10324_v5 = vld [vmem:[%s16106_s1 + $0x42c] ss:$16 sps:$4 sm:$0xff]   ;;  %v10265_v11 = vld [vmem:[%s16105_s0 + $0x1f0] ss:$72 sps:$4 sm:$0xff]  }
 0x1f5   :  { %v5738_v30 = vpop.f32.mrf.mxu1  ;;  %6637 = vmatpush1.bf16.msra.mxu1 %v10307_v52  ;;  %v12992_v3 = vadd.f32 %v5736_v9, %v5576_v42  ;;  %v5578_v63 = vadd.f32 %v5577_v36, %v12506_v24  ;;  %6477 = vmatprep.subr.bf16.mxu0 %v10312_v33  ;;  %v10270_v33 = vld [vmem:[%s16105_s0 + $0x284] ss:$72 sps:$4 sm:$0xff]   ;;  %v10319_v29 = vld [vmem:[%s16106_s1 + $0x228] ss:$16 sps:$4 sm:$0xff]  }
 0x1f6   :  { %6638 = vmatprep.subr.bf16.mxu1 %v10315_v57  ;;  %v5579_v52 = vpop.f32.mrf.mxu0  ;;  %v10322_v36 = vld [vmem:[%s16106_s1 + $0x428] ss:$16 sps:$4 sm:$0xff]  }
 0x1f7   :  { %v5740_v8 = vpop.f32.mrf.mxu1  ;;  %v13004_v9 = vadd.f32 %v5738_v30, %v5578_v63  ;;  %v5580_v24 = vadd.f32 %v5579_v52, %v12518_v15  ;;  %v10327_v63 = vld [vmem:[%s16106_s1 + $0x20c] ss:$16 sps:$4 sm:$0xff]  }
 0x1f8   :  { %v5581_v57 = vpop.f32.mrf.mxu0  ;;  %6478 = vmatpush1.bf16.msra.mxu0 %v10310_v39  ;;  %v10330_v39 = vld [vmem:[%s16106_s1 + $0x40c] ss:$16 sps:$4 sm:$0xff]  }
 0x1f9   :  { %v5742_v42 = vpop.f32.mrf.mxu1  ;;  %6639 = vmatpush1.bf16.msra.mxu1 %v10313_v46  ;;  %v13016_v30 = vadd.f32 %v5740_v8, %v5580_v24  ;;  %v5582_v15 = vadd.f32 %v5581_v57, %v12527_v26  ;;  %6479 = vmatprep.subr.bf16.mxu0 %v10321_v38  ;;  %v10685_v8 = vld [vmem:[%s16105_s0 + $0x1b0] ss:$72 sps:$4 sm:$0xff]   ;;  %v10686_v38 = vld [vmem:[%s16105_s0 + $0x244] ss:$72 sps:$4 sm:$0xff]  }
 0x1fa   :  { %6640 = vmatprep.subr.bf16.mxu1 %v10324_v5  ;;  %v5585_v46 = vpop.f32.mrf.mxu0  ;;  %6208 = vmatmul.mubr.bf16.gmra.mxu0 %v10265_v11  ;;  %v10325_v11 = vld [vmem:[%s16106_s1 + $0x208] ss:$16 sps:$4 sm:$0xff]  }
 0x1fb   :  { %v5746_v52 = vpop.f32.mrf.mxu1  ;;  %6369 = vmatmul.mubr.bf16.gmra.mxu1 %v10685_v8  ;;  %v13028_v24 = vadd.f32 %v5742_v42, %v5582_v15  ;;  %v5586_v26 = vadd.f32 %v5585_v46, %v12542_v54  ;;  %6217 = vmatprep.mubr.bf16.mxu0 %v10270_v33  ;;  %v10328_v42 = vld [vmem:[%s16106_s1 + $0x408] ss:$16 sps:$4 sm:$0xff]   ;;  %v10336_v33 = vld [vmem:[%s16106_s1 + $0x3ec] ss:$16 sps:$4 sm:$0xff]  }
 0x1fc   :  { %6378 = vmatprep.mubr.bf16.mxu1 %v10686_v38  ;;  %v5587_v5 = vpop.f32.mrf.mxu0  ;;  %6480 = vmatpush1.bf16.msra.mxu0 %v10319_v29  ;;  %v10339_v29 = vld [vmem:[%s16106_s1 + $0x5ec] ss:$16 sps:$4 sm:$0xff]   ;;  %v10268_v8 = vld [vmem:[%s16105_s0 + $0x280] ss:$72 sps:$4 sm:$0xff]  }
 0x1fd   :  { %v5748_v57 = vpop.f32.mrf.mxu1  ;;  %6641 = vmatpush1.bf16.msra.mxu1 %v10322_v36  ;;  %v13040_v15 = vadd.f32 %v5746_v52, %v5586_v26  ;;  %v5588_v54 = vadd.f32 %v5587_v5, %v12554_v12  ;;  %6481 = vmatprep.subr.bf16.mxu0 %v10327_v63  ;;  %v10273_v63 = vld [vmem:[%s16105_s0 + $0x314] ss:$72 sps:$4 sm:$0xff]   ;;  %v10334_v38 = vld [vmem:[%s16106_s1 + $0x3e8] ss:$16 sps:$4 sm:$0xff]  }
 0x1fe   :  { %6642 = vmatprep.subr.bf16.mxu1 %v10330_v39  ;;  %v5589_v36 = vpop.f32.mrf.mxu0  ;;  %v10337_v5 = vld [vmem:[%s16106_s1 + $0x5e8] ss:$16 sps:$4 sm:$0xff]  }
 0x1ff   :  { %v5750_v46 = vpop.f32.mrf.mxu1  ;;  %v13052_v52 = vadd.f32 %v5748_v57, %v5588_v54  ;;  %v5590_v12 = vadd.f32 %v5589_v36, %v12566_v20  ;;  %v10342_v54 = vld [vmem:[%s16106_s1 + $0x3cc] ss:$16 sps:$4 sm:$0xff]  }
 0x200   :  { %v5591_v39 = vpop.f32.mrf.mxu0  ;;  %6482 = vmatpush1.bf16.msra.mxu0 %v10325_v11  ;;  %v10345_v11 = vld [vmem:[%s16106_s1 + $0x5cc] ss:$16 sps:$4 sm:$0xff]  }
 0x201   :  { %v5752_v26 = vpop.f32.mrf.mxu1  ;;  %6643 = vmatpush1.bf16.msra.mxu1 %v10328_v42  ;;  %v13064_v57 = vadd.f32 %v5750_v46, %v5590_v12  ;;  %v5592_v20 = vadd.f32 %v5591_v39, %v12575_v22  ;;  %6483 = vmatprep.subr.bf16.mxu0 %v10336_v33  ;;  %v10687_v46 = vld [vmem:[%s16105_s0 + $0x240] ss:$72 sps:$4 sm:$0xff]   ;;  %v10688_v33 = vld [vmem:[%s16105_s0 + $0x2d4] ss:$72 sps:$4 sm:$0xff]  }
 0x202   :  { %6644 = vmatprep.subr.bf16.mxu1 %v10339_v29  ;;  %v5595_v42 = vpop.f32.mrf.mxu0  ;;  %6218 = vmatmul.mubr.bf16.gmra.mxu0 %v10268_v8  ;;  %v10340_v8 = vld [vmem:[%s16106_s1 + $0x3c8] ss:$16 sps:$4 sm:$0xff]  }
 0x203   :  { %v5756_v36 = vpop.f32.mrf.mxu1  ;;  %6379 = vmatmul.mubr.bf16.gmra.mxu1 %v10687_v46  ;;  %v13076_v12 = vadd.f32 %v5752_v26, %v5592_v20  ;;  %v5596_v22 = vadd.f32 %v5595_v42, %v12590_v28  ;;  %6227 = vmatprep.mubr.bf16.mxu0 %v10273_v63  ;;  %v10343_v26 = vld [vmem:[%s16106_s1 + $0x5c8] ss:$16 sps:$4 sm:$0xff]   ;;  %v10351_v63 = vld [vmem:[%s16106_s1 + $0x3ac] ss:$16 sps:$4 sm:$0xff]  }
 0x204   :  { %6388 = vmatprep.mubr.bf16.mxu1 %v10688_v33  ;;  %v5597_v29 = vpop.f32.mrf.mxu0  ;;  %6484 = vmatpush2.bf16.msra.mxu0 %v10334_v38  ;;  %v10354_v38 = vld [vmem:[%s16106_s1 + $0x5ac] ss:$16 sps:$4 sm:$0xff]   ;;  %v10271_v46 = vld [vmem:[%s16105_s0 + $0x310] ss:$72 sps:$4 sm:$0xff]  }
 0x205   :  { %v5758_v39 = vpop.f32.mrf.mxu1  ;;  %6645 = vmatpush2.bf16.msra.mxu1 %v10337_v5  ;;  %v13088_v20 = vadd.f32 %v5756_v36, %v5596_v22  ;;  %v5598_v28 = vadd.f32 %v5597_v29, %v12602_v41  ;;  %6485 = vmatprep.subr.bf16.mxu0 %v10342_v54  ;;  %v10288_v54 = vld [vmem:[%s16105_s0 + $0x3a4] ss:$72 sps:$4 sm:$0xff]   ;;  %v10349_v33 = vld [vmem:[%s16106_s1 + $0x3a8] ss:$16 sps:$4 sm:$0xff]  }
 0x206   :  { %6646 = vmatprep.subr.bf16.mxu1 %v10345_v11  ;;  %v5599_v5 = vpop.f32.mrf.mxu0  ;;  %v10352_v29 = vld [vmem:[%s16106_s1 + $0x5a8] ss:$16 sps:$4 sm:$0xff]  }
 0x207   :  { %v5760_v42 = vpop.f32.mrf.mxu1  ;;  %v13100_v36 = vadd.f32 %v5758_v39, %v5598_v28  ;;  %v5600_v41 = vadd.f32 %v5599_v5, %v12614_v56  ;;  %v10357_v28 = vld [vmem:[%s16106_s1 + $0x38c] ss:$16 sps:$4 sm:$0xff]  }
 0x208   :  { %v5601_v11 = vpop.f32.mrf.mxu0  ;;  %6486 = vmatpush2.bf16.msra.mxu0 %v10340_v8  ;;  %v10360_v8 = vld [vmem:[%s16106_s1 + $0x58c] ss:$16 sps:$4 sm:$0xff]  }
 0x209   :  { %v5762_v22 = vpop.f32.mrf.mxu1  ;;  %6647 = vmatpush2.bf16.msra.mxu1 %v10343_v26  ;;  %v13112_v39 = vadd.f32 %v5760_v42, %v5600_v41  ;;  %v5602_v56 = vadd.f32 %v5601_v11, %v12623_v13  ;;  %6487 = vmatprep.subr.bf16.mxu0 %v10351_v63  ;;  %v10689_v42 = vld [vmem:[%s16105_s0 + $0x2d0] ss:$72 sps:$4 sm:$0xff]   ;;  %v10690_v63 = vld [vmem:[%s16105_s0 + $0x364] ss:$72 sps:$4 sm:$0xff]  }
 0x20a   :  { %6648 = vmatprep.subr.bf16.mxu1 %v10354_v38  ;;  %v5605_v26 = vpop.f32.mrf.mxu0  ;;  %6228 = vmatmul.mubr.bf16.gmra.mxu0 %v10271_v46  ;;  %v10355_v46 = vld [vmem:[%s16106_s1 + $0x388] ss:$16 sps:$4 sm:$0xff]  }
 0x20b   :  { %v5766_v5 = vpop.f32.mrf.mxu1  ;;  %6389 = vmatmul.mubr.bf16.gmra.mxu1 %v10689_v42  ;;  %v13124_v41 = vadd.f32 %v5762_v22, %v5602_v56  ;;  %v5606_v13 = vadd.f32 %v5605_v26, %v12638_v35  ;;  %6237 = vmatprep.mubr.bf16.mxu0 %v10288_v54  ;;  %v10358_v22 = vld [vmem:[%s16106_s1 + $0x588] ss:$16 sps:$4 sm:$0xff]   ;;  %v10366_v54 = vld [vmem:[%s16106_s1 + $0x36c] ss:$16 sps:$4 sm:$0xff]  }
 0x20c   :  { %6398 = vmatprep.mubr.bf16.mxu1 %v10690_v63  ;;  %v5607_v38 = vpop.f32.mrf.mxu0  ;;  %6488 = vmatpush2.bf16.msra.mxu0 %v10349_v33  ;;  %v10369_v33 = vld [vmem:[%s16106_s1 + $0x56c] ss:$16 sps:$4 sm:$0xff]   ;;  %v10286_v42 = vld [vmem:[%s16105_s0 + $0x3a0] ss:$72 sps:$4 sm:$0xff]  }
 0x20d   :  { %v5768_v11 = vpop.f32.mrf.mxu1  ;;  %6649 = vmatpush2.bf16.msra.mxu1 %v10352_v29  ;;  %v13136_v56 = vadd.f32 %v5766_v5, %v5606_v13  ;;  %v5608_v35 = vadd.f32 %v5607_v38, %v12650_v21  ;;  %6489 = vmatprep.subr.bf16.mxu0 %v10357_v28  ;;  %v10303_v28 = vld [vmem:[%s16105_s0 + $0x434] ss:$72 sps:$4 sm:$0xff]   ;;  %v10364_v63 = vld [vmem:[%s16106_s1 + $0x368] ss:$16 sps:$4 sm:$0xff]  }
 0x20e   :  { %6650 = vmatprep.subr.bf16.mxu1 %v10360_v8  ;;  %v5609_v29 = vpop.f32.mrf.mxu0  ;;  %v10367_v38 = vld [vmem:[%s16106_s1 + $0x568] ss:$16 sps:$4 sm:$0xff]  }
 0x20f   :  { %v5770_v26 = vpop.f32.mrf.mxu1  ;;  %v13148_v5 = vadd.f32 %v5768_v11, %v5608_v35  ;;  %v5610_v21 = vadd.f32 %v5609_v29, %v12662_v31  ;;  %v10372_v35 = vld [vmem:[%s16106_s1 + $0x34c] ss:$16 sps:$4 sm:$0xff]  }
 0x210   :  { %v5611_v8 = vpop.f32.mrf.mxu0  ;;  %6490 = vmatpush2.bf16.msra.mxu0 %v10355_v46  ;;  %v10375_v46 = vld [vmem:[%s16106_s1 + $0x54c] ss:$16 sps:$4 sm:$0xff]  }
 0x211   :  { %v5772_v13 = vpop.f32.mrf.mxu1  ;;  %6651 = vmatpush2.bf16.msra.mxu1 %v10358_v22  ;;  %v13160_v11 = vadd.f32 %v5770_v26, %v5610_v21  ;;  %v5612_v31 = vadd.f32 %v5611_v8, %v12671_v34  ;;  %6491 = vmatprep.subr.bf16.mxu0 %v10366_v54  ;;  %v10691_v26 = vld [vmem:[%s16105_s0 + $0x360] ss:$72 sps:$4 sm:$0xff]   ;;  %v10692_v54 = vld [vmem:[%s16105_s0 + $0x3f4] ss:$72 sps:$4 sm:$0xff]  }
 0x212   :  { %6652 = vmatprep.subr.bf16.mxu1 %v10369_v33  ;;  %v5615_v22 = vpop.f32.mrf.mxu0  ;;  %6238 = vmatmul.mubr.bf16.gmra.mxu0 %v10286_v42  ;;  %v10370_v42 = vld [vmem:[%s16106_s1 + $0x348] ss:$16 sps:$4 sm:$0xff]  }
 0x213   :  { %v5776_v29 = vpop.f32.mrf.mxu1  ;;  %6399 = vmatmul.mubr.bf16.gmra.mxu1 %v10691_v26  ;;  %v13172_v21 = vadd.f32 %v5772_v13, %v5612_v31  ;;  %v5616_v34 = vadd.f32 %v5615_v22, %v12686_v14  ;;  %6247 = vmatprep.mubr.bf16.mxu0 %v10303_v28  ;;  %v10373_v13 = vld [vmem:[%s16106_s1 + $0x548] ss:$16 sps:$4 sm:$0xff]   ;;  %v10380_v28 = vld [vmem:[%s16106_s1 + $0x32c] ss:$16 sps:$4 sm:$0xff]  }
 0x214   :  { %6408 = vmatprep.mubr.bf16.mxu1 %v10692_v54  ;;  %v5617_v33 = vpop.f32.mrf.mxu0  ;;  %6492 = vmatpush2.bf16.msra.mxu0 %v10364_v63  ;;  %v10383_v63 = vld [vmem:[%s16106_s1 + $0x52c] ss:$16 sps:$4 sm:$0xff]   ;;  %v10301_v26 = vld [vmem:[%s16105_s0 + $0x430] ss:$72 sps:$4 sm:$0xff]  }
 0x215   :  { %v5778_v8 = vpop.f32.mrf.mxu1  ;;  %6653 = vmatpush2.bf16.msra.mxu1 %v10367_v38  ;;  %v13184_v31 = vadd.f32 %v5776_v29, %v5616_v34  ;;  %v5618_v14 = vadd.f32 %v5617_v33, %v12698_v4  ;;  %6493 = vmatprep.subr.bf16.mxu0 %v10372_v35  ;;  %v10318_v35 = vld [vmem:[%s16105_s0 + $0x4c4] ss:$72 sps:$4 sm:$0xff]   ;;  %v10378_v54 = vld [vmem:[%s16106_s1 + $0x328] ss:$16 sps:$4 sm:$0xff]  }
 0x216   :  { %6654 = vmatprep.subr.bf16.mxu1 %v10375_v46  ;;  %v5619_v38 = vpop.f32.mrf.mxu0  ;;  %v10381_v33 = vld [vmem:[%s16106_s1 + $0x528] ss:$16 sps:$4 sm:$0xff]  }
 0x217   :  { %v5780_v22 = vpop.f32.mrf.mxu1  ;;  %v13196_v29 = vadd.f32 %v5778_v8, %v5618_v14  ;;  %v5620_v4 = vadd.f32 %v5619_v38, %v12710_v17  ;;  %v10386_v14 = vld [vmem:[%s16106_s1 + $0x30c] ss:$16 sps:$4 sm:$0xff]  }
 0x218   :  { %v5621_v46 = vpop.f32.mrf.mxu0  ;;  %6494 = vmatpush2.bf16.msra.mxu0 %v10370_v42  ;;  %v10389_v42 = vld [vmem:[%s16106_s1 + $0x50c] ss:$16 sps:$4 sm:$0xff]  }
 0x219   :  { %v5782_v34 = vpop.f32.mrf.mxu1  ;;  %6655 = vmatpush2.bf16.msra.mxu1 %v10373_v13  ;;  %v13208_v8 = vadd.f32 %v5780_v22, %v5620_v4  ;;  %v5622_v17 = vadd.f32 %v5621_v46, %v12719_v16  ;;  %6495 = vmatprep.subr.bf16.mxu0 %v10380_v28  ;;  %v10693_v22 = vld [vmem:[%s16105_s0 + $0x3f0] ss:$72 sps:$4 sm:$0xff]   ;;  %v10694_v28 = vld [vmem:[%s16105_s0 + $0x484] ss:$72 sps:$4 sm:$0xff]  }
 0x21a   :  { %6656 = vmatprep.subr.bf16.mxu1 %v10383_v63  ;;  %v5625_v13 = vpop.f32.mrf.mxu0  ;;  %6248 = vmatmul.mubr.bf16.gmra.mxu0 %v10301_v26  ;;  %v10384_v26 = vld [vmem:[%s16106_s1 + $0x308] ss:$16 sps:$4 sm:$0xff]  }
 0x21b   :  { %v5786_v38 = vpop.f32.mrf.mxu1  ;;  %6409 = vmatmul.mubr.bf16.gmra.mxu1 %v10693_v22  ;;  %v13220_v4 = vadd.f32 %v5782_v34, %v5622_v17  ;;  %v5626_v16 = vadd.f32 %v5625_v13, %v12734_v51  ;;  %6257 = vmatprep.mubr.bf16.mxu0 %v10318_v35  ;;  %v10387_v34 = vld [vmem:[%s16106_s1 + $0x508] ss:$16 sps:$4 sm:$0xff]   ;;  %v10392_v35 = vld [vmem:[%s16106_s1 + $0x6ec] ss:$16 sps:$4 sm:$0xff]  }
 0x21c   :  { %6418 = vmatprep.mubr.bf16.mxu1 %v10694_v28  ;;  %v5627_v63 = vpop.f32.mrf.mxu0  ;;  %6496 = vmatpush2.bf16.msra.mxu0 %v10378_v54  ;;  %v10395_v54 = vld [vmem:[%s16106_s1 + $0x8ec] ss:$16 sps:$4 sm:$0xff]   ;;  %v10316_v22 = vld [vmem:[%s16105_s0 + $0x4c0] ss:$72 sps:$4 sm:$0xff]  }
 0x21d   :  { %16167 = vst [vmem:[#allocation21_spill] sm:$0xff] %v13220_v4  ;;  %v5788_v46 = vpop.f32.mrf.mxu1  ;;  %6657 = vmatpush2.bf16.msra.mxu1 %v10381_v33  ;;  %v13232_v17 = vadd.f32 %v5786_v38, %v5626_v16  ;;  %v5628_v51 = vadd.f32 %v5627_v63, %v12746_v45  ;;  %6497 = vmatprep.subr.bf16.mxu0 %v10386_v14  ;;  %v10333_v14 = vld [vmem:[%s16105_s0 + $0x554] ss:$72 sps:$4 sm:$0xff]  }
 0x21e   :  { %6658 = vmatprep.subr.bf16.mxu1 %v10389_v42  ;;  %v5629_v33 = vpop.f32.mrf.mxu0 }
 0x21f   :  { %16168 = vst [vmem:[#allocation22_spill] sm:$0xff] %v13232_v17  ;;  %v5790_v13 = vpop.f32.mrf.mxu1  ;;  %v13244_v38 = vadd.f32 %v5788_v46, %v5628_v51  ;;  %v5630_v45 = vadd.f32 %v5629_v33, %v12752_v44  ;;  %v10695_v44 = vld [vmem:[%s16105_s0 + $0x480] ss:$72 sps:$4 sm:$0xff]  }
 0x220   :  { %v5631_v42 = vpop.f32.mrf.mxu0  ;;  %6498 = vmatpush2.bf16.msra.mxu0 %v10384_v26  ;;  %v10696_v26 = vld [vmem:[%s16105_s0 + $0x514] ss:$72 sps:$4 sm:$0xff]  }
 0x221   :  { %v5792_v16 = vpop.f32.mrf.mxu1  ;;  %6659 = vmatpush2.bf16.msra.mxu1 %v10387_v34  ;;  %v13250_v28 = vadd.f32 %v5790_v13, %v5630_v45  ;;  %v5632_v63 = vadd.f32 %v5631_v42, %v12755_v18  ;;  %6789 = vmatprep.subr.bf16.mxu0 %v10392_v35 }
 0x222   :  { %6950 = vmatprep.subr.bf16.mxu1 %v10395_v54  ;;  %v5635_v17 = vpop.f32.mrf.mxu0  ;;  %6258 = vmatmul.mubr.bf16.gmra.mxu0 %v10316_v22  ;;  %v10331_v22 = vld [vmem:[%s16105_s0 + $0x550] ss:$72 sps:$4 sm:$0xff]  }
 0x223   :  { %v5796_v4 = vpop.f32.mrf.mxu1  ;;  %6419 = vmatmul.mubr.bf16.gmra.mxu1 %v10695_v44  ;;  %v13256_v46 = vadd.f32 %v5792_v16, %v5632_v63  ;;  %v5636_v51 = vadd.f32 %v5635_v17, %v12761_v19  ;;  %6267 = vmatprep.mubr.bf16.mxu0 %v10333_v14  ;;  %v10348_v17 = vld [vmem:[%s16105_s0 + $0x5e4] ss:$72 sps:$4 sm:$0xff]   ;;  %v10697_v44 = vld [vmem:[%s16105_s0 + $0x510] ss:$72 sps:$4 sm:$0xff]  }
 0x224   :  { %6428 = vmatprep.mubr.bf16.mxu1 %v10696_v26  ;;  %v5637_v18 = vpop.f32.mrf.mxu0  ;;  %v10698_v26 = vld [vmem:[%s16105_s0 + $0x5a4] ss:$72 sps:$4 sm:$0xff]  }
 0x225   :  { %v5798_v34 = vpop.f32.mrf.mxu1  ;;  %v13262_v35 = vadd.f32 %v5796_v4, %v5636_v51  ;;  %v5638_v54 = vadd.f32 %v5637_v18, %v12773_v27 }
 0x226   :  { %v5639_v33 = vpop.f32.mrf.mxu0 }
 0x227   :  { %v5800_v13 = vpop.f32.mrf.mxu1  ;;  %v13268_v45 = vadd.f32 %v5798_v34, %v5638_v54  ;;  %v5640_v19 = vadd.f32 %v5639_v33, %v12776_v2 }
 0x228   :  { %v5641_v14 = vpop.f32.mrf.mxu0 }
 0x229   :  { %v5802_v42 = vpop.f32.mrf.mxu1  ;;  %v13274_v4 = vadd.f32 %v5800_v13, %v5640_v19  ;;  %v5642_v27 = vadd.f32 %v5641_v14, %v12779_v43 }
 0x22a   :  { %v5645_v16 = vpop.f32.mrf.mxu0  ;;  %6268 = vmatmul.mubr.bf16.gmra.mxu0 %v10331_v22  ;;  %v10346_v22 = vld [vmem:[%s16105_s0 + $0x5e0] ss:$72 sps:$4 sm:$0xff]  }
 0x22b   :  { %v5806_v63 = vpop.f32.mrf.mxu1  ;;  %6429 = vmatmul.mubr.bf16.gmra.mxu1 %v10697_v44  ;;  %v13280_v51 = vadd.f32 %v5802_v42, %v5642_v27  ;;  %v5646_v2 = vadd.f32 %v5645_v16, %v12788_v58  ;;  %6277 = vmatprep.mubr.bf16.mxu0 %v10348_v17  ;;  %v10363_v17 = vld [vmem:[%s16105_s0 + $0x674] ss:$72 sps:$4 sm:$0xff]   ;;  %v10699_v44 = vld [vmem:[%s16105_s0 + $0x5a0] ss:$72 sps:$4 sm:$0xff]  }
 0x22c   :  { %6438 = vmatprep.mubr.bf16.mxu1 %v10698_v26  ;;  %v5647_v18 = vpop.f32.mrf.mxu0  ;;  %v10700_v26 = vld [vmem:[%s16105_s0 + $0x634] ss:$72 sps:$4 sm:$0xff]  }
 0x22d   :  { %v5808_v43 = vpop.f32.mrf.mxu1  ;;  %v13286_v34 = vadd.f32 %v5806_v63, %v5646_v2  ;;  %v5648_v54 = vadd.f32 %v5647_v18, %v12797_v10 }
 0x22e   :  { %v5649_v33 = vpop.f32.mrf.mxu0 }
 0x22f   :  { %v5810_v13 = vpop.f32.mrf.mxu1  ;;  %v13292_v19 = vadd.f32 %v5808_v43, %v5648_v54  ;;  %v5650_v58 = vadd.f32 %v5649_v33, %v12800_v49  ;;  %v257_v43 = vld [vmem:[%s16105_s0 + $0x700] sm:$0xff] }
 0x230   :  { %v5651_v14 = vpop.f32.mrf.mxu0 }
 0x231   :  { %v5812_v42 = vpop.f32.mrf.mxu1  ;;  %v13298_v27 = vadd.f32 %v5810_v13, %v5650_v58  ;;  %v5652_v10 = vadd.f32 %v5651_v14, %v12809_v62 }
 0x232   :  { %v5655_v16 = vpop.f32.mrf.mxu0  ;;  %6278 = vmatmul.mubr.bf16.gmra.mxu0 %v10346_v22 }
 0x233   :  { %v5816_v63 = vpop.f32.mrf.mxu1  ;;  %6439 = vmatmul.mubr.bf16.gmra.mxu1 %v10699_v44  ;;  %v13304_v2 = vadd.f32 %v5812_v42, %v5652_v10  ;;  %v5656_v49 = vadd.f32 %v5655_v16, %v12818_v59  ;;  %6287 = vmatprep.mubr.bf16.mxu0 %v10363_v17  ;;  %v10361_v59 = vld [vmem:[%s16105_s0 + $0x670] ss:$72 sps:$4 sm:$0xff]   ;;  %v13321_v17 = vcombine.high %v257_v43, %v257_v43  ;;  %v16170_v44 = vld [vmem:[#allocation5_spill] sm:$0xff] }
 0x234   :  { %6448 = vmatprep.mubr.bf16.mxu1 %v10700_v26  ;;  %v5657_v18 = vpop.f32.mrf.mxu0 }
 0x235   :  { %v5818_v62 = vpop.f32.mrf.mxu1  ;;  %v13313_v54 = vadd.f32 %v5816_v63, %v5656_v49  ;;  %v5658_v33 = vadd.f32 %v5657_v18, %v12821_v23  ;;  %16169 = vst [vmem:[#allocation23_spill] sm:$0xff] %v13321_v17  ;;  %v10701_v63 = vld [vmem:[%s16105_s0 + $0x630] ss:$72 sps:$4 sm:$0xff]  }
 0x236   :  { %v5659_v13 = vpop.f32.mrf.mxu0 }
 0x237   :  { %v5820_v22 = vpop.f32.mrf.mxu1  ;;  %v13319_v58 = vadd.f32 %v5818_v62, %v5658_v33 }
 0x238   :  { %v5660_v14 = vpop.f32.mrf.mxu0  ;;  %v13332_v22 = vcombine.low %v257_v43, %v257_v43 }
 0x239   :  { %v5821_v42 = vpop.f32.mrf.mxu1 }
 0x23a   :  { %v5857_v10 = vpop.f32.mrf.mxu0  ;;  %6288 = vmatmul.mubr.bf16.gmra.mxu0 %v10361_v59  ;;  %16171 = vst [vmem:[#allocation5_spill] sm:$0xff] %v13332_v22 }
 0x23b   :  { %v6018_v16 = vpop.f32.mrf.mxu1  ;;  %6449 = vmatmul.mubr.bf16.gmra.mxu1 %v10701_v63  ;;  %v5858_v23 = vadd.f32 %v5857_v10, %v12830_v61  ;;  %6297 = vmatprep.mubr.bf16.mxu0 %v13321_v17 }
 0x23c   :  { %6458 = vmatprep.mubr.bf16.mxu1 %v16170_v44  ;;  %v5859_v49 = vpop.f32.mrf.mxu0 }
 0x23d   :  { %v6020_v26 = vpop.f32.mrf.mxu1  ;;  %v13329_v18 = vadd.f32 %v6018_v16, %v5858_v23  ;;  %v5860_v62 = vadd.f32 %v5859_v49, %v12837_v7  ;;  %v16172_v16 = vld [vmem:[#allocation7_spill] sm:$0xff] }
 0x23e   :  { %v5861_v33 = vpop.f32.mrf.mxu0  ;;  %v10703_v23 = vld [vmem:[%s16105_s0 + $0x14] ss:$72 sps:$4 sm:$0xff]  }
 0x23f   :  { %v6022_v13 = vpop.f32.mrf.mxu1  ;;  %v13334_v59 = vadd.f32 %v6020_v26, %v5860_v62  ;;  %v5862_v14 = vadd.f32 %v5861_v33, %v12843_v32  ;;  %v10702_v32 = vld [vmem:[%s16105_s0 + $0xc] ss:$72 sps:$4 sm:$0xff]  }
 0x240   :  { %v5863_v42 = vpop.f32.mrf.mxu0 }
 0x241   :  { %v6024_v61 = vpop.f32.mrf.mxu1  ;;  %v13337_v10 = vadd.f32 %v6022_v13, %v5862_v14  ;;  %v5864_v63 = vadd.f32 %v5863_v42, %v12848_v48 }
 0x242   :  { %v5867_v44 = vpop.f32.mrf.mxu0  ;;  %6298 = vmatmul.mubr.bf16.gmra.mxu0 %v13332_v22 }
 0x243   :  { %v6028_v17 = vpop.f32.mrf.mxu1  ;;  %6459 = vmatmul.mubr.bf16.gmra.mxu1 %v16172_v16  ;;  %v13342_v7 = vadd.f32 %v6024_v61, %v5864_v63  ;;  %v5868_v43 = vadd.f32 %v5867_v44, %v12854_v53  ;;  %6499 = vmatprep.mubr.bf16.mxu0 %v10702_v32  ;;  %v16173_v53 = vld [vmem:[#allocation20_spill] sm:$0xff] }
 0x244   :  { %6660 = vmatprep.mubr.bf16.mxu1 %v10703_v23  ;;  %v5869_v48 = vpop.f32.mrf.mxu0  ;;  %v10390_v44 = vld [vmem:[%s16106_s1 + $0x6e8] ss:$16 sps:$4 sm:$0xff]   ;;  %v10401_v32 = vld [vmem:[%s16106_s1 + $0x8cc] ss:$16 sps:$4 sm:$0xff]  }
 0x245   :  { %v6030_v49 = vpop.f32.mrf.mxu1  ;;  %v13351_v26 = vadd.f32 %v6028_v17, %v5868_v43  ;;  %v5870_v62 = vadd.f32 %v5869_v48, %v12860_v50  ;;  %v10393_v16 = vld [vmem:[%s16106_s1 + $0x8e8] ss:$16 sps:$4 sm:$0xff]   ;;  %v10398_v43 = vld [vmem:[%s16106_s1 + $0x6cc] ss:$16 sps:$4 sm:$0xff]  }
 0x246   :  { %v5871_v33 = vpop.f32.mrf.mxu0 }
 0x247   :  { %v6032_v13 = vpop.f32.mrf.mxu1  ;;  %v13354_v14 = vadd.f32 %v6030_v49, %v5870_v62  ;;  %v5872_v42 = vadd.f32 %v5871_v33, %v16173_v53  ;;  %v10704_v49 = vld [vmem:[%s16105_s0 + $0x8] ss:$72 sps:$4 sm:$0xff]   ;;  %v10707_v53 = vld [vmem:[%s16105_s0 + $0xa4] ss:$72 sps:$4 sm:$0xff]  }
 0x248   :  { %v5873_v61 = vpop.f32.mrf.mxu0  ;;  %v10705_v62 = vld [vmem:[%s16105_s0 + $0x10] ss:$72 sps:$4 sm:$0xff]  }
 0x249   :  { %v6034_v63 = vpop.f32.mrf.mxu1  ;;  %v13363_v17 = vadd.f32 %v6032_v13, %v5872_v42  ;;  %v5874_v50 = vadd.f32 %v5873_v61, %v12884_v6  ;;  %v10706_v13 = vld [vmem:[%s16105_s0 + $0x9c] ss:$72 sps:$4 sm:$0xff]  }
 0x24a   :  { %v5877_v23 = vpop.f32.mrf.mxu0  ;;  %6500 = vmatmul.mubr.bf16.vlgmr.msra.gmra.mxu0 %v10704_v49  ;;  %v10404_v49 = vld [vmem:[%s16106_s1 + $0x6ac] ss:$16 sps:$4 sm:$0xff]  }
 0x24b   :  { %v6038_v48 = vpop.f32.mrf.mxu1  ;;  %6661 = vmatmul.mubr.bf16.vlgmr.msra.gmra.mxu1 %v10705_v62  ;;  %v13378_v6 = vadd.f32 %v6034_v63, %v5874_v50  ;;  %v5878_v33 = vadd.f32 %v5877_v23, %v12896_v25  ;;  %6509 = vmatprep.mubr.bf16.mxu0 %v10706_v13  ;;  %v10396_v63 = vld [vmem:[%s16106_s1 + $0x6c8] ss:$16 sps:$4 sm:$0xff]  }
 0x24c   :  { %6670 = vmatprep.mubr.bf16.mxu1 %v10707_v53  ;;  %v5879_v42 = vpop.f32.mrf.mxu0  ;;  %6790 = vmatpush1.bf16.msra.mxu0 %v10390_v44  ;;  %v10399_v25 = vld [vmem:[%s16106_s1 + $0x8c8] ss:$16 sps:$4 sm:$0xff]   ;;  %v10407_v44 = vld [vmem:[%s16106_s1 + $0x8ac] ss:$16 sps:$4 sm:$0xff]  }
 0x24d   :  { %v6040_v61 = vpop.f32.mrf.mxu1  ;;  %6951 = vmatpush1.bf16.msra.mxu1 %v10393_v16  ;;  %v13393_v50 = vadd.f32 %v6038_v48, %v5878_v33  ;;  %v5880_v23 = vadd.f32 %v5879_v42, %v12908_v37  ;;  %6791 = vmatprep.subr.bf16.mxu0 %v10398_v43  ;;  %v10402_v37 = vld [vmem:[%s16106_s1 + $0x6a8] ss:$16 sps:$4 sm:$0xff]  }
 0x24e   :  { %6952 = vmatprep.subr.bf16.mxu1 %v10401_v32  ;;  %v5881_v16 = vpop.f32.mrf.mxu0  ;;  %v10405_v43 = vld [vmem:[%s16106_s1 + $0x8a8] ss:$16 sps:$4 sm:$0xff]  }
 0x24f   :  { %v6042_v62 = vpop.f32.mrf.mxu1  ;;  %v13402_v13 = vadd.f32 %v6040_v61, %v5880_v23  ;;  %v5882_v53 = vadd.f32 %v5881_v16, %v12920_v55  ;;  %v10410_v55 = vld [vmem:[%s16106_s1 + $0x68c] ss:$16 sps:$4 sm:$0xff]   ;;  %v10708_v23 = vld [vmem:[%s16105_s0 + $0x98] ss:$72 sps:$4 sm:$0xff]  }
 0x250   :  { %v5883_v48 = vpop.f32.mrf.mxu0  ;;  %6792 = vmatpush1.bf16.msra.mxu0 %v10396_v63  ;;  %v10413_v61 = vld [vmem:[%s16106_s1 + $0x88c] ss:$16 sps:$4 sm:$0xff]  }
 0x251   :  { %v6044_v33 = vpop.f32.mrf.mxu1  ;;  %6953 = vmatpush1.bf16.msra.mxu1 %v10399_v25  ;;  %v13411_v32 = vadd.f32 %v6042_v62, %v5882_v53  ;;  %v5884_v42 = vadd.f32 %v5883_v48, %v12932_v60  ;;  %6793 = vmatprep.subr.bf16.mxu0 %v10404_v49  ;;  %v10709_v60 = vld [vmem:[%s16105_s0 + $0xa0] ss:$72 sps:$4 sm:$0xff]   ;;  %v10710_v16 = vld [vmem:[%s16105_s0 + $0x12c] ss:$72 sps:$4 sm:$0xff]  }
 0x252   :  { %6954 = vmatprep.subr.bf16.mxu1 %v10407_v44  ;;  %v5887_v63 = vpop.f32.mrf.mxu0  ;;  %6510 = vmatmul.mubr.bf16.gmra.mxu0 %v10708_v23  ;;  %v10711_v62 = vld [vmem:[%s16105_s0 + $0x134] ss:$72 sps:$4 sm:$0xff]  }
 0x253   :  { %v6048_v25 = vpop.f32.mrf.mxu1  ;;  %6671 = vmatmul.mubr.bf16.gmra.mxu1 %v10709_v60  ;;  %v13426_v49 = vadd.f32 %v6044_v33, %v5884_v42  ;;  %v5888_v44 = vadd.f32 %v5887_v63, %v12944_v1  ;;  %6519 = vmatprep.mubr.bf16.mxu0 %v10710_v16  ;;  %v10408_v33 = vld [vmem:[%s16106_s1 + $0x688] ss:$16 sps:$4 sm:$0xff]   ;;  %v10416_v23 = vld [vmem:[%s16106_s1 + $0x66c] ss:$16 sps:$4 sm:$0xff]  }
 0x254   :  { %6680 = vmatprep.mubr.bf16.mxu1 %v10711_v62  ;;  %v5889_v53 = vpop.f32.mrf.mxu0  ;;  %6794 = vmatpush1.bf16.msra.mxu0 %v10402_v37  ;;  %v10411_v1 = vld [vmem:[%s16106_s1 + $0x888] ss:$16 sps:$4 sm:$0xff]   ;;  %v10419_v37 = vld [vmem:[%s16106_s1 + $0x86c] ss:$16 sps:$4 sm:$0xff]  }
 0x255   :  { %v6050_v48 = vpop.f32.mrf.mxu1  ;;  %6955 = vmatpush1.bf16.msra.mxu1 %v10405_v43  ;;  %v13441_v42 = vadd.f32 %v6048_v25, %v5888_v44  ;;  %v5890_v63 = vadd.f32 %v5889_v53, %v12956_v40  ;;  %6795 = vmatprep.subr.bf16.mxu0 %v10410_v55  ;;  %v10414_v40 = vld [vmem:[%s16106_s1 + $0x668] ss:$16 sps:$4 sm:$0xff]  }
 0x256   :  { %6956 = vmatprep.subr.bf16.mxu1 %v10413_v61  ;;  %v5891_v43 = vpop.f32.mrf.mxu0  ;;  %v10417_v55 = vld [vmem:[%s16106_s1 + $0x868] ss:$16 sps:$4 sm:$0xff]  }
 0x257   :  { %v6052_v60 = vpop.f32.mrf.mxu1  ;;  %v13450_v16 = vadd.f32 %v6050_v48, %v5890_v63  ;;  %v5892_v62 = vadd.f32 %v5891_v43, %v12968_v47  ;;  %v10422_v47 = vld [vmem:[%s16106_s1 + $0x64c] ss:$16 sps:$4 sm:$0xff]   ;;  %v10712_v63 = vld [vmem:[%s16105_s0 + $0x128] ss:$72 sps:$4 sm:$0xff]  }
 0x258   :  { %v5893_v25 = vpop.f32.mrf.mxu0  ;;  %6796 = vmatpush1.bf16.msra.mxu0 %v10408_v33  ;;  %v10425_v48 = vld [vmem:[%s16106_s1 + $0x84c] ss:$16 sps:$4 sm:$0xff]  }
 0x259   :  { %v6054_v44 = vpop.f32.mrf.mxu1  ;;  %6957 = vmatpush1.bf16.msra.mxu1 %v10411_v1  ;;  %v13459_v61 = vadd.f32 %v6052_v60, %v5892_v62  ;;  %v5894_v53 = vadd.f32 %v5893_v25, %v12980_v0  ;;  %6797 = vmatprep.subr.bf16.mxu0 %v10416_v23  ;;  %v10713_v0 = vld [vmem:[%s16105_s0 + $0x130] ss:$72 sps:$4 sm:$0xff]   ;;  %v10714_v43 = vld [vmem:[%s16105_s0 + $0x1bc] ss:$72 sps:$4 sm:$0xff]  }
 0x25a   :  { %6958 = vmatprep.subr.bf16.mxu1 %v10419_v37  ;;  %v5897_v33 = vpop.f32.mrf.mxu0  ;;  %6520 = vmatmul.mubr.bf16.gmra.mxu0 %v10712_v63  ;;  %v10715_v60 = vld [vmem:[%s16105_s0 + $0x1c4] ss:$72 sps:$4 sm:$0xff]  }
 0x25b   :  { %v6058_v1 = vpop.f32.mrf.mxu1  ;;  %6681 = vmatmul.mubr.bf16.gmra.mxu1 %v10713_v0  ;;  %v13474_v23 = vadd.f32 %v6054_v44, %v5894_v53  ;;  %v5898_v37 = vadd.f32 %v5897_v33, %v12992_v3  ;;  %6529 = vmatprep.mubr.bf16.mxu0 %v10714_v43  ;;  %v10420_v44 = vld [vmem:[%s16106_s1 + $0x648] ss:$16 sps:$4 sm:$0xff]   ;;  %v10428_v63 = vld [vmem:[%s16106_s1 + $0x62c] ss:$16 sps:$4 sm:$0xff]  }
 0x25c   :  { %6690 = vmatprep.mubr.bf16.mxu1 %v10715_v60  ;;  %v5899_v62 = vpop.f32.mrf.mxu0  ;;  %6798 = vmatpush1.bf16.msra.mxu0 %v10414_v40  ;;  %v10423_v3 = vld [vmem:[%s16106_s1 + $0x848] ss:$16 sps:$4 sm:$0xff]   ;;  %v10431_v40 = vld [vmem:[%s16106_s1 + $0x82c] ss:$16 sps:$4 sm:$0xff]  }
 0x25d   :  { %v6060_v25 = vpop.f32.mrf.mxu1  ;;  %6959 = vmatpush1.bf16.msra.mxu1 %v10417_v55  ;;  %v13489_v53 = vadd.f32 %v6058_v1, %v5898_v37  ;;  %v5900_v33 = vadd.f32 %v5899_v62, %v13004_v9  ;;  %6799 = vmatprep.subr.bf16.mxu0 %v10422_v47  ;;  %v10426_v9 = vld [vmem:[%s16106_s1 + $0x628] ss:$16 sps:$4 sm:$0xff]  }
 0x25e   :  { %6960 = vmatprep.subr.bf16.mxu1 %v10425_v48  ;;  %v5901_v55 = vpop.f32.mrf.mxu0  ;;  %v10429_v47 = vld [vmem:[%s16106_s1 + $0x828] ss:$16 sps:$4 sm:$0xff]  }
 0x25f   :  { %v6062_v0 = vpop.f32.mrf.mxu1  ;;  %v13498_v43 = vadd.f32 %v6060_v25, %v5900_v33  ;;  %v5902_v60 = vadd.f32 %v5901_v55, %v13016_v30  ;;  %v10434_v30 = vld [vmem:[%s16106_s1 + $0x60c] ss:$16 sps:$4 sm:$0xff]   ;;  %v10716_v33 = vld [vmem:[%s16105_s0 + $0x1b8] ss:$72 sps:$4 sm:$0xff]  }
 0x260   :  { %v5903_v1 = vpop.f32.mrf.mxu0  ;;  %6800 = vmatpush1.bf16.msra.mxu0 %v10420_v44  ;;  %v10437_v25 = vld [vmem:[%s16106_s1 + $0x80c] ss:$16 sps:$4 sm:$0xff]  }
 0x261   :  { %v6064_v37 = vpop.f32.mrf.mxu1  ;;  %6961 = vmatpush1.bf16.msra.mxu1 %v10423_v3  ;;  %v13507_v48 = vadd.f32 %v6062_v0, %v5902_v60  ;;  %v5904_v62 = vadd.f32 %v5903_v1, %v13028_v24  ;;  %6801 = vmatprep.subr.bf16.mxu0 %v10428_v63  ;;  %v10717_v24 = vld [vmem:[%s16105_s0 + $0x1c0] ss:$72 sps:$4 sm:$0xff]   ;;  %v10718_v55 = vld [vmem:[%s16105_s0 + $0x24c] ss:$72 sps:$4 sm:$0xff]  }
 0x262   :  { %6962 = vmatprep.subr.bf16.mxu1 %v10431_v40  ;;  %v5907_v44 = vpop.f32.mrf.mxu0  ;;  %6530 = vmatmul.mubr.bf16.gmra.mxu0 %v10716_v33  ;;  %v10719_v0 = vld [vmem:[%s16105_s0 + $0x254] ss:$72 sps:$4 sm:$0xff]  }
 0x263   :  { %v6068_v3 = vpop.f32.mrf.mxu1  ;;  %6691 = vmatmul.mubr.bf16.gmra.mxu1 %v10717_v24  ;;  %v13522_v63 = vadd.f32 %v6064_v37, %v5904_v62  ;;  %v5908_v40 = vadd.f32 %v5907_v44, %v13040_v15  ;;  %6539 = vmatprep.mubr.bf16.mxu0 %v10718_v55  ;;  %v10432_v37 = vld [vmem:[%s16106_s1 + $0x608] ss:$16 sps:$4 sm:$0xff]   ;;  %v10440_v33 = vld [vmem:[%s16106_s1 + $0x7ec] ss:$16 sps:$4 sm:$0xff]  }
 0x264   :  { %6700 = vmatprep.mubr.bf16.mxu1 %v10719_v0  ;;  %v5909_v60 = vpop.f32.mrf.mxu0  ;;  %6802 = vmatpush1.bf16.msra.mxu0 %v10426_v9  ;;  %v10435_v15 = vld [vmem:[%s16106_s1 + $0x808] ss:$16 sps:$4 sm:$0xff]   ;;  %v10443_v9 = vld [vmem:[%s16106_s1 + $0x9ec] ss:$16 sps:$4 sm:$0xff]  }
 0x265   :  { %v6070_v1 = vpop.f32.mrf.mxu1  ;;  %6963 = vmatpush1.bf16.msra.mxu1 %v10429_v47  ;;  %v13537_v62 = vadd.f32 %v6068_v3, %v5908_v40  ;;  %v5910_v44 = vadd.f32 %v5909_v60, %v13052_v52  ;;  %6803 = vmatprep.subr.bf16.mxu0 %v10434_v30  ;;  %v10438_v52 = vld [vmem:[%s16106_s1 + $0x7e8] ss:$16 sps:$4 sm:$0xff]  }
 0x266   :  { %6964 = vmatprep.subr.bf16.mxu1 %v10437_v25  ;;  %v5911_v47 = vpop.f32.mrf.mxu0  ;;  %v10441_v30 = vld [vmem:[%s16106_s1 + $0x9e8] ss:$16 sps:$4 sm:$0xff]  }
 0x267   :  { %v6072_v24 = vpop.f32.mrf.mxu1  ;;  %v13546_v55 = vadd.f32 %v6070_v1, %v5910_v44  ;;  %v5912_v0 = vadd.f32 %v5911_v47, %v13064_v57  ;;  %v10446_v57 = vld [vmem:[%s16106_s1 + $0x7cc] ss:$16 sps:$4 sm:$0xff]   ;;  %v10720_v44 = vld [vmem:[%s16105_s0 + $0x248] ss:$72 sps:$4 sm:$0xff]  }
 0x268   :  { %v5913_v3 = vpop.f32.mrf.mxu0  ;;  %6804 = vmatpush1.bf16.msra.mxu0 %v10432_v37  ;;  %v10449_v1 = vld [vmem:[%s16106_s1 + $0x9cc] ss:$16 sps:$4 sm:$0xff]  }
 0x269   :  { %v6074_v40 = vpop.f32.mrf.mxu1  ;;  %6965 = vmatpush1.bf16.msra.mxu1 %v10435_v15  ;;  %v13555_v25 = vadd.f32 %v6072_v24, %v5912_v0  ;;  %v5914_v60 = vadd.f32 %v5913_v3, %v13076_v12  ;;  %6805 = vmatprep.subr.bf16.mxu0 %v10440_v33  ;;  %v10721_v12 = vld [vmem:[%s16105_s0 + $0x250] ss:$72 sps:$4 sm:$0xff]   ;;  %v10722_v47 = vld [vmem:[%s16105_s0 + $0x2dc] ss:$72 sps:$4 sm:$0xff]  }
 0x26a   :  { %6966 = vmatprep.subr.bf16.mxu1 %v10443_v9  ;;  %v5917_v37 = vpop.f32.mrf.mxu0  ;;  %6540 = vmatmul.mubr.bf16.gmra.mxu0 %v10720_v44  ;;  %v10723_v24 = vld [vmem:[%s16105_s0 + $0x2e4] ss:$72 sps:$4 sm:$0xff]  }
 0x26b   :  { %v6078_v15 = vpop.f32.mrf.mxu1  ;;  %6701 = vmatmul.mubr.bf16.gmra.mxu1 %v10721_v12  ;;  %v13570_v33 = vadd.f32 %v6074_v40, %v5914_v60  ;;  %v5918_v9 = vadd.f32 %v5917_v37, %v13088_v20  ;;  %6549 = vmatprep.mubr.bf16.mxu0 %v10722_v47  ;;  %v10444_v40 = vld [vmem:[%s16106_s1 + $0x7c8] ss:$16 sps:$4 sm:$0xff]   ;;  %v10452_v44 = vld [vmem:[%s16106_s1 + $0x7ac] ss:$16 sps:$4 sm:$0xff]  }
 0x26c   :  { %6710 = vmatprep.mubr.bf16.mxu1 %v10723_v24  ;;  %v5919_v0 = vpop.f32.mrf.mxu0  ;;  %6806 = vmatpush2.bf16.msra.mxu0 %v10438_v52  ;;  %v10447_v20 = vld [vmem:[%s16106_s1 + $0x9c8] ss:$16 sps:$4 sm:$0xff]   ;;  %v10455_v52 = vld [vmem:[%s16106_s1 + $0x9ac] ss:$16 sps:$4 sm:$0xff]  }
 0x26d   :  { %v6080_v3 = vpop.f32.mrf.mxu1  ;;  %6967 = vmatpush2.bf16.msra.mxu1 %v10441_v30  ;;  %v13585_v60 = vadd.f32 %v6078_v15, %v5918_v9  ;;  %v5920_v37 = vadd.f32 %v5919_v0, %v13100_v36  ;;  %6807 = vmatprep.subr.bf16.mxu0 %v10446_v57  ;;  %v10450_v36 = vld [vmem:[%s16106_s1 + $0x7a8] ss:$16 sps:$4 sm:$0xff]  }
 0x26e   :  { %6968 = vmatprep.subr.bf16.mxu1 %v10449_v1  ;;  %v5921_v30 = vpop.f32.mrf.mxu0  ;;  %v10453_v57 = vld [vmem:[%s16106_s1 + $0x9a8] ss:$16 sps:$4 sm:$0xff]  }
 0x26f   :  { %v6082_v12 = vpop.f32.mrf.mxu1  ;;  %v13594_v47 = vadd.f32 %v6080_v3, %v5920_v37  ;;  %v5922_v24 = vadd.f32 %v5921_v30, %v13112_v39  ;;  %v10458_v39 = vld [vmem:[%s16106_s1 + $0x78c] ss:$16 sps:$4 sm:$0xff]   ;;  %v10724_v37 = vld [vmem:[%s16105_s0 + $0x2d8] ss:$72 sps:$4 sm:$0xff]  }
 0x270   :  { %v5923_v15 = vpop.f32.mrf.mxu0  ;;  %6808 = vmatpush2.bf16.msra.mxu0 %v10444_v40  ;;  %v10461_v3 = vld [vmem:[%s16106_s1 + $0x98c] ss:$16 sps:$4 sm:$0xff]  }
 0x271   :  { %v6084_v9 = vpop.f32.mrf.mxu1  ;;  %6969 = vmatpush2.bf16.msra.mxu1 %v10447_v20  ;;  %v13603_v1 = vadd.f32 %v6082_v12, %v5922_v24  ;;  %v5924_v0 = vadd.f32 %v5923_v15, %v13124_v41  ;;  %6809 = vmatprep.subr.bf16.mxu0 %v10452_v44  ;;  %v10725_v41 = vld [vmem:[%s16105_s0 + $0x2e0] ss:$72 sps:$4 sm:$0xff]   ;;  %v10726_v30 = vld [vmem:[%s16105_s0 + $0x36c] ss:$72 sps:$4 sm:$0xff]  }
 0x272   :  { %6970 = vmatprep.subr.bf16.mxu1 %v10455_v52  ;;  %v5927_v40 = vpop.f32.mrf.mxu0  ;;  %6550 = vmatmul.mubr.bf16.gmra.mxu0 %v10724_v37  ;;  %v10727_v12 = vld [vmem:[%s16105_s0 + $0x374] ss:$72 sps:$4 sm:$0xff]  }
 0x273   :  { %v6088_v20 = vpop.f32.mrf.mxu1  ;;  %6711 = vmatmul.mubr.bf16.gmra.mxu1 %v10725_v41  ;;  %v13618_v44 = vadd.f32 %v6084_v9, %v5924_v0  ;;  %v5928_v52 = vadd.f32 %v5927_v40, %v13136_v56  ;;  %6559 = vmatprep.mubr.bf16.mxu0 %v10726_v30  ;;  %v10456_v9 = vld [vmem:[%s16106_s1 + $0x788] ss:$16 sps:$4 sm:$0xff]   ;;  %v10464_v37 = vld [vmem:[%s16106_s1 + $0x76c] ss:$16 sps:$4 sm:$0xff]  }
 0x274   :  { %6720 = vmatprep.mubr.bf16.mxu1 %v10727_v12  ;;  %v5929_v24 = vpop.f32.mrf.mxu0  ;;  %6810 = vmatpush2.bf16.msra.mxu0 %v10450_v36  ;;  %v10459_v56 = vld [vmem:[%s16106_s1 + $0x988] ss:$16 sps:$4 sm:$0xff]   ;;  %v10467_v36 = vld [vmem:[%s16106_s1 + $0x96c] ss:$16 sps:$4 sm:$0xff]  }
 0x275   :  { %v6090_v15 = vpop.f32.mrf.mxu1  ;;  %6971 = vmatpush2.bf16.msra.mxu1 %v10453_v57  ;;  %v13633_v0 = vadd.f32 %v6088_v20, %v5928_v52  ;;  %v5930_v40 = vadd.f32 %v5929_v24, %v13148_v5  ;;  %6811 = vmatprep.subr.bf16.mxu0 %v10458_v39  ;;  %v10462_v5 = vld [vmem:[%s16106_s1 + $0x768] ss:$16 sps:$4 sm:$0xff]  }
 0x276   :  { %6972 = vmatprep.subr.bf16.mxu1 %v10461_v3  ;;  %v5931_v57 = vpop.f32.mrf.mxu0  ;;  %v10465_v39 = vld [vmem:[%s16106_s1 + $0x968] ss:$16 sps:$4 sm:$0xff]  }
 0x277   :  { %v6092_v41 = vpop.f32.mrf.mxu1  ;;  %v13642_v30 = vadd.f32 %v6090_v15, %v5930_v40  ;;  %v5932_v12 = vadd.f32 %v5931_v57, %v13160_v11  ;;  %v10470_v11 = vld [vmem:[%s16106_s1 + $0x74c] ss:$16 sps:$4 sm:$0xff]   ;;  %v10728_v40 = vld [vmem:[%s16105_s0 + $0x368] ss:$72 sps:$4 sm:$0xff]  }
 0x278   :  { %v5933_v20 = vpop.f32.mrf.mxu0  ;;  %6812 = vmatpush2.bf16.msra.mxu0 %v10456_v9  ;;  %v10473_v15 = vld [vmem:[%s16106_s1 + $0x94c] ss:$16 sps:$4 sm:$0xff]  }
 0x279   :  { %v6094_v52 = vpop.f32.mrf.mxu1  ;;  %6973 = vmatpush2.bf16.msra.mxu1 %v10459_v56  ;;  %v13651_v3 = vadd.f32 %v6092_v41, %v5932_v12  ;;  %v5934_v24 = vadd.f32 %v5933_v20, %v13172_v21  ;;  %6813 = vmatprep.subr.bf16.mxu0 %v10464_v37  ;;  %v10729_v21 = vld [vmem:[%s16105_s0 + $0x370] ss:$72 sps:$4 sm:$0xff]   ;;  %v10730_v57 = vld [vmem:[%s16105_s0 + $0x3fc] ss:$72 sps:$4 sm:$0xff]  }
 0x27a   :  { %6974 = vmatprep.subr.bf16.mxu1 %v10467_v36  ;;  %v5937_v9 = vpop.f32.mrf.mxu0  ;;  %6560 = vmatmul.mubr.bf16.gmra.mxu0 %v10728_v40  ;;  %v10731_v41 = vld [vmem:[%s16105_s0 + $0x404] ss:$72 sps:$4 sm:$0xff]  }
 0x27b   :  { %v6098_v56 = vpop.f32.mrf.mxu1  ;;  %6721 = vmatmul.mubr.bf16.gmra.mxu1 %v10729_v21  ;;  %v13666_v37 = vadd.f32 %v6094_v52, %v5934_v24  ;;  %v5938_v36 = vadd.f32 %v5937_v9, %v13184_v31  ;;  %6569 = vmatprep.mubr.bf16.mxu0 %v10730_v57  ;;  %v10468_v52 = vld [vmem:[%s16106_s1 + $0x748] ss:$16 sps:$4 sm:$0xff]   ;;  %v10476_v40 = vld [vmem:[%s16106_s1 + $0x72c] ss:$16 sps:$4 sm:$0xff]  }
 0x27c   :  { %6730 = vmatprep.mubr.bf16.mxu1 %v10731_v41  ;;  %v5939_v12 = vpop.f32.mrf.mxu0  ;;  %6814 = vmatpush2.bf16.msra.mxu0 %v10462_v5  ;;  %v10471_v31 = vld [vmem:[%s16106_s1 + $0x948] ss:$16 sps:$4 sm:$0xff]   ;;  %v10479_v5 = vld [vmem:[%s16106_s1 + $0x92c] ss:$16 sps:$4 sm:$0xff]  }
 0x27d   :  { %v6100_v20 = vpop.f32.mrf.mxu1  ;;  %6975 = vmatpush2.bf16.msra.mxu1 %v10465_v39  ;;  %v13681_v24 = vadd.f32 %v6098_v56, %v5938_v36  ;;  %v5940_v9 = vadd.f32 %v5939_v12, %v13196_v29  ;;  %6815 = vmatprep.subr.bf16.mxu0 %v10470_v11  ;;  %v10474_v29 = vld [vmem:[%s16106_s1 + $0x728] ss:$16 sps:$4 sm:$0xff]  }
 0x27e   :  { %6976 = vmatprep.subr.bf16.mxu1 %v10473_v15  ;;  %v5941_v39 = vpop.f32.mrf.mxu0  ;;  %v10477_v11 = vld [vmem:[%s16106_s1 + $0x928] ss:$16 sps:$4 sm:$0xff]  }
 0x27f   :  { %v6102_v21 = vpop.f32.mrf.mxu1  ;;  %v13690_v57 = vadd.f32 %v6100_v20, %v5940_v9  ;;  %v5942_v41 = vadd.f32 %v5941_v39, %v13208_v8  ;;  %v16174_v12 = vld [vmem:[#allocation21_spill] sm:$0xff]  ;;  %v10482_v8 = vld [vmem:[%s16106_s1 + $0x70c] ss:$16 sps:$4 sm:$0xff]  }
 0x280   :  { %v5943_v56 = vpop.f32.mrf.mxu0  ;;  %6816 = vmatpush2.bf16.msra.mxu0 %v10468_v52  ;;  %v10485_v20 = vld [vmem:[%s16106_s1 + $0x90c] ss:$16 sps:$4 sm:$0xff]   ;;  %v10732_v9 = vld [vmem:[%s16105_s0 + $0x3f8] ss:$72 sps:$4 sm:$0xff]  }
 0x281   :  { %v6104_v36 = vpop.f32.mrf.mxu1  ;;  %6977 = vmatpush2.bf16.msra.mxu1 %v10471_v31  ;;  %v13699_v15 = vadd.f32 %v6102_v21, %v5942_v41  ;;  %v5944_v22 = vadd.f32 %v5943_v56, %v16174_v12  ;;  %6817 = vmatprep.subr.bf16.mxu0 %v10476_v40  ;;  %v10733_v40 = vld [vmem:[%s16105_s0 + $0x400] ss:$72 sps:$4 sm:$0xff]   ;;  %v10734_v41 = vld [vmem:[%s16105_s0 + $0x48c] ss:$72 sps:$4 sm:$0xff]  }
 0x282   :  { %6978 = vmatprep.subr.bf16.mxu1 %v10479_v5  ;;  %v5947_v52 = vpop.f32.mrf.mxu0  ;;  %6570 = vmatmul.mubr.bf16.gmra.mxu0 %v10732_v9  ;;  %v16176_v39 = vld [vmem:[#allocation22_spill] sm:$0xff]  ;;  %v10735_v56 = vld [vmem:[%s16105_s0 + $0x494] ss:$72 sps:$4 sm:$0xff]  }
 0x283   :  { %v6108_v31 = vpop.f32.mrf.mxu1  ;;  %6731 = vmatmul.mubr.bf16.gmra.mxu1 %v10733_v40  ;;  %v13714_v5 = vadd.f32 %v6104_v36, %v5944_v22  ;;  %v5948_v21 = vadd.f32 %v5947_v52, %v16176_v39  ;;  %6579 = vmatprep.mubr.bf16.mxu0 %v10734_v41  ;;  %v10480_v22 = vld [vmem:[%s16106_s1 + $0x708] ss:$16 sps:$4 sm:$0xff]   ;;  %v10488_v39 = vld [vmem:[%s16106_s1 + $0xaec] ss:$16 sps:$4 sm:$0xff]  }
 0x284   :  { %6740 = vmatprep.mubr.bf16.mxu1 %v10735_v56  ;;  %v5949_v12 = vpop.f32.mrf.mxu0  ;;  %6818 = vmatpush2.bf16.msra.mxu0 %v10474_v29  ;;  %v10483_v36 = vld [vmem:[%s16106_s1 + $0x908] ss:$16 sps:$4 sm:$0xff]   ;;  %v10491_v29 = vld [vmem:[%s16106_s1 + $0xcec] ss:$16 sps:$4 sm:$0xff]  }
 0x285   :  { %16175 = vst [vmem:[#allocation7_spill] sm:$0xff] %v13714_v5  ;;  %v6110_v9 = vpop.f32.mrf.mxu1  ;;  %6979 = vmatpush2.bf16.msra.mxu1 %v10477_v11  ;;  %v13729_v52 = vadd.f32 %v6108_v31, %v5948_v21  ;;  %v5950_v40 = vadd.f32 %v5949_v12, %v13244_v38  ;;  %6819 = vmatprep.subr.bf16.mxu0 %v10482_v8 }
 0x286   :  { %6980 = vmatprep.subr.bf16.mxu1 %v10485_v20  ;;  %v5951_v11 = vpop.f32.mrf.mxu0 }
 0x287   :  { %16177 = vst [vmem:[#allocation20_spill] sm:$0xff] %v13729_v52  ;;  %v6112_v41 = vpop.f32.mrf.mxu1  ;;  %v13738_v56 = vadd.f32 %v6110_v9, %v5950_v40  ;;  %v5952_v5 = vadd.f32 %v5951_v11, %v13250_v28  ;;  %v10736_v52 = vld [vmem:[%s16105_s0 + $0x488] ss:$72 sps:$4 sm:$0xff]  }
 0x288   :  { %v5953_v31 = vpop.f32.mrf.mxu0  ;;  %6820 = vmatpush2.bf16.msra.mxu0 %v10480_v22  ;;  %v10737_v28 = vld [vmem:[%s16105_s0 + $0x490] ss:$72 sps:$4 sm:$0xff]   ;;  %v10739_v22 = vld [vmem:[%s16105_s0 + $0x524] ss:$72 sps:$4 sm:$0xff]  }
 0x289   :  { %v6114_v21 = vpop.f32.mrf.mxu1  ;;  %6981 = vmatpush2.bf16.msra.mxu1 %v10483_v36  ;;  %v13741_v38 = vadd.f32 %v6112_v41, %v5952_v5  ;;  %v5954_v8 = vadd.f32 %v5953_v31, %v13256_v46  ;;  %7111 = vmatprep.subr.bf16.mxu0 %v10488_v39  ;;  %v10738_v46 = vld [vmem:[%s16105_s0 + $0x51c] ss:$72 sps:$4 sm:$0xff]  }
 0x28a   :  { %7272 = vmatprep.subr.bf16.mxu1 %v10491_v29  ;;  %v5957_v20 = vpop.f32.mrf.mxu0  ;;  %6580 = vmatmul.mubr.bf16.gmra.mxu0 %v10736_v52 }
 0x28b   :  { %v6118_v12 = vpop.f32.mrf.mxu1  ;;  %6741 = vmatmul.mubr.bf16.gmra.mxu1 %v10737_v28  ;;  %v13750_v9 = vadd.f32 %v6114_v21, %v5954_v8  ;;  %v5958_v5 = vadd.f32 %v5957_v20, %v13262_v35  ;;  %6589 = vmatprep.mubr.bf16.mxu0 %v10738_v46 }
 0x28c   :  { %6750 = vmatprep.mubr.bf16.mxu1 %v10739_v22  ;;  %v5959_v36 = vpop.f32.mrf.mxu0  ;;  %v10743_v22 = vld [vmem:[%s16105_s0 + $0x5b4] ss:$72 sps:$4 sm:$0xff]  }
 0x28d   :  { %v6120_v52 = vpop.f32.mrf.mxu1  ;;  %v13759_v40 = vadd.f32 %v6118_v12, %v5958_v5  ;;  %v5960_v39 = vadd.f32 %v5959_v36, %v13268_v45  ;;  %v10740_v12 = vld [vmem:[%s16105_s0 + $0x518] ss:$72 sps:$4 sm:$0xff]  }
 0x28e   :  { %v5961_v29 = vpop.f32.mrf.mxu0  ;;  %v10741_v45 = vld [vmem:[%s16105_s0 + $0x520] ss:$72 sps:$4 sm:$0xff]  }
 0x28f   :  { %v6122_v11 = vpop.f32.mrf.mxu1  ;;  %v13762_v41 = vadd.f32 %v6120_v52, %v5960_v39  ;;  %v5962_v35 = vadd.f32 %v5961_v29, %v13274_v4 }
 0x290   :  { %v5963_v31 = vpop.f32.mrf.mxu0 }
 0x291   :  { %v6124_v21 = vpop.f32.mrf.mxu1  ;;  %v13765_v8 = vadd.f32 %v6122_v11, %v5962_v35  ;;  %v5964_v20 = vadd.f32 %v5963_v31, %v13280_v51  ;;  %v10742_v51 = vld [vmem:[%s16105_s0 + $0x5ac] ss:$72 sps:$4 sm:$0xff]  }
 0x292   :  { %v5967_v28 = vpop.f32.mrf.mxu0  ;;  %6590 = vmatmul.mubr.bf16.gmra.mxu0 %v10740_v12 }
 0x293   :  { %v6128_v46 = vpop.f32.mrf.mxu1  ;;  %6751 = vmatmul.mubr.bf16.gmra.mxu1 %v10741_v45  ;;  %v13774_v5 = vadd.f32 %v6124_v21, %v5964_v20  ;;  %v5968_v4 = vadd.f32 %v5967_v28, %v13286_v34  ;;  %6599 = vmatprep.mubr.bf16.mxu0 %v10742_v51 }
 0x294   :  { %6760 = vmatprep.mubr.bf16.mxu1 %v10743_v22  ;;  %v5969_v36 = vpop.f32.mrf.mxu0  ;;  %v10747_v22 = vld [vmem:[%s16105_s0 + $0x644] ss:$72 sps:$4 sm:$0xff]  }
 0x295   :  { %v6130_v52 = vpop.f32.mrf.mxu1  ;;  %v13783_v39 = vadd.f32 %v6128_v46, %v5968_v4  ;;  %v5970_v29 = vadd.f32 %v5969_v36, %v13292_v19  ;;  %v10744_v46 = vld [vmem:[%s16105_s0 + $0x5a8] ss:$72 sps:$4 sm:$0xff]  }
 0x296   :  { %v5971_v11 = vpop.f32.mrf.mxu0  ;;  %v10745_v19 = vld [vmem:[%s16105_s0 + $0x5b0] ss:$72 sps:$4 sm:$0xff]  }
 0x297   :  { %v6132_v35 = vpop.f32.mrf.mxu1  ;;  %v13786_v31 = vadd.f32 %v6130_v52, %v5970_v29  ;;  %v5972_v34 = vadd.f32 %v5971_v11, %v13298_v27 }
 0x298   :  { %v5973_v21 = vpop.f32.mrf.mxu0 }
 0x299   :  { %v6134_v20 = vpop.f32.mrf.mxu1  ;;  %v13789_v28 = vadd.f32 %v6132_v35, %v5972_v34  ;;  %v5974_v12 = vadd.f32 %v5973_v21, %v13304_v2  ;;  %v10746_v2 = vld [vmem:[%s16105_s0 + $0x63c] ss:$72 sps:$4 sm:$0xff]  }
 0x29a   :  { %v5977_v45 = vpop.f32.mrf.mxu0  ;;  %6600 = vmatmul.mubr.bf16.gmra.mxu0 %v10744_v46  ;;  %v10748_v46 = vld [vmem:[%s16105_s0 + $0x638] ss:$72 sps:$4 sm:$0xff]  }
 0x29b   :  { %v6138_v51 = vpop.f32.mrf.mxu1  ;;  %6761 = vmatmul.mubr.bf16.gmra.mxu1 %v10745_v19  ;;  %v13798_v4 = vadd.f32 %v6134_v20, %v5974_v12  ;;  %v5978_v27 = vadd.f32 %v5977_v45, %v13313_v54  ;;  %6609 = vmatprep.mubr.bf16.mxu0 %v10746_v2  ;;  %v16179_v19 = vld [vmem:[#allocation6_spill] sm:$0xff] }
 0x29c   :  { %6770 = vmatprep.mubr.bf16.mxu1 %v10747_v22  ;;  %v5979_v36 = vpop.f32.mrf.mxu0 }
 0x29d   :  { %v6140_v52 = vpop.f32.mrf.mxu1  ;;  %v13807_v29 = vadd.f32 %v6138_v51, %v5978_v27  ;;  %v5980_v11 = vadd.f32 %v5979_v36, %v13319_v58  ;;  %v10749_v51 = vld [vmem:[%s16105_s0 + $0x640] ss:$72 sps:$4 sm:$0xff]  }
 0x29e   :  { %v5981_v35 = vpop.f32.mrf.mxu0  ;;  %v16180_v27 = vld [vmem:[#allocation9_spill] sm:$0xff] }
 0x29f   :  { %v6142_v34 = vpop.f32.mrf.mxu1  ;;  %v13810_v21 = vadd.f32 %v6140_v52, %v5980_v11 }
 0x2a0   :  { %v5982_v54 = vpop.f32.mrf.mxu0 }
 0x2a1   :  { %v6143_v20 = vpop.f32.mrf.mxu1 }
 0x2a2   :  { %v6179_v12 = vpop.f32.mrf.mxu0  ;;  %6610 = vmatmul.mubr.bf16.gmra.mxu0 %v10748_v46  ;;  %v16184_v46 = vld [vmem:[#allocation8_spill] sm:$0xff] }
 0x2a3   :  { %v13812_v45 = vpop.f32.mrf.mxu1  ;;  %6771 = vmatmul.mubr.bf16.gmra.mxu1 %v10749_v51  ;;  %v13821_v58 = vadd.f32 %v6179_v12, %v13329_v18  ;;  %6619 = vmatprep.mubr.bf16.mxu0 %v16179_v19  ;;  %v16185_v51 = vld [vmem:[#allocation11_spill] sm:$0xff] }
 0x2a4   :  { %6780 = vmatprep.mubr.bf16.mxu1 %v16180_v27  ;;  %v6181_v2 = vpop.f32.mrf.mxu0 }
 0x2a5   :  { %16178 = vst [vmem:[#allocation21_spill] sm:$0xff] %v13821_v58  ;;  %v13825_v22 = vpop.f32.mrf.mxu1  ;;  %v13828_v36 = vadd.f32 %v6181_v2, %v13334_v59  ;;  %v10754_v58 = vld [vmem:[%s16105_s0 + $0xac] ss:$72 sps:$4 sm:$0xff]  }
 0x2a6   :  { %v6183_v52 = vpop.f32.mrf.mxu0 }
 0x2a7   :  { %16181 = vst [vmem:[#allocation22_spill] sm:$0xff] %v13828_v36  ;;  %v13830_v11 = vpop.f32.mrf.mxu1  ;;  %v13833_v35 = vadd.f32 %v6183_v52, %v13337_v10  ;;  %v10750_v10 = vld [vmem:[%s16105_s0 + $0x1c] ss:$72 sps:$4 sm:$0xff]   ;;  %v10752_v36 = vld [vmem:[%s16105_s0 + $0x18] ss:$72 sps:$4 sm:$0xff]  }
 0x2a8   :  { %v6185_v34 = vpop.f32.mrf.mxu0 }
 0x2a9   :  { %16182 = vst [vmem:[#allocation6_spill] sm:$0xff] %v13833_v35  ;;  %v13835_v54 = vpop.f32.mrf.mxu1  ;;  %v13838_v18 = vadd.f32 %v6185_v34, %v13342_v7  ;;  %v10751_v7 = vld [vmem:[%s16105_s0 + $0x24] ss:$72 sps:$4 sm:$0xff]  }
 0x2aa   :  { %v6189_v20 = vpop.f32.mrf.mxu0  ;;  %6620 = vmatmul.mubr.bf16.gmra.mxu0 %v16184_v46 }
 0x2ab   :  { %16183 = vst [vmem:[#allocation9_spill] sm:$0xff] %v13838_v18  ;;  %v13840_v12 = vpop.f32.mrf.mxu1  ;;  %6781 = vmatmul.mubr.bf16.gmra.mxu1 %v16185_v51  ;;  %v13845_v59 = vadd.f32 %v6189_v20, %v13351_v26  ;;  %6821 = vmatprep.mubr.bf16.mxu0 %v10750_v10  ;;  %v10486_v51 = vld [vmem:[%s16106_s1 + $0xae8] ss:$16 sps:$4 sm:$0xff]   ;;  %v10755_v18 = vld [vmem:[%s16105_s0 + $0xb4] ss:$72 sps:$4 sm:$0xff]  }
 0x2ac   :  { %6982 = vmatprep.mubr.bf16.mxu1 %v10751_v7  ;;  %v6191_v19 = vpop.f32.mrf.mxu0  ;;  %v10489_v10 = vld [vmem:[%s16106_s1 + $0xce8] ss:$16 sps:$4 sm:$0xff]   ;;  %v10494_v7 = vld [vmem:[%s16106_s1 + $0xacc] ss:$16 sps:$4 sm:$0xff]  }
 0x2ad   :  { %16186 = vst [vmem:[#allocation8_spill] sm:$0xff] %v13845_v59  ;;  %v13853_v27 = vpop.f32.mrf.mxu1  ;;  %v13856_v2 = vadd.f32 %v6191_v19, %v13354_v14 }
 0x2ae   :  { %v6193_v52 = vpop.f32.mrf.mxu0 }
 0x2af   :  { %16187 = vst [vmem:[#allocation11_spill] sm:$0xff] %v13856_v2  ;;  %v13858_v34 = vpop.f32.mrf.mxu1  ;;  %v13861_v26 = vadd.f32 %v6193_v52, %v13363_v17  ;;  %v10497_v17 = vld [vmem:[%s16106_s1 + $0xccc] ss:$16 sps:$4 sm:$0xff]  }
 0x2b0   :  { %v6195_v20 = vpop.f32.mrf.mxu0 }
 0x2b1   :  { %16188 = vst [vmem:[#allocation25_spill] sm:$0xff] %v13861_v26  ;;  %v13863_v46 = vpop.f32.mrf.mxu1  ;;  %v13872_v14 = vadd.f32 %v6195_v20, %v13378_v6  ;;  %v10753_v6 = vld [vmem:[%s16105_s0 + $0x20] ss:$72 sps:$4 sm:$0xff]  }
 0x2b2   :  { %v6199_v19 = vpop.f32.mrf.mxu0  ;;  %6822 = vmatmul.mubr.bf16.vlgmr.msra.gmra.mxu0 %v10752_v36 }
 0x2b3   :  { %16189 = vst [vmem:[#allocation26_spill] sm:$0xff] %v13872_v14  ;;  %v13880_v52 = vpop.f32.mrf.mxu1  ;;  %6983 = vmatmul.mubr.bf16.vlgmr.msra.gmra.mxu1 %v10753_v6  ;;  %v13889_v20 = vadd.f32 %v6199_v19, %v13393_v50  ;;  %6831 = vmatprep.mubr.bf16.mxu0 %v10754_v58  ;;  %v10492_v50 = vld [vmem:[%s16106_s1 + $0xac8] ss:$16 sps:$4 sm:$0xff]  }
 0x2b4   :  { %6992 = vmatprep.mubr.bf16.mxu1 %v10755_v18  ;;  %v6201_v35 = vpop.f32.mrf.mxu0  ;;  %7112 = vmatpush1.bf16.msra.mxu0 %v10486_v51  ;;  %v10495_v19 = vld [vmem:[%s16106_s1 + $0xcc8] ss:$16 sps:$4 sm:$0xff]   ;;  %v10500_v18 = vld [vmem:[%s16106_s1 + $0xaac] ss:$16 sps:$4 sm:$0xff]  }
 0x2b5   :  { %16190 = vst [vmem:[#allocation27_spill] sm:$0xff] %v13889_v20  ;;  %v13897_v36 = vpop.f32.mrf.mxu1  ;;  %7273 = vmatpush1.bf16.msra.mxu1 %v10489_v10  ;;  %v13906_v58 = vadd.f32 %v6201_v35, %v13402_v13  ;;  %7113 = vmatprep.subr.bf16.mxu0 %v10494_v7  ;;  %v10503_v51 = vld [vmem:[%s16106_s1 + $0xcac] ss:$16 sps:$4 sm:$0xff]   ;;  %v10498_v13 = vld [vmem:[%s16106_s1 + $0xaa8] ss:$16 sps:$4 sm:$0xff]  }
 0x2b6   :  { %7274 = vmatprep.subr.bf16.mxu1 %v10497_v17  ;;  %v6203_v10 = vpop.f32.mrf.mxu0  ;;  %v10501_v35 = vld [vmem:[%s16106_s1 + $0xca8] ss:$16 sps:$4 sm:$0xff]   ;;  %v10509_v17 = vld [vmem:[%s16106_s1 + $0xc8c] ss:$16 sps:$4 sm:$0xff]  }
 0x2b7   :  { %16191 = vst [vmem:[#allocation28_spill] sm:$0xff] %v13906_v58  ;;  %v13914_v6 = vpop.f32.mrf.mxu1  ;;  %v13917_v2 = vadd.f32 %v6203_v10, %v13411_v32  ;;  %v10506_v32 = vld [vmem:[%s16106_s1 + $0xa8c] ss:$16 sps:$4 sm:$0xff]   ;;  %v10756_v10 = vld [vmem:[%s16105_s0 + $0xa8] ss:$72 sps:$4 sm:$0xff]  }
 0x2b8   :  { %v6205_v59 = vpop.f32.mrf.mxu0  ;;  %7114 = vmatpush1.bf16.msra.mxu0 %v10492_v50 }
 0x2b9   :  { %16192 = vst [vmem:[#allocation29_spill] sm:$0xff] %v13917_v2  ;;  %v13919_v14 = vpop.f32.mrf.mxu1  ;;  %7275 = vmatpush1.bf16.msra.mxu1 %v10495_v19  ;;  %v13928_v7 = vadd.f32 %v6205_v59, %v13426_v49  ;;  %7115 = vmatprep.subr.bf16.mxu0 %v10500_v18  ;;  %v10757_v49 = vld [vmem:[%s16105_s0 + $0xb0] ss:$72 sps:$4 sm:$0xff]   ;;  %v10758_v18 = vld [vmem:[%s16105_s0 + $0x13c] ss:$72 sps:$4 sm:$0xff]  }
 0x2ba   :  { %7276 = vmatprep.subr.bf16.mxu1 %v10503_v51  ;;  %v6209_v50 = vpop.f32.mrf.mxu0  ;;  %6832 = vmatmul.mubr.bf16.gmra.mxu0 %v10756_v10  ;;  %v10759_v51 = vld [vmem:[%s16105_s0 + $0x144] ss:$72 sps:$4 sm:$0xff]  }
 0x2bb   :  { %16193 = vst [vmem:[#allocation30_spill] sm:$0xff] %v13928_v7  ;;  %v13936_v19 = vpop.f32.mrf.mxu1  ;;  %6993 = vmatmul.mubr.bf16.gmra.mxu1 %v10757_v49  ;;  %v13945_v59 = vadd.f32 %v6209_v50, %v13441_v42  ;;  %6841 = vmatprep.mubr.bf16.mxu0 %v10758_v18  ;;  %v10504_v42 = vld [vmem:[%s16106_s1 + $0xa88] ss:$16 sps:$4 sm:$0xff]   ;;  %v10512_v18 = vld [vmem:[%s16106_s1 + $0xa6c] ss:$16 sps:$4 sm:$0xff]  }
 0x2bc   :  { %7002 = vmatprep.mubr.bf16.mxu1 %v10759_v51  ;;  %v6211_v26 = vpop.f32.mrf.mxu0  ;;  %7116 = vmatpush1.bf16.msra.mxu0 %v10498_v13  ;;  %v10507_v50 = vld [vmem:[%s16106_s1 + $0xc88] ss:$16 sps:$4 sm:$0xff]   ;;  %v10515_v13 = vld [vmem:[%s16106_s1 + $0xc6c] ss:$16 sps:$4 sm:$0xff]  }
 0x2bd   :  { %16194 = vst [vmem:[#allocation31_spill] sm:$0xff] %v13945_v59  ;;  %v13953_v10 = vpop.f32.mrf.mxu1  ;;  %7277 = vmatpush1.bf16.msra.mxu1 %v10501_v35  ;;  %v13962_v49 = vadd.f32 %v6211_v26, %v13450_v16  ;;  %7117 = vmatprep.subr.bf16.mxu0 %v10506_v32  ;;  %v10510_v16 = vld [vmem:[%s16106_s1 + $0xa68] ss:$16 sps:$4 sm:$0xff]  }
 0x2be   :  { %7278 = vmatprep.subr.bf16.mxu1 %v10509_v17  ;;  %v6213_v35 = vpop.f32.mrf.mxu0  ;;  %v10513_v26 = vld [vmem:[%s16106_s1 + $0xc68] ss:$16 sps:$4 sm:$0xff]   ;;  %v10521_v17 = vld [vmem:[%s16106_s1 + $0xc4c] ss:$16 sps:$4 sm:$0xff]  }
 0x2bf   :  { %16195 = vst [vmem:[#allocation32_spill] sm:$0xff] %v13962_v49  ;;  %v13970_v51 = vpop.f32.mrf.mxu1  ;;  %v13973_v58 = vadd.f32 %v6213_v35, %v13459_v61  ;;  %v10518_v61 = vld [vmem:[%s16106_s1 + $0xa4c] ss:$16 sps:$4 sm:$0xff]   ;;  %v10760_v35 = vld [vmem:[%s16105_s0 + $0x138] ss:$72 sps:$4 sm:$0xff]  }
 0x2c0   :  { %v6215_v20 = vpop.f32.mrf.mxu0  ;;  %7118 = vmatpush1.bf16.msra.mxu0 %v10504_v42 }
 0x2c1   :  { %16196 = vst [vmem:[#allocation33_spill] sm:$0xff] %v13973_v58  ;;  %v13975_v7 = vpop.f32.mrf.mxu1  ;;  %7279 = vmatpush1.bf16.msra.mxu1 %v10507_v50  ;;  %v13984_v32 = vadd.f32 %v6215_v20, %v13474_v23  ;;  %7119 = vmatprep.subr.bf16.mxu0 %v10512_v18  ;;  %v10761_v23 = vld [vmem:[%s16105_s0 + $0x140] ss:$72 sps:$4 sm:$0xff]   ;;  %v10762_v18 = vld [vmem:[%s16105_s0 + $0x1cc] ss:$72 sps:$4 sm:$0xff]  }
 0x2c2   :  { %7280 = vmatprep.subr.bf16.mxu1 %v10515_v13  ;;  %v6219_v42 = vpop.f32.mrf.mxu0  ;;  %6842 = vmatmul.mubr.bf16.gmra.mxu0 %v10760_v35  ;;  %v10763_v13 = vld [vmem:[%s16105_s0 + $0x1d4] ss:$72 sps:$4 sm:$0xff]  }
 0x2c3   :  { %16197 = vst [vmem:[#allocation34_spill] sm:$0xff] %v13984_v32  ;;  %v13992_v50 = vpop.f32.mrf.mxu1  ;;  %7003 = vmatmul.mubr.bf16.gmra.mxu1 %v10761_v23  ;;  %v14001_v20 = vadd.f32 %v6219_v42, %v13489_v53  ;;  %6851 = vmatprep.mubr.bf16.mxu0 %v10762_v18  ;;  %v10516_v53 = vld [vmem:[%s16106_s1 + $0xa48] ss:$16 sps:$4 sm:$0xff]   ;;  %v10524_v18 = vld [vmem:[%s16106_s1 + $0xa2c] ss:$16 sps:$4 sm:$0xff]  }
 0x2c4   :  { %7012 = vmatprep.mubr.bf16.mxu1 %v10763_v13  ;;  %v6221_v2 = vpop.f32.mrf.mxu0  ;;  %7120 = vmatpush1.bf16.msra.mxu0 %v10510_v16  ;;  %v10519_v42 = vld [vmem:[%s16106_s1 + $0xc48] ss:$16 sps:$4 sm:$0xff]   ;;  %v10527_v16 = vld [vmem:[%s16106_s1 + $0xc2c] ss:$16 sps:$4 sm:$0xff]  }
 0x2c5   :  { %16198 = vst [vmem:[#allocation35_spill] sm:$0xff] %v14001_v20  ;;  %v14009_v35 = vpop.f32.mrf.mxu1  ;;  %7281 = vmatpush1.bf16.msra.mxu1 %v10513_v26  ;;  %v14018_v23 = vadd.f32 %v6221_v2, %v13498_v43  ;;  %7121 = vmatprep.subr.bf16.mxu0 %v10518_v61  ;;  %v10522_v43 = vld [vmem:[%s16106_s1 + $0xa28] ss:$16 sps:$4 sm:$0xff]  }
 0x2c6   :  { %7282 = vmatprep.subr.bf16.mxu1 %v10521_v17  ;;  %v6223_v26 = vpop.f32.mrf.mxu0  ;;  %v10525_v2 = vld [vmem:[%s16106_s1 + $0xc28] ss:$16 sps:$4 sm:$0xff]   ;;  %v10533_v17 = vld [vmem:[%s16106_s1 + $0xc0c] ss:$16 sps:$4 sm:$0xff]  }
 0x2c7   :  { %16199 = vst [vmem:[#allocation36_spill] sm:$0xff] %v14018_v23  ;;  %v14026_v13 = vpop.f32.mrf.mxu1  ;;  %v14029_v49 = vadd.f32 %v6223_v26, %v13507_v48  ;;  %v10530_v48 = vld [vmem:[%s16106_s1 + $0xa0c] ss:$16 sps:$4 sm:$0xff]   ;;  %v10764_v26 = vld [vmem:[%s16105_s0 + $0x1c8] ss:$72 sps:$4 sm:$0xff]  }
 0x2c8   :  { %v6225_v59 = vpop.f32.mrf.mxu0  ;;  %7122 = vmatpush1.bf16.msra.mxu0 %v10516_v53 }
 0x2c9   :  { %16200 = vst [vmem:[#allocation37_spill] sm:$0xff] %v14029_v49  ;;  %v14031_v32 = vpop.f32.mrf.mxu1  ;;  %7283 = vmatpush1.bf16.msra.mxu1 %v10519_v42  ;;  %v14040_v61 = vadd.f32 %v6225_v59, %v13522_v63  ;;  %7123 = vmatprep.subr.bf16.mxu0 %v10524_v18  ;;  %v10765_v63 = vld [vmem:[%s16105_s0 + $0x1d0] ss:$72 sps:$4 sm:$0xff]   ;;  %v10766_v18 = vld [vmem:[%s16105_s0 + $0x25c] ss:$72 sps:$4 sm:$0xff]  }
 0x2ca   :  { %7284 = vmatprep.subr.bf16.mxu1 %v10527_v16  ;;  %v6229_v53 = vpop.f32.mrf.mxu0  ;;  %6852 = vmatmul.mubr.bf16.gmra.mxu0 %v10764_v26  ;;  %v10767_v16 = vld [vmem:[%s16105_s0 + $0x264] ss:$72 sps:$4 sm:$0xff]  }
 0x2cb   :  { %16201 = vst [vmem:[#allocation38_spill] sm:$0xff] %v14040_v61  ;;  %v14048_v42 = vpop.f32.mrf.mxu1  ;;  %7013 = vmatmul.mubr.bf16.gmra.mxu1 %v10765_v63  ;;  %v14057_v59 = vadd.f32 %v6229_v53, %v13537_v62  ;;  %6861 = vmatprep.mubr.bf16.mxu0 %v10766_v18  ;;  %v10528_v62 = vld [vmem:[%s16106_s1 + $0xa08] ss:$16 sps:$4 sm:$0xff]   ;;  %v10536_v18 = vld [vmem:[%s16106_s1 + $0xbec] ss:$16 sps:$4 sm:$0xff]  }
 0x2cc   :  { %7022 = vmatprep.mubr.bf16.mxu1 %v10767_v16  ;;  %v6231_v58 = vpop.f32.mrf.mxu0  ;;  %7124 = vmatpush1.bf16.msra.mxu0 %v10522_v43  ;;  %v10531_v53 = vld [vmem:[%s16106_s1 + $0xc08] ss:$16 sps:$4 sm:$0xff]   ;;  %v10539_v43 = vld [vmem:[%s16106_s1 + $0xdec] ss:$16 sps:$4 sm:$0xff]  }
 0x2cd   :  { %16202 = vst [vmem:[#allocation39_spill] sm:$0xff] %v14057_v59  ;;  %v14065_v26 = vpop.f32.mrf.mxu1  ;;  %7285 = vmatpush1.bf16.msra.mxu1 %v10525_v2  ;;  %v14074_v63 = vadd.f32 %v6231_v58, %v13546_v55  ;;  %7125 = vmatprep.subr.bf16.mxu0 %v10530_v48  ;;  %v10534_v55 = vld [vmem:[%s16106_s1 + $0xbe8] ss:$16 sps:$4 sm:$0xff]  }
 0x2ce   :  { %7286 = vmatprep.subr.bf16.mxu1 %v10533_v17  ;;  %v6233_v2 = vpop.f32.mrf.mxu0  ;;  %v10537_v58 = vld [vmem:[%s16106_s1 + $0xde8] ss:$16 sps:$4 sm:$0xff]   ;;  %v10545_v17 = vld [vmem:[%s16106_s1 + $0xdcc] ss:$16 sps:$4 sm:$0xff]  }
 0x2cf   :  { %16203 = vst [vmem:[#allocation40_spill] sm:$0xff] %v14074_v63  ;;  %v14082_v16 = vpop.f32.mrf.mxu1  ;;  %v14085_v23 = vadd.f32 %v6233_v2, %v13555_v25  ;;  %v10542_v25 = vld [vmem:[%s16106_s1 + $0xbcc] ss:$16 sps:$4 sm:$0xff]   ;;  %v10768_v2 = vld [vmem:[%s16105_s0 + $0x258] ss:$72 sps:$4 sm:$0xff]  }
 0x2d0   :  { %v6235_v20 = vpop.f32.mrf.mxu0  ;;  %7126 = vmatpush1.bf16.msra.mxu0 %v10528_v62 }
 0x2d1   :  { %16204 = vst [vmem:[#allocation41_spill] sm:$0xff] %v14085_v23  ;;  %v14087_v61 = vpop.f32.mrf.mxu1  ;;  %7287 = vmatpush1.bf16.msra.mxu1 %v10531_v53  ;;  %v14096_v48 = vadd.f32 %v6235_v20, %v13570_v33  ;;  %7127 = vmatprep.subr.bf16.mxu0 %v10536_v18  ;;  %v10769_v33 = vld [vmem:[%s16105_s0 + $0x260] ss:$72 sps:$4 sm:$0xff]   ;;  %v10770_v18 = vld [vmem:[%s16105_s0 + $0x2ec] ss:$72 sps:$4 sm:$0xff]  }
 0x2d2   :  { %7288 = vmatprep.subr.bf16.mxu1 %v10539_v43  ;;  %v6239_v62 = vpop.f32.mrf.mxu0  ;;  %6862 = vmatmul.mubr.bf16.gmra.mxu0 %v10768_v2  ;;  %v10771_v43 = vld [vmem:[%s16105_s0 + $0x2f4] ss:$72 sps:$4 sm:$0xff]  }
 0x2d3   :  { %16205 = vst [vmem:[#allocation42_spill] sm:$0xff] %v14096_v48  ;;  %v14104_v53 = vpop.f32.mrf.mxu1  ;;  %7023 = vmatmul.mubr.bf16.gmra.mxu1 %v10769_v33  ;;  %v14113_v20 = vadd.f32 %v6239_v62, %v13585_v60  ;;  %6871 = vmatprep.mubr.bf16.mxu0 %v10770_v18  ;;  %v10540_v60 = vld [vmem:[%s16106_s1 + $0xbc8] ss:$16 sps:$4 sm:$0xff]   ;;  %v10548_v18 = vld [vmem:[%s16106_s1 + $0xbac] ss:$16 sps:$4 sm:$0xff]  }
 0x2d4   :  { %7032 = vmatprep.mubr.bf16.mxu1 %v10771_v43  ;;  %v6241_v49 = vpop.f32.mrf.mxu0  ;;  %7128 = vmatpush2.bf16.msra.mxu0 %v10534_v55  ;;  %v10543_v62 = vld [vmem:[%s16106_s1 + $0xdc8] ss:$16 sps:$4 sm:$0xff]   ;;  %v10551_v55 = vld [vmem:[%s16106_s1 + $0xdac] ss:$16 sps:$4 sm:$0xff]  }
 0x2d5   :  { %16206 = vst [vmem:[#allocation43_spill] sm:$0xff] %v14113_v20  ;;  %v14121_v2 = vpop.f32.mrf.mxu1  ;;  %7289 = vmatpush2.bf16.msra.mxu1 %v10537_v58  ;;  %v14130_v33 = vadd.f32 %v6241_v49, %v13594_v47  ;;  %7129 = vmatprep.subr.bf16.mxu0 %v10542_v25  ;;  %v10546_v47 = vld [vmem:[%s16106_s1 + $0xba8] ss:$16 sps:$4 sm:$0xff]  }
 0x2d6   :  { %7290 = vmatprep.subr.bf16.mxu1 %v10545_v17  ;;  %v6243_v58 = vpop.f32.mrf.mxu0  ;;  %v10549_v49 = vld [vmem:[%s16106_s1 + $0xda8] ss:$16 sps:$4 sm:$0xff]   ;;  %v10557_v17 = vld [vmem:[%s16106_s1 + $0xd8c] ss:$16 sps:$4 sm:$0xff]  }
 0x2d7   :  { %16207 = vst [vmem:[#allocation44_spill] sm:$0xff] %v14130_v33  ;;  %v14138_v43 = vpop.f32.mrf.mxu1  ;;  %v14141_v63 = vadd.f32 %v6243_v58, %v13603_v1  ;;  %v10554_v1 = vld [vmem:[%s16106_s1 + $0xb8c] ss:$16 sps:$4 sm:$0xff]   ;;  %v10772_v58 = vld [vmem:[%s16105_s0 + $0x2e8] ss:$72 sps:$4 sm:$0xff]  }
 0x2d8   :  { %v6245_v59 = vpop.f32.mrf.mxu0  ;;  %7130 = vmatpush2.bf16.msra.mxu0 %v10540_v60 }
 0x2d9   :  { %16208 = vst [vmem:[#allocation45_spill] sm:$0xff] %v14141_v63  ;;  %v14143_v48 = vpop.f32.mrf.mxu1  ;;  %7291 = vmatpush2.bf16.msra.mxu1 %v10543_v62  ;;  %v14152_v25 = vadd.f32 %v6245_v59, %v13618_v44  ;;  %7131 = vmatprep.subr.bf16.mxu0 %v10548_v18  ;;  %v10773_v44 = vld [vmem:[%s16105_s0 + $0x2f0] ss:$72 sps:$4 sm:$0xff]   ;;  %v10774_v18 = vld [vmem:[%s16105_s0 + $0x37c] ss:$72 sps:$4 sm:$0xff]  }
 0x2da   :  { %7292 = vmatprep.subr.bf16.mxu1 %v10551_v55  ;;  %v6249_v60 = vpop.f32.mrf.mxu0  ;;  %6872 = vmatmul.mubr.bf16.gmra.mxu0 %v10772_v58  ;;  %v10775_v55 = vld [vmem:[%s16105_s0 + $0x384] ss:$72 sps:$4 sm:$0xff]  }
 0x2db   :  { %16209 = vst [vmem:[#allocation46_spill] sm:$0xff] %v14152_v25  ;;  %v14160_v62 = vpop.f32.mrf.mxu1  ;;  %7033 = vmatmul.mubr.bf16.gmra.mxu1 %v10773_v44  ;;  %v14169_v59 = vadd.f32 %v6249_v60, %v13633_v0  ;;  %6881 = vmatprep.mubr.bf16.mxu0 %v10774_v18  ;;  %v10552_v0 = vld [vmem:[%s16106_s1 + $0xb88] ss:$16 sps:$4 sm:$0xff]   ;;  %v10560_v18 = vld [vmem:[%s16106_s1 + $0xb6c] ss:$16 sps:$4 sm:$0xff]  }
 0x2dc   :  { %7042 = vmatprep.mubr.bf16.mxu1 %v10775_v55  ;;  %v6251_v23 = vpop.f32.mrf.mxu0  ;;  %7132 = vmatpush2.bf16.msra.mxu0 %v10546_v47  ;;  %v10555_v60 = vld [vmem:[%s16106_s1 + $0xd88] ss:$16 sps:$4 sm:$0xff]   ;;  %v10563_v47 = vld [vmem:[%s16106_s1 + $0xd6c] ss:$16 sps:$4 sm:$0xff]  }
 0x2dd   :  { %16210 = vst [vmem:[#allocation47_spill] sm:$0xff] %v14169_v59  ;;  %v14177_v58 = vpop.f32.mrf.mxu1  ;;  %7293 = vmatpush2.bf16.msra.mxu1 %v10549_v49  ;;  %v14186_v44 = vadd.f32 %v6251_v23, %v13642_v30  ;;  %7133 = vmatprep.subr.bf16.mxu0 %v10554_v1  ;;  %v10558_v30 = vld [vmem:[%s16106_s1 + $0xb68] ss:$16 sps:$4 sm:$0xff]  }
 0x2de   :  { %7294 = vmatprep.subr.bf16.mxu1 %v10557_v17  ;;  %v6253_v49 = vpop.f32.mrf.mxu0  ;;  %v10561_v23 = vld [vmem:[%s16106_s1 + $0xd68] ss:$16 sps:$4 sm:$0xff]   ;;  %v10569_v17 = vld [vmem:[%s16106_s1 + $0xd4c] ss:$16 sps:$4 sm:$0xff]  }
 0x2df   :  { %16211 = vst [vmem:[#allocation48_spill] sm:$0xff] %v14186_v44  ;;  %v14194_v55 = vpop.f32.mrf.mxu1  ;;  %v14197_v20 = vadd.f32 %v6253_v49, %v13651_v3  ;;  %v10566_v3 = vld [vmem:[%s16106_s1 + $0xb4c] ss:$16 sps:$4 sm:$0xff]   ;;  %v10776_v49 = vld [vmem:[%s16105_s0 + $0x378] ss:$72 sps:$4 sm:$0xff]  }
 0x2e0   :  { %v6255_v33 = vpop.f32.mrf.mxu0  ;;  %7134 = vmatpush2.bf16.msra.mxu0 %v10552_v0 }
 0x2e1   :  { %16212 = vst [vmem:[#allocation49_spill] sm:$0xff] %v14197_v20  ;;  %v14199_v63 = vpop.f32.mrf.mxu1  ;;  %7295 = vmatpush2.bf16.msra.mxu1 %v10555_v60  ;;  %v14208_v1 = vadd.f32 %v6255_v33, %v13666_v37  ;;  %7135 = vmatprep.subr.bf16.mxu0 %v10560_v18  ;;  %v10777_v37 = vld [vmem:[%s16105_s0 + $0x380] ss:$72 sps:$4 sm:$0xff]   ;;  %v10778_v18 = vld [vmem:[%s16105_s0 + $0x40c] ss:$72 sps:$4 sm:$0xff]  }
 0x2e2   :  { %7296 = vmatprep.subr.bf16.mxu1 %v10563_v47  ;;  %v6259_v0 = vpop.f32.mrf.mxu0  ;;  %6882 = vmatmul.mubr.bf16.gmra.mxu0 %v10776_v49  ;;  %v10779_v47 = vld [vmem:[%s16105_s0 + $0x414] ss:$72 sps:$4 sm:$0xff]  }
 0x2e3   :  { %v14216_v60 = vpop.f32.mrf.mxu1  ;;  %7043 = vmatmul.mubr.bf16.gmra.mxu1 %v10777_v37  ;;  %v14225_v33 = vadd.f32 %v6259_v0, %v13681_v24  ;;  %6891 = vmatprep.mubr.bf16.mxu0 %v10778_v18  ;;  %v10564_v24 = vld [vmem:[%s16106_s1 + $0xb48] ss:$16 sps:$4 sm:$0xff]   ;;  %v10572_v18 = vld [vmem:[%s16106_s1 + $0xb2c] ss:$16 sps:$4 sm:$0xff]  }
 0x2e4   :  { %7052 = vmatprep.mubr.bf16.mxu1 %v10779_v47  ;;  %v6261_v25 = vpop.f32.mrf.mxu0  ;;  %7136 = vmatpush2.bf16.msra.mxu0 %v10558_v30  ;;  %v10567_v0 = vld [vmem:[%s16106_s1 + $0xd48] ss:$16 sps:$4 sm:$0xff]   ;;  %v10575_v30 = vld [vmem:[%s16106_s1 + $0xd2c] ss:$16 sps:$4 sm:$0xff]  }
 0x2e5   :  { %16213 = vst [vmem:[#allocation50_spill] sm:$0xff] %v14225_v33  ;;  %v14233_v49 = vpop.f32.mrf.mxu1  ;;  %7297 = vmatpush2.bf16.msra.mxu1 %v10561_v23  ;;  %v14242_v37 = vadd.f32 %v6261_v25, %v13690_v57  ;;  %7137 = vmatprep.subr.bf16.mxu0 %v10566_v3  ;;  %v10570_v57 = vld [vmem:[%s16106_s1 + $0xb28] ss:$16 sps:$4 sm:$0xff]  }
 0x2e6   :  { %7298 = vmatprep.subr.bf16.mxu1 %v10569_v17  ;;  %v6263_v23 = vpop.f32.mrf.mxu0  ;;  %v10573_v25 = vld [vmem:[%s16106_s1 + $0xd28] ss:$16 sps:$4 sm:$0xff]  }
 0x2e7   :  { %16214 = vst [vmem:[#allocation51_spill] sm:$0xff] %v14242_v37  ;;  %v14250_v47 = vpop.f32.mrf.mxu1  ;;  %v14253_v33 = vadd.f32 %v6263_v23, %v13699_v15  ;;  %v16216_v3 = vld [vmem:[#allocation7_spill] sm:$0xff]  ;;  %v10578_v15 = vld [vmem:[%s16106_s1 + $0xb0c] ss:$16 sps:$4 sm:$0xff]  }
 0x2e8   :  { %v6265_v59 = vpop.f32.mrf.mxu0  ;;  %7138 = vmatpush2.bf16.msra.mxu0 %v10564_v24  ;;  %v10581_v24 = vld [vmem:[%s16106_s1 + $0xd0c] ss:$16 sps:$4 sm:$0xff]   ;;  %v10780_v37 = vld [vmem:[%s16105_s0 + $0x408] ss:$72 sps:$4 sm:$0xff]  }
 0x2e9   :  { %16215 = vst [vmem:[#allocation52_spill] sm:$0xff] %v14253_v33  ;;  %v14255_v44 = vpop.f32.mrf.mxu1  ;;  %7299 = vmatpush2.bf16.msra.mxu1 %v10567_v0  ;;  %v14264_v17 = vadd.f32 %v6265_v59, %v16216_v3  ;;  %7139 = vmatprep.subr.bf16.mxu0 %v10572_v18  ;;  %v10781_v59 = vld [vmem:[%s16105_s0 + $0x410] ss:$72 sps:$4 sm:$0xff]   ;;  %v10782_v3 = vld [vmem:[%s16105_s0 + $0x49c] ss:$72 sps:$4 sm:$0xff]  }
 0x2ea   :  { %7300 = vmatprep.subr.bf16.mxu1 %v10575_v30  ;;  %v6269_v0 = vpop.f32.mrf.mxu0  ;;  %6892 = vmatmul.mubr.bf16.gmra.mxu0 %v10780_v37  ;;  %v16218_v18 = vld [vmem:[#allocation20_spill] sm:$0xff] }
 0x2eb   :  { %16217 = vst [vmem:[#allocation7_spill] sm:$0xff] %v14264_v17  ;;  %v14272_v23 = vpop.f32.mrf.mxu1  ;;  %7053 = vmatmul.mubr.bf16.gmra.mxu1 %v10781_v59  ;;  %v14281_v30 = vadd.f32 %v6269_v0, %v16218_v18  ;;  %6901 = vmatprep.mubr.bf16.mxu0 %v10782_v3  ;;  %v10783_v17 = vld [vmem:[%s16105_s0 + $0x4a4] ss:$72 sps:$4 sm:$0xff]   ;;  %v10576_v0 = vld [vmem:[%s16106_s1 + $0xb08] ss:$16 sps:$4 sm:$0xff]  }
 0x2ec   :  { %7062 = vmatprep.mubr.bf16.mxu1 %v10783_v17  ;;  %v6271_v33 = vpop.f32.mrf.mxu0  ;;  %7140 = vmatpush2.bf16.msra.mxu0 %v10570_v57  ;;  %v10579_v59 = vld [vmem:[%s16106_s1 + $0xd08] ss:$16 sps:$4 sm:$0xff]   ;;  %v10584_v17 = vld [vmem:[%s16106_s1 + $0xeec] ss:$16 sps:$4 sm:$0xff]  }
 0x2ed   :  { %16219 = vst [vmem:[#allocation20_spill] sm:$0xff] %v14281_v30  ;;  %v14289_v37 = vpop.f32.mrf.mxu1  ;;  %7301 = vmatpush2.bf16.msra.mxu1 %v10573_v25  ;;  %v14298_v18 = vadd.f32 %v6271_v33, %v13738_v56  ;;  %7141 = vmatprep.subr.bf16.mxu0 %v10578_v15  ;;  %v10617_v57 = vld [vmem:[%s16106_s1 + $0x10ec] ss:$16 sps:$4 sm:$0xff]  }
 0x2ee   :  { %16220 = vst [vmem:[#allocation53_spill] sm:$0xff] %v14289_v37  ;;  %7302 = vmatprep.subr.bf16.mxu1 %v10581_v24  ;;  %v6273_v25 = vpop.f32.mrf.mxu0  ;;  %v10784_v24 = vld [vmem:[%s16105_s0 + $0x498] ss:$72 sps:$4 sm:$0xff]  }
 0x2ef   :  { %16221 = vst [vmem:[#allocation54_spill] sm:$0xff] %v14298_v18  ;;  %v14306_v3 = vpop.f32.mrf.mxu1  ;;  %v14309_v30 = vadd.f32 %v6273_v25, %v13741_v38  ;;  %v10785_v38 = vld [vmem:[%s16105_s0 + $0x4a0] ss:$72 sps:$4 sm:$0xff]  }
 0x2f0   :  { %v6275_v20 = vpop.f32.mrf.mxu0  ;;  %7142 = vmatpush2.bf16.msra.mxu0 %v10576_v0 }
 0x2f1   :  { %16222 = vst [vmem:[#allocation55_spill] sm:$0xff] %v14309_v30  ;;  %v14311_v37 = vpop.f32.mrf.mxu1  ;;  %7303 = vmatpush2.bf16.msra.mxu1 %v10579_v59  ;;  %v14314_v56 = vadd.f32 %v6275_v20, %v13750_v9  ;;  %7433 = vmatprep.subr.bf16.mxu0 %v10584_v17  ;;  %v10786_v9 = vld [vmem:[%s16105_s0 + $0x52c] ss:$72 sps:$4 sm:$0xff]  }
 0x2f2   :  { %7594 = vmatprep.subr.bf16.mxu1 %v10617_v57  ;;  %v6279_v33 = vpop.f32.mrf.mxu0  ;;  %6902 = vmatmul.mubr.bf16.gmra.mxu0 %v10784_v24  ;;  %v10787_v20 = vld [vmem:[%s16105_s0 + $0x534] ss:$72 sps:$4 sm:$0xff]  }
 0x2f3   :  { %16223 = vst [vmem:[#allocation56_spill] sm:$0xff] %v14314_v56  ;;  %v14316_v15 = vpop.f32.mrf.mxu1  ;;  %7063 = vmatmul.mubr.bf16.gmra.mxu1 %v10785_v38  ;;  %v14325_v0 = vadd.f32 %v6279_v33, %v13759_v40  ;;  %6911 = vmatprep.mubr.bf16.mxu0 %v10786_v9 }
 0x2f4   :  { %7072 = vmatprep.mubr.bf16.mxu1 %v10787_v20  ;;  %v6281_v59 = vpop.f32.mrf.mxu0 }
 0x2f5   :  { %16224 = vst [vmem:[#allocation57_spill] sm:$0xff] %v14325_v0  ;;  %v14333_v17 = vpop.f32.mrf.mxu1  ;;  %v14336_v57 = vadd.f32 %v6281_v59, %v13762_v41  ;;  %v10788_v41 = vld [vmem:[%s16105_s0 + $0x528] ss:$72 sps:$4 sm:$0xff]  }
 0x2f6   :  { %v6283_v25 = vpop.f32.mrf.mxu0  ;;  %v10789_v59 = vld [vmem:[%s16105_s0 + $0x530] ss:$72 sps:$4 sm:$0xff]  }
 0x2f7   :  { %16225 = vst [vmem:[#allocation58_spill] sm:$0xff] %v14336_v57  ;;  %v14338_v24 = vpop.f32.mrf.mxu1  ;;  %v14341_v40 = vadd.f32 %v6283_v25, %v13765_v8  ;;  %v10791_v25 = vld [vmem:[%s16105_s0 + $0x5c4] ss:$72 sps:$4 sm:$0xff]  }
 0x2f8   :  { %v6285_v33 = vpop.f32.mrf.mxu0 }
 0x2f9   :  { %16226 = vst [vmem:[#allocation59_spill] sm:$0xff] %v14341_v40  ;;  %v14343_v38 = vpop.f32.mrf.mxu1  ;;  %v14346_v9 = vadd.f32 %v6285_v33, %v13774_v5  ;;  %v10790_v5 = vld [vmem:[%s16105_s0 + $0x5bc] ss:$72 sps:$4 sm:$0xff]  }
 0x2fa   :  { %v6289_v18 = vpop.f32.mrf.mxu0  ;;  %6912 = vmatmul.mubr.bf16.gmra.mxu0 %v10788_v41 }
 0x2fb   :  { %16227 = vst [vmem:[#allocation60_spill] sm:$0xff] %v14346_v9  ;;  %v14348_v20 = vpop.f32.mrf.mxu1  ;;  %7073 = vmatmul.mubr.bf16.gmra.mxu1 %v10789_v59  ;;  %v14357_v8 = vadd.f32 %v6289_v18, %v13783_v39  ;;  %6921 = vmatprep.mubr.bf16.mxu0 %v10790_v5 }
 0x2fc   :  { %7082 = vmatprep.mubr.bf16.mxu1 %v10791_v25  ;;  %v6291_v33 = vpop.f32.mrf.mxu0 }
 0x2fd   :  { %16228 = vst [vmem:[#allocation61_spill] sm:$0xff] %v14357_v8  ;;  %v14365_v41 = vpop.f32.mrf.mxu1  ;;  %v14368_v56 = vadd.f32 %v6291_v33, %v13786_v31  ;;  %v10792_v31 = vld [vmem:[%s16105_s0 + $0x5b8] ss:$72 sps:$4 sm:$0xff]  }
 0x2fe   :  { %v6293_v59 = vpop.f32.mrf.mxu0  ;;  %v10793_v33 = vld [vmem:[%s16105_s0 + $0x5c0] ss:$72 sps:$4 sm:$0xff]  }
 0x2ff   :  { %16229 = vst [vmem:[#allocation62_spill] sm:$0xff] %v14368_v56  ;;  %v14370_v30 = vpop.f32.mrf.mxu1  ;;  %v14373_v39 = vadd.f32 %v6293_v59, %v13789_v28  ;;  %v10795_v59 = vld [vmem:[%s16105_s0 + $0x654] ss:$72 sps:$4 sm:$0xff]  }
 0x300   :  { %v6295_v18 = vpop.f32.mrf.mxu0 }
 0x301   :  { %16230 = vst [vmem:[#allocation63_spill] sm:$0xff] %v14373_v39  ;;  %v14375_v57 = vpop.f32.mrf.mxu1  ;;  %v14378_v5 = vadd.f32 %v6295_v18, %v13798_v4  ;;  %v10794_v4 = vld [vmem:[%s16105_s0 + $0x64c] ss:$72 sps:$4 sm:$0xff]  }
 0x302   :  { %v6299_v0 = vpop.f32.mrf.mxu0  ;;  %6922 = vmatmul.mubr.bf16.gmra.mxu0 %v10792_v31 }
 0x303   :  { %16231 = vst [vmem:[#allocation64_spill] sm:$0xff] %v14378_v5  ;;  %v14380_v25 = vpop.f32.mrf.mxu1  ;;  %7083 = vmatmul.mubr.bf16.gmra.mxu1 %v10793_v33  ;;  %v14389_v28 = vadd.f32 %v6299_v0, %v13807_v29  ;;  %6931 = vmatprep.mubr.bf16.mxu0 %v10794_v4  ;;  %v10796_v4 = vld [vmem:[%s16105_s0 + $0x648] ss:$72 sps:$4 sm:$0xff]  }
 0x304   :  { %16232 = vst [vmem:[#allocation65_spill] sm:$0xff] %v14380_v25  ;;  %7092 = vmatprep.mubr.bf16.mxu1 %v10795_v59  ;;  %v6301_v18 = vpop.f32.mrf.mxu0  ;;  %v10797_v59 = vld [vmem:[%s16105_s0 + $0x650] ss:$72 sps:$4 sm:$0xff]  }
 0x305   :  { %16233 = vst [vmem:[#allocation66_spill] sm:$0xff] %v14389_v28  ;;  %v14397_v31 = vpop.f32.mrf.mxu1  ;;  %v14400_v40 = vadd.f32 %v6301_v18, %v13810_v21  ;;  %v16236_v21 = vld [vmem:[#allocation10_spill] sm:$0xff]  ;;  %v16237_v18 = vld [vmem:[#allocation15_spill] sm:$0xff] }
 0x306   :  { %16234 = vst [vmem:[#allocation67_spill] sm:$0xff] %v14397_v31  ;;  %v6303_v33 = vpop.f32.mrf.mxu0 }
 0x307   :  { %16235 = vst [vmem:[#allocation68_spill] sm:$0xff] %v14400_v40  ;;  %v6464_v9 = vpop.f32.mrf.mxu1 }
 0x308   :  { %v6304_v29 = vpop.f32.mrf.mxu0 }
 0x309   :  { %v6465_v0 = vpop.f32.mrf.mxu1 }
 0x30a   :  { %v6501_v56 = vpop.f32.mrf.mxu0  ;;  %6932 = vmatmul.mubr.bf16.gmra.mxu0 %v10796_v4 }
 0x30b   :  { %v6662_v8 = vpop.f32.mrf.mxu1  ;;  %7093 = vmatmul.mubr.bf16.gmra.mxu1 %v10797_v59  ;;  %v6502_v39 = vadd.f32 %v6501_v56, %v13812_v45  ;;  %6941 = vmatprep.mubr.bf16.mxu0 %v16236_v21 }
 0x30c   :  { %7102 = vmatprep.mubr.bf16.mxu1 %v16237_v18  ;;  %v6503_v9 = vpop.f32.mrf.mxu0  ;;  %v16238_v18 = vld [vmem:[#allocation12_spill] sm:$0xff] }
 0x30d   :  { %v6664_v33 = vpop.f32.mrf.mxu1  ;;  %v14411_v29 = vadd.f32 %v6662_v8, %v6502_v39  ;;  %v6504_v0 = vadd.f32 %v6503_v9, %v13825_v22  ;;  %v16239_v8 = vld [vmem:[#allocation18_spill] sm:$0xff] }
 0x30e   :  { %v6505_v5 = vpop.f32.mrf.mxu0 }
 0x30f   :  { %v6666_v28 = vpop.f32.mrf.mxu1  ;;  %v14414_v4 = vadd.f32 %v6664_v33, %v6504_v0  ;;  %v6506_v40 = vadd.f32 %v6505_v5, %v13830_v11  ;;  %v10798_v11 = vld [vmem:[%s16105_s0 + $0x2c] ss:$72 sps:$4 sm:$0xff]  }
 0x310   :  { %v6507_v31 = vpop.f32.mrf.mxu0 }
 0x311   :  { %v6668_v59 = vpop.f32.mrf.mxu1  ;;  %v14417_v25 = vadd.f32 %v6666_v28, %v6506_v40  ;;  %v6508_v45 = vadd.f32 %v6507_v31, %v13835_v54  ;;  %v10799_v40 = vld [vmem:[%s16105_s0 + $0x34] ss:$72 sps:$4 sm:$0xff]  }
 0x312   :  { %v6511_v56 = vpop.f32.mrf.mxu0  ;;  %6942 = vmatmul.mubr.bf16.gmra.mxu0 %v16238_v18  ;;  %v10587_v18 = vld [vmem:[%s16106_s1 + $0xecc] ss:$16 sps:$4 sm:$0xff]  }
 0x313   :  { %v6672_v21 = vpop.f32.mrf.mxu1  ;;  %7103 = vmatmul.mubr.bf16.gmra.mxu1 %v16239_v8  ;;  %v14422_v39 = vadd.f32 %v6668_v59, %v6508_v45  ;;  %v6512_v22 = vadd.f32 %v6511_v56, %v13840_v12  ;;  %7143 = vmatprep.mubr.bf16.mxu0 %v10798_v11  ;;  %v10582_v59 = vld [vmem:[%s16106_s1 + $0xee8] ss:$16 sps:$4 sm:$0xff]  }
 0x314   :  { %7304 = vmatprep.mubr.bf16.mxu1 %v10799_v40  ;;  %v6513_v54 = vpop.f32.mrf.mxu0  ;;  %v10615_v8 = vld [vmem:[%s16106_s1 + $0x10e8] ss:$16 sps:$4 sm:$0xff]  }
 0x315   :  { %v6674_v5 = vpop.f32.mrf.mxu1  ;;  %v14431_v28 = vadd.f32 %v6672_v21, %v6512_v22  ;;  %v6514_v31 = vadd.f32 %v6513_v54, %v13853_v27  ;;  %v10800_v11 = vld [vmem:[%s16105_s0 + $0x28] ss:$72 sps:$4 sm:$0xff]  }
 0x316   :  { %v6515_v9 = vpop.f32.mrf.mxu0  ;;  %v10801_v40 = vld [vmem:[%s16105_s0 + $0x30] ss:$72 sps:$4 sm:$0xff]  }
 0x317   :  { %v6676_v33 = vpop.f32.mrf.mxu1  ;;  %v14434_v0 = vadd.f32 %v6674_v5, %v6514_v31  ;;  %v6516_v12 = vadd.f32 %v6515_v9, %v13858_v34  ;;  %v10585_v31 = vld [vmem:[%s16106_s1 + $0xec8] ss:$16 sps:$4 sm:$0xff]   ;;  %v10802_v9 = vld [vmem:[%s16105_s0 + $0xbc] ss:$72 sps:$4 sm:$0xff]  }
 0x318   :  { %v6517_v45 = vpop.f32.mrf.mxu0 }
 0x319   :  { %v6678_v56 = vpop.f32.mrf.mxu1  ;;  %v14443_v21 = vadd.f32 %v6676_v33, %v6516_v12  ;;  %v6518_v27 = vadd.f32 %v6517_v45, %v13863_v46  ;;  %v10623_v46 = vld [vmem:[%s16106_s1 + $0x10cc] ss:$16 sps:$4 sm:$0xff]  }
 0x31a   :  { %v6521_v22 = vpop.f32.mrf.mxu0  ;;  %7144 = vmatmul.mubr.bf16.vlgmr.msra.gmra.mxu0 %v10800_v11  ;;  %v10803_v45 = vld [vmem:[%s16105_s0 + $0xc4] ss:$72 sps:$4 sm:$0xff]  }
 0x31b   :  { %v6682_v34 = vpop.f32.mrf.mxu1  ;;  %7305 = vmatmul.mubr.bf16.vlgmr.msra.gmra.mxu1 %v10801_v40  ;;  %v14458_v54 = vadd.f32 %v6678_v56, %v6518_v27  ;;  %v6522_v5 = vadd.f32 %v6521_v22, %v13880_v52  ;;  %7434 = vmatpush1.bf16.msra.mxu0 %v10582_v59  ;;  %v10590_v52 = vld [vmem:[%s16106_s1 + $0xeac] ss:$16 sps:$4 sm:$0xff]   ;;  %v10621_v27 = vld [vmem:[%s16106_s1 + $0x10c8] ss:$16 sps:$4 sm:$0xff]  }
 0x31c   :  { %7153 = vmatprep.mubr.bf16.mxu0 %v10802_v9  ;;  %v6523_v33 = vpop.f32.mrf.mxu0  ;;  %7435 = vmatprep.subr.bf16.mxu0 %v10587_v18 }
 0x31d   :  { %v6684_v12 = vpop.f32.mrf.mxu1  ;;  %7314 = vmatprep.mubr.bf16.mxu1 %v10803_v45  ;;  %v14473_v59 = vadd.f32 %v6682_v34, %v6522_v5  ;;  %v6524_v56 = vadd.f32 %v6523_v33, %v13897_v36  ;;  %7595 = vmatpush1.bf16.msra.mxu1 %v10615_v8  ;;  %v10588_v34 = vld [vmem:[%s16106_s1 + $0xea8] ss:$16 sps:$4 sm:$0xff]   ;;  %v10593_v36 = vld [vmem:[%s16106_s1 + $0xe8c] ss:$16 sps:$4 sm:$0xff]  }
 0x31e   :  { %v6525_v22 = vpop.f32.mrf.mxu0  ;;  %7596 = vmatprep.subr.bf16.mxu1 %v10623_v46  ;;  %v10805_v45 = vld [vmem:[%s16105_s0 + $0xc0] ss:$72 sps:$4 sm:$0xff]  }
 0x31f   :  { %v6686_v18 = vpop.f32.mrf.mxu1  ;;  %v14479_v11 = vadd.f32 %v6684_v12, %v6524_v56  ;;  %v6526_v40 = vadd.f32 %v6525_v22, %v13914_v6  ;;  %7436 = vmatpush1.bf16.msra.mxu0 %v10585_v31  ;;  %v10629_v6 = vld [vmem:[%s16106_s1 + $0x10ac] ss:$16 sps:$4 sm:$0xff]   ;;  %v10804_v12 = vld [vmem:[%s16105_s0 + $0xb8] ss:$72 sps:$4 sm:$0xff]  }
 0x320   :  { %v6527_v5 = vpop.f32.mrf.mxu0  ;;  %7437 = vmatprep.subr.bf16.mxu0 %v10590_v52  ;;  %v10806_v22 = vld [vmem:[%s16105_s0 + $0x14c] ss:$72 sps:$4 sm:$0xff]  }
 0x321   :  { %v6688_v9 = vpop.f32.mrf.mxu1  ;;  %v14488_v8 = vadd.f32 %v6686_v18, %v6526_v40  ;;  %v6528_v46 = vadd.f32 %v6527_v5, %v13919_v14  ;;  %7597 = vmatpush1.bf16.msra.mxu1 %v10621_v27  ;;  %v10627_v14 = vld [vmem:[%s16106_s1 + $0x10a8] ss:$16 sps:$4 sm:$0xff]   ;;  %v10635_v18 = vld [vmem:[%s16106_s1 + $0x108c] ss:$16 sps:$4 sm:$0xff]  }
 0x322   :  { %v6531_v31 = vpop.f32.mrf.mxu0  ;;  %7154 = vmatmul.mubr.bf16.gmra.mxu0 %v10804_v12  ;;  %v10591_v27 = vld [vmem:[%s16106_s1 + $0xe88] ss:$16 sps:$4 sm:$0xff]   ;;  %7598 = vmatprep.subr.bf16.mxu1 %v10629_v6 }
 0x323   :  { %v6692_v33 = vpop.f32.mrf.mxu1  ;;  %7315 = vmatmul.mubr.bf16.gmra.mxu1 %v10805_v45  ;;  %v14503_v52 = vadd.f32 %v6688_v9, %v6528_v46  ;;  %v6532_v56 = vadd.f32 %v6531_v31, %v13936_v19  ;;  %7438 = vmatpush1.bf16.msra.mxu0 %v10588_v34  ;;  %v10807_v19 = vld [vmem:[%s16105_s0 + $0x154] ss:$72 sps:$4 sm:$0xff]  }
 0x324   :  { %7163 = vmatprep.mubr.bf16.mxu0 %v10806_v22  ;;  %v6533_v40 = vpop.f32.mrf.mxu0  ;;  %7439 = vmatprep.subr.bf16.mxu0 %v10593_v36  ;;  %v10596_v34 = vld [vmem:[%s16106_s1 + $0xe6c] ss:$16 sps:$4 sm:$0xff]   ;;  %v10594_v22 = vld [vmem:[%s16106_s1 + $0xe68] ss:$16 sps:$4 sm:$0xff]  }
 0x325   :  { %16240 = vst [vmem:[#allocation10_spill] sm:$0xff] %v14503_v52  ;;  %v6694_v5 = vpop.f32.mrf.mxu1  ;;  %7324 = vmatprep.mubr.bf16.mxu1 %v10807_v19  ;;  %v14521_v9 = vadd.f32 %v6692_v33, %v6532_v56  ;;  %v6534_v46 = vadd.f32 %v6533_v40, %v13953_v10  ;;  %7599 = vmatpush1.bf16.msra.mxu1 %v10627_v14  ;;  %v10599_v10 = vld [vmem:[%s16106_s1 + $0xe4c] ss:$16 sps:$4 sm:$0xff]  }
 0x326   :  { %v6535_v31 = vpop.f32.mrf.mxu0  ;;  %7600 = vmatprep.subr.bf16.mxu1 %v10635_v18  ;;  %v10809_v18 = vld [vmem:[%s16105_s0 + $0x150] ss:$72 sps:$4 sm:$0xff]  }
 0x327   :  { %v6696_v12 = vpop.f32.mrf.mxu1  ;;  %v14524_v45 = vadd.f32 %v6694_v5, %v6534_v46  ;;  %v6536_v36 = vadd.f32 %v6535_v31, %v13970_v51  ;;  %7440 = vmatpush1.bf16.msra.mxu0 %v10591_v27  ;;  %v10633_v51 = vld [vmem:[%s16106_s1 + $0x1088] ss:$16 sps:$4 sm:$0xff]   ;;  %v10810_v46 = vld [vmem:[%s16105_s0 + $0x1dc] ss:$72 sps:$4 sm:$0xff]  }
 0x328   :  { %v6537_v19 = vpop.f32.mrf.mxu0  ;;  %7441 = vmatprep.subr.bf16.mxu0 %v10596_v34  ;;  %v10808_v27 = vld [vmem:[%s16105_s0 + $0x148] ss:$72 sps:$4 sm:$0xff]  }
 0x329   :  { %v6698_v52 = vpop.f32.mrf.mxu1  ;;  %v14533_v6 = vadd.f32 %v6696_v12, %v6536_v36  ;;  %v6538_v33 = vadd.f32 %v6537_v19, %v13975_v7  ;;  %v10641_v7 = vld [vmem:[%s16106_s1 + $0x106c] ss:$16 sps:$4 sm:$0xff]   ;;  %v10597_v34 = vld [vmem:[%s16106_s1 + $0xe48] ss:$16 sps:$4 sm:$0xff]   ;;  %7601 = vmatpush1.bf16.msra.mxu1 %v10633_v51 }
 0x32a   :  { %v6541_v14 = vpop.f32.mrf.mxu0  ;;  %7164 = vmatmul.mubr.bf16.gmra.mxu0 %v10808_v27  ;;  %v10639_v19 = vld [vmem:[%s16106_s1 + $0x1068] ss:$16 sps:$4 sm:$0xff]   ;;  %7602 = vmatprep.subr.bf16.mxu1 %v10641_v7 }
 0x32b   :  { %v6702_v56 = vpop.f32.mrf.mxu1  ;;  %7325 = vmatmul.mubr.bf16.gmra.mxu1 %v10809_v18  ;;  %v14548_v40 = vadd.f32 %v6698_v52, %v6538_v33  ;;  %v6542_v5 = vadd.f32 %v6541_v14, %v13992_v50  ;;  %7442 = vmatpush1.bf16.msra.mxu0 %v10594_v22  ;;  %v10811_v52 = vld [vmem:[%s16105_s0 + $0x1e4] ss:$72 sps:$4 sm:$0xff]  }
 0x32c   :  { %7173 = vmatprep.mubr.bf16.mxu0 %v10810_v46  ;;  %v6543_v31 = vpop.f32.mrf.mxu0  ;;  %7443 = vmatprep.subr.bf16.mxu0 %v10599_v10  ;;  %v10602_v50 = vld [vmem:[%s16106_s1 + $0xe2c] ss:$16 sps:$4 sm:$0xff]  }
 0x32d   :  { %v6704_v12 = vpop.f32.mrf.mxu1  ;;  %7334 = vmatprep.mubr.bf16.mxu1 %v10811_v52  ;;  %v14563_v36 = vadd.f32 %v6702_v56, %v6542_v5  ;;  %v6544_v22 = vadd.f32 %v6543_v31, %v14009_v35  ;;  %v10600_v56 = vld [vmem:[%s16106_s1 + $0xe28] ss:$16 sps:$4 sm:$0xff]   ;;  %v10605_v35 = vld [vmem:[%s16106_s1 + $0xe0c] ss:$16 sps:$4 sm:$0xff]   ;;  %7603 = vmatpush1.bf16.msra.mxu1 %v10639_v19 }
 0x32e   :  { %v6545_v33 = vpop.f32.mrf.mxu0  ;;  %v10812_v31 = vld [vmem:[%s16105_s0 + $0x1d8] ss:$72 sps:$4 sm:$0xff]   ;;  %v10814_v19 = vld [vmem:[%s16105_s0 + $0x26c] ss:$72 sps:$4 sm:$0xff]  }
 0x32f   :  { %v6706_v10 = vpop.f32.mrf.mxu1  ;;  %v14569_v14 = vadd.f32 %v6704_v12, %v6544_v22  ;;  %v6546_v27 = vadd.f32 %v6545_v33, %v14026_v13  ;;  %7444 = vmatpush1.bf16.msra.mxu0 %v10597_v34  ;;  %v10647_v13 = vld [vmem:[%s16106_s1 + $0x104c] ss:$16 sps:$4 sm:$0xff]   ;;  %v10813_v12 = vld [vmem:[%s16105_s0 + $0x1e0] ss:$72 sps:$4 sm:$0xff]  }
 0x330   :  { %v6547_v18 = vpop.f32.mrf.mxu0  ;;  %7445 = vmatprep.subr.bf16.mxu0 %v10602_v50  ;;  %v10603_v22 = vld [vmem:[%s16106_s1 + $0xe08] ss:$16 sps:$4 sm:$0xff]   ;;  %v10650_v33 = vld [vmem:[%s16106_s1 + $0x102c] ss:$16 sps:$4 sm:$0xff]   ;;  %7604 = vmatprep.subr.bf16.mxu1 %v10647_v13 }
 0x331   :  { %v6708_v5 = vpop.f32.mrf.mxu1  ;;  %v14578_v51 = vadd.f32 %v6706_v10, %v6546_v27  ;;  %v6548_v7 = vadd.f32 %v6547_v18, %v14031_v32  ;;  %v10645_v32 = vld [vmem:[%s16106_s1 + $0x1048] ss:$16 sps:$4 sm:$0xff]  }
 0x332   :  { %v6551_v34 = vpop.f32.mrf.mxu0  ;;  %7174 = vmatmul.mubr.bf16.gmra.mxu0 %v10812_v31  ;;  %7605 = vmatpush1.bf16.msra.mxu1 %v10645_v32 }
 0x333   :  { %v6712_v46 = vpop.f32.mrf.mxu1  ;;  %7335 = vmatmul.mubr.bf16.gmra.mxu1 %v10813_v12  ;;  %v14593_v52 = vadd.f32 %v6708_v5, %v6548_v7  ;;  %v6552_v50 = vadd.f32 %v6551_v34, %v14048_v42  ;;  %7446 = vmatpush1.bf16.msra.mxu0 %v10600_v56  ;;  %v10815_v42 = vld [vmem:[%s16105_s0 + $0x274] ss:$72 sps:$4 sm:$0xff]   ;;  %v10606_v12 = vld [vmem:[%s16106_s1 + $0xfe8] ss:$16 sps:$4 sm:$0xff]  }
 0x334   :  { %7183 = vmatprep.mubr.bf16.mxu0 %v10814_v19  ;;  %v6553_v10 = vpop.f32.mrf.mxu0  ;;  %7447 = vmatprep.subr.bf16.mxu0 %v10605_v35  ;;  %v10608_v56 = vld [vmem:[%s16106_s1 + $0xfec] ss:$16 sps:$4 sm:$0xff]  }
 0x335   :  { %v6714_v27 = vpop.f32.mrf.mxu1  ;;  %7344 = vmatprep.mubr.bf16.mxu1 %v10815_v42  ;;  %v14611_v18 = vadd.f32 %v6712_v46, %v6552_v50  ;;  %v6554_v5 = vadd.f32 %v6553_v10, %v14065_v26  ;;  %7606 = vmatprep.subr.bf16.mxu1 %v10650_v33  ;;  %v10611_v26 = vld [vmem:[%s16106_s1 + $0xfcc] ss:$16 sps:$4 sm:$0xff]   ;;  %v10817_v33 = vld [vmem:[%s16105_s0 + $0x270] ss:$72 sps:$4 sm:$0xff]  }
 0x336   :  { %v6555_v7 = vpop.f32.mrf.mxu0 }
 0x337   :  { %v6716_v34 = vpop.f32.mrf.mxu1  ;;  %v14614_v31 = vadd.f32 %v6714_v27, %v6554_v5  ;;  %v6556_v35 = vadd.f32 %v6555_v7, %v14082_v16  ;;  %7448 = vmatpush1.bf16.msra.mxu0 %v10603_v22  ;;  %v10648_v16 = vld [vmem:[%s16106_s1 + $0x1028] ss:$16 sps:$4 sm:$0xff]   ;;  %v10818_v5 = vld [vmem:[%s16105_s0 + $0x2fc] ss:$72 sps:$4 sm:$0xff]  }
 0x338   :  { %v6557_v19 = vpop.f32.mrf.mxu0  ;;  %7449 = vmatprep.subr.bf16.mxu0 %v10608_v56  ;;  %v10816_v22 = vld [vmem:[%s16105_s0 + $0x268] ss:$72 sps:$4 sm:$0xff]   ;;  %7607 = vmatpush1.bf16.msra.mxu1 %v10648_v16 }
 0x339   :  { %v6718_v42 = vpop.f32.mrf.mxu1  ;;  %v14623_v13 = vadd.f32 %v6716_v34, %v6556_v35  ;;  %v6558_v46 = vadd.f32 %v6557_v19, %v14087_v61  ;;  %v10653_v61 = vld [vmem:[%s16106_s1 + $0x100c] ss:$16 sps:$4 sm:$0xff]   ;;  %v10609_v56 = vld [vmem:[%s16106_s1 + $0xfc8] ss:$16 sps:$4 sm:$0xff]  }
 0x33a   :  { %v6561_v32 = vpop.f32.mrf.mxu0  ;;  %7184 = vmatmul.mubr.bf16.gmra.mxu0 %v10816_v22  ;;  %v10819_v35 = vld [vmem:[%s16105_s0 + $0x304] ss:$72 sps:$4 sm:$0xff]   ;;  %7608 = vmatprep.subr.bf16.mxu1 %v10653_v61 }
 0x33b   :  { %v6722_v50 = vpop.f32.mrf.mxu1  ;;  %7345 = vmatmul.mubr.bf16.gmra.mxu1 %v10817_v33  ;;  %v14638_v10 = vadd.f32 %v6718_v42, %v6558_v46  ;;  %v6562_v27 = vadd.f32 %v6561_v32, %v14104_v53  ;;  %7450 = vmatpush2.bf16.msra.mxu0 %v10606_v12  ;;  %v10614_v53 = vld [vmem:[%s16106_s1 + $0xfac] ss:$16 sps:$4 sm:$0xff]   ;;  %v10651_v42 = vld [vmem:[%s16106_s1 + $0x1008] ss:$16 sps:$4 sm:$0xff]  }
 0x33c   :  { %7193 = vmatprep.mubr.bf16.mxu0 %v10818_v5  ;;  %v6563_v7 = vpop.f32.mrf.mxu0  ;;  %7451 = vmatprep.subr.bf16.mxu0 %v10611_v26 }
 0x33d   :  { %v6724_v34 = vpop.f32.mrf.mxu1  ;;  %7354 = vmatprep.mubr.bf16.mxu1 %v10819_v35  ;;  %v14653_v12 = vadd.f32 %v6722_v50, %v6562_v27  ;;  %v6564_v19 = vadd.f32 %v6563_v7, %v14121_v2  ;;  %v10612_v50 = vld [vmem:[%s16106_s1 + $0xfa8] ss:$16 sps:$4 sm:$0xff]   ;;  %v10620_v2 = vld [vmem:[%s16106_s1 + $0xf8c] ss:$16 sps:$4 sm:$0xff]   ;;  %7609 = vmatpush1.bf16.msra.mxu1 %v10651_v42 }
 0x33e   :  { %v6565_v46 = vpop.f32.mrf.mxu0  ;;  %v10821_v35 = vld [vmem:[%s16105_s0 + $0x300] ss:$72 sps:$4 sm:$0xff]  }
 0x33f   :  { %v6726_v26 = vpop.f32.mrf.mxu1  ;;  %v14659_v32 = vadd.f32 %v6724_v34, %v6564_v19  ;;  %v6566_v22 = vadd.f32 %v6565_v46, %v14138_v43  ;;  %7452 = vmatpush2.bf16.msra.mxu0 %v10609_v56  ;;  %v10656_v43 = vld [vmem:[%s16106_s1 + $0x11ec] ss:$16 sps:$4 sm:$0xff]   ;;  %v7757_v56 = vlaneseq  ;;  %v10820_v34 = vld [vmem:[%s16105_s0 + $0x2f8] ss:$72 sps:$4 sm:$0xff]  }
 0x340   :  { %v6567_v33 = vpop.f32.mrf.mxu0  ;;  %7453 = vmatprep.subr.bf16.mxu0 %v10614_v53  ;;  %v10618_v42 = vld [vmem:[%s16106_s1 + $0xf88] ss:$16 sps:$4 sm:$0xff]   ;;  %v10822_v46 = vld [vmem:[%s16105_s0 + $0x38c] ss:$72 sps:$4 sm:$0xff]   ;;  %7610 = vmatprep.subr.bf16.mxu1 %v10656_v43 }
 0x341   :  { %v6728_v27 = vpop.f32.mrf.mxu1  ;;  %v14668_v16 = vadd.f32 %v6726_v26, %v6566_v22  ;;  %v6568_v61 = vadd.f32 %v6567_v33, %v14143_v48  ;;  %v10654_v48 = vld [vmem:[%s16106_s1 + $0x11e8] ss:$16 sps:$4 sm:$0xff]   ;;  %v10659_v26 = vld [vmem:[%s16106_s1 + $0x11cc] ss:$16 sps:$4 sm:$0xff]  }
 0x342   :  { %v6571_v5 = vpop.f32.mrf.mxu0  ;;  %7194 = vmatmul.mubr.bf16.gmra.mxu0 %v10820_v34  ;;  %7611 = vmatpush2.bf16.msra.mxu1 %v10654_v48  ;;  %v10632_v43 = vld [vmem:[%s16106_s1 + $0xf4c] ss:$16 sps:$4 sm:$0xff]  }
 0x343   :  { %v6732_v7 = vpop.f32.mrf.mxu1  ;;  %7355 = vmatmul.mubr.bf16.gmra.mxu1 %v10821_v35  ;;  %v14683_v53 = vadd.f32 %v6728_v27, %v6568_v61  ;;  %v6572_v19 = vadd.f32 %v6571_v5, %v14160_v62  ;;  %7454 = vmatpush2.bf16.msra.mxu0 %v10612_v50  ;;  %v10823_v62 = vld [vmem:[%s16105_s0 + $0x394] ss:$72 sps:$4 sm:$0xff]   ;;  %v14704_v5 = vshrl.u32 %v7757_v56, 7 }
 0x344   :  { %7203 = vmatprep.mubr.bf16.mxu0 %v10822_v46  ;;  %v6573_v22 = vpop.f32.mrf.mxu0  ;;  %7455 = vmatprep.subr.bf16.mxu0 %v10620_v2  ;;  %v10626_v50 = vld [vmem:[%s16106_s1 + $0xf6c] ss:$16 sps:$4 sm:$0xff]  }
 0x345   :  { %v6734_v33 = vpop.f32.mrf.mxu1  ;;  %7364 = vmatprep.mubr.bf16.mxu1 %v10823_v62  ;;  %v14701_v27 = vadd.f32 %v6732_v7, %v6572_v19  ;;  %v6574_v61 = vadd.f32 %v6573_v22, %v14177_v58  ;;  %16241 = vst [vmem:[#allocation15_spill] sm:$0xff] %v14704_v5  ;;  %v10624_v62 = vld [vmem:[%s16106_s1 + $0xf68] ss:$16 sps:$4 sm:$0xff]   ;;  %7612 = vmatprep.subr.bf16.mxu1 %v10659_v26  ;;  %v7763_v7 = vsub.s32 1, %v14704_v5 }
 0x346   :  { %v6575_v34 = vpop.f32.mrf.mxu0  ;;  %v10824_v26 = vld [vmem:[%s16105_s0 + $0x388] ss:$72 sps:$4 sm:$0xff]  }
 0x347   :  { %v6736_v35 = vpop.f32.mrf.mxu1  ;;  %v14706_v2 = vadd.f32 %v6734_v33, %v6574_v61  ;;  %v6576_v46 = vadd.f32 %v6575_v34, %v14194_v55  ;;  %7456 = vmatpush2.bf16.msra.mxu0 %v10618_v42  ;;  %v10657_v55 = vld [vmem:[%s16106_s1 + $0x11c8] ss:$16 sps:$4 sm:$0xff]  }
 0x348   :  { %v6577_v19 = vpop.f32.mrf.mxu0  ;;  %7457 = vmatprep.subr.bf16.mxu0 %v10626_v50  ;;  %v10825_v33 = vld [vmem:[%s16105_s0 + $0x390] ss:$72 sps:$4 sm:$0xff]   ;;  %v14734_v50 = vld [vmem:[%s16107_s2] sm:$0xf]  ;;  %7613 = vmatpush2.bf16.msra.mxu1 %v10657_v55 }
 0x349   :  { %v6738_v58 = vpop.f32.mrf.mxu1  ;;  %v14716_v56 = vadd.f32 %v6736_v35, %v6576_v46  ;;  %v6578_v48 = vadd.f32 %v6577_v19, %v14199_v63  ;;  %v10662_v63 = vld [vmem:[%s16106_s1 + $0x11ac] ss:$16 sps:$4 sm:$0xff]   ;;  %v10630_v35 = vld [vmem:[%s16106_s1 + $0xf48] ss:$16 sps:$4 sm:$0xff]   ;;  %v14746_v19 = vrot.slane %v14734_v50, %v7763_v7 }
 0x34a   :  { %v6581_v42 = vpop.f32.mrf.mxu0  ;;  %7204 = vmatmul.mubr.bf16.gmra.mxu0 %v10824_v26  ;;  %v10826_v46 = vld [vmem:[%s16105_s0 + $0x41c] ss:$72 sps:$4 sm:$0xff]   ;;  %7614 = vmatprep.subr.bf16.mxu1 %v10662_v63  ;;  %v10636_v55 = vld [vmem:[%s16106_s1 + $0xf28] ss:$16 sps:$4 sm:$0xff]  }
 0x34b   :  { %16242 = vst [vmem:[#allocation12_spill] sm:$0xff] %v14716_v56  ;;  %v6742_v22 = vpop.f32.mrf.mxu1  ;;  %7365 = vmatmul.mubr.bf16.gmra.mxu1 %v10825_v33  ;;  %v14736_v61 = vadd.f32 %v6738_v58, %v6578_v48  ;;  %v6582_v34 = vadd.f32 %v6581_v42, %v14216_v60  ;;  %7458 = vmatpush2.bf16.msra.mxu0 %v10624_v62  ;;  %v10827_v60 = vld [vmem:[%s16105_s0 + $0x424] ss:$72 sps:$4 sm:$0xff]   ;;  %v10660_v42 = vld [vmem:[%s16106_s1 + $0x11a8] ss:$16 sps:$4 sm:$0xff]  }
 0x34c   :  { %7213 = vmatprep.mubr.bf16.mxu0 %v10826_v46  ;;  %v6583_v26 = vpop.f32.mrf.mxu0  ;;  %7459 = vmatprep.subr.bf16.mxu0 %v10632_v43  ;;  %v10638_v62 = vld [vmem:[%s16106_s1 + $0xf2c] ss:$16 sps:$4 sm:$0xff]   ;;  %v7838_v43 = vmul.f32 %v14746_v19, %v14208_v1 }
 0x34d   :  { %16243 = vst [vmem:[#allocation18_spill] sm:$0xff] %v14736_v61  ;;  %v6744_v33 = vpop.f32.mrf.mxu1  ;;  %7374 = vmatprep.mubr.bf16.mxu1 %v10827_v60  ;;  %v14754_v58 = vadd.f32 %v6742_v22, %v6582_v34  ;;  %v6584_v48 = vadd.f32 %v6583_v26, %v14233_v49  ;;  %v14765_v60 = vld [vmem:[%s16108_s3] sm:$0xf]  ;;  %v10644_v1 = vld [vmem:[%s16106_s1 + $0xf0c] ss:$16 sps:$4 sm:$0xff]   ;;  %7615 = vmatpush2.bf16.msra.mxu1 %v10660_v42 }
 0x34e   :  { %v6585_v46 = vpop.f32.mrf.mxu0  ;;  %v14777_v63 = vrot.slane %v14765_v60, %v7763_v7  ;;  %v10829_v7 = vld [vmem:[%s16105_s0 + $0x420] ss:$72 sps:$4 sm:$0xff]  }
 0x34f   :  { %16244 = vst [vmem:[#allocation69_spill] sm:$0xff] %v14754_v58  ;;  %v6746_v61 = vpop.f32.mrf.mxu1  ;;  %v14767_v22 = vadd.f32 %v6744_v33, %v6584_v48  ;;  %v6586_v49 = vadd.f32 %v6585_v46, %v14250_v47  ;;  %7460 = vmatpush2.bf16.msra.mxu0 %v10630_v35  ;;  %v10665_v47 = vld [vmem:[%s16106_s1 + $0x118c] ss:$16 sps:$4 sm:$0xff]  }
 0x350   :  { %v6587_v34 = vpop.f32.mrf.mxu0  ;;  %7461 = vmatprep.subr.bf16.mxu0 %v10638_v62  ;;  %v10828_v62 = vld [vmem:[%s16105_s0 + $0x418] ss:$72 sps:$4 sm:$0xff]   ;;  %7616 = vmatprep.subr.bf16.mxu1 %v10665_v47 }
 0x351   :  { %16245 = vst [vmem:[#allocation70_spill] sm:$0xff] %v14767_v22  ;;  %v6748_v26 = vpop.f32.mrf.mxu1  ;;  %v14779_v58 = vadd.f32 %v6746_v61, %v6586_v49  ;;  %v6588_v33 = vadd.f32 %v6587_v34, %v14255_v44  ;;  %v7960_v61 = vadd.f32 %v14777_v63, %v7838_v43  ;;  %v10663_v44 = vld [vmem:[%s16106_s1 + $0x1188] ss:$16 sps:$4 sm:$0xff]   ;;  %v10830_v34 = vld [vmem:[%s16105_s0 + $0x4ac] ss:$72 sps:$4 sm:$0xff]  }
 0x352   :  { %v6591_v35 = vpop.f32.mrf.mxu0  ;;  %7214 = vmatmul.mubr.bf16.gmra.mxu0 %v10828_v62  ;;  %v10642_v49 = vld [vmem:[%s16106_s1 + $0xf08] ss:$16 sps:$4 sm:$0xff]   ;;  %v10668_v43 = vld [vmem:[%s16106_s1 + $0x116c] ss:$16 sps:$4 sm:$0xff]   ;;  %7617 = vmatpush2.bf16.msra.mxu1 %v10663_v44 }
 0x353   :  { %16246 = vst [vmem:[#allocation71_spill] sm:$0xff] %v14779_v58  ;;  %v6752_v48 = vpop.f32.mrf.mxu1  ;;  %7375 = vmatmul.mubr.bf16.gmra.mxu1 %v10829_v7  ;;  %v14795_v42 = vadd.f32 %v6748_v26, %v6588_v33  ;;  %v6592_v46 = vadd.f32 %v6591_v35, %v14272_v23  ;;  %7462 = vmatpush2.bf16.msra.mxu0 %v10636_v55  ;;  %v10831_v23 = vld [vmem:[%s16105_s0 + $0x4b4] ss:$72 sps:$4 sm:$0xff]   ;;  %v16248_v26 = vld [vmem:[#allocation53_spill] sm:$0xff] }
 0x354   :  { %7223 = vmatprep.mubr.bf16.mxu0 %v10830_v34  ;;  %v6593_v62 = vpop.f32.mrf.mxu0  ;;  %7463 = vmatprep.subr.bf16.mxu0 %v10644_v1  ;;  %v8060_v34 = vmax.f32 %v7960_v61, 0.0  ;;  %v10671_v61 = vld [vmem:[%s16106_s1 + $0x114c] ss:$16 sps:$4 sm:$0xff]  }
 0x355   :  { %16247 = vst [vmem:[#allocation72_spill] sm:$0xff] %v14795_v42  ;;  %v6754_v7 = vpop.f32.mrf.mxu1  ;;  %7384 = vmatprep.mubr.bf16.mxu1 %v10831_v23  ;;  %v14810_v55 = vadd.f32 %v6752_v48, %v6592_v46  ;;  %v6594_v33 = vadd.f32 %v6593_v62, %v16248_v26  ;;  %7618 = vmatprep.subr.bf16.mxu1 %v10668_v43  ;;  %v10666_v48 = vld [vmem:[%s16106_s1 + $0x1168] ss:$16 sps:$4 sm:$0xff]   ;;  %v10835_v43 = vld [vmem:[%s16105_s0 + $0x544] ss:$72 sps:$4 sm:$0xff]  }
 0x356   :  { %v6595_v35 = vpop.f32.mrf.mxu0  ;;  %7619 = vmatpush2.bf16.msra.mxu1 %v10666_v48 }
 0x357   :  { %v6756_v42 = vpop.f32.mrf.mxu1  ;;  %v14813_v58 = vadd.f32 %v6754_v7, %v6594_v33  ;;  %v6596_v22 = vadd.f32 %v6595_v35, %v14306_v3  ;;  %7464 = vmatpush2.bf16.msra.mxu0 %v10642_v49  ;;  %v10832_v3 = vld [vmem:[%s16105_s0 + $0x4a8] ss:$72 sps:$4 sm:$0xff]   ;;  %7620 = vmatprep.subr.bf16.mxu1 %v10671_v61  ;;  %v10674_v33 = vld [vmem:[%s16106_s1 + $0x112c] ss:$16 sps:$4 sm:$0xff]  }
 0x358   :  { %8113 = vmatprep.subr.mxu0 %v8060_v34  ;;  %v6597_v1 = vpop.f32.mrf.mxu0  ;;  %v10833_v49 = vld [vmem:[%s16105_s0 + $0x4b0] ss:$72 sps:$4 sm:$0xff]   ;;  %v10677_v61 = vld [vmem:[%s16106_s1 + $0x110c] ss:$16 sps:$4 sm:$0xff]  }
 0x359   :  { %v6758_v56 = vpop.f32.mrf.mxu1  ;;  %v14819_v46 = vadd.f32 %v6756_v42, %v6596_v22  ;;  %v6598_v47 = vadd.f32 %v6597_v1, %v14311_v37  ;;  %v10834_v42 = vld [vmem:[%s16105_s0 + $0x53c] ss:$72 sps:$4 sm:$0xff]  }
 0x35a   :  { %v6601_v44 = vpop.f32.mrf.mxu0  ;;  %7224 = vmatmul.mubr.bf16.gmra.mxu0 %v10832_v3 }
 0x35b   :  { %v6762_v62 = vpop.f32.mrf.mxu1  ;;  %7385 = vmatmul.mubr.bf16.gmra.mxu1 %v10833_v49  ;;  %v14831_v22 = vadd.f32 %v6758_v56, %v6598_v47  ;;  %v6602_v37 = vadd.f32 %v6601_v44, %v14316_v15  ;;  %7233 = vmatprep.mubr.bf16.mxu0 %v10834_v42  ;;  %v10669_v56 = vld [vmem:[%s16106_s1 + $0x1148] ss:$16 sps:$4 sm:$0xff]  }
 0x35c   :  { %7394 = vmatprep.mubr.bf16.mxu1 %v10835_v43  ;;  %v6603_v7 = vpop.f32.mrf.mxu0  ;;  %7621 = vmatpush2.bf16.msra.mxu1 %v10669_v56  ;;  %v10837_v42 = vld [vmem:[%s16105_s0 + $0x540] ss:$72 sps:$4 sm:$0xff]  }
 0x35d   :  { %v6764_v23 = vpop.f32.mrf.mxu1  ;;  %v14843_v26 = vadd.f32 %v6762_v62, %v6602_v37  ;;  %v6604_v15 = vadd.f32 %v6603_v7, %v14333_v17  ;;  %v10672_v62 = vld [vmem:[%s16106_s1 + $0x1128] ss:$16 sps:$4 sm:$0xff]   ;;  %7622 = vmatprep.subr.bf16.mxu1 %v10674_v33  ;;  %v10838_v7 = vld [vmem:[%s16105_s0 + $0x5cc] ss:$72 sps:$4 sm:$0xff]  }
 0x35e   :  { %v6605_v35 = vpop.f32.mrf.mxu0  ;;  %v10675_v33 = vld [vmem:[%s16106_s1 + $0x1108] ss:$16 sps:$4 sm:$0xff]  }
 0x35f   :  { %v6766_v34 = vpop.f32.mrf.mxu1  ;;  %v14849_v1 = vadd.f32 %v6764_v23, %v6604_v15  ;;  %v6606_v47 = vadd.f32 %v6605_v35, %v14338_v24  ;;  %v10836_v24 = vld [vmem:[%s16105_s0 + $0x538] ss:$72 sps:$4 sm:$0xff]   ;;  %v10839_v23 = vld [vmem:[%s16105_s0 + $0x5d4] ss:$72 sps:$4 sm:$0xff]  }
 0x360   :  { %v6607_v48 = vpop.f32.mrf.mxu0  ;;  %7623 = vmatpush2.bf16.msra.mxu1 %v10672_v62 }
 0x361   :  { %v6768_v44 = vpop.f32.mrf.mxu1  ;;  %v14855_v3 = vadd.f32 %v6766_v34, %v6606_v47  ;;  %v6608_v17 = vadd.f32 %v6607_v48, %v14343_v38  ;;  %7624 = vmatprep.subr.bf16.mxu1 %v10677_v61  ;;  %v10841_v61 = vld [vmem:[%s16105_s0 + $0x5d0] ss:$72 sps:$4 sm:$0xff]  }
 0x362   :  { %v6611_v49 = vpop.f32.mrf.mxu0  ;;  %7234 = vmatmul.mubr.bf16.gmra.mxu0 %v10836_v24 }
 0x363   :  { %v6772_v37 = vpop.f32.mrf.mxu1  ;;  %7395 = vmatmul.mubr.bf16.gmra.mxu1 %v10837_v42  ;;  %v14867_v43 = vadd.f32 %v6768_v44, %v6608_v17  ;;  %v6612_v38 = vadd.f32 %v6611_v49, %v14348_v20  ;;  %7243 = vmatprep.mubr.bf16.mxu0 %v10838_v7 }
 0x364   :  { %7404 = vmatprep.mubr.bf16.mxu1 %v10839_v23  ;;  %v6613_v56 = vpop.f32.mrf.mxu0  ;;  %7625 = vmatpush2.bf16.msra.mxu1 %v10675_v33  ;;  %v10843_v23 = vld [vmem:[%s16105_s0 + $0x664] ss:$72 sps:$4 sm:$0xff]  }
 0x365   :  { %v6774_v15 = vpop.f32.mrf.mxu1  ;;  %v14879_v35 = vadd.f32 %v6772_v37, %v6612_v38  ;;  %v6614_v20 = vadd.f32 %v6613_v56, %v14365_v41  ;;  %v10840_v41 = vld [vmem:[%s16105_s0 + $0x5c8] ss:$72 sps:$4 sm:$0xff]  }
 0x366   :  { %v6615_v34 = vpop.f32.mrf.mxu0  ;;  %v16251_v37 = vld [vmem:[#allocation65_spill] sm:$0xff] }
 0x367   :  { %v6776_v47 = vpop.f32.mrf.mxu1  ;;  %v14882_v48 = vadd.f32 %v6774_v15, %v6614_v20  ;;  %v6616_v44 = vadd.f32 %v6615_v34, %v14370_v30  ;;  %v16252_v20 = vld [vmem:[#allocation67_spill] sm:$0xff] }
 0x368   :  { %v6617_v17 = vpop.f32.mrf.mxu0 }
 0x369   :  { %16249 = vst [vmem:[#allocation53_spill] sm:$0xff] %v14882_v48  ;;  %v6778_v49 = vpop.f32.mrf.mxu1  ;;  %v14885_v24 = vadd.f32 %v6776_v47, %v6616_v44  ;;  %v6618_v62 = vadd.f32 %v6617_v17, %v14375_v57  ;;  %v10842_v57 = vld [vmem:[%s16105_s0 + $0x65c] ss:$72 sps:$4 sm:$0xff]   ;;  %v16267_v48 = vld [vmem:[#allocation43_spill] sm:$0xff] }
 0x36a   :  { %v6621_v42 = vpop.f32.mrf.mxu0  ;;  %7244 = vmatmul.mubr.bf16.gmra.mxu0 %v10840_v41 }
 0x36b   :  { %v6782_v7 = vpop.f32.mrf.mxu1  ;;  %7405 = vmatmul.mubr.bf16.gmra.mxu1 %v10841_v61  ;;  %v14894_v30 = vadd.f32 %v6778_v49, %v6618_v62  ;;  %v6622_v38 = vadd.f32 %v6621_v42, %v16251_v37  ;;  %7253 = vmatprep.mubr.bf16.mxu0 %v10842_v57  ;;  %v10844_v61 = vld [vmem:[%s16105_s0 + $0x658] ss:$72 sps:$4 sm:$0xff]   ;;  %v7759_v37 = vsub.s32 0, %v14704_v5 }
 0x36c   :  { %7414 = vmatprep.mubr.bf16.mxu1 %v10843_v23  ;;  %v6623_v56 = vpop.f32.mrf.mxu0  ;;  %v16253_v57 = vld [vmem:[#allocation16_spill] sm:$0xff]  ;;  %v16254_v23 = vld [vmem:[#allocation13_spill] sm:$0xff] }
 0x36d   :  { %16250 = vst [vmem:[#allocation73_spill] sm:$0xff] %v14894_v30  ;;  %v6784_v15 = vpop.f32.mrf.mxu1  ;;  %v14903_v33 = vadd.f32 %v6782_v7, %v6622_v38  ;;  %v6624_v34 = vadd.f32 %v6623_v56, %v16252_v20  ;;  %v10845_v7 = vld [vmem:[%s16105_s0 + $0x660] ss:$72 sps:$4 sm:$0xff]  }
 0x36e   :  { %v6625_v47 = vpop.f32.mrf.mxu0 }
 0x36f   :  { %v6786_v44 = vpop.f32.mrf.mxu1  ;;  %v14906_v17 = vadd.f32 %v6784_v15, %v6624_v34 }
 0x370   :  { %v6626_v49 = vpop.f32.mrf.mxu0 }
 0x371   :  { %v6787_v62 = vpop.f32.mrf.mxu1  ;;  %v14922_v49 = vrot.slane %v14734_v50, %v7759_v37 }
 0x372   :  { %v6823_v42 = vpop.f32.mrf.mxu0  ;;  %7254 = vmatmul.mubr.bf16.gmra.mxu0 %v10844_v61 }
 0x373   :  { %v6984_v41 = vpop.f32.mrf.mxu1  ;;  %7415 = vmatmul.mubr.bf16.gmra.mxu1 %v10845_v7  ;;  %v6824_v38 = vadd.f32 %v6823_v42, %v14411_v29  ;;  %7263 = vmatprep.mubr.bf16.mxu0 %v16253_v57  ;;  %v16256_v7 = vld [vmem:[#allocation49_spill] sm:$0xff] }
 0x374   :  { %7424 = vmatprep.mubr.bf16.mxu1 %v16254_v23  ;;  %v6825_v56 = vpop.f32.mrf.mxu0  ;;  %v7837_v57 = vmul.f32 %v14922_v49, %v16256_v7 }
 0x375   :  { %v6986_v15 = vpop.f32.mrf.mxu1  ;;  %v14918_v20 = vadd.f32 %v6984_v41, %v6824_v38  ;;  %v6826_v34 = vadd.f32 %v6825_v56, %v14414_v4  ;;  %v14933_v4 = vrot.slane %v14765_v60, %v7759_v37  ;;  %v16258_v38 = vld [vmem:[#allocation48_spill] sm:$0xff]  ;;  %v10847_v60 = vld [vmem:[%s16105_s0 + $0x44] ss:$72 sps:$4 sm:$0xff]  }
 0x376   :  { %v6827_v47 = vpop.f32.mrf.mxu0  ;;  %v7834_v50 = vmul.f32 %v14746_v19, %v16258_v38  ;;  %v16263_v37 = vld [vmem:[#allocation46_spill] sm:$0xff] }
 0x377   :  { %v6988_v44 = vpop.f32.mrf.mxu1  ;;  %v14924_v62 = vadd.f32 %v6986_v15, %v6826_v34  ;;  %v6828_v61 = vadd.f32 %v6827_v47, %v14417_v25  ;;  %v16259_v34 = vld [vmem:[#allocation19_spill] sm:$0xff]  ;;  %v16260_v25 = vld [vmem:[#allocation17_spill] sm:$0xff] }
 0x378   :  { %v6829_v29 = vpop.f32.mrf.mxu0  ;;  %v16261_v47 = vld [vmem:[#allocation47_spill] sm:$0xff] }
 0x379   :  { %16255 = vst [vmem:[#allocation65_spill] sm:$0xff] %v14924_v62  ;;  %v6990_v42 = vpop.f32.mrf.mxu1  ;;  %v14929_v23 = vadd.f32 %v6988_v44, %v6828_v61  ;;  %v6830_v41 = vadd.f32 %v6829_v29, %v14422_v39  ;;  %v7833_v5 = vmul.f32 %v14922_v49, %v16261_v47  ;;  %v10846_v39 = vld [vmem:[%s16105_s0 + $0x3c] ss:$72 sps:$4 sm:$0xff]   ;;  %v7830_v61 = vmul.f32 %v14746_v19, %v16263_v37 }
 0x37a   :  { %v6833_v56 = vpop.f32.mrf.mxu0  ;;  %7264 = vmatmul.mubr.bf16.gmra.mxu0 %v16259_v34  ;;  %v16264_v34 = vld [vmem:[#allocation45_spill] sm:$0xff]  ;;  %v7825_v37 = vmul.f32 %v14922_v49, %v16267_v48 }
 0x37b   :  { %16257 = vst [vmem:[#allocation67_spill] sm:$0xff] %v14929_v23  ;;  %v6994_v15 = vpop.f32.mrf.mxu1  ;;  %7425 = vmatmul.mubr.bf16.gmra.mxu1 %v16260_v25  ;;  %v14941_v7 = vadd.f32 %v6990_v42, %v6830_v41  ;;  %v6834_v44 = vadd.f32 %v6833_v56, %v14431_v28  ;;  %7465 = vmatprep.mubr.bf16.mxu0 %v10846_v39  ;;  %v16266_v25 = vld [vmem:[#allocation44_spill] sm:$0xff] }
 0x37c   :  { %7626 = vmatprep.mubr.bf16.mxu1 %v10847_v60  ;;  %v6835_v29 = vpop.f32.mrf.mxu0  ;;  %v7829_v42 = vmul.f32 %v14922_v49, %v16264_v34  ;;  %v7959_v28 = vadd.f32 %v14933_v4, %v7837_v57  ;;  %v7826_v47 = vmul.f32 %v14746_v19, %v16266_v25  ;;  %v7956_v60 = vadd.f32 %v14777_v63, %v7834_v50 }
 0x37d   :  { %16262 = vst [vmem:[#allocation16_spill] sm:$0xff] %v14941_v7  ;;  %v6996_v38 = vpop.f32.mrf.mxu1  ;;  %v14955_v41 = vadd.f32 %v6994_v15, %v6834_v44  ;;  %v6836_v56 = vadd.f32 %v6835_v29, %v14434_v0  ;;  %v7955_v7 = vadd.f32 %v14933_v4, %v7833_v5  ;;  %v16269_v15 = vld [vmem:[#allocation41_spill] sm:$0xff]  ;;  %v16270_v0 = vld [vmem:[#allocation42_spill] sm:$0xff] }
 0x37e   :  { %v6837_v39 = vpop.f32.mrf.mxu0  ;;  %v7821_v44 = vmul.f32 %v14922_v49, %v16269_v15  ;;  %v7822_v29 = vmul.f32 %v14746_v19, %v16270_v0  ;;  %v7951_v50 = vadd.f32 %v14933_v4, %v7829_v42  ;;  %v8059_v62 = vmax.f32 %v7959_v28, 0.0  ;;  %v10848_v0 = vld [vmem:[%s16105_s0 + $0x38] ss:$72 sps:$4 sm:$0xff]  }
 0x37f   :  { %16265 = vst [vmem:[#allocation13_spill] sm:$0xff] %v14955_v41  ;;  %v6998_v30 = vpop.f32.mrf.mxu1  ;;  %v14964_v23 = vadd.f32 %v6996_v38, %v6836_v56  ;;  %v6838_v57 = vadd.f32 %v6837_v39, %v14443_v21  ;;  %v7952_v41 = vadd.f32 %v14777_v63, %v7830_v61  ;;  %v16272_v38 = vld [vmem:[#allocation39_spill] sm:$0xff]  ;;  %v16273_v56 = vld [vmem:[#allocation40_spill] sm:$0xff]  ;;  %v8056_v61 = vmax.f32 %v7956_v60, 0.0 }
 0x380   :  { %v6839_v34 = vpop.f32.mrf.mxu0  ;;  %v7817_v21 = vmul.f32 %v14922_v49, %v16272_v38  ;;  %v7818_v39 = vmul.f32 %v14746_v19, %v16273_v56  ;;  %v7947_v42 = vadd.f32 %v14933_v4, %v7825_v37  ;;  %v8055_v28 = vmax.f32 %v7955_v7, 0.0  ;;  %v10850_v38 = vld [vmem:[%s16105_s0 + $0xcc] ss:$72 sps:$4 sm:$0xff]   ;;  %v16275_v56 = vld [vmem:[#allocation37_spill] sm:$0xff] }
 0x381   :  { %16268 = vst [vmem:[#allocation49_spill] sm:$0xff] %v14964_v23  ;;  %v7000_v25 = vpop.f32.mrf.mxu1  ;;  %v14973_v48 = vadd.f32 %v6998_v30, %v6838_v57  ;;  %v6840_v5 = vadd.f32 %v6839_v34, %v14458_v54  ;;  %v10849_v30 = vld [vmem:[%s16105_s0 + $0x40] ss:$72 sps:$4 sm:$0xff]   ;;  %v7948_v54 = vadd.f32 %v14777_v63, %v7826_v47  ;;  %v8052_v7 = vmax.f32 %v7952_v41, 0.0 }
 0x382   :  { %v6843_v15 = vpop.f32.mrf.mxu0  ;;  %7466 = vmatmul.mubr.bf16.vlgmr.msra.gmra.mxu0 %v10848_v0  ;;  %v7813_v0 = vmul.f32 %v14922_v49, %v16275_v56  ;;  %v16277_v56 = vld [vmem:[#allocation35_spill] sm:$0xff] }
 0x383   :  { %16271 = vst [vmem:[#allocation48_spill] sm:$0xff] %v14973_v48  ;;  %v7004_v23 = vpop.f32.mrf.mxu1  ;;  %7627 = vmatmul.mubr.bf16.vlgmr.msra.gmra.mxu1 %v10849_v30  ;;  %v14988_v57 = vadd.f32 %v7000_v25, %v6840_v5  ;;  %v6844_v34 = vadd.f32 %v6843_v15, %v14473_v59  ;;  %8114 = vmatpush1.msra.mxu0 %v8059_v62  ;;  %v16276_v30 = vld [vmem:[#allocation38_spill] sm:$0xff]  ;;  %v10851_v59 = vld [vmem:[%s16105_s0 + $0xd4] ss:$72 sps:$4 sm:$0xff]   ;;  %v8051_v5 = vmax.f32 %v7951_v50, 0.0  ;;  %v8047_v50 = vmax.f32 %v7947_v42, 0.0 }
 0x384   :  { %7475 = vmatprep.mubr.bf16.mxu0 %v10850_v38  ;;  %v7814_v60 = vmul.f32 %v14746_v19, %v16276_v30  ;;  %8115 = vmatprep.subr.mxu0 %v8056_v61  ;;  %v6845_v47 = vpop.f32.mrf.mxu0  ;;  %v7944_v62 = vadd.f32 %v14777_v63, %v7822_v29  ;;  %v7943_v25 = vadd.f32 %v14933_v4, %v7821_v44  ;;  %v16278_v30 = vld [vmem:[#allocation36_spill] sm:$0xff] }
 0x385   :  { %16274 = vst [vmem:[#allocation19_spill] sm:$0xff] %v14988_v57  ;;  %v7006_v37 = vpop.f32.mrf.mxu1  ;;  %7636 = vmatprep.mubr.bf16.mxu1 %v10851_v59  ;;  %v15003_v15 = vadd.f32 %v7004_v23, %v6844_v34  ;;  %v6846_v38 = vadd.f32 %v6845_v47, %v14479_v11  ;;  %8116 = vmatpush1.msra.mxu0 %v8055_v28  ;;  %v8048_v59 = vmax.f32 %v7948_v54, 0.0  ;;  %v16280_v28 = vld [vmem:[#allocation33_spill] sm:$0xff]  ;;  %v16281_v47 = vld [vmem:[#allocation34_spill] sm:$0xff] }
 0x386   :  { %v7809_v61 = vmul.f32 %v14922_v49, %v16277_v56  ;;  %v7810_v41 = vmul.f32 %v14746_v19, %v16278_v30  ;;  %8117 = vmatprep.subr.mxu0 %v8052_v7  ;;  %v6847_v57 = vpop.f32.mrf.mxu0  ;;  %v7940_v29 = vadd.f32 %v14777_v63, %v7818_v39  ;;  %v7939_v44 = vadd.f32 %v14933_v4, %v7817_v21 }
 0x387   :  { %v7008_v48 = vpop.f32.mrf.mxu1  ;;  %v15012_v23 = vadd.f32 %v7006_v37, %v6846_v38  ;;  %v6848_v11 = vadd.f32 %v6847_v57, %v14488_v8  ;;  %8118 = vmatpush1.msra.mxu0 %v8051_v5  ;;  %v7805_v34 = vmul.f32 %v14922_v49, %v16280_v28  ;;  %v7806_v56 = vmul.f32 %v14746_v19, %v16281_v47  ;;  %v16282_v38 = vld [vmem:[#allocation10_spill] sm:$0xff]  ;;  %v16283_v57 = vld [vmem:[#allocation31_spill] sm:$0xff]  ;;  %v16284_v28 = vld [vmem:[#allocation32_spill] sm:$0xff] }
 0x388   :  { %8119 = vmatprep.subr.mxu0 %v8048_v59  ;;  %v6849_v7 = vpop.f32.mrf.mxu0  ;;  %v8044_v54 = vmax.f32 %v7944_v62, 0.0  ;;  %v7936_v39 = vadd.f32 %v14777_v63, %v7814_v60  ;;  %v7935_v21 = vadd.f32 %v14933_v4, %v7813_v0  ;;  %v8043_v42 = vmax.f32 %v7943_v25, 0.0  ;;  %v10852_v60 = vld [vmem:[%s16105_s0 + $0xc8] ss:$72 sps:$4 sm:$0xff]  }
 0x389   :  { %16279 = vst [vmem:[#allocation17_spill] sm:$0xff] %v15012_v23  ;;  %v7010_v30 = vpop.f32.mrf.mxu1  ;;  %v15021_v37 = vadd.f32 %v7008_v48, %v6848_v11  ;;  %v6850_v8 = vadd.f32 %v6849_v7, %v16282_v38  ;;  %8120 = vmatpush1.msra.mxu0 %v8047_v50  ;;  %v7801_v5 = vmul.f32 %v14922_v49, %v16283_v57  ;;  %v8040_v0 = vmax.f32 %v7940_v29, 0.0  ;;  %v10853_v7 = vld [vmem:[%s16105_s0 + $0xd0] ss:$72 sps:$4 sm:$0xff]  }
 0x38a   :  { %v7802_v47 = vmul.f32 %v14746_v19, %v16284_v28  ;;  %8121 = vmatprep.subr.mxu0 %v8044_v54  ;;  %v6853_v59 = vpop.f32.mrf.mxu0  ;;  %7476 = vmatmul.mubr.bf16.gmra.mxu0 %v10852_v60  ;;  %v7932_v48 = vadd.f32 %v14777_v63, %v7810_v41  ;;  %v7931_v62 = vadd.f32 %v14933_v4, %v7809_v61  ;;  %v8039_v25 = vmax.f32 %v7939_v44, 0.0  ;;  %v16285_v54 = vld [vmem:[#allocation29_spill] sm:$0xff]  ;;  %v16286_v57 = vld [vmem:[#allocation30_spill] sm:$0xff] }
 0x38b   :  { %v7014_v23 = vpop.f32.mrf.mxu1  ;;  %v15033_v50 = vadd.f32 %v7010_v30, %v6850_v8  ;;  %v6854_v11 = vadd.f32 %v6853_v59, %v14521_v9  ;;  %7637 = vmatmul.mubr.bf16.gmra.mxu1 %v10853_v7  ;;  %8122 = vmatpush1.msra.mxu0 %v8043_v42  ;;  %v7797_v38 = vmul.f32 %v14922_v49, %v16285_v54  ;;  %v8036_v44 = vmax.f32 %v7936_v39, 0.0  ;;  %v10854_v9 = vld [vmem:[%s16105_s0 + $0x15c] ss:$72 sps:$4 sm:$0xff]   ;;  %v16287_v39 = vld [vmem:[#allocation27_spill] sm:$0xff] }
 0x38c   :  { %v7798_v29 = vmul.f32 %v14746_v19, %v16286_v57  ;;  %8123 = vmatprep.subr.mxu0 %v8040_v0  ;;  %v6855_v41 = vpop.f32.mrf.mxu0  ;;  %7485 = vmatprep.mubr.bf16.mxu0 %v10854_v9  ;;  %v7928_v30 = vadd.f32 %v14777_v63, %v7806_v56  ;;  %v7927_v8 = vadd.f32 %v14933_v4, %v7805_v34  ;;  %v8035_v42 = vmax.f32 %v7935_v21, 0.0  ;;  %v10855_v60 = vld [vmem:[%s16105_s0 + $0x164] ss:$72 sps:$4 sm:$0xff]   ;;  %v16288_v7 = vld [vmem:[#allocation28_spill] sm:$0xff] }
 0x38d   :  { %v7016_v61 = vpop.f32.mrf.mxu1  ;;  %v15048_v28 = vadd.f32 %v7014_v23, %v6854_v11  ;;  %v6856_v59 = vadd.f32 %v6855_v41, %v14524_v45  ;;  %8124 = vmatpush1.msra.mxu0 %v8039_v25  ;;  %7646 = vmatprep.mubr.bf16.mxu1 %v10855_v60  ;;  %v7793_v0 = vmul.f32 %v14922_v49, %v16287_v39  ;;  %v8032_v21 = vmax.f32 %v7932_v48, 0.0  ;;  %v16289_v41 = vld [vmem:[#allocation25_spill] sm:$0xff]  ;;  %v16290_v60 = vld [vmem:[#allocation26_spill] sm:$0xff] }
 0x38e   :  { %v7794_v54 = vmul.f32 %v14746_v19, %v16288_v7  ;;  %8125 = vmatprep.subr.mxu0 %v8036_v44  ;;  %v6857_v56 = vpop.f32.mrf.mxu0  ;;  %v7924_v23 = vadd.f32 %v14777_v63, %v7802_v47  ;;  %v7923_v45 = vadd.f32 %v14933_v4, %v7801_v5  ;;  %v8031_v25 = vmax.f32 %v7931_v62, 0.0 }
 0x38f   :  { %v7018_v34 = vpop.f32.mrf.mxu1  ;;  %v15060_v11 = vadd.f32 %v7016_v61, %v6856_v59  ;;  %v6858_v57 = vadd.f32 %v6857_v56, %v14533_v6  ;;  %8126 = vmatpush1.msra.mxu0 %v8035_v42  ;;  %v7789_v9 = vmul.f32 %v14922_v49, %v16289_v41  ;;  %v7790_v39 = vmul.f32 %v14746_v19, %v16290_v60  ;;  %v16291_v42 = vld [vmem:[#allocation8_spill] sm:$0xff]  ;;  %v16292_v56 = vld [vmem:[#allocation11_spill] sm:$0xff] }
 0x390   :  { %8127 = vmatprep.subr.mxu0 %v8032_v21  ;;  %v6859_v44 = vpop.f32.mrf.mxu0  ;;  %v8028_v48 = vmax.f32 %v7928_v30, 0.0  ;;  %v7920_v47 = vadd.f32 %v14777_v63, %v7798_v29  ;;  %v7919_v5 = vadd.f32 %v14933_v4, %v7797_v38  ;;  %v8027_v62 = vmax.f32 %v7927_v8, 0.0  ;;  %v10856_v29 = vld [vmem:[%s16105_s0 + $0x158] ss:$72 sps:$4 sm:$0xff]  }
 0x391   :  { %v7020_v7 = vpop.f32.mrf.mxu1  ;;  %v15069_v61 = vadd.f32 %v7018_v34, %v6858_v57  ;;  %v6860_v6 = vadd.f32 %v6859_v44, %v14548_v40  ;;  %8128 = vmatpush1.msra.mxu0 %v8031_v25  ;;  %v7785_v59 = vmul.f32 %v14922_v49, %v16291_v42  ;;  %v7786_v41 = vmul.f32 %v14746_v19, %v16292_v56  ;;  %v10857_v57 = vld [vmem:[%s16105_s0 + $0x160] ss:$72 sps:$4 sm:$0xff]  }
 0x392   :  { %8129 = vmatprep.subr.mxu0 %v8028_v48  ;;  %v6863_v21 = vpop.f32.mrf.mxu0  ;;  %7486 = vmatmul.mubr.bf16.gmra.mxu0 %v10856_v29  ;;  %v8024_v38 = vmax.f32 %v7924_v23, 0.0  ;;  %v7916_v30 = vadd.f32 %v14777_v63, %v7794_v54  ;;  %v7915_v40 = vadd.f32 %v14933_v4, %v7793_v0  ;;  %v8023_v8 = vmax.f32 %v7923_v45, 0.0  ;;  %v16293_v44 = vld [vmem:[#allocation6_spill] sm:$0xff]  ;;  %v16294_v42 = vld [vmem:[#allocation9_spill] sm:$0xff]  ;;  %v10859_v29 = vld [vmem:[%s16105_s0 + $0x1f4] ss:$72 sps:$4 sm:$0xff]  }
 0x393   :  { %v7024_v60 = vpop.f32.mrf.mxu1  ;;  %v15081_v34 = vadd.f32 %v7020_v7, %v6860_v6  ;;  %v6864_v25 = vadd.f32 %v6863_v21, %v14563_v36  ;;  %7647 = vmatmul.mubr.bf16.gmra.mxu1 %v10857_v57  ;;  %8130 = vmatpush1.msra.mxu0 %v8027_v62  ;;  %v7781_v48 = vmul.f32 %v14922_v49, %v16293_v44  ;;  %v8020_v45 = vmax.f32 %v7920_v47, 0.0  ;;  %v10858_v36 = vld [vmem:[%s16105_s0 + $0x1ec] ss:$72 sps:$4 sm:$0xff]   ;;  %v16296_v47 = vld [vmem:[#allocation21_spill] sm:$0xff] }
 0x394   :  { %v7782_v23 = vmul.f32 %v14746_v19, %v16294_v42  ;;  %8131 = vmatprep.subr.mxu0 %v8024_v38  ;;  %v6865_v54 = vpop.f32.mrf.mxu0  ;;  %7495 = vmatprep.mubr.bf16.mxu0 %v10858_v36  ;;  %v7912_v7 = vadd.f32 %v14777_v63, %v7790_v39  ;;  %v7911_v6 = vadd.f32 %v14933_v4, %v7789_v9  ;;  %v8019_v62 = vmax.f32 %v7919_v5, 0.0  ;;  %v16297_v57 = vld [vmem:[#allocation22_spill] sm:$0xff]  ;;  %v16298_v36 = vld [vmem:[#allocation68_spill] sm:$0xff] }
 0x395   :  { %v7026_v0 = vpop.f32.mrf.mxu1  ;;  %v15096_v56 = vadd.f32 %v7024_v60, %v6864_v25  ;;  %v6866_v21 = vadd.f32 %v6865_v54, %v14569_v14  ;;  %8132 = vmatpush1.msra.mxu0 %v8023_v8  ;;  %7656 = vmatprep.mubr.bf16.mxu1 %v10859_v29  ;;  %v7777_v38 = vmul.f32 %v14922_v49, %v16296_v47  ;;  %v8016_v5 = vmax.f32 %v7916_v30, 0.0 }
 0x396   :  { %v7778_v44 = vmul.f32 %v14746_v19, %v16297_v57  ;;  %8133 = vmatprep.subr.mxu0 %v8020_v45  ;;  %v6867_v39 = vpop.f32.mrf.mxu0  ;;  %v7908_v60 = vadd.f32 %v14777_v63, %v7786_v41  ;;  %v7907_v14 = vadd.f32 %v14933_v4, %v7785_v59  ;;  %v8015_v8 = vmax.f32 %v7915_v40, 0.0 }
 0x397   :  { %16295 = vst [vmem:[#allocation47_spill] sm:$0xff] %v15096_v56  ;;  %v7028_v9 = vpop.f32.mrf.mxu1  ;;  %v15108_v25 = vadd.f32 %v7026_v0, %v6866_v21  ;;  %v6868_v42 = vadd.f32 %v6867_v39, %v14578_v51  ;;  %8134 = vmatpush1.msra.mxu0 %v8019_v62  ;;  %v7903_v54 = vadd.f32 %v14933_v4, %v7781_v48  ;;  %v8012_v57 = vmax.f32 %v7912_v7, 0.0  ;;  %v16299_v56 = vld [vmem:[#allocation66_spill] sm:$0xff]  ;;  %v16300_v0 = vld [vmem:[#allocation64_spill] sm:$0xff] }
 0x398   :  { %v7874_v29 = vmul.f32 %v14746_v19, %v16298_v36  ;;  %8135 = vmatprep.subr.mxu0 %v8016_v5  ;;  %v6869_v45 = vpop.f32.mrf.mxu0  ;;  %v7904_v30 = vadd.f32 %v14777_v63, %v7782_v23  ;;  %v8011_v41 = vmax.f32 %v7911_v6, 0.0  ;;  %v7873_v59 = vmul.f32 %v14922_v49, %v16299_v56  ;;  %v10860_v23 = vld [vmem:[%s16105_s0 + $0x1e8] ss:$72 sps:$4 sm:$0xff]  }
 0x399   :  { %v7030_v47 = vpop.f32.mrf.mxu1  ;;  %v15117_v40 = vadd.f32 %v7028_v9, %v6868_v42  ;;  %v6870_v51 = vadd.f32 %v6869_v45, %v14593_v52  ;;  %8136 = vmatpush1.msra.mxu0 %v8015_v8  ;;  %v7899_v48 = vadd.f32 %v14933_v4, %v7777_v38  ;;  %v7870_v62 = vmul.f32 %v14746_v19, %v16300_v0  ;;  %v16301_v9 = vld [vmem:[#allocation63_spill] sm:$0xff]  ;;  %v16302_v42 = vld [vmem:[#allocation61_spill] sm:$0xff] }
 0x39a   :  { %8137 = vmatprep.subr.mxu0 %v8012_v57  ;;  %v6873_v21 = vpop.f32.mrf.mxu0  ;;  %7496 = vmatmul.mubr.bf16.gmra.mxu0 %v10860_v23  ;;  %v8008_v7 = vmax.f32 %v7908_v60, 0.0  ;;  %v7900_v6 = vadd.f32 %v14777_v63, %v7778_v44  ;;  %v8007_v56 = vmax.f32 %v7907_v14, 0.0  ;;  %v7869_v52 = vmul.f32 %v14922_v49, %v16301_v9  ;;  %v10861_v8 = vld [vmem:[%s16105_s0 + $0x1f0] ss:$72 sps:$4 sm:$0xff]   ;;  %v10863_v23 = vld [vmem:[%s16105_s0 + $0x284] ss:$72 sps:$4 sm:$0xff]  }
 0x39b   :  { %v7034_v39 = vpop.f32.mrf.mxu1  ;;  %v15129_v5 = vadd.f32 %v7030_v47, %v6870_v51  ;;  %v6874_v38 = vadd.f32 %v6873_v21, %v14611_v18  ;;  %7657 = vmatmul.mubr.bf16.gmra.mxu1 %v10861_v8  ;;  %8138 = vmatpush1.msra.mxu0 %v8011_v41  ;;  %v7865_v36 = vmul.f32 %v14922_v49, %v16302_v42  ;;  %v16303_v60 = vld [vmem:[#allocation62_spill] sm:$0xff]  ;;  %v8004_v57 = vmax.f32 %v7904_v30, 0.0  ;;  %v10862_v18 = vld [vmem:[%s16105_s0 + $0x27c] ss:$72 sps:$4 sm:$0xff]  }
 0x39c   :  { %v7866_v44 = vmul.f32 %v14746_v19, %v16303_v60  ;;  %8139 = vmatprep.subr.mxu0 %v8008_v7  ;;  %v6875_v14 = vpop.f32.mrf.mxu0  ;;  %7505 = vmatprep.mubr.bf16.mxu0 %v10862_v18  ;;  %v7996_v47 = vadd.f32 %v14777_v63, %v7874_v29  ;;  %v8003_v51 = vmax.f32 %v7903_v54, 0.0  ;;  %v7995_v41 = vadd.f32 %v14933_v4, %v7873_v59  ;;  %v16304_v7 = vld [vmem:[#allocation60_spill] sm:$0xff] }
 0x39d   :  { %v7036_v45 = vpop.f32.mrf.mxu1  ;;  %v15144_v0 = vadd.f32 %v7034_v39, %v6874_v38  ;;  %v6876_v21 = vadd.f32 %v6875_v14, %v14614_v31  ;;  %8140 = vmatpush1.msra.mxu0 %v8007_v56  ;;  %7666 = vmatprep.mubr.bf16.mxu1 %v10863_v23  ;;  %v7999_v30 = vmax.f32 %v7899_v48, 0.0  ;;  %v7862_v9 = vmul.f32 %v14746_v19, %v16304_v7  ;;  %v16305_v39 = vld [vmem:[#allocation59_spill] sm:$0xff]  ;;  %v16306_v48 = vld [vmem:[#allocation57_spill] sm:$0xff]  ;;  %v16307_v14 = vld [vmem:[#allocation58_spill] sm:$0xff] }
 0x39e   :  { %8141 = vmatprep.subr.mxu0 %v8004_v57  ;;  %v6877_v8 = vpop.f32.mrf.mxu0  ;;  %v8000_v54 = vmax.f32 %v7900_v6, 0.0  ;;  %v7992_v59 = vadd.f32 %v14777_v63, %v7870_v62  ;;  %v7861_v38 = vmul.f32 %v14922_v49, %v16305_v39  ;;  %v7991_v31 = vadd.f32 %v14933_v4, %v7869_v52 }
 0x39f   :  { %v7038_v29 = vpop.f32.mrf.mxu1  ;;  %v15156_v56 = vadd.f32 %v7036_v45, %v6876_v21  ;;  %v6878_v42 = vadd.f32 %v6877_v8, %v14623_v13  ;;  %8142 = vmatpush1.msra.mxu0 %v8003_v51  ;;  %v7857_v60 = vmul.f32 %v14922_v49, %v16306_v48  ;;  %v7858_v57 = vmul.f32 %v14746_v19, %v16307_v14  ;;  %v16308_v51 = vld [vmem:[#allocation55_spill] sm:$0xff]  ;;  %v16309_v8 = vld [vmem:[#allocation56_spill] sm:$0xff] }
 0x3a0   :  { %8143 = vmatprep.subr.mxu0 %v8000_v54  ;;  %v6879_v6 = vpop.f32.mrf.mxu0  ;;  %v8096_v62 = vmax.f32 %v7996_v47, 0.0  ;;  %v7988_v23 = vadd.f32 %v14777_v63, %v7866_v44  ;;  %v7987_v7 = vadd.f32 %v14933_v4, %v7865_v36  ;;  %v8095_v52 = vmax.f32 %v7995_v41, 0.0  ;;  %v10864_v44 = vld [vmem:[%s16105_s0 + $0x278] ss:$72 sps:$4 sm:$0xff]  }
 0x3a1   :  { %v7040_v18 = vpop.f32.mrf.mxu1  ;;  %v15165_v45 = vadd.f32 %v7038_v29, %v6878_v42  ;;  %v6880_v13 = vadd.f32 %v6879_v6, %v14638_v10  ;;  %8144 = vmatpush1.msra.mxu0 %v7999_v30  ;;  %v7853_v21 = vmul.f32 %v14922_v49, %v16308_v51  ;;  %v7854_v39 = vmul.f32 %v14746_v19, %v16309_v8  ;;  %v10865_v42 = vld [vmem:[%s16105_s0 + $0x280] ss:$72 sps:$4 sm:$0xff]  }
 0x3a2   :  { %8159 = vmatprep.subr.mxu0 %v8096_v62  ;;  %v6883_v54 = vpop.f32.mrf.mxu0  ;;  %7506 = vmatmul.mubr.bf16.gmra.mxu0 %v10864_v44  ;;  %v8092_v36 = vmax.f32 %v7992_v59, 0.0  ;;  %v7984_v47 = vadd.f32 %v14777_v63, %v7862_v9  ;;  %v7983_v10 = vadd.f32 %v14933_v4, %v7861_v38  ;;  %v8091_v41 = vmax.f32 %v7991_v31, 0.0  ;;  %v16310_v14 = vld [vmem:[#allocation20_spill] sm:$0xff]  ;;  %v16311_v62 = vld [vmem:[#allocation54_spill] sm:$0xff] }
 0x3a3   :  { %v7044_v48 = vpop.f32.mrf.mxu1  ;;  %v15177_v30 = vadd.f32 %v7040_v18, %v6880_v13  ;;  %v6884_v29 = vadd.f32 %v6883_v54, %v14653_v12  ;;  %7667 = vmatmul.mubr.bf16.gmra.mxu1 %v10865_v42  ;;  %8160 = vmatpush2.msra.mxu0 %v8095_v52  ;;  %v7849_v6 = vmul.f32 %v14922_v49, %v16310_v14  ;;  %v8088_v31 = vmax.f32 %v7988_v23, 0.0  ;;  %v10866_v12 = vld [vmem:[%s16105_s0 + $0x30c] ss:$72 sps:$4 sm:$0xff]   ;;  %v16312_v23 = vld [vmem:[#allocation52_spill] sm:$0xff] }
 0x3a4   :  { %v7850_v59 = vmul.f32 %v14746_v19, %v16311_v62  ;;  %8161 = vmatprep.subr.mxu0 %v8092_v36  ;;  %v6885_v9 = vpop.f32.mrf.mxu0  ;;  %7515 = vmatprep.mubr.bf16.mxu0 %v10866_v12  ;;  %v7980_v18 = vadd.f32 %v14777_v63, %v7858_v57  ;;  %v7979_v13 = vadd.f32 %v14933_v4, %v7857_v60  ;;  %v8087_v52 = vmax.f32 %v7987_v7, 0.0  ;;  %v10867_v54 = vld [vmem:[%s16105_s0 + $0x314] ss:$72 sps:$4 sm:$0xff]   ;;  %v16314_v62 = vld [vmem:[#allocation50_spill] sm:$0xff] }
 0x3a5   :  { %v7046_v38 = vpop.f32.mrf.mxu1  ;;  %v15192_v51 = vadd.f32 %v7044_v48, %v6884_v29  ;;  %v6886_v8 = vadd.f32 %v6885_v9, %v14659_v32  ;;  %8162 = vmatpush2.msra.mxu0 %v8091_v41  ;;  %7676 = vmatprep.mubr.bf16.mxu1 %v10867_v54  ;;  %v7845_v44 = vmul.f32 %v14922_v49, %v16312_v23  ;;  %v16313_v36 = vld [vmem:[#allocation7_spill] sm:$0xff]  ;;  %v8084_v7 = vmax.f32 %v7984_v47, 0.0 }
 0x3a6   :  { %v7846_v42 = vmul.f32 %v14746_v19, %v16313_v36  ;;  %8163 = vmatprep.subr.mxu0 %v8088_v31  ;;  %v6887_v57 = vpop.f32.mrf.mxu0  ;;  %v7976_v48 = vadd.f32 %v14777_v63, %v7854_v39  ;;  %v7975_v32 = vadd.f32 %v14933_v4, %v7853_v21  ;;  %v8083_v41 = vmax.f32 %v7983_v10, 0.0  ;;  %v16315_v12 = vld [vmem:[#allocation51_spill] sm:$0xff] }
 0x3a7   :  { %v7048_v60 = vpop.f32.mrf.mxu1  ;;  %v15204_v29 = vadd.f32 %v7046_v38, %v6886_v8  ;;  %v6888_v14 = vadd.f32 %v6887_v57, %v14668_v16  ;;  %8164 = vmatpush2.msra.mxu0 %v8087_v52  ;;  %v7841_v9 = vmul.f32 %v14922_v49, %v16314_v62  ;;  %v7842_v54 = vmul.f32 %v14746_v19, %v16315_v12  ;;  %v10868_v19 = vld [vmem:[%s16105_s0 + $0x308] ss:$72 sps:$4 sm:$0xff]  }
 0x3a8   :  { %8165 = vmatprep.subr.mxu0 %v8084_v7  ;;  %v6889_v31 = vpop.f32.mrf.mxu0  ;;  %v8080_v47 = vmax.f32 %v7980_v18, 0.0  ;;  %v7972_v39 = vadd.f32 %v14777_v63, %v7850_v59  ;;  %v7971_v21 = vadd.f32 %v14933_v4, %v7849_v6  ;;  %v8079_v10 = vmax.f32 %v7979_v13, 0.0 }
 0x3a9   :  { %v7050_v23 = vpop.f32.mrf.mxu1  ;;  %v15213_v38 = vadd.f32 %v7048_v60, %v6888_v14  ;;  %v6890_v16 = vadd.f32 %v6889_v31, %v14683_v53  ;;  %8166 = vmatpush2.msra.mxu0 %v8083_v41  ;;  %v8076_v8 = vmax.f32 %v7976_v48, 0.0  ;;  %v7968_v18 = vadd.f32 %v14777_v63, %v7846_v42  ;;  %v10869_v53 = vld [vmem:[%s16105_s0 + $0x310] ss:$72 sps:$4 sm:$0xff]   ;;  %v10870_v42 = vld [vmem:[%s16105_s0 + $0x39c] ss:$72 sps:$4 sm:$0xff]  }
 0x3aa   :  { %8167 = vmatprep.subr.mxu0 %v8080_v47  ;;  %v6893_v52 = vpop.f32.mrf.mxu0  ;;  %7516 = vmatmul.mubr.bf16.gmra.mxu0 %v10868_v19  ;;  %v7967_v59 = vadd.f32 %v14933_v4, %v7845_v44  ;;  %v8075_v6 = vmax.f32 %v7975_v32, 0.0  ;;  %v8072_v7 = vmax.f32 %v7972_v39, 0.0  ;;  %v7964_v44 = vadd.f32 %v14777_v63, %v7842_v54  ;;  %v10871_v14 = vld [vmem:[%s16105_s0 + $0x3a4] ss:$72 sps:$4 sm:$0xff]   ;;  %v16316_v63 = vld [vmem:[#allocation12_spill] sm:$0xff] }
 0x3ab   :  { %v7054_v49 = vpop.f32.mrf.mxu1  ;;  %v15221_v13 = vadd.f32 %v7050_v23, %v6890_v16  ;;  %v6894_v36 = vadd.f32 %v6893_v52, %v14701_v27  ;;  %7677 = vmatmul.mubr.bf16.gmra.mxu1 %v10869_v53  ;;  %8168 = vmatpush2.msra.mxu0 %v8079_v10  ;;  %v7963_v48 = vadd.f32 %v14933_v4, %v7841_v9  ;;  %v8071_v27 = vmax.f32 %v7971_v21, 0.0  ;;  %v16317_v10 = vld [vmem:[#allocation18_spill] sm:$0xff]  ;;  %v10872_v19 = vld [vmem:[%s16105_s0 + $0x398] ss:$72 sps:$4 sm:$0xff]  }
 0x3ac   :  { %8169 = vmatprep.subr.mxu0 %v8076_v8  ;;  %v6895_v57 = vpop.f32.mrf.mxu0  ;;  %7525 = vmatprep.mubr.bf16.mxu0 %v10870_v42  ;;  %v8068_v31 = vmax.f32 %v7968_v18, 0.0  ;;  %v8067_v23 = vmax.f32 %v7967_v59, 0.0  ;;  %v16318_v18 = vld [vmem:[#allocation69_spill] sm:$0xff]  ;;  %v16319_v42 = vld [vmem:[#allocation70_spill] sm:$0xff] }
 0x3ad   :  { %v7056_v60 = vpop.f32.mrf.mxu1  ;;  %v15232_v32 = vadd.f32 %v7054_v49, %v6894_v36  ;;  %v6896_v41 = vadd.f32 %v6895_v57, %v14706_v2  ;;  %8170 = vmatpush2.msra.mxu0 %v8075_v6  ;;  %7686 = vmatprep.mubr.bf16.mxu1 %v10871_v14  ;;  %v8064_v2 = vmax.f32 %v7964_v44, 0.0  ;;  %v8063_v39 = vmax.f32 %v7963_v48, 0.0  ;;  %v10873_v6 = vld [vmem:[%s16105_s0 + $0x3a0] ss:$72 sps:$4 sm:$0xff]   ;;  %v10874_v57 = vld [vmem:[%s16105_s0 + $0x42c] ss:$72 sps:$4 sm:$0xff]  }
 0x3ae   :  { %8171 = vmatprep.subr.mxu0 %v8072_v7  ;;  %v6897_v62 = vpop.f32.mrf.mxu0  ;;  %v16320_v14 = vld [vmem:[#allocation71_spill] sm:$0xff] }
 0x3af   :  { %v7058_v12 = vpop.f32.mrf.mxu1  ;;  %v15238_v47 = vadd.f32 %v7056_v60, %v6896_v41  ;;  %v6898_v4 = vadd.f32 %v6897_v62, %v16316_v63  ;;  %8172 = vmatpush2.msra.mxu0 %v8071_v27  ;;  %v10875_v60 = vld [vmem:[%s16105_s0 + $0x434] ss:$72 sps:$4 sm:$0xff]  }
 0x3b0   :  { %8173 = vmatprep.subr.mxu0 %v8068_v31  ;;  %v6899_v9 = vpop.f32.mrf.mxu0  ;;  %v16321_v63 = vld [vmem:[#allocation72_spill] sm:$0xff] }
 0x3b1   :  { %v7060_v54 = vpop.f32.mrf.mxu1  ;;  %v15241_v21 = vadd.f32 %v7058_v12, %v6898_v4  ;;  %v6900_v16 = vadd.f32 %v6899_v9, %v16317_v10  ;;  %8174 = vmatpush2.msra.mxu0 %v8067_v23 }
 0x3b2   :  { %8175 = vmatprep.subr.mxu0 %v8064_v2  ;;  %v6903_v52 = vpop.f32.mrf.mxu0  ;;  %7526 = vmatmul.mubr.bf16.gmra.mxu0 %v10872_v19  ;;  %v10876_v2 = vld [vmem:[%s16105_s0 + $0x428] ss:$72 sps:$4 sm:$0xff]  }
 0x3b3   :  { %v7064_v49 = vpop.f32.mrf.mxu1  ;;  %v15247_v8 = vadd.f32 %v7060_v54, %v6900_v16  ;;  %v6904_v59 = vadd.f32 %v6903_v52, %v16318_v18  ;;  %7687 = vmatmul.mubr.bf16.gmra.mxu1 %v10873_v6  ;;  %8176 = vmatpush2.msra.mxu0 %v8063_v39  ;;  %v10877_v16 = vld [vmem:[%s16105_s0 + $0x430] ss:$72 sps:$4 sm:$0xff]   ;;  %v10878_v52 = vld [vmem:[%s16105_s0 + $0x4bc] ss:$72 sps:$4 sm:$0xff]  }
 0x3b4   :  { %v6905_v36 = vpop.f32.mrf.mxu0  ;;  %7535 = vmatprep.mubr.bf16.mxu0 %v10874_v57  ;;  %7696 = vmatprep.mubr.bf16.mxu1 %v10875_v60  ;;  %v10879_v18 = vld [vmem:[%s16105_s0 + $0x4c4] ss:$72 sps:$4 sm:$0xff]  }
 0x3b5   :  { %v7066_v53 = vpop.f32.mrf.mxu1  ;;  %v15259_v7 = vadd.f32 %v7064_v49, %v6904_v59  ;;  %v6906_v44 = vadd.f32 %v6905_v36, %v16319_v42 }
 0x3b6   :  { %v6907_v48 = vpop.f32.mrf.mxu0 }
 0x3b7   :  { %v7068_v27 = vpop.f32.mrf.mxu1  ;;  %v15262_v41 = vadd.f32 %v7066_v53, %v6906_v44  ;;  %v6908_v62 = vadd.f32 %v6907_v48, %v16320_v14 }
 0x3b8   :  { %v6909_v12 = vpop.f32.mrf.mxu0 }
 0x3b9   :  { %v7070_v31 = vpop.f32.mrf.mxu1  ;;  %v15265_v23 = vadd.f32 %v7068_v27, %v6908_v62  ;;  %v6910_v4 = vadd.f32 %v6909_v12, %v16321_v63  ;;  %v10880_v62 = vld [vmem:[%s16105_s0 + $0x4b8] ss:$72 sps:$4 sm:$0xff]  }
 0x3ba   :  { %v6913_v9 = vpop.f32.mrf.mxu0  ;;  %7536 = vmatmul.mubr.bf16.gmra.mxu0 %v10876_v2 }
 0x3bb   :  { %v7074_v54 = vpop.f32.mrf.mxu1  ;;  %v15271_v39 = vadd.f32 %v7070_v31, %v6910_v4  ;;  %v6914_v10 = vadd.f32 %v6913_v9, %v14810_v55  ;;  %7697 = vmatmul.mubr.bf16.gmra.mxu1 %v10877_v16  ;;  %7545 = vmatprep.mubr.bf16.mxu0 %v10878_v52  ;;  %v10883_v4 = vld [vmem:[%s16105_s0 + $0x554] ss:$72 sps:$4 sm:$0xff]  }
 0x3bc   :  { %v6915_v49 = vpop.f32.mrf.mxu0  ;;  %7706 = vmatprep.mubr.bf16.mxu1 %v10879_v18 }
 0x3bd   :  { %v7076_v19 = vpop.f32.mrf.mxu1  ;;  %v15283_v59 = vadd.f32 %v7074_v54, %v6914_v10  ;;  %v6916_v55 = vadd.f32 %v6915_v49, %v14813_v58 }
 0x3be   :  { %v6917_v6 = vpop.f32.mrf.mxu0 }
 0x3bf   :  { %v7078_v36 = vpop.f32.mrf.mxu1  ;;  %v15286_v53 = vadd.f32 %v7076_v19, %v6916_v55  ;;  %v6918_v57 = vadd.f32 %v6917_v6, %v14819_v46  ;;  %v10881_v46 = vld [vmem:[%s16105_s0 + $0x4c0] ss:$72 sps:$4 sm:$0xff]  }
 0x3c0   :  { %v6919_v60 = vpop.f32.mrf.mxu0 }
 0x3c1   :  { %v7080_v42 = vpop.f32.mrf.mxu1  ;;  %v15289_v44 = vadd.f32 %v7078_v36, %v6918_v57  ;;  %v6920_v48 = vadd.f32 %v6919_v60, %v14831_v22  ;;  %v10882_v22 = vld [vmem:[%s16105_s0 + $0x54c] ss:$72 sps:$4 sm:$0xff]   ;;  %v10884_v36 = vld [vmem:[%s16105_s0 + $0x548] ss:$72 sps:$4 sm:$0xff]  }
 0x3c2   :  { %v6923_v27 = vpop.f32.mrf.mxu0  ;;  %7546 = vmatmul.mubr.bf16.gmra.mxu0 %v10880_v62 }
 0x3c3   :  { %v7084_v14 = vpop.f32.mrf.mxu1  ;;  %v15295_v58 = vadd.f32 %v7080_v42, %v6920_v48  ;;  %v6924_v12 = vadd.f32 %v6923_v27, %v14843_v26  ;;  %7707 = vmatmul.mubr.bf16.gmra.mxu1 %v10881_v46  ;;  %7555 = vmatprep.mubr.bf16.mxu0 %v10882_v22  ;;  %v10887_v48 = vld [vmem:[%s16105_s0 + $0x5e4] ss:$72 sps:$4 sm:$0xff]  }
 0x3c4   :  { %v6925_v31 = vpop.f32.mrf.mxu0  ;;  %7716 = vmatprep.mubr.bf16.mxu1 %v10883_v4  ;;  %v10888_v4 = vld [vmem:[%s16105_s0 + $0x5d8] ss:$72 sps:$4 sm:$0xff]  }
 0x3c5   :  { %v7086_v63 = vpop.f32.mrf.mxu1  ;;  %v15307_v9 = vadd.f32 %v7084_v14, %v6924_v12  ;;  %v6926_v26 = vadd.f32 %v6925_v31, %v14849_v1 }
 0x3c6   :  { %v6927_v54 = vpop.f32.mrf.mxu0 }
 0x3c7   :  { %v7088_v2 = vpop.f32.mrf.mxu1  ;;  %v15310_v10 = vadd.f32 %v7086_v63, %v6926_v26  ;;  %v6928_v16 = vadd.f32 %v6927_v54, %v14855_v3  ;;  %v10885_v3 = vld [vmem:[%s16105_s0 + $0x550] ss:$72 sps:$4 sm:$0xff]   ;;  %v10889_v54 = vld [vmem:[%s16105_s0 + $0x5e0] ss:$72 sps:$4 sm:$0xff]  }
 0x3c8   :  { %v6929_v52 = vpop.f32.mrf.mxu0 }
 0x3c9   :  { %v7090_v49 = vpop.f32.mrf.mxu1  ;;  %v15313_v19 = vadd.f32 %v7088_v2, %v6928_v16  ;;  %v6930_v18 = vadd.f32 %v6929_v52, %v14867_v43  ;;  %v10886_v43 = vld [vmem:[%s16105_s0 + $0x5dc] ss:$72 sps:$4 sm:$0xff]  }
 0x3ca   :  { %v6933_v55 = vpop.f32.mrf.mxu0  ;;  %7556 = vmatmul.mubr.bf16.gmra.mxu0 %v10884_v36  ;;  %v10891_v52 = vld [vmem:[%s16105_s0 + $0x674] ss:$72 sps:$4 sm:$0xff]  }
 0x3cb   :  { %v7094_v6 = vpop.f32.mrf.mxu1  ;;  %v15319_v1 = vadd.f32 %v7090_v49, %v6930_v18  ;;  %v6934_v57 = vadd.f32 %v6933_v55, %v14879_v35  ;;  %7717 = vmatmul.mubr.bf16.gmra.mxu1 %v10885_v3  ;;  %7565 = vmatprep.mubr.bf16.mxu0 %v10886_v43 }
 0x3cc   :  { %v15328_v60 = vpop.f32.mrf.mxu0  ;;  %7726 = vmatprep.mubr.bf16.mxu1 %v10887_v48  ;;  %v10892_v48 = vld [vmem:[%s16105_s0 + $0x668] ss:$72 sps:$4 sm:$0xff]  }
 0x3cd   :  { %v15330_v42 = vpop.f32.mrf.mxu1  ;;  %v15335_v35 = vadd.f32 %v7094_v6, %v6934_v57 }
 0x3ce   :  { %v6937_v27 = vpop.f32.mrf.mxu0 }
 0x3cf   :  { %v7098_v14 = vpop.f32.mrf.mxu1  ;;  %v6938_v62 = vadd.f32 %v6937_v27, %v14885_v24  ;;  %v10890_v24 = vld [vmem:[%s16105_s0 + $0x66c] ss:$72 sps:$4 sm:$0xff]  }
 0x3d0   :  { %v15338_v12 = vpop.f32.mrf.mxu0 }
 0x3d1   :  { %v15340_v46 = vpop.f32.mrf.mxu1  ;;  %v15342_v22 = vadd.f32 %v7098_v14, %v6938_v62  ;;  %v10893_v14 = vld [vmem:[%s16105_s0 + $0x670] ss:$72 sps:$4 sm:$0xff]  }
 0x3d2   :  { %v6943_v31 = vpop.f32.mrf.mxu0  ;;  %7566 = vmatmul.mubr.bf16.gmra.mxu0 %v10888_v4 }
 0x3d3   :  { %v7104_v63 = vpop.f32.mrf.mxu1  ;;  %v6944_v26 = vadd.f32 %v6943_v31, %v14903_v33  ;;  %7727 = vmatmul.mubr.bf16.gmra.mxu1 %v10889_v54  ;;  %7575 = vmatprep.mubr.bf16.mxu0 %v10890_v24 }
 0x3d4   :  { %v6945_v2 = vpop.f32.mrf.mxu0  ;;  %7736 = vmatprep.mubr.bf16.mxu1 %v10891_v52 }
 0x3d5   :  { %v7106_v16 = vpop.f32.mrf.mxu1  ;;  %v15357_v49 = vadd.f32 %v7104_v63, %v6944_v26  ;;  %v6946_v33 = vadd.f32 %v6945_v2, %v14906_v17  ;;  %v16322_v17 = vld [vmem:[#allocation14_spill] sm:$0xff]  ;;  %v16323_v63 = vld [vmem:[#allocation23_spill] sm:$0xff]  ;;  %v16324_v26 = vld [vmem:[#allocation65_spill] sm:$0xff] }
 0x3d6   :  { %v6947_v18 = vpop.f32.mrf.mxu0 }
 0x3d7   :  { %v7108_v55 = vpop.f32.mrf.mxu1  ;;  %v15360_v6 = vadd.f32 %v7106_v16, %v6946_v33 }
 0x3d8   :  { %v6948_v36 = vpop.f32.mrf.mxu0 }
 0x3d9   :  { %v7109_v57 = vpop.f32.mrf.mxu1  ;;  %v16327_v36 = vld [vmem:[#allocation16_spill] sm:$0xff] }
 0x3da   :  { %v7145_v3 = vpop.f32.mrf.mxu0  ;;  %7576 = vmatmul.mubr.bf16.gmra.mxu0 %v10892_v48 }
 0x3db   :  { %v7306_v43 = vpop.f32.mrf.mxu1  ;;  %v7146_v27 = vadd.f32 %v7145_v3, %v14918_v20  ;;  %7737 = vmatmul.mubr.bf16.gmra.mxu1 %v10893_v14  ;;  %7585 = vmatprep.mubr.bf16.mxu0 %v16322_v17  ;;  %v16325_v20 = vld [vmem:[#allocation67_spill] sm:$0xff]  ;;  %v16328_v14 = vld [vmem:[#allocation24_spill] sm:$0xff] }
 0x3dc   :  { %v7147_v62 = vpop.f32.mrf.mxu0  ;;  %7746 = vmatprep.mubr.bf16.mxu1 %v16323_v63 }
 0x3dd   :  { %v7308_v31 = vpop.f32.mrf.mxu1  ;;  %v15371_v4 = vadd.f32 %v7306_v43, %v7146_v27  ;;  %v7148_v54 = vadd.f32 %v7147_v62, %v16324_v26  ;;  %v16330_v27 = vld [vmem:[#allocation13_spill] sm:$0xff] }
 0x3de   :  { %v7149_v24 = vpop.f32.mrf.mxu0  ;;  %v16331_v62 = vld [vmem:[#allocation5_spill] sm:$0xff] }
 0x3df   :  { %v7310_v2 = vpop.f32.mrf.mxu1  ;;  %v15374_v16 = vadd.f32 %v7308_v31, %v7148_v54  ;;  %v7150_v52 = vadd.f32 %v7149_v24, %v16325_v20  ;;  %v16332_v54 = vld [vmem:[#allocation49_spill] sm:$0xff] }
 0x3e0   :  { %v7151_v33 = vpop.f32.mrf.mxu0 }
 0x3e1   :  { %v7312_v18 = vpop.f32.mrf.mxu1  ;;  %v15377_v55 = vadd.f32 %v7310_v2, %v7150_v52  ;;  %v7152_v57 = vadd.f32 %v7151_v33, %v16327_v36  ;;  %v16334_v33 = vld [vmem:[#allocation48_spill] sm:$0xff] }
 0x3e2   :  { %v7155_v3 = vpop.f32.mrf.mxu0  ;;  %7586 = vmatmul.mubr.bf16.gmra.mxu0 %v16328_v14 }
 0x3e3   :  { %16326 = vst [vmem:[#allocation46_spill] sm:$0xff] %v15377_v55  ;;  %v7316_v48 = vpop.f32.mrf.mxu1  ;;  %v15381_v43 = vadd.f32 %v7312_v18, %v7152_v57  ;;  %v7156_v17 = vadd.f32 %v7155_v3, %v16330_v27  ;;  %7747 = vmatmul.mubr.bf16.gmra.mxu1 %v16331_v62  ;;  %v16335_v57 = vld [vmem:[#allocation19_spill] sm:$0xff] }
 0x3e4   :  { %v7157_v31 = vpop.f32.mrf.mxu0 }
 0x3e5   :  { %16329 = vst [vmem:[#allocation45_spill] sm:$0xff] %v15381_v43  ;;  %v7318_v63 = vpop.f32.mrf.mxu1  ;;  %v15385_v26 = vadd.f32 %v7316_v48, %v7156_v17  ;;  %v7158_v24 = vadd.f32 %v7157_v31, %v16332_v54 }
 0x3e6   :  { %v7159_v2 = vpop.f32.mrf.mxu0 }
 0x3e7   :  { %v7320_v20 = vpop.f32.mrf.mxu1  ;;  %v15388_v52 = vadd.f32 %v7318_v63, %v7158_v24  ;;  %v7160_v36 = vadd.f32 %v7159_v2, %v16334_v33  ;;  %v16336_v63 = vld [vmem:[#allocation17_spill] sm:$0xff] }
 0x3e8   :  { %v7161_v55 = vpop.f32.mrf.mxu0 }
 0x3e9   :  { %16333 = vst [vmem:[#allocation44_spill] sm:$0xff] %v15388_v52  ;;  %v7322_v14 = vpop.f32.mrf.mxu1  ;;  %v15391_v18 = vadd.f32 %v7320_v20, %v7160_v36  ;;  %v7162_v3 = vadd.f32 %v7161_v55, %v16335_v57 }
 0x3ea   :  { %v7165_v27 = vpop.f32.mrf.mxu0 }
 0x3eb   :  { %v7326_v62 = vpop.f32.mrf.mxu1  ;;  %v15394_v43 = vadd.f32 %v7322_v14, %v7162_v3  ;;  %v7166_v48 = vadd.f32 %v7165_v27, %v15003_v15 }
 0x3ec   :  { %v7167_v17 = vpop.f32.mrf.mxu0 }
 0x3ed   :  { %v7328_v31 = vpop.f32.mrf.mxu1  ;;  %v15397_v54 = vadd.f32 %v7326_v62, %v7166_v48  ;;  %v7168_v24 = vadd.f32 %v7167_v17, %v16336_v63 }
 0x3ee   :  { %v7169_v52 = vpop.f32.mrf.mxu0 }
 0x3ef   :  { %v7330_v2 = vpop.f32.mrf.mxu1  ;;  %v15400_v33 = vadd.f32 %v7328_v31, %v7168_v24  ;;  %v7170_v20 = vadd.f32 %v7169_v52, %v15021_v37 }
 0x3f0   :  { %v7171_v36 = vpop.f32.mrf.mxu0 }
 0x3f1   :  { %v7332_v55 = vpop.f32.mrf.mxu1  ;;  %v15403_v57 = vadd.f32 %v7330_v2, %v7170_v20  ;;  %v7172_v14 = vadd.f32 %v7171_v36, %v15033_v50 }
 0x3f2   :  { %v7175_v3 = vpop.f32.mrf.mxu0 }
 0x3f3   :  { %v7336_v15 = vpop.f32.mrf.mxu1  ;;  %v15406_v27 = vadd.f32 %v7332_v55, %v7172_v14  ;;  %v7176_v62 = vadd.f32 %v7175_v3, %v15048_v28 }
 0x3f4   :  { %v7177_v48 = vpop.f32.mrf.mxu0 }
 0x3f5   :  { %v7338_v17 = vpop.f32.mrf.mxu1  ;;  %v15409_v63 = vadd.f32 %v7336_v15, %v7176_v62  ;;  %v7178_v31 = vadd.f32 %v7177_v48, %v15060_v11  ;;  %v16338_v15 = vld [vmem:[#allocation47_spill] sm:$0xff] }
 0x3f6   :  { %v7179_v24 = vpop.f32.mrf.mxu0 }
 0x3f7   :  { %16337 = vst [vmem:[#allocation43_spill] sm:$0xff] %v15409_v63  ;;  %v7340_v37 = vpop.f32.mrf.mxu1  ;;  %v15412_v52 = vadd.f32 %v7338_v17, %v7178_v31  ;;  %v7180_v2 = vadd.f32 %v7179_v24, %v15069_v61 }
 0x3f8   :  { %v7181_v20 = vpop.f32.mrf.mxu0 }
 0x3f9   :  { %v7342_v50 = vpop.f32.mrf.mxu1  ;;  %v15415_v36 = vadd.f32 %v7340_v37, %v7180_v2  ;;  %v7182_v55 = vadd.f32 %v7181_v20, %v15081_v34 }
 0x3fa   :  { %v7185_v14 = vpop.f32.mrf.mxu0 }
 0x3fb   :  { %v7346_v28 = vpop.f32.mrf.mxu1  ;;  %v15418_v3 = vadd.f32 %v7342_v50, %v7182_v55  ;;  %v7186_v62 = vadd.f32 %v7185_v14, %v16338_v15 }
 0x3fc   :  { %v7187_v63 = vpop.f32.mrf.mxu0 }
 0x3fd   :  { %v7348_v11 = vpop.f32.mrf.mxu1  ;;  %v15421_v48 = vadd.f32 %v7346_v28, %v7186_v62  ;;  %v7188_v17 = vadd.f32 %v7187_v63, %v15108_v25 }
 0x3fe   :  { %v7189_v31 = vpop.f32.mrf.mxu0 }
 0x3ff   :  { %v7350_v61 = vpop.f32.mrf.mxu1  ;;  %v15424_v24 = vadd.f32 %v7348_v11, %v7188_v17  ;;  %v7190_v37 = vadd.f32 %v7189_v31, %v15117_v40 }
 0x400   :  { %v7191_v2 = vpop.f32.mrf.mxu0 }
 0x401   :  { %v7352_v34 = vpop.f32.mrf.mxu1  ;;  %v15427_v20 = vadd.f32 %v7350_v61, %v7190_v37  ;;  %v7192_v50 = vadd.f32 %v7191_v2, %v15129_v5 }
 0x402   :  { %v7195_v55 = vpop.f32.mrf.mxu0 }
 0x403   :  { %v7356_v14 = vpop.f32.mrf.mxu1  ;;  %v15430_v15 = vadd.f32 %v7352_v34, %v7192_v50  ;;  %v7196_v28 = vadd.f32 %v7195_v55, %v15144_v0 }
 0x404   :  { %v7197_v62 = vpop.f32.mrf.mxu0 }
 0x405   :  { %v7358_v25 = vpop.f32.mrf.mxu1  ;;  %v15433_v63 = vadd.f32 %v7356_v14, %v7196_v28  ;;  %v7198_v11 = vadd.f32 %v7197_v62, %v15156_v56 }
 0x406   :  { %v7199_v17 = vpop.f32.mrf.mxu0 }
 0x407   :  { %v7360_v40 = vpop.f32.mrf.mxu1  ;;  %v15436_v31 = vadd.f32 %v7358_v25, %v7198_v11  ;;  %v7200_v61 = vadd.f32 %v7199_v17, %v15165_v45 }
 0x408   :  { %v7201_v37 = vpop.f32.mrf.mxu0 }
 0x409   :  { %v7362_v5 = vpop.f32.mrf.mxu1  ;;  %v15439_v2 = vadd.f32 %v7360_v40, %v7200_v61  ;;  %v7202_v34 = vadd.f32 %v7201_v37, %v15177_v30 }
 0x40a   :  { %v7205_v50 = vpop.f32.mrf.mxu0 }
 0x40b   :  { %v7366_v0 = vpop.f32.mrf.mxu1  ;;  %v15442_v55 = vadd.f32 %v7362_v5, %v7202_v34  ;;  %v7206_v14 = vadd.f32 %v7205_v50, %v15192_v51 }
 0x40c   :  { %v7207_v28 = vpop.f32.mrf.mxu0 }
 0x40d   :  { %v7368_v56 = vpop.f32.mrf.mxu1  ;;  %v15445_v62 = vadd.f32 %v7366_v0, %v7206_v14  ;;  %v7208_v25 = vadd.f32 %v7207_v28, %v15204_v29 }
 0x40e   :  { %v7209_v11 = vpop.f32.mrf.mxu0 }
 0x40f   :  { %v7370_v45 = vpop.f32.mrf.mxu1  ;;  %v15448_v17 = vadd.f32 %v7368_v56, %v7208_v25  ;;  %v7210_v40 = vadd.f32 %v7209_v11, %v15213_v38 }
 0x410   :  { %v7211_v61 = vpop.f32.mrf.mxu0 }
 0x411   :  { %v7372_v30 = vpop.f32.mrf.mxu1  ;;  %v15451_v37 = vadd.f32 %v7370_v45, %v7210_v40  ;;  %v7212_v5 = vadd.f32 %v7211_v61, %v15221_v13 }
 0x412   :  { %v7215_v34 = vpop.f32.mrf.mxu0 }
 0x413   :  { %v7376_v51 = vpop.f32.mrf.mxu1  ;;  %v15454_v50 = vadd.f32 %v7372_v30, %v7212_v5  ;;  %v7216_v0 = vadd.f32 %v7215_v34, %v15232_v32 }
 0x414   :  { %v7217_v14 = vpop.f32.mrf.mxu0 }
 0x415   :  { %v7378_v29 = vpop.f32.mrf.mxu1  ;;  %v15457_v28 = vadd.f32 %v7376_v51, %v7216_v0  ;;  %v7218_v56 = vadd.f32 %v7217_v14, %v15238_v47 }
 0x416   :  { %v7219_v25 = vpop.f32.mrf.mxu0 }
 0x417   :  { %v7380_v38 = vpop.f32.mrf.mxu1  ;;  %v15460_v11 = vadd.f32 %v7378_v29, %v7218_v56  ;;  %v7220_v45 = vadd.f32 %v7219_v25, %v15241_v21 }
 0x418   :  { %v7221_v40 = vpop.f32.mrf.mxu0 }
 0x419   :  { %v7382_v13 = vpop.f32.mrf.mxu1  ;;  %v15463_v61 = vadd.f32 %v7380_v38, %v7220_v45  ;;  %v7222_v30 = vadd.f32 %v7221_v40, %v15247_v8 }
 0x41a   :  { %v7225_v5 = vpop.f32.mrf.mxu0 }
 0x41b   :  { %v7386_v32 = vpop.f32.mrf.mxu1  ;;  %v15466_v34 = vadd.f32 %v7382_v13, %v7222_v30  ;;  %v7226_v51 = vadd.f32 %v7225_v5, %v15259_v7 }
 0x41c   :  { %v7227_v0 = vpop.f32.mrf.mxu0 }
 0x41d   :  { %v7388_v47 = vpop.f32.mrf.mxu1  ;;  %v15469_v14 = vadd.f32 %v7386_v32, %v7226_v51  ;;  %v7228_v29 = vadd.f32 %v7227_v0, %v15262_v41 }
 0x41e   :  { %v7229_v56 = vpop.f32.mrf.mxu0 }
 0x41f   :  { %16339 = vst [vmem:[#allocation41_spill] sm:$0xff] %v15469_v14  ;;  %v7390_v21 = vpop.f32.mrf.mxu1  ;;  %v15472_v25 = vadd.f32 %v7388_v47, %v7228_v29  ;;  %v7230_v38 = vadd.f32 %v7229_v56, %v15265_v23 }
 0x420   :  { %v7231_v45 = vpop.f32.mrf.mxu0 }
 0x421   :  { %16340 = vst [vmem:[#allocation42_spill] sm:$0xff] %v15472_v25  ;;  %v7392_v8 = vpop.f32.mrf.mxu1  ;;  %v15475_v40 = vadd.f32 %v7390_v21, %v7230_v38  ;;  %v7232_v13 = vadd.f32 %v7231_v45, %v15271_v39 }
 0x422   :  { %v7235_v30 = vpop.f32.mrf.mxu0 }
 0x423   :  { %16341 = vst [vmem:[#allocation39_spill] sm:$0xff] %v15475_v40  ;;  %v7396_v7 = vpop.f32.mrf.mxu1  ;;  %v15478_v5 = vadd.f32 %v7392_v8, %v7232_v13  ;;  %v7236_v32 = vadd.f32 %v7235_v30, %v15283_v59 }
 0x424   :  { %v7237_v51 = vpop.f32.mrf.mxu0 }
 0x425   :  { %16342 = vst [vmem:[#allocation40_spill] sm:$0xff] %v15478_v5  ;;  %v7398_v41 = vpop.f32.mrf.mxu1  ;;  %v15481_v0 = vadd.f32 %v7396_v7, %v7236_v32  ;;  %v7238_v47 = vadd.f32 %v7237_v51, %v15286_v53 }
 0x426   :  { %v7239_v29 = vpop.f32.mrf.mxu0 }
 0x427   :  { %16343 = vst [vmem:[#allocation37_spill] sm:$0xff] %v15481_v0  ;;  %v7400_v23 = vpop.f32.mrf.mxu1  ;;  %v15484_v56 = vadd.f32 %v7398_v41, %v7238_v47  ;;  %v7240_v21 = vadd.f32 %v7239_v29, %v15289_v44  ;;  %v16348_v29 = vld [vmem:[#allocation53_spill] sm:$0xff] }
 0x428   :  { %v7241_v38 = vpop.f32.mrf.mxu0 }
 0x429   :  { %16344 = vst [vmem:[#allocation38_spill] sm:$0xff] %v15484_v56  ;;  %v7402_v39 = vpop.f32.mrf.mxu1  ;;  %v15487_v45 = vadd.f32 %v7400_v23, %v7240_v21  ;;  %v7242_v8 = vadd.f32 %v7241_v38, %v15295_v58  ;;  %v6936_v23 = vadd.f32 %v15328_v60, %v16348_v29 }
 0x42a   :  { %v7245_v13 = vpop.f32.mrf.mxu0 }
 0x42b   :  { %16345 = vst [vmem:[#allocation35_spill] sm:$0xff] %v15487_v45  ;;  %v7406_v59 = vpop.f32.mrf.mxu1  ;;  %v15490_v30 = vadd.f32 %v7402_v39, %v7242_v8  ;;  %v7246_v7 = vadd.f32 %v7245_v13, %v15307_v9 }
 0x42c   :  { %v7247_v32 = vpop.f32.mrf.mxu0 }
 0x42d   :  { %16346 = vst [vmem:[#allocation36_spill] sm:$0xff] %v15490_v30  ;;  %v7408_v53 = vpop.f32.mrf.mxu1  ;;  %v15493_v51 = vadd.f32 %v7406_v59, %v7246_v7  ;;  %v7248_v41 = vadd.f32 %v7247_v32, %v15310_v10  ;;  %v7097_v7 = vadd.f32 %v15330_v42, %v6936_v23  ;;  %v16351_v10 = vld [vmem:[#allocation73_spill] sm:$0xff] }
 0x42e   :  { %v7249_v47 = vpop.f32.mrf.mxu0  ;;  %v6940_v32 = vadd.f32 %v15338_v12, %v16351_v10  ;;  %v15519_v12 = vld.sshfl [vmem:[%s16109_s4] sm:$0x33 pattern:$0x76325410] }
 0x42f   :  { %16347 = vst [vmem:[#allocation33_spill] sm:$0xff] %v15493_v51  ;;  %v7410_v44 = vpop.f32.mrf.mxu1  ;;  %v15498_v21 = vadd.f32 %v7408_v53, %v7248_v41  ;;  %v7250_v58 = vadd.f32 %v7249_v47, %v15313_v19  ;;  %16355 = vst [vmem:[#allocation30_spill] sm:$0xff] %v15519_v12 }
 0x430   :  { %v7251_v38 = vpop.f32.mrf.mxu0 }
 0x431   :  { %16349 = vst [vmem:[#allocation34_spill] sm:$0xff] %v15498_v21  ;;  %v7412_v39 = vpop.f32.mrf.mxu1  ;;  %v15501_v8 = vadd.f32 %v7410_v44, %v7250_v58  ;;  %v7252_v9 = vadd.f32 %v7251_v38, %v15319_v1  ;;  %v7101_v1 = vadd.f32 %v15340_v46, %v6940_v32  ;;  %v8108_v38 = vcombine.high %v15519_v12, %v15519_v12 }
 0x432   :  { %v7255_v13 = vpop.f32.mrf.mxu0 }
 0x433   :  { %16350 = vst [vmem:[#allocation10_spill] sm:$0xff] %v15501_v8  ;;  %v7416_v59 = vpop.f32.mrf.mxu1  ;;  %v15507_v40 = vadd.f32 %v7412_v39, %v7252_v9  ;;  %v7256_v60 = vadd.f32 %v7255_v13, %v15335_v35  ;;  %9378 = vmatprep.mubr.msk.f32.mxu0 %vm8110_vm0, %v8108_v38  ;;  %9379 = vmatprep.mubr.msk.f32.mxu1 %vm8110_vm0, %v8108_v38 }
 0x434   :  { %v7257_v53 = vpop.f32.mrf.mxu0  ;;  %8178 = vmatmul.mubr.f32.vlgmr.msra.gmra.mxu0 %v15519_v12 }
 0x435   :  { %16352 = vst [vmem:[#allocation31_spill] sm:$0xff] %v15507_v40  ;;  %v7418_v41 = vpop.f32.mrf.mxu1  ;;  %v15510_v19 = vadd.f32 %v7416_v59, %v7256_v60  ;;  %v7258_v47 = vadd.f32 %v7257_v53, %v7097_v7 }
 0x436   :  { %v7259_v44 = vpop.f32.mrf.mxu0 }
 0x437   :  { %16353 = vst [vmem:[#allocation32_spill] sm:$0xff] %v15510_v19  ;;  %v7420_v29 = vpop.f32.mrf.mxu1  ;;  %v15513_v58 = vadd.f32 %v7418_v41, %v7258_v47  ;;  %v7260_v42 = vadd.f32 %v7259_v44, %v15342_v22 }
 0x438   :  { %v7261_v23 = vpop.f32.mrf.mxu0 }
 0x439   :  { %16354 = vst [vmem:[#allocation29_spill] sm:$0xff] %v15513_v58  ;;  %v7422_v35 = vpop.f32.mrf.mxu1  ;;  %v15523_v39 = vadd.f32 %v7420_v29, %v7260_v42  ;;  %v7262_v9 = vadd.f32 %v7261_v23, %v7101_v1  ;;  %v8286_v1 = vld [vmem:[%s16110_s5 + $0xf8] sm:$0xff]  ;;  %v8285_v42 = vld [vmem:[%s16110_s5 + $0xf0] sm:$0xff] }
 0x43a   :  { %v7265_v13 = vpop.f32.mrf.mxu0  ;;  %9383 = vmatprep.subr.mxu0 %v8286_v1 }
 0x43b   :  { %16356 = vst [vmem:[#allocation27_spill] sm:$0xff] %v15523_v39  ;;  %v7426_v46 = vpop.f32.mrf.mxu1  ;;  %v15525_v59 = vadd.f32 %v7422_v35, %v7262_v9  ;;  %v7266_v22 = vadd.f32 %v7265_v13, %v15357_v49  ;;  %v8270_v49 = vld [vmem:[%s16110_s5 + $0x78] sm:$0xff]  ;;  %v8269_v35 = vld [vmem:[%s16110_s5 + $0x70] sm:$0xff]  ;;  %v8284_v9 = vld [vmem:[%s16110_s5 + $0xe8] sm:$0xff] }
 0x43c   :  { %v7267_v7 = vpop.f32.mrf.mxu0  ;;  %9384 = vmatpush3.msra.mxu0 %v8270_v49 }
 0x43d   :  { %16357 = vst [vmem:[#allocation28_spill] sm:$0xff] %v15525_v59  ;;  %v7428_v10 = vpop.f32.mrf.mxu1  ;;  %v15529_v32 = vadd.f32 %v7426_v46, %v7266_v22  ;;  %v7268_v60 = vadd.f32 %v7267_v7, %v15360_v6  ;;  %9385 = vmatprep.subr.mxu0 %v8285_v42  ;;  %v8268_v22 = vld [vmem:[%s16110_s5 + $0x68] sm:$0xff] }
 0x43e   :  { %v7269_v53 = vpop.f32.mrf.mxu0  ;;  %9386 = vmatpush3.msra.mxu0 %v8269_v35  ;;  %v16364_v35 = vld [vmem:[#allocation45_spill] sm:$0xff] }
 0x43f   :  { %16358 = vst [vmem:[#allocation25_spill] sm:$0xff] %v15529_v32  ;;  %v7430_v41 = vpop.f32.mrf.mxu1  ;;  %v15532_v47 = vadd.f32 %v7428_v10, %v7268_v60  ;;  %9387 = vmatprep.subr.mxu0 %v8284_v9  ;;  %v8281_v9 = vld [vmem:[%s16110_s5 + $0xd0] sm:$0xff] }
 0x440   :  { %v7270_v44 = vpop.f32.mrf.mxu0  ;;  %v8267_v41 = vld [vmem:[%s16110_s5 + $0x60] sm:$0xff]  ;;  %9388 = vmatpush3.msra.mxu0 %v8268_v22 }
 0x441   :  { %16359 = vst [vmem:[#allocation26_spill] sm:$0xff] %v15532_v47  ;;  %v7431_v29 = vpop.f32.mrf.mxu1 }
 0x442   :  { %v7467_v23 = vpop.f32.mrf.mxu0  ;;  %v16362_v29 = vld [vmem:[#allocation46_spill] sm:$0xff] }
 0x443   :  { %v7628_v6 = vpop.f32.mrf.mxu1  ;;  %v7468_v38 = vadd.f32 %v7467_v23, %v15371_v4  ;;  %v8283_v4 = vld [vmem:[%s16110_s5 + $0xe0] sm:$0xff]  ;;  %v8266_v23 = vld [vmem:[%s16110_s5 + $0x58] sm:$0xff] }
 0x444   :  { %v7469_v13 = vpop.f32.mrf.mxu0  ;;  %9389 = vmatprep.subr.mxu0 %v8283_v4 }
 0x445   :  { %v7630_v46 = vpop.f32.mrf.mxu1  ;;  %v15553_v7 = vadd.f32 %v7628_v6, %v7468_v38  ;;  %v7470_v10 = vadd.f32 %v7469_v13, %v15374_v16  ;;  %v8282_v16 = vld [vmem:[%s16110_s5 + $0xd8] sm:$0xff]  ;;  %9390 = vmatpush3.msra.mxu0 %v8267_v41  ;;  %v8264_v41 = vld [vmem:[%s16110_s5 + $0x48] sm:$0xff] }
 0x446   :  { %v7471_v60 = vpop.f32.mrf.mxu0  ;;  %9391 = vmatprep.subr.mxu0 %v8282_v16 }
 0x447   :  { %16360 = vst [vmem:[#allocation8_spill] sm:$0xff] %v15553_v7  ;;  %v7632_v53 = vpop.f32.mrf.mxu1  ;;  %v15562_v44 = vadd.f32 %v7630_v46, %v7470_v10  ;;  %v7472_v1 = vadd.f32 %v7471_v60, %v16362_v29  ;;  %v8265_v46 = vld [vmem:[%s16110_s5 + $0x50] sm:$0xff]  ;;  %9392 = vmatpush3.msra.mxu0 %v8266_v23  ;;  %v8280_v60 = vld [vmem:[%s16110_s5 + $0xc8] sm:$0xff]  ;;  %v8263_v23 = vld [vmem:[%s16110_s5 + $0x40] sm:$0xff] }
 0x448   :  { %v7473_v49 = vpop.f32.mrf.mxu0  ;;  %9393 = vmatprep.subr.mxu0 %v8281_v9 }
 0x449   :  { %16361 = vst [vmem:[#allocation11_spill] sm:$0xff] %v15562_v44  ;;  %v7634_v42 = vpop.f32.mrf.mxu1  ;;  %v15571_v6 = vadd.f32 %v7632_v53, %v7472_v1  ;;  %v7474_v38 = vadd.f32 %v7473_v49, %v16364_v35  ;;  %v16367_v1 = vld [vmem:[#allocation44_spill] sm:$0xff]  ;;  %9394 = vmatpush3.msra.mxu0 %v8265_v46 }
 0x44a   :  { %v7477_v13 = vpop.f32.mrf.mxu0  ;;  %9395 = vmatprep.subr.mxu0 %v8280_v60 }
 0x44b   :  { %16363 = vst [vmem:[#allocation6_spill] sm:$0xff] %v15571_v6  ;;  %v15580_v22 = vadd.f32 %v7634_v42, %v7474_v38  ;;  %v7478_v10 = vadd.f32 %v7477_v13, %v15385_v26  ;;  %v7638_v4 = vpop.f32.mrf.mxu1  ;;  %v8279_v26 = vld [vmem:[%s16110_s5 + $0xc0] sm:$0xff]  ;;  %9396 = vmatpush3.msra.mxu0 %v8264_v41  ;;  %v8278_v13 = vld [vmem:[%s16110_s5 + $0xb8] sm:$0xff]  ;;  %v8256_v6 = vld [vmem:[%s16110_s5 + $0x8] sm:$0xff] }
 0x44c   :  { %v7479_v53 = vpop.f32.mrf.mxu0  ;;  %9397 = vmatprep.subr.mxu0 %v8279_v26 }
 0x44d   :  { %16365 = vst [vmem:[#allocation9_spill] sm:$0xff] %v15580_v22  ;;  %v15589_v29 = vadd.f32 %v7638_v4, %v7478_v10  ;;  %v7480_v16 = vadd.f32 %v7479_v53, %v16367_v1  ;;  %v7640_v49 = vpop.f32.mrf.mxu1  ;;  %v8262_v10 = vld [vmem:[%s16110_s5 + $0x38] sm:$0xff]  ;;  %9398 = vmatpush3.msra.mxu0 %v8263_v23  ;;  %v8261_v1 = vld [vmem:[%s16110_s5 + $0x30] sm:$0xff]  ;;  %v8260_v23 = vld [vmem:[%s16110_s5 + $0x28] sm:$0xff] }
 0x44e   :  { %v7481_v42 = vpop.f32.mrf.mxu0  ;;  %9399 = vmatprep.subr.mxu0 %v8278_v13 }
 0x44f   :  { %16366 = vst [vmem:[#allocation21_spill] sm:$0xff] %v15589_v29  ;;  %v15598_v35 = vadd.f32 %v7640_v49, %v7480_v16  ;;  %v7482_v38 = vadd.f32 %v7481_v42, %v15391_v18  ;;  %v7642_v9 = vpop.f32.mrf.mxu1  ;;  %v8277_v18 = vld [vmem:[%s16110_s5 + $0xb0] sm:$0xff]  ;;  %9400 = vmatpush3.msra.mxu0 %v8262_v10  ;;  %v8259_v10 = vld [vmem:[%s16110_s5 + $0x20] sm:$0xff] }
 0x450   :  { %v7483_v46 = vpop.f32.mrf.mxu0  ;;  %9401 = vmatprep.subr.mxu0 %v8277_v18 }
 0x451   :  { %16368 = vst [vmem:[#allocation22_spill] sm:$0xff] %v15598_v35  ;;  %v15607_v4 = vadd.f32 %v7642_v9, %v7482_v38  ;;  %v7484_v60 = vadd.f32 %v7483_v46, %v15394_v43  ;;  %v7644_v53 = vpop.f32.mrf.mxu1  ;;  %v8276_v43 = vld [vmem:[%s16110_s5 + $0xa8] sm:$0xff]  ;;  %9402 = vmatpush3.msra.mxu0 %v8261_v1  ;;  %v8258_v1 = vld [vmem:[%s16110_s5 + $0x18] sm:$0xff] }
 0x452   :  { %v7487_v41 = vpop.f32.mrf.mxu0  ;;  %9403 = vmatprep.subr.mxu0 %v8276_v43 }
 0x453   :  { %16369 = vst [vmem:[#allocation68_spill] sm:$0xff] %v15607_v4  ;;  %v15616_v16 = vadd.f32 %v7644_v53, %v7484_v60  ;;  %v7488_v49 = vadd.f32 %v7487_v41, %v15397_v54  ;;  %v7648_v26 = vpop.f32.mrf.mxu1  ;;  %v8275_v54 = vld [vmem:[%s16110_s5 + $0xa0] sm:$0xff]  ;;  %9404 = vmatpush3.msra.mxu0 %v8260_v23  ;;  %v16383_v4 = vld [vmem:[#allocation15_spill] sm:$0xff] }
 0x454   :  { %v7489_v42 = vpop.f32.mrf.mxu0  ;;  %9405 = vmatprep.subr.mxu0 %v8275_v54 }
 0x455   :  { %16370 = vst [vmem:[#allocation66_spill] sm:$0xff] %v15616_v16  ;;  %v15625_v38 = vadd.f32 %v7648_v26, %v7488_v49  ;;  %v7490_v9 = vadd.f32 %v7489_v42, %v15400_v33  ;;  %v7650_v13 = vpop.f32.mrf.mxu1  ;;  %v8274_v33 = vld [vmem:[%s16110_s5 + $0x98] sm:$0xff]  ;;  %9406 = vmatpush3.msra.mxu0 %v8259_v10  ;;  %v8257_v42 = vld [vmem:[%s16110_s5 + $0x10] sm:$0xff]  ;;  %v7767_v16 = vsub.s32 2, %v16383_v4 }
 0x456   :  { %v7491_v46 = vpop.f32.mrf.mxu0  ;;  %9407 = vmatprep.subr.mxu0 %v8274_v33 }
 0x457   :  { %16371 = vst [vmem:[#allocation64_spill] sm:$0xff] %v15625_v38  ;;  %v15634_v60 = vadd.f32 %v7650_v13, %v7490_v9  ;;  %v7492_v53 = vadd.f32 %v7491_v46, %v15403_v57  ;;  %v7652_v18 = vpop.f32.mrf.mxu1  ;;  %v8273_v57 = vld [vmem:[%s16110_s5 + $0x90] sm:$0xff]  ;;  %9408 = vmatpush3.msra.mxu0 %v8258_v1  ;;  %v7771_v38 = vsub.s32 3, %v16383_v4  ;;  %v10894_v4 = vld [vmem:[%s16107_s2] sm:$0xf]  ;;  %s10920_s2 = smov [#allocation2]  }
 0x458   :  { %v15640_v41 = vpop.f32.mrf.mxu0  ;;  %9409 = vmatprep.subr.mxu0 %v8273_v57 }
 0x459   :  { %16372 = vst [vmem:[#allocation63_spill] sm:$0xff] %v15634_v60  ;;  %v15645_v49 = vadd.f32 %v7652_v18, %v7492_v53  ;;  %v15647_v26 = vpop.f32.mrf.mxu1  ;;  %9410 = vmatpush3.msra.mxu0 %v8257_v42  ;;  %v8272_v60 = vld [vmem:[%s16110_s5 + $0x88] sm:$0xff] }
 0x45a   :  { %16374 = vst [vmem:[#allocation62_spill] sm:$0xff] %v15647_v26  ;;  %v7497_v43 = vpop.f32.mrf.mxu0  ;;  %9411 = vmatprep.subr.mxu0 %v8272_v60 }
 0x45b   :  { %16373 = vst [vmem:[#allocation61_spill] sm:$0xff] %v15645_v49  ;;  %v15655_v23 = vpop.f32.mrf.mxu1  ;;  %9412 = vmatpush3.msra.mxu0 %v8256_v6 }
 0x45c   :  { %16375 = vst [vmem:[#allocation60_spill] sm:$0xff] %v15655_v23  ;;  %v15657_v9 = vpop.f32.mrf.mxu0  ;;  %v15706_v23 = vrot.slane %v10894_v4, %v7767_v16 }
 0x45d   :  { %v15659_v13 = vpop.f32.mrf.mxu1 }
 0x45e   :  { %16376 = vst [vmem:[#allocation59_spill] sm:$0xff] %v15659_v13  ;;  %v7501_v54 = vpop.f32.mrf.mxu0  ;;  %v10895_v13 = vld [vmem:[%s16108_s3] sm:$0xf]  ;;  %s8559_s3 = sshll.u32 %s10920_s2, 4  ;;  %s8560_s3 = int_to_ptr.vmem [resolvable:$true] %s8559_s3 }
 0x45f   :  { %v15661_v46 = vpop.f32.mrf.mxu1  ;;  %p10901_p1 = scmp.lt.s32.totalorder %s8560_s3, %s8560_s3 }
 0x460   :  { %16377 = vst [vmem:[#allocation57_spill] sm:$0xff] %v15661_v46  ;;  %v15663_v10 = vpop.f32.mrf.mxu0  ;;  %v15711_v46 = vrot.slane %v10895_v13, %v7767_v16 }
 0x461   :  { %v15665_v53 = vpop.f32.mrf.mxu1 }
 0x462   :  { %16378 = vst [vmem:[#allocation58_spill] sm:$0xff] %v15665_v53  ;;  %v15667_v18 = vpop.f32.mrf.mxu0 }
 0x463   :  { %v15669_v33 = vpop.f32.mrf.mxu1 }
 0x464   :  { %16379 = vst [vmem:[#allocation55_spill] sm:$0xff] %v15669_v33  ;;  %v15671_v12 = vpop.f32.mrf.mxu0  ;;  %v15722_v33 = vadd.f32 %v15640_v41, %v15406_v27  ;;  %v15735_v27 = vadd.f32 %v7501_v54, %v15415_v36 }
 0x465   :  { %v15673_v1 = vpop.f32.mrf.mxu1 }
 0x466   :  { %16380 = vst [vmem:[#allocation56_spill] sm:$0xff] %v15673_v1  ;;  %v15675_v0 = vpop.f32.mrf.mxu0  ;;  %v16384_v1 = vld [vmem:[#allocation43_spill] sm:$0xff] }
 0x467   :  { %v15677_v57 = vpop.f32.mrf.mxu1 }
 0x468   :  { %16381 = vst [vmem:[#allocation20_spill] sm:$0xff] %v15677_v57  ;;  %v15679_v42 = vpop.f32.mrf.mxu0  ;;  %v15725_v57 = vadd.f32 %v7497_v43, %v16384_v1 }
 0x469   :  { %v15681_v56 = vpop.f32.mrf.mxu1 }
 0x46a   :  { %16382 = vst [vmem:[#allocation54_spill] sm:$0xff] %v15681_v56  ;;  %v15683_v45 = vpop.f32.mrf.mxu0 }
 0x46b   :  { %v15685_v5 = vpop.f32.mrf.mxu1 }
 0x46c   :  { %v7519_v51 = vpop.f32.mrf.mxu0 }
 0x46d   :  { %v15687_v30 = vpop.f32.mrf.mxu1 }
 0x46e   :  { %v7521_v25 = vpop.f32.mrf.mxu0 }
 0x46f   :  { %v15689_v47 = vpop.f32.mrf.mxu1 }
 0x470   :  { %v7523_v21 = vpop.f32.mrf.mxu0 }
 0x471   :  { %v15691_v8 = vpop.f32.mrf.mxu1  ;;  %v7524_v41 = vadd.f32 %v7523_v21, %v15442_v55  ;;  %v7518_v21 = vadd.f32 %v15683_v45, %v15433_v63  ;;  %v7512_v63 = vadd.f32 %v15675_v0, %v15427_v20  ;;  %v7508_v20 = vadd.f32 %v15667_v18, %v15421_v48 }
 0x472   :  { %v7527_v14 = vpop.f32.mrf.mxu0 }
 0x473   :  { %v7688_v32 = vpop.f32.mrf.mxu1  ;;  %v7679_v0 = vadd.f32 %v15685_v5, %v7518_v21 }
 0x474   :  { %v7529_v40 = vpop.f32.mrf.mxu0 }
 0x475   :  { %v7690_v19 = vpop.f32.mrf.mxu1  ;;  %v7530_v16 = vadd.f32 %v7529_v40, %v15448_v17  ;;  %v7522_v40 = vadd.f32 %v7521_v25, %v15439_v2 }
 0x476   :  { %v7531_v59 = vpop.f32.mrf.mxu0 }
 0x477   :  { %v7692_v58 = vpop.f32.mrf.mxu1  ;;  %v7691_v36 = vadd.f32 %v7690_v19, %v7530_v16 }
 0x478   :  { %v7533_v39 = vpop.f32.mrf.mxu0 }
 0x479   :  { %v7694_v35 = vpop.f32.mrf.mxu1  ;;  %v7534_v60 = vadd.f32 %v7533_v39, %v15454_v50 }
 0x47a   :  { %v7537_v29 = vpop.f32.mrf.mxu0 }
 0x47b   :  { %v7698_v22 = vpop.f32.mrf.mxu1  ;;  %v7538_v44 = vadd.f32 %v7537_v29, %v15457_v28  ;;  %v15714_v28 = vrot.slane %v10894_v4, %v7771_v38  ;;  %v7528_v4 = vadd.f32 %v7527_v14, %v15445_v62  ;;  %v7695_v43 = vadd.f32 %v7694_v35, %v7534_v60 }
 0x47c   :  { %v7539_v49 = vpop.f32.mrf.mxu0 }
 0x47d   :  { %v7540_v7 = vadd.f32 %v7539_v49, %v15460_v11  ;;  %v7700_v26 = vpop.f32.mrf.mxu1  ;;  %v7532_v11 = vadd.f32 %v7531_v59, %v15451_v37  ;;  %v15718_v49 = vrot.slane %v10895_v13, %v7771_v38  ;;  %v7699_v56 = vadd.f32 %v7698_v22, %v7538_v44 }
 0x47e   :  { %v7541_v53 = vpop.f32.mrf.mxu0  ;;  %v15732_v38 = vadd.f32 %v15657_v9, %v15412_v52  ;;  %v7504_v52 = vadd.f32 %v15663_v10, %v15418_v3  ;;  %v7520_v44 = vadd.f32 %v7519_v51, %v15436_v31  ;;  %v7689_v2 = vadd.f32 %v7688_v32, %v7528_v4 }
 0x47f   :  { %v7542_v6 = vadd.f32 %v7541_v53, %v15463_v61  ;;  %v7702_v29 = vpop.f32.mrf.mxu1  ;;  %v7701_v50 = vadd.f32 %v7700_v26, %v7540_v7  ;;  %v7693_v62 = vadd.f32 %v7692_v58, %v7532_v11  ;;  %v7835_v25 = vmul.f32 %v15706_v23, %v7699_v56 }
 0x480   :  { %v7543_v39 = vpop.f32.mrf.mxu0  ;;  %v7510_v3 = vadd.f32 %v15671_v12, %v15424_v24  ;;  %v7514_v31 = vadd.f32 %v15679_v42, %v15430_v15  ;;  %v7685_v51 = vadd.f32 %v15691_v8, %v7524_v41  ;;  %v7832_v19 = vmul.f32 %v15714_v28, %v7695_v43  ;;  %v16388_v41 = vld [vmem:[#allocation55_spill] sm:$0xff] }
 0x481   :  { %v7703_v37 = vadd.f32 %v7702_v29, %v7542_v6  ;;  %v7544_v61 = vadd.f32 %v7543_v39, %v15466_v34  ;;  %v7704_v59 = vpop.f32.mrf.mxu1  ;;  %v7836_v22 = vmul.f32 %v15714_v28, %v7701_v50  ;;  %v7683_v56 = vadd.f32 %v15689_v47, %v7522_v40  ;;  %v16386_v6 = vld [vmem:[#allocation20_spill] sm:$0xff] }
 0x482   :  { %v15738_v17 = vpop.f32.mrf.mxu0  ;;  %v7831_v45 = vmul.f32 %v15706_v23, %v7693_v62  ;;  %v7681_v24 = vadd.f32 %v15687_v30, %v7520_v44  ;;  %v7828_v15 = vmul.f32 %v15714_v28, %v7691_v36  ;;  %v7827_v47 = vmul.f32 %v15706_v23, %v7689_v2  ;;  %v16385_v30 = vld [vmem:[#allocation54_spill] sm:$0xff]  ;;  %v16387_v50 = vld [vmem:[#allocation56_spill] sm:$0xff] }
 0x483   :  { %v7839_v14 = vmul.f32 %v15706_v23, %v7703_v37  ;;  %v7705_v7 = vadd.f32 %v7704_v59, %v7544_v61  ;;  %v15742_v34 = vpop.f32.mrf.mxu1  ;;  %v7958_v13 = vadd.f32 %v15718_v49, %v7836_v22  ;;  %v7957_v54 = vadd.f32 %v15711_v46, %v7835_v25  ;;  %v16389_v44 = vld [vmem:[#allocation58_spill] sm:$0xff] }
 0x484   :  { %v15748_v55 = vpop.f32.mrf.mxu0  ;;  %v7675_v53 = vadd.f32 %v16385_v30, %v7514_v31  ;;  %v7824_v1 = vmul.f32 %v15714_v28, %v7685_v51  ;;  %v7954_v11 = vadd.f32 %v15718_v49, %v7832_v19  ;;  %v7673_v29 = vadd.f32 %v16386_v6, %v7512_v63 }
 0x485   :  { %v7840_v58 = vmul.f32 %v15714_v28, %v7705_v7  ;;  %v15754_v35 = vpop.f32.mrf.mxu1  ;;  %v7961_v32 = vadd.f32 %v15711_v46, %v7839_v14  ;;  %v7823_v48 = vmul.f32 %v15706_v23, %v7683_v56  ;;  %v7953_v5 = vadd.f32 %v15711_v46, %v7831_v45 }
 0x486   :  { %v15762_v26 = vpop.f32.mrf.mxu0  ;;  %v7671_v39 = vadd.f32 %v16387_v50, %v7510_v3  ;;  %v7820_v4 = vmul.f32 %v15714_v28, %v7681_v24  ;;  %v8058_v61 = vmax.f32 %v7958_v13, 0.0  ;;  %v7950_v59 = vadd.f32 %v15718_v49, %v7828_v15 }
 0x487   :  { %v15769_v9 = vpop.f32.mrf.mxu1  ;;  %v7962_v12 = vadd.f32 %v15718_v49, %v7840_v58  ;;  %v8061_v18 = vmax.f32 %v7961_v32, 0.0  ;;  %v7669_v43 = vadd.f32 %v16388_v41, %v7508_v20  ;;  %v7819_v40 = vmul.f32 %v15706_v23, %v7679_v0  ;;  %v16390_v58 = vld [vmem:[#allocation57_spill] sm:$0xff] }
 0x488   :  { %v15773_v8 = vpop.f32.mrf.mxu0  ;;  %v7949_v62 = vadd.f32 %v15711_v46, %v7827_v47  ;;  %v8057_v14 = vmax.f32 %v7957_v54, 0.0  ;;  %v7665_v36 = vadd.f32 %v16389_v44, %v7504_v52  ;;  %v7816_v22 = vmul.f32 %v15714_v28, %v7675_v53  ;;  %v16391_v52 = vld [vmem:[#allocation59_spill] sm:$0xff] }
 0x489   :  { %v15782_v10 = vpop.f32.mrf.mxu1  ;;  %v8062_v60 = vmax.f32 %v7962_v12, 0.0  ;;  %v8054_v2 = vmax.f32 %v7954_v11, 0.0  ;;  %v7946_v25 = vadd.f32 %v15718_v49, %v7824_v1  ;;  %v7663_v3 = vadd.f32 %v16390_v58, %v15735_v27  ;;  %v16392_v27 = vld [vmem:[#allocation60_spill] sm:$0xff]  ;;  %v16395_v44 = vld [vmem:[#allocation11_spill] sm:$0xff] }
 0x48a   :  { %v15786_v42 = vpop.f32.mrf.mxu0  ;;  %v7815_v31 = vmul.f32 %v15706_v23, %v7673_v29  ;;  %v7945_v51 = vadd.f32 %v15711_v46, %v7823_v48  ;;  %v8053_v19 = vmax.f32 %v7953_v5, 0.0  ;;  %v7661_v56 = vadd.f32 %v16391_v52, %v15732_v38  ;;  %v16393_v38 = vld [vmem:[#allocation62_spill] sm:$0xff] }
 0x48b   :  { %v15792_v16 = vpop.f32.mrf.mxu1  ;;  %8184 = vmatprep.subr.mxu1 %v8062_v60  ;;  %v7812_v45 = vmul.f32 %v15714_v28, %v7671_v39  ;;  %v8050_v24 = vmax.f32 %v7950_v59, 0.0  ;;  %v7942_v15 = vadd.f32 %v15718_v49, %v7820_v4  ;;  %v7659_v12 = vadd.f32 %v16392_v27, %v15725_v57  ;;  %v16394_v59 = vld [vmem:[#allocation8_spill] sm:$0xff] }
 0x48c   :  { %v15796_v37 = vpop.f32.mrf.mxu0  ;;  %8185 = vmatpush1.msra.mxu1 %v8061_v18  ;;  %v7811_v13 = vmul.f32 %v15706_v23, %v7669_v43  ;;  %v7941_v20 = vadd.f32 %v15711_v46, %v7819_v40  ;;  %v8049_v0 = vmax.f32 %v7949_v62, 0.0  ;;  %v7655_v54 = vadd.f32 %v16393_v38, %v15722_v33 }
 0x48d   :  { %v15802_v7 = vpop.f32.mrf.mxu1  ;;  %8186 = vmatprep.subr.mxu1 %v8058_v61  ;;  %v7808_v30 = vmul.f32 %v15714_v28, %v7665_v36  ;;  %v8046_v1 = vmax.f32 %v7946_v25, 0.0  ;;  %v7938_v60 = vadd.f32 %v15718_v49, %v7816_v22  ;;  %v7807_v57 = vmul.f32 %v15706_v23, %v7663_v3  ;;  %v16396_v22 = vld [vmem:[#allocation61_spill] sm:$0xff] }
 0x48e   :  { %v15806_v21 = vpop.f32.mrf.mxu0  ;;  %8187 = vmatpush1.msra.mxu1 %v8057_v14  ;;  %v7937_v11 = vadd.f32 %v15711_v46, %v7815_v31  ;;  %v8045_v6 = vmax.f32 %v7945_v51, 0.0  ;;  %v7804_v48 = vmul.f32 %v15714_v28, %v7661_v56  ;;  %v8042_v5 = vmax.f32 %v7942_v15, 0.0  ;;  %v16397_v31 = vld [vmem:[#allocation6_spill] sm:$0xff]  ;;  %v16399_v15 = vld [vmem:[#allocation9_spill] sm:$0xff] }
 0x48f   :  { %v15813_v63 = vpop.f32.mrf.mxu1  ;;  %8188 = vmatprep.subr.mxu1 %v8054_v2  ;;  %v7934_v18 = vadd.f32 %v15718_v49, %v7812_v45  ;;  %v7803_v50 = vmul.f32 %v15706_v23, %v7659_v12  ;;  %v7933_v39 = vadd.f32 %v15711_v46, %v7811_v13  ;;  %v8041_v4 = vmax.f32 %v7941_v20, 0.0  ;;  %v16400_v12 = vld [vmem:[#allocation64_spill] sm:$0xff] }
 0x490   :  { %v15818_v32 = vpop.f32.mrf.mxu0  ;;  %8189 = vmatpush1.msra.mxu1 %v8053_v19  ;;  %v7779_v41 = vmul.f32 %v15706_v23, %v16394_v59  ;;  %v7800_v43 = vmul.f32 %v15714_v28, %v7655_v54  ;;  %v8038_v62 = vmax.f32 %v7938_v60, 0.0  ;;  %v7930_v14 = vadd.f32 %v15718_v49, %v7808_v30  ;;  %v16398_v19 = vld [vmem:[#allocation63_spill] sm:$0xff]  ;;  %v16401_v54 = vld [vmem:[#allocation21_spill] sm:$0xff]  ;;  %v16404_v59 = vld [vmem:[#allocation22_spill] sm:$0xff] }
 0x491   :  { %v15825_v47 = vpop.f32.mrf.mxu1  ;;  %8190 = vmatprep.subr.mxu1 %v8050_v24  ;;  %v7780_v36 = vmul.f32 %v15714_v28, %v16395_v44  ;;  %v7799_v2 = vmul.f32 %v15706_v23, %v16396_v22  ;;  %v7929_v25 = vadd.f32 %v15711_v46, %v7807_v57  ;;  %v8037_v58 = vmax.f32 %v7937_v11, 0.0 }
 0x492   :  { %v15830_v53 = vpop.f32.mrf.mxu0  ;;  %8191 = vmatpush1.msra.mxu1 %v8049_v0  ;;  %v7783_v51 = vmul.f32 %v15706_v23, %v16397_v31  ;;  %v7796_v52 = vmul.f32 %v15714_v28, %v16398_v19  ;;  %v8034_v45 = vmax.f32 %v7934_v18, 0.0  ;;  %v7926_v24 = vadd.f32 %v15718_v49, %v7804_v48 }
 0x493   :  { %v15835_v29 = vpop.f32.mrf.mxu1  ;;  %8192 = vmatprep.subr.mxu1 %v8046_v1  ;;  %v7784_v27 = vmul.f32 %v15714_v28, %v16399_v15  ;;  %v7795_v13 = vmul.f32 %v15706_v23, %v16400_v12  ;;  %v7925_v20 = vadd.f32 %v15711_v46, %v7803_v50  ;;  %v8033_v0 = vmax.f32 %v7933_v39, 0.0  ;;  %v16402_v1 = vld [vmem:[#allocation66_spill] sm:$0xff] }
 0x494   :  { %v15838_v33 = vpop.f32.mrf.mxu0  ;;  %8193 = vmatpush1.msra.mxu1 %v8045_v6  ;;  %v7787_v30 = vmul.f32 %v15706_v23, %v16401_v54  ;;  %v7792_v60 = vmul.f32 %v15714_v28, %v16402_v1  ;;  %v8030_v11 = vmax.f32 %v7930_v14, 0.0  ;;  %v7922_v6 = vadd.f32 %v15718_v49, %v7800_v43 }
 0x495   :  { %v15843_v61 = vpop.f32.mrf.mxu1  ;;  %8194 = vmatprep.subr.mxu1 %v8042_v5  ;;  %v15876_v48 = vadd.f32 %v15711_v46, %v7779_v41  ;;  %v16403_v5 = vld [vmem:[#allocation68_spill] sm:$0xff]  ;;  %v7921_v50 = vadd.f32 %v15711_v46, %v7799_v2  ;;  %v8029_v39 = vmax.f32 %v7929_v25, 0.0  ;;  %v8026_v22 = vmax.f32 %v7926_v24, 0.0 }
 0x496   :  { %v15848_v40 = vpop.f32.mrf.mxu0  ;;  %8195 = vmatpush1.msra.mxu1 %v8041_v4  ;;  %v7791_v18 = vmul.f32 %v15706_v23, %v16403_v5  ;;  %v7918_v14 = vadd.f32 %v15718_v49, %v7796_v52  ;;  %v15885_v43 = vadd.f32 %v15718_v49, %v7780_v36  ;;  %v15888_v41 = vadd.f32 %v15711_v46, %v7783_v51  ;;  %v16407_v5 = vld [vmem:[#allocation28_spill] sm:$0xff] }
 0x497   :  { %v15856_v3 = vpop.f32.mrf.mxu1  ;;  %8196 = vmatprep.subr.mxu1 %v8038_v62  ;;  %v7788_v62 = vmul.f32 %v15714_v28, %v16404_v59  ;;  %v8025_v2 = vmax.f32 %v7925_v20, 0.0  ;;  %v7909_v31 = vadd.f32 %v15711_v46, %v7787_v30  ;;  %v7914_v24 = vadd.f32 %v15718_v49, %v7792_v60  ;;  %v16408_v59 = vld [vmem:[#allocation32_spill] sm:$0xff] }
 0x498   :  { %v7573_v56 = vpop.f32.mrf.mxu0  ;;  %8197 = vmatpush1.msra.mxu1 %v8037_v58  ;;  %v7917_v58 = vadd.f32 %v15711_v46, %v7795_v13  ;;  %v7906_v52 = vadd.f32 %v15718_v49, %v7784_v27  ;;  %v7913_v15 = vadd.f32 %v15711_v46, %v7791_v18  ;;  %v8021_v51 = vmax.f32 %v7921_v50, 0.0  ;;  %v16405_v13 = vld [vmem:[#allocation27_spill] sm:$0xff]  ;;  %v16406_v27 = vld [vmem:[#allocation29_spill] sm:$0xff] }
 0x499   :  { %v15868_v38 = vpop.f32.mrf.mxu1  ;;  %8198 = vmatprep.subr.mxu1 %v8034_v45  ;;  %v8022_v45 = vmax.f32 %v7922_v6, 0.0  ;;  %v8018_v54 = vmax.f32 %v7918_v14, 0.0  ;;  %v7910_v30 = vadd.f32 %v15718_v49, %v7788_v62  ;;  %v8002_v1 = vmax.f32 %v15885_v43, 0.0  ;;  %v16409_v62 = vld [vmem:[#allocation31_spill] sm:$0xff]  ;;  %v16410_v43 = vld [vmem:[#allocation25_spill] sm:$0xff] }
 0x49a   :  { %v7577_v57 = vpop.f32.mrf.mxu0  ;;  %8199 = vmatpush1.msra.mxu1 %v8033_v0  ;;  %v8005_v60 = vmax.f32 %v15888_v41, 0.0  ;;  %v8009_v50 = vmax.f32 %v7909_v31, 0.0  ;;  %v8006_v14 = vmax.f32 %v7906_v52, 0.0  ;;  %v16413_v52 = vld [vmem:[#allocation34_spill] sm:$0xff] }
 0x49b   :  { %v7738_v4 = vpop.f32.mrf.mxu1  ;;  %8200 = vmatprep.subr.mxu1 %v8030_v11  ;;  %v8017_v11 = vmax.f32 %v7917_v58, 0.0 }
 0x49c   :  { %v7579_v44 = vpop.f32.mrf.mxu0  ;;  %8201 = vmatpush1.msra.mxu1 %v8029_v39 }
 0x49d   :  { %v7740_v25 = vpop.f32.mrf.mxu1  ;;  %8202 = vmatprep.subr.mxu1 %v8026_v22  ;;  %v7580_v6 = vadd.f32 %v7579_v44, %v16406_v27  ;;  %v7578_v22 = vadd.f32 %v7577_v57, %v16408_v59  ;;  %v16411_v44 = vld [vmem:[#allocation41_spill] sm:$0xff]  ;;  %v16414_v27 = vld [vmem:[#allocation26_spill] sm:$0xff]  ;;  %v16416_v59 = vld [vmem:[#allocation36_spill] sm:$0xff] }
 0x49e   :  { %v7581_v19 = vpop.f32.mrf.mxu0  ;;  %8203 = vmatpush1.msra.mxu1 %v8025_v2 }
 0x49f   :  { %v7742_v12 = vpop.f32.mrf.mxu1  ;;  %v7582_v20 = vadd.f32 %v7581_v19, %v16405_v13  ;;  %8204 = vmatprep.subr.mxu1 %v8022_v45  ;;  %v8014_v19 = vmax.f32 %v7914_v24, 0.0  ;;  %v8013_v45 = vmax.f32 %v7913_v15, 0.0  ;;  %v7574_v13 = vadd.f32 %v7573_v56, %v16409_v62  ;;  %v16419_v62 = vld [vmem:[#allocation35_spill] sm:$0xff] }
 0x4a0   :  { %v7583_v0 = vpop.f32.mrf.mxu0  ;;  %8205 = vmatpush1.msra.mxu1 %v8021_v51  ;;  %v16412_v51 = vld [vmem:[#allocation10_spill] sm:$0xff]  ;;  %v8010_v24 = vmax.f32 %v7910_v30, 0.0  ;;  %v7570_v15 = vadd.f32 %v15838_v33, %v16413_v52  ;;  %v7741_v56 = vadd.f32 %v7740_v25, %v7580_v6 }
 0x4a1   :  { %v7584_v39 = vadd.f32 %v7583_v0, %v16407_v5  ;;  %v7744_v18 = vpop.f32.mrf.mxu1  ;;  %8206 = vmatprep.subr.mxu1 %v8018_v54  ;;  %v15907_v0 = vadd.f32 %v15738_v17, %v16411_v44  ;;  %v7572_v31 = vadd.f32 %v15848_v40, %v16412_v51  ;;  %v7743_v57 = vadd.f32 %v7742_v12, %v7582_v20  ;;  %v16417_v40 = vld [vmem:[#allocation33_spill] sm:$0xff] }
 0x4a2   :  { %v7587_v2 = vpop.f32.mrf.mxu0  ;;  %8207 = vmatpush1.msra.mxu1 %v8017_v11  ;;  %v7568_v12 = vadd.f32 %v15830_v53, %v16417_v40  ;;  %v7739_v20 = vadd.f32 %v7738_v4, %v7578_v22  ;;  %v7735_v33 = vadd.f32 %v15868_v38, %v7574_v13  ;;  %v16420_v38 = vld [vmem:[#allocation38_spill] sm:$0xff]  ;;  %v16422_v51 = vmax.f32 %v15876_v48, 0.0 }
 0x4a3   :  { %v7588_v36 = vadd.f32 %v7587_v2, %v16410_v43  ;;  %v7745_v41 = vadd.f32 %v7744_v18, %v7584_v39  ;;  %v7748_v58 = vpop.f32.mrf.mxu1  ;;  %8208 = vmatprep.subr.mxu1 %v8014_v19  ;;  %v16415_v18 = vld [vmem:[#allocation42_spill] sm:$0xff]  ;;  %v7564_v2 = vadd.f32 %v15818_v32, %v16416_v59  ;;  %v7562_v32 = vadd.f32 %v15806_v21, %v16419_v62 }
 0x4a4   :  { %v7589_v54 = vpop.f32.mrf.mxu0  ;;  %8209 = vmatpush1.msra.mxu1 %v8013_v45  ;;  %v7550_v17 = vadd.f32 %v15748_v55, %v16415_v18  ;;  %v16418_v45 = vld [vmem:[#allocation40_spill] sm:$0xff]  ;;  %v7733_v53 = vadd.f32 %v15856_v3, %v7572_v31  ;;  %v7871_v4 = vmul.f32 %v15706_v23, %v7743_v57  ;;  %v7560_v13 = vadd.f32 %v15796_v37, %v16420_v38  ;;  %v16423_v57 = vld [vmem:[#allocation39_spill] sm:$0xff] }
 0x4a5   :  { %v7590_v5 = vadd.f32 %v7589_v54, %v16414_v27  ;;  %v7749_v39 = vadd.f32 %v7748_v58, %v7588_v36  ;;  %v7750_v11 = vpop.f32.mrf.mxu1  ;;  %8210 = vmatprep.subr.mxu1 %v8010_v24  ;;  %v7872_v25 = vmul.f32 %v15714_v28, %v7745_v41  ;;  %v7554_v55 = vadd.f32 %v15773_v8, %v16418_v45  ;;  %v16421_v58 = vld [vmem:[#allocation37_spill] sm:$0xff] }
 0x4a6   :  { %v7591_v30 = vpop.f32.mrf.mxu0  ;;  %8211 = vmatpush1.msra.mxu1 %v8009_v50  ;;  %v7731_v43 = vadd.f32 %v15843_v61, %v7570_v15  ;;  %v7868_v50 = vmul.f32 %v15714_v28, %v7741_v56  ;;  %v7558_v21 = vadd.f32 %v15786_v42, %v16421_v58  ;;  %v7729_v3 = vadd.f32 %v15835_v29, %v7568_v12 }
 0x4a7   :  { %v7875_v36 = vmul.f32 %v15706_v23, %v7749_v39  ;;  %v7751_v6 = vadd.f32 %v7750_v11, %v7590_v5  ;;  %v7752_v19 = vpop.f32.mrf.mxu1  ;;  %8212 = vmatprep.subr.mxu1 %v8006_v14  ;;  %v7867_v44 = vmul.f32 %v15706_v23, %v7739_v20  ;;  %v7725_v37 = vadd.f32 %v15825_v47, %v7564_v2 }
 0x4a8   :  { %v7592_v22 = vpop.f32.mrf.mxu0  ;;  %8213 = vmatpush1.msra.mxu1 %v8005_v60  ;;  %v7864_v61 = vmul.f32 %v15714_v28, %v7735_v33  ;;  %v7994_v31 = vadd.f32 %v15718_v49, %v7872_v25  ;;  %v7552_v42 = vadd.f32 %v15762_v26, %v16423_v57  ;;  %v7723_v29 = vadd.f32 %v15813_v63, %v7562_v32  ;;  %v8313_v57 = vld [vmem:[%s16110_s5 + $0x1d0] sm:$0xff] }
 0x4a9   :  { %v7876_v41 = vmul.f32 %v15714_v28, %v7751_v6  ;;  %v7753_v8 = vpop.f32.mrf.mxu1  ;;  %v7997_v14 = vadd.f32 %v15711_v46, %v7875_v36  ;;  %8214 = vmatprep.subr.mxu1 %v8002_v1  ;;  %v7863_v54 = vmul.f32 %v15706_v23, %v7733_v53  ;;  %v7993_v1 = vadd.f32 %v15711_v46, %v7871_v4 }
 0x4aa   :  { %8215 = vmatpush1.msra.mxu1 %v16422_v51  ;;  %v7721_v47 = vadd.f32 %v15802_v7, %v7560_v13  ;;  %v7860_v24 = vmul.f32 %v15714_v28, %v7731_v43  ;;  %v7990_v48 = vadd.f32 %v15718_v49, %v7868_v50  ;;  %v7719_v15 = vadd.f32 %v15792_v16, %v7558_v21  ;;  %v8318_v21 = vld [vmem:[%s16110_s5 + $0x1f8] sm:$0xff]  ;;  %v8299_v51 = vld [vmem:[%s16110_s5 + $0x160] sm:$0xff] }
 0x4ab   :  { %v7998_v60 = vadd.f32 %v15718_v49, %v7876_v41  ;;  %v7859_v56 = vmul.f32 %v15706_v23, %v7729_v3  ;;  %v7989_v27 = vadd.f32 %v15711_v46, %v7867_v44  ;;  %v8097_v26 = vmax.f32 %v7997_v14, 0.0  ;;  %v16424_v3 = vld [vmem:[#allocation30_spill] sm:$0xff] }
 0x4ac   :  { %v7715_v63 = vadd.f32 %v15782_v10, %v7554_v55  ;;  %v7856_v5 = vmul.f32 %v15714_v28, %v7725_v37  ;;  %v8094_v39 = vmax.f32 %v7994_v31, 0.0  ;;  %v7986_v7 = vadd.f32 %v15718_v49, %v7864_v61  ;;  %v8301_v44 = vld [vmem:[%s16110_s5 + $0x170] sm:$0xff]  ;;  %v8316_v14 = vld [vmem:[%s16110_s5 + $0x1e8] sm:$0xff]  ;;  %v8315_v61 = vld [vmem:[%s16110_s5 + $0x1e0] sm:$0xff] }
 0x4ad   :  { %v8098_v52 = vmax.f32 %v7998_v60, 0.0  ;;  %v7713_v11 = vadd.f32 %v15769_v9, %v7552_v42  ;;  %v7855_v18 = vmul.f32 %v15706_v23, %v7723_v29  ;;  %v7985_v59 = vadd.f32 %v15711_v46, %v7863_v54  ;;  %v8300_v37 = vld [vmem:[%s16110_s5 + $0x168] sm:$0xff]  ;;  %v8314_v60 = vld [vmem:[%s16110_s5 + $0x1d8] sm:$0xff]  ;;  %v8297_v42 = vld [vmem:[%s16110_s5 + $0x150] sm:$0xff] }
 0x4ae   :  { %v8093_v16 = vmax.f32 %v7993_v1, 0.0  ;;  %v7711_v2 = vadd.f32 %v15754_v35, %v7550_v17  ;;  %v7852_v40 = vmul.f32 %v15714_v28, %v7721_v47  ;;  %v8090_v10 = vmax.f32 %v7990_v48, 0.0  ;;  %v8298_v31 = vld [vmem:[%s16110_s5 + $0x158] sm:$0xff]  ;;  %v8312_v29 = vld [vmem:[%s16110_s5 + $0x1c8] sm:$0xff]  ;;  %v8311_v1 = vld [vmem:[%s16110_s5 + $0x1c0] sm:$0xff] }
 0x4af   :  { %8230 = vmatprep.subr.mxu1 %v8098_v52  ;;  %v7982_v12 = vadd.f32 %v15718_v49, %v7860_v24  ;;  %v7709_v20 = vadd.f32 %v15742_v34, %v15907_v0  ;;  %v7851_v30 = vmul.f32 %v15706_v23, %v7719_v15  ;;  %v7981_v9 = vadd.f32 %v15711_v46, %v7859_v56  ;;  %v8296_v54 = vld [vmem:[%s16110_s5 + $0x148] sm:$0xff]  ;;  %v8295_v47 = vld [vmem:[%s16110_s5 + $0x140] sm:$0xff]  ;;  %v8310_v24 = vld [vmem:[%s16110_s5 + $0x1b8] sm:$0xff] }
 0x4b0   :  { %8231 = vmatpush2.msra.mxu1 %v8097_v26  ;;  %v8089_v33 = vmax.f32 %v7989_v27, 0.0  ;;  %v7848_v25 = vmul.f32 %v15714_v28, %v7715_v63  ;;  %v8086_v36 = vmax.f32 %v7986_v7, 0.0  ;;  %v7978_v35 = vadd.f32 %v15718_v49, %v7856_v5  ;;  %v8294_v52 = vld [vmem:[%s16110_s5 + $0x138] sm:$0xff]  ;;  %v8309_v48 = vld [vmem:[%s16110_s5 + $0x1b0] sm:$0xff]  ;;  %v8308_v56 = vld [vmem:[%s16110_s5 + $0x1a8] sm:$0xff] }
 0x4b1   :  { %8232 = vmatprep.subr.mxu1 %v8094_v39  ;;  %v7847_v17 = vmul.f32 %v15706_v23, %v7713_v11  ;;  %v7977_v6 = vadd.f32 %v15711_v46, %v7855_v18  ;;  %v8085_v19 = vmax.f32 %v7985_v59, 0.0  ;;  %v7844_v34 = vmul.f32 %v15714_v28, %v7711_v2  ;;  %v8293_v15 = vld [vmem:[%s16110_s5 + $0x130] sm:$0xff]  ;;  %v8292_v27 = vld [vmem:[%s16110_s5 + $0x128] sm:$0xff]  ;;  %v8307_v26 = vld [vmem:[%s16110_s5 + $0x1a0] sm:$0xff] }
 0x4b2   :  { %8233 = vmatpush2.msra.mxu1 %v8093_v16  ;;  %v8082_v0 = vmax.f32 %v7982_v12, 0.0  ;;  %v7974_v45 = vadd.f32 %v15718_v49, %v7852_v40  ;;  %v7843_v55 = vmul.f32 %v15706_v23, %v7709_v20  ;;  %v7973_v62 = vadd.f32 %v15711_v46, %v7851_v30  ;;  %v8291_v63 = vld [vmem:[%s16110_s5 + $0x120] sm:$0xff]  ;;  %v8306_v5 = vld [vmem:[%s16110_s5 + $0x198] sm:$0xff]  ;;  %v8305_v7 = vld [vmem:[%s16110_s5 + $0x190] sm:$0xff] }
 0x4b3   :  { %8234 = vmatprep.subr.mxu1 %v8090_v10  ;;  %v8081_v32 = vmax.f32 %v7981_v9, 0.0  ;;  %v8078_v53 = vmax.f32 %v7978_v35, 0.0  ;;  %v7970_v4 = vadd.f32 %v15718_v49, %v7848_v25  ;;  %v7969_v22 = vadd.f32 %v15711_v46, %v7847_v17  ;;  %v8290_v39 = vld [vmem:[%s16110_s5 + $0x118] sm:$0xff]  ;;  %v8289_v11 = vld [vmem:[%s16110_s5 + $0x110] sm:$0xff]  ;;  %v8271_v59 = vld [vmem:[%s16110_s5 + $0x80] sm:$0xff] }
 0x4b4   :  { %8235 = vmatpush2.msra.mxu1 %v8089_v33  ;;  %v8077_v38 = vmax.f32 %v7977_v6, 0.0  ;;  %v8074_v28 = vmax.f32 %v7974_v45, 0.0  ;;  %v7966_v13 = vadd.f32 %v15718_v49, %v7844_v34  ;;  %v7965_v43 = vadd.f32 %v15711_v46, %v7843_v55  ;;  %v8302_v49 = vld [vmem:[%s16110_s5 + $0x178] sm:$0xff]  ;;  %v8317_v46 = vld [vmem:[%s16110_s5 + $0x1f0] sm:$0xff]  ;;  %9413 = vmatprep.subr.mxu0 %v8271_v59  ;;  %v8255_v2 = vld [vmem:[%s16110_s5] sm:$0xff] }
 0x4b5   :  { %8236 = vmatprep.subr.mxu1 %v8086_v36  ;;  %v8073_v50 = vmax.f32 %v7973_v62, 0.0  ;;  %v8070_v23 = vmax.f32 %v7970_v4, 0.0  ;;  %v8069_v41 = vmax.f32 %v7969_v22, 0.0  ;;  %9414 = vmatpush3.msra.mxu0 %v8255_v2  ;;  %v8304_v40 = vld [vmem:[%s16110_s5 + $0x188] sm:$0xff]  ;;  %v8303_v12 = vld [vmem:[%s16110_s5 + $0x180] sm:$0xff]  ;;  %v10918_v30 = vmov 0.0  }
 0x4b6   :  { %8237 = vmatpush2.msra.mxu1 %v8085_v19  ;;  %v8066_v8 = vmax.f32 %v7966_v13, 0.0  ;;  %v8065_v58 = vmax.f32 %v7965_v43, 0.0  ;;  %v8288_v10 = vld [vmem:[%s16110_s5 + $0x108] sm:$0xff]  ;;  %v8287_v20 = vld [vmem:[%s16110_s5 + $0x100] sm:$0xff]  ;;  %9458 = vmatprep.subr.mxu0 %v10918_v30  ;;  %v8469_v25 = vld [vmem:[%s16112_s7 + $0x18] sm:$0xff] }
 0x4b7   :  { %8238 = vmatprep.subr.mxu1 %v8082_v0  ;;  %v8468_v36 = vld [vmem:[%s16112_s7 + $0x10] sm:$0xff]  ;;  %v8467_v35 = vld [vmem:[%s16112_s7 + $0x8] sm:$0xff]  ;;  %v8466_v17 = vld [vmem:[%s16112_s7] sm:$0xff] }
 0x4b8   :  { %8239 = vmatpush2.msra.mxu1 %v8081_v32  ;;  %v9380_v0 = vld [vmem:[%s16111_s6] ss:$0 sm:$0xff]  ;;  %s10896_s6 = scalar_lea.vmem %s8560_s3, 32 }
 0x4b9   :  { %8240 = vmatprep.subr.mxu1 %v8078_v53  ;;  %v9381_v4 = vld [vmem:[%s16113_s8] ss:$0 sm:$0xff]  ;;  %p10897_p0 = scmp.ne.s32.totalorder %s8560_s3, %s10896_s6  ;;  %p10902_p2 = scmp.lt.s32.totalorder %s10896_s6, %s10896_s6 }
 0x4ba   :  { %8241 = vmatpush2.msra.mxu1 %v8077_v38 }
 0x4bb   :  { %8242 = vmatprep.subr.mxu1 %v8074_v28  ;;  %p10903_p3 = por %p10902_p2, %p10901_p1 }
 0x4bc   :  { %8243 = vmatpush2.msra.mxu1 %v8073_v50 }
 0x4bd   :  { %8244 = vmatprep.subr.mxu1 %v8070_v23  ;;  %p10904_p4 = pnand %p10903_p3, %p10897_p0 }
 0x4be   :  { %8245 = vmatpush2.msra.mxu1 %v8069_v41 }
 0x4bf   :  { %8246 = vmatprep.subr.mxu1 %v8066_v8 }
 0x4c0   :  { %8247 = vmatpush2.msra.mxu1 %v8065_v58 }
 0x4c1   :  { %8249 = vmatmul.mubr.f32.vlgmr.msra.gmra.mxu1 %v16424_v3  ;;  %9418 = vmatprep.subr.mxu1 %v8318_v21 }
 0x4c2   :  { %9419 = vmatpush3.msra.mxu1 %v8302_v49 }
 0x4c3   :  { %9420 = vmatprep.subr.mxu1 %v8317_v46 }
 0x4c4   :  { %9421 = vmatpush3.msra.mxu1 %v8301_v44 }
 0x4c5   :  { %9422 = vmatprep.subr.mxu1 %v8316_v14 }
 0x4c6   :  { %9423 = vmatpush3.msra.mxu1 %v8300_v37 }
 0x4c7   :  { %9424 = vmatprep.subr.mxu1 %v8315_v61 }
 0x4c8   :  { %9425 = vmatpush3.msra.mxu1 %v8299_v51 }
 0x4c9   :  { %9426 = vmatprep.subr.mxu1 %v8314_v60 }
 0x4ca   :  { %9427 = vmatpush3.msra.mxu1 %v8298_v31 }
 0x4cb   :  { %9428 = vmatprep.subr.mxu1 %v8313_v57 }
 0x4cc   :  { %9429 = vmatpush3.msra.mxu1 %v8297_v42 }
 0x4cd   :  { %9430 = vmatprep.subr.mxu1 %v8312_v29 }
 0x4ce   :  { %9431 = vmatpush3.msra.mxu1 %v8296_v54 }
 0x4cf   :  { %9432 = vmatprep.subr.mxu1 %v8311_v1 }
 0x4d0   :  { %9433 = vmatpush3.msra.mxu1 %v8295_v47 }
 0x4d1   :  { %9434 = vmatprep.subr.mxu1 %v8310_v24 }
 0x4d2   :  { %9435 = vmatpush3.msra.mxu1 %v8294_v52 }
 0x4d3   :  { %9436 = vmatprep.subr.mxu1 %v8309_v48 }
 0x4d4   :  { %9437 = vmatpush3.msra.mxu1 %v8293_v15 }
 0x4d5   :  { %9438 = vmatprep.subr.mxu1 %v8308_v56 }
 0x4d6   :  { %9439 = vmatpush3.msra.mxu1 %v8292_v27 }
 0x4d7   :  { %9440 = vmatprep.subr.mxu1 %v8307_v26 }
 0x4d8   :  { %9441 = vmatpush3.msra.mxu1 %v8291_v63 }
 0x4d9   :  { %9442 = vmatprep.subr.mxu1 %v8306_v5 }
 0x4da   :  { %9443 = vmatpush3.msra.mxu1 %v8290_v39 }
 0x4db   :  { %9444 = vmatprep.subr.mxu1 %v8305_v7 }
 0x4dc   :  { %9445 = vmatpush3.msra.mxu1 %v8289_v11 }
 0x4dd   :  { %9446 = vmatprep.subr.mxu1 %v8304_v40 }
 0x4de   :  { %9447 = vmatpush3.msra.mxu1 %v8288_v10 }
 0x4df   :  { %9448 = vmatprep.subr.mxu1 %v8303_v12 }
 0x4e0   :  { %9449 = vmatpush3.msra.mxu1 %v8287_v20 }
 0x4f4   :  { %v8179_v18 = vpop.f32.mrf.mxu0 }
 0x4f6   :  { %v8181_v16 = vpop.f32.mrf.mxu0 }
 0x4f7   :  { %8390 = vmatprep.mubr.f32.mxu0 %v8181_v16 }
 0x4f8   :  { %8391 = vmatmul.mubr.f32.vlgmr.msra.gmra.mxu0 %v8179_v18 }
 0x4f9   :  { %9459 = vmatpush3.msra.mxu0 %v8469_v25  ;;  %9466 = vmatprep.mubr.msk.f32.mxu0 %vm10919_vm1, %v10918_v30 }
 0x4fa   :  { %9460 = vmatprep.subr.mxu0 %v10918_v30 }
 0x4fb   :  { %9461 = vmatpush3.msra.mxu0 %v8468_v36 }
 0x4fc   :  { %9462 = vmatprep.subr.mxu0 %v10918_v30 }
 0x4fd   :  { %9463 = vmatpush3.msra.mxu0 %v8467_v35 }
 0x4fe   :  { %9464 = vmatprep.subr.mxu0 %v10918_v30 }
 0x4ff   :  { %9465 = vmatpush3.msra.mxu0 %v8466_v17 }
 0x581   :  { %v8250_v9 = vpop.f32.mrf.mxu1 }
 0x583   :  { %v8252_v33 = vpop.f32.mrf.mxu1 }
 0x584   :  { %8460 = vmatprep.mubr.f32.mxu1 %v8252_v33 }
 0x585   :  { %8461 = vmatmul.mubr.f32.vlgmr.msra.gmra.mxu1 %v8250_v9 }
 0x5b8   :  { %v9415_v6 = vpop.f32.mrf.mxu0 }
 0x5ba   :  { %v9416_v19 = vpop.f32.mrf.mxu0 }
 0x5bb   :  { %v9417_v34 = vadd.f32 %v9416_v19, %v9415_v6 }
 0x5bd   :  { %v8393_v62 = vadd.f32 %v9417_v34, %v9380_v0 }
 0x645   :  { %v9450_v45 = vpop.f32.mrf.mxu1 }
 0x647   :  { %v9451_v55 = vpop.f32.mrf.mxu1 }
 0x648   :  { %v9452_v32 = vadd.f32 %v9451_v55, %v9450_v45 }
 0x64a   :  { %v8463_v53 = vadd.f32 %v9452_v32, %v8393_v62 }
 0x64c   :  { %9467 = vmatmul.mubr.msk.f32.vlgmr.msra.gmra.mxu0 %vm8477_vm2, %v8463_v53 }
 0x70c   :  { %v8547_v22 = vpop.f32.mrf.mxu0 }
 0x70d   :  { %v8548_v38 = vadd.f32 %v9381_v4, %v8547_v22 }
 0x70e   :  { %v9468_v28 = vpop.f32.mrf.mxu0 }
 0x70f   :  { %8552 = vst.msk [vmem:[#allocation2] sm:$0x3] %vm8551_vm3, %v8548_v38 }
 0x710   :  { %10907 = shalt.err (!%p10904_p4)
}
 0x711   :  { %8562 = dma.vmem_to_hbm [thread:$0]  %s8560_s3, 32, %s16114_s9, [#allocation3]  }
 0x712   :  { %10916 = dma.done.wait [#allocation3], 32  }
 0x713   :  { %10917 = vsyncadd [#allocation3], 4294967264 }
 0x714   :  { %8566 = vsyncpa [#allocation3], 1 }

</bundles_post_ra>
